<compile_context>
chip_gen: v6e
topology: v6e:2x2x1
jax: 0.10.0
libtpu: 0.0.40
codegen_flags: <defaults>
</compile_context>

<pallas_src>
import functools

import jax
import jax.numpy as jnp
from jax.experimental import pallas as pl
from jax.experimental.pallas import tpu as pltpu


def _round_up(x, m):
    return ((x + m - 1) // m) * m


# ----------------------------------------------------------------------------
# Per-generation hardware knobs (safe fallbacks if queries are unavailable)
# ----------------------------------------------------------------------------
@functools.lru_cache(maxsize=None)
def _vmem_budget_bytes():
    cap = 0
    try:
        cap = int(getattr(pltpu.get_tpu_info(), "vmem_capacity_bytes", 0))
    except Exception:
        cap = 0
    if cap >= (100 << 20):
        return 100 << 20          # v5e / v6e: 128 MiB physical VMEM
    return 56 << 20               # v7x (64 MiB physical) or unknown -> conservative


@functools.lru_cache(maxsize=None)
def _dual_tensorcore():
    try:
        return "v7" in jax.devices()[0].device_kind.lower()
    except Exception:
        return False


# ----------------------------------------------------------------------------
# Pallas kernels
# ----------------------------------------------------------------------------
def _gemm_kernel(a_ref, b_ref, bias_ref, o_ref, acc_ref, *, apply_relu):
    @pl.when(pl.program_id(2) == 0)
    def _init():
        acc_ref[...] = jnp.zeros_like(acc_ref)

    acc_ref[...] += jnp.dot(a_ref[...], b_ref[...],
                            preferred_element_type=jnp.float32)

    @pl.when(pl.program_id(2) == pl.num_programs(2) - 1)
    def _finalize():
        acc = acc_ref[...] + bias_ref[...]
        if apply_relu:
            acc = jnp.maximum(acc, 0.0)
        o_ref[...] = acc.astype(o_ref.dtype)


def _gemm_res_kernel(a_ref, b_ref, bias_ref, r_ref, o_ref, acc_ref, *, apply_relu):
    @pl.when(pl.program_id(2) == 0)
    def _init():
        acc_ref[...] = jnp.zeros_like(acc_ref)

    acc_ref[...] += jnp.dot(a_ref[...], b_ref[...],
                            preferred_element_type=jnp.float32)

    @pl.when(pl.program_id(2) == pl.num_programs(2) - 1)
    def _finalize():
        acc = acc_ref[...] + bias_ref[...] + r_ref[...].astype(jnp.float32)
        if apply_relu:
            acc = jnp.maximum(acc, 0.0)
        o_ref[...] = acc.astype(o_ref.dtype)


def _fakequant_kernel(x_ref, o_ref, *, scale):
    # Simulates torch QuantStub -> DeQuantStub round trip (per-tensor symmetric int8),
    # emitting bf16 activations directly.
    q = jnp.clip(jnp.round(x_ref[...] * (1.0 / scale)), -128.0, 127.0)
    o_ref[...] = (q * scale).astype(o_ref.dtype)


def _max9_kernel(x_ref, o_ref):
    # x_ref: (9 taps, tr, lane); elementwise max over the 9 window taps (VPU only).
    out = x_ref[0]
    for i in range(1, 9):
        out = jnp.maximum(out, x_ref[i])
    o_ref[...] = out


def _avgpool_kernel(x_ref, o_ref):
    # x_ref: (tb, H*W, C) bf16 -> (tb, C) f32 mean.
    o_ref[...] = jnp.mean(x_ref[...].astype(jnp.float32), axis=1)


# ----------------------------------------------------------------------------
# Tile selection helpers
# ----------------------------------------------------------------------------
_TM_CANDIDATES = (1024, 768, 512, 448, 384, 320, 256, 192, 128, 112, 96, 80, 64, 48, 32, 16)


def _pick_tm(M, N):
    """Prefer divisors of M (no pad/slice copies); bigger tiles for small-N layers."""
    cap = 1024 if N <= 64 else (512 if N <= 128 else 256)
    for cand in _TM_CANDIDATES:
        if cand <= cap and M % cand == 0:
            return cand, M
    if M <= cap:
        tm = _round_up(M, 16)
        return tm, tm
    tm = cap
    return tm, _round_up(M, tm)


def _pick_tk(K):
    if K <= 1024:
        return K
    for cand in (512, 384, 256, 128):
        if K % cand == 0:
            return cand
    return K


# ----------------------------------------------------------------------------
# GEMM wrapper: out = act(A @ B + bias [+ residual]) with K-tiled grid reduction
# ----------------------------------------------------------------------------
def matmul_bias_act(a, b, bias, residual=None, relu=True, out_dtype=jnp.bfloat16):
    """A:(M,K), B:(K,N), bias:(N,).  bf16 operands, f32 accumulation, fused epilogue."""
    M, K = a.shape
    Kb, N = b.shape
    assert K == Kb

    a = a.astype(jnp.bfloat16)
    b = b.astype(jnp.bfloat16)

    # Lane-align a ragged small K (conv1: 7*7*3 = 147 -> 256) so the A operand / MXU pass
    # is unmasked; only for small K where the one-off pad copy is cheap.
    if K % 128 != 0 and 96 < K <= 256:
        Kp = _round_up(K, 128)
        a = jnp.pad(a, ((0, 0), (0, Kp - K)))
        b = jnp.pad(b, ((0, Kp - K), (0, 0)))
        K = Kp

    bias2 = bias.astype(jnp.float32).reshape(1, N)

    tm, Mp = _pick_tm(M, N)
    gm = Mp // tm

    # Split N only when there is a single M tile: keeps the K x N weight slab from being
    # re-fetched per M tile on the deep layers, while still giving >=2 parallel grid steps
    # for small-M layers.
    tn = N
    if gm == 1 and N >= 512 and N % 256 == 0:
        tn = 256
    gn = N // tn

    # Degenerate (1,1,*) grid on a dual-TensorCore chip (v7x): split M so both cores work.
    if _dual_tensorcore() and gm == 1 and gn == 1 and tm >= 32 and tm % 32 == 0:
        tm //= 2
        gm = Mp // tm

    tk = _pick_tk(K)
    gk = K // tk
    grid = (gm, gn, gk)

    if Mp != M:
        a = jnp.pad(a, ((0, Mp - M), (0, 0)))

    a_spec = pl.BlockSpec((tm, tk), lambda i, j, k: (i, k))
    b_spec = pl.BlockSpec((tk, tn), lambda i, j, k: (k, j))
    bias_spec = pl.BlockSpec((1, tn), lambda i, j, k: (0, j))
    out_spec = pl.BlockSpec((tm, tn), lambda i, j, k: (i, j))

    out_isz = jnp.dtype(out_dtype).itemsize
    # Double-buffered tile footprint + f32 accumulator scratch.
    vmem_need = (2 * tm * tk * 2 + 2 * tk * tn * 2 + 2 * tm * tn * out_isz
                 + 2 * tn * 4 + tm * tn * 4)
    flops = 2 * Mp * K * N
    bytes_acc = Mp * K * 2 * gn + K * N * 2 * gm + Mp * N * out_isz + N * 4

    args = [a, b, bias2]
    specs = [a_spec, b_spec, bias_spec]
    if residual is not None:
        r = residual.astype(jnp.bfloat16)
        if Mp != M:
            r = jnp.pad(r, ((0, Mp - M), (0, 0)))
        args.append(r)
        specs.append(pl.BlockSpec((tm, tn), lambda i, j, k: (i, j)))
        vmem_need += 2 * tm * tn * 2
        bytes_acc += Mp * N * 2
        kernel = functools.partial(_gemm_res_kernel, apply_relu=relu)
    else:
        kernel = functools.partial(_gemm_kernel, apply_relu=relu)

    vmem_limit = int(min(_vmem_budget_bytes(), max(2 * vmem_need + (8 << 20), 32 << 20)))
    cp = pltpu.CompilerParams(
        dimension_semantics=("parallel", "parallel", "arbitrary"),
        vmem_limit_bytes=vmem_limit,
    )

    out = pl.pallas_call(
        kernel,
        out_shape=jax.ShapeDtypeStruct((Mp, N), out_dtype),
        grid=grid,
        in_specs=specs,
        out_specs=out_spec,
        scratch_shapes=[pltpu.VMEM((tm, tn), jnp.float32)],
        compiler_params=cp,
        cost_estimate=pl.CostEstimate(
            flops=flops, transcendentals=0, bytes_accessed=bytes_acc),
    )(*args)

    return out[:M] if Mp != M else out


# ----------------------------------------------------------------------------
# Pointwise / pooling kernels (grid-tiled, lane-dense blocks)
# ----------------------------------------------------------------------------
def _pick_row_tile(rows, cap):
    start = (min(cap, rows) // 8) * 8
    for cand in range(start, 7, -8):
        if rows % cand == 0:
            return cand
    return 8


def fake_quant_to_bf16(x, scale=0.05):
    """QuantStub simulation; emits bf16 directly (no extra f32 round trip)."""
    shape = x.shape
    flat = x.reshape(-1).astype(jnp.float32)
    total = flat.shape[0]
    lane = 1024  # 8 sublanes x 128 lanes of f32
    totp = _round_up(total, 8 * lane)
    if totp != total:
        flat = jnp.pad(flat, (0, totp - total))
    rows = totp // lane
    tr = _pick_row_tile(rows, 512)
    mat = flat.reshape(rows, lane)

    out = pl.pallas_call(
        functools.partial(_fakequant_kernel, scale=scale),
        out_shape=jax.ShapeDtypeStruct((rows, lane), jnp.bfloat16),
        grid=(rows // tr,),
        in_specs=[pl.BlockSpec((tr, lane), lambda i: (i, 0))],
        out_specs=pl.BlockSpec((tr, lane), lambda i: (i, 0)),
        compiler_params=pltpu.CompilerParams(dimension_semantics=("parallel",)),
    )(mat)
    return out.reshape(-1)[:total].reshape(shape)


def maxpool_3x3_s2_p1(x):
    N, H, W, C = x.shape
    Ho = (H + 2 - 3) // 2 + 1
    Wo = (W + 2 - 3) // 2 + 1
    xp = jnp.pad(x, ((0, 0), (1, 1), (1, 1), (0, 0)), constant_values=-jnp.inf)
    cols = [xp[:, i:i + 2 * Ho:2, j:j + 2 * Wo:2, :] for i in range(3) for j in range(3)]

    # Lane-dense relayout: each of the 9 tap planes is flattened identically to
    # (rows, 512); elementwise max is layout-agnostic.
    M = N * Ho * Wo
    total = M * C
    lane = 512
    totp = _round_up(total, 8 * lane)
    stacked = jnp.stack(cols, axis=0).reshape(9, total)
    if totp != total:
        stacked = jnp.pad(stacked, ((0, 0), (0, totp - total)))
    rows = totp // lane
    tr = _pick_row_tile(rows, 256)
    planes = stacked.reshape(9, rows, lane)

    out = pl.pallas_call(
        _max9_kernel,
        out_shape=jax.ShapeDtypeStruct((rows, lane), x.dtype),
        grid=(rows // tr,),
        in_specs=[pl.BlockSpec((9, tr, lane), lambda i: (0, i, 0))],
        out_specs=pl.BlockSpec((tr, lane), lambda i: (i, 0)),
        compiler_params=pltpu.CompilerParams(dimension_semantics=("parallel",)),
    )(planes)
    return out.reshape(-1)[:total].reshape(N, Ho, Wo, C)


def global_avgpool(x):
    N, H, W, C = x.shape
    xr = x.reshape(N, H * W, C)
    tb = min(N, 8)
    Np = _round_up(N, tb)
    if Np != N:
        xr = jnp.pad(xr, ((0, Np - N), (0, 0), (0, 0)))
    out = pl.pallas_call(
        _avgpool_kernel,
        out_shape=jax.ShapeDtypeStruct((Np, C), jnp.float32),
        grid=(Np // tb,),
        in_specs=[pl.BlockSpec((tb, H * W, C), lambda i: (i, 0, 0))],
        out_specs=pl.BlockSpec((tb, C), lambda i: (i, 0)),
        compiler_params=pltpu.CompilerParams(dimension_semantics=("parallel",)),
    )(xr)
    return out[:N]


# ----------------------------------------------------------------------------
# Conv (im2col + fused-epilogue GEMM)
# ----------------------------------------------------------------------------
def im2col(x, kh, kw, stride, pad):
    """x: NHWC (bf16) -> (N*Ho*Wo, kh*kw*Cin) bf16 patch matrix (plain-JAX glue)."""
    N, H, W, C = x.shape
    xp = jnp.pad(x, ((0, 0), (pad, pad), (pad, pad), (0, 0))) if pad else x
    Ho = (H + 2 * pad - kh) // stride + 1
    Wo = (W + 2 * pad - kw) // stride + 1
    cols = []
    for i in range(kh):
        for j in range(kw):
            cols.append(xp[:, i:i + stride * Ho:stride, j:j + stride * Wo:stride, :])
    patches = jnp.stack(cols, axis=3)  # (N, Ho, Wo, kh*kw, C)
    return patches.reshape(N * Ho * Wo, kh * kw * C), Ho, Wo


def conv_bn(x, w, b, stride, pad, relu=True, residual=None):
    """Conv2d (folded BN) + optional residual add + ReLU.  x: NHWC bf16, w:(kh,kw,Cin,Cout) bf16."""
    # TODO(synk): fuse the tap gather into the GEMM K-reduction via manual strided DMA
    # from the padded NHWC activation to remove the im2col HBM round trip.
    kh, kw, cin, cout = w.shape
    a, Ho, Wo = im2col(x, kh, kw, stride, pad)
    bmat = w.reshape(kh * kw * cin, cout)
    res2d = residual.reshape(-1, cout) if residual is not None else None
    out = matmul_bias_act(a, bmat, b, residual=res2d, relu=relu, out_dtype=jnp.bfloat16)
    return out.reshape(x.shape[0], Ho, Wo, cout)


# ----------------------------------------------------------------------------
# Deterministic parameter init (BatchNorm folded into conv weight/bias, weights in bf16)
# ----------------------------------------------------------------------------
def init_conv_bn(key, kh, kw, cin, cout):
    k1, k2, k3, k4, k5 = jax.random.split(key, 5)
    w = jax.random.normal(k1, (kh, kw, cin, cout), jnp.float32) * 0.05
    gamma = jax.random.uniform(k2, (cout,), jnp.float32, 0.5, 1.5)
    beta = jax.random.normal(k3, (cout,), jnp.float32) * 0.1
    mean = jax.random.normal(k4, (cout,), jnp.float32) * 0.1
    var = jax.random.uniform(k5, (cout,), jnp.float32, 0.5, 1.5)
    scale = gamma / jnp.sqrt(var + 1e-5)
    w_fold = (w * scale[None, None, None, :]).astype(jnp.bfloat16)
    b_fold = beta - mean * scale  # bias kept in f32 for the epilogue
    return w_fold, b_fold


def init_params(key):
    keys = iter(jax.random.split(key, 64))
    params = {"conv1": init_conv_bn(next(keys), 7, 7, 3, 64)}
    layers = []
    cin = 64
    for li, cout in enumerate([64, 128, 256, 512]):
        blocks = []
        for bi in range(2):
            stride = 2 if (li > 0 and bi == 0) else 1
            blk = {
                "conv1": init_conv_bn(next(keys), 3, 3, cin, cout),
                "conv2": init_conv_bn(next(keys), 3, 3, cout, cout),
            }
            if stride != 1 or cin != cout:
                blk["down"] = init_conv_bn(next(keys), 1, 1, cin, cout)
            blocks.append(blk)
            cin = cout
        layers.append(blocks)
    params["layers"] = layers
    kf1, kf2 = jax.random.split(next(keys))
    params["fc_w"] = (jax.random.normal(kf1, (512, 1000), jnp.float32) * 0.02).astype(jnp.bfloat16)
    params["fc_b"] = jax.random.normal(kf2, (1000,), jnp.float32) * 0.02
    return params


# ----------------------------------------------------------------------------
# Full forward (ResNet18 with quant/dequant stubs simulated)
# ----------------------------------------------------------------------------
@jax.jit
def quantized_resnet18_forward(x_nchw, params):
    # NCHW -> NHWC once; QuantStub fake-quant writes bf16 activations directly.
    x = fake_quant_to_bf16(jnp.transpose(x_nchw, (0, 2, 3, 1)))

    w, b = params["conv1"]
    x = conv_bn(x, w, b, stride=2, pad=3, relu=True)           # conv1 + bn1 + relu
    x = maxpool_3x3_s2_p1(x)                                   # maxpool

    for li, blocks in enumerate(params["layers"]):
        for bi, blk in enumerate(blocks):
            stride = 2 if (li > 0 and bi == 0) else 1
            identity = x
            out = conv_bn(x, *blk["conv1"], stride=stride, pad=1, relu=True)
            if "down" in blk:
                identity = conv_bn(x, *blk["down"], stride=stride, pad=0, relu=False)
            # conv2 + bn2 with fused residual add + relu (quantized add_relu semantics)
            x = conv_bn(out, *blk["conv2"], stride=1, pad=1, relu=True, residual=identity)

    pooled = global_avgpool(x)                                 # (N, 512) f32

    # fc: pad N=1000 -> 1024 for lane-dense, unmasked output stores; slice back after.
    ncls = params["fc_w"].shape[1]
    npad = _round_up(ncls, 128) - ncls
    fc_w = jnp.pad(params["fc_w"], ((0, 0), (0, npad)))
    fc_b = jnp.pad(params["fc_b"], (0, npad))
    logits = matmul_bias_act(pooled, fc_w, fc_b, relu=False, out_dtype=jnp.float32)
    return logits[:, :ncls]                                    # (N, 1000) f32 (DeQuantStub output)


if __name__ == "__main__":
    key = jax.random.PRNGKey(0)
    kx, kp = jax.random.split(key)
    # Small input consistent with a 3-channel image model (32x32 keeps every stage >= 1x1).
    x = jax.random.normal(kx, (2, 3, 32, 32), jnp.float32)
    params = init_params(kp)

    logits = quantized_resnet18_forward(x, params)
    logits = jax.block_until_ready(logits)
    assert logits.shape == (2, 1000) and logits.dtype == jnp.float32
    print("KERNEL_OK")
</pallas_src>

<mosaic_0001>
module attributes {stable_mosaic.version = 11 : i64} {
  func.func @_fakequant_kernel(%arg0: i32, %arg1: memref<8x1024xf32, #tpu.memory_space<vmem>>, %arg2: memref<8x1024xbf16, #tpu.memory_space<vmem>>) attributes {dimension_semantics = [#tpu.dimension_semantics<parallel>], iteration_bounds = array<i64: 1>, scalar_prefetch = 0 : i64, scratch_operands = 0 : i64, tpu.core_type = #tpu.core_type<tc>, window_params = [{transform_indices = @transform_0, window_bounds = array<i64: 8, 1024>}, {transform_indices = @transform_1, window_bounds = array<i64: 8, 1024>}]} {
    %c0 = arith.constant 0 : index
    %c0_0 = arith.constant 0 : index
    %0 = vector.load %arg1[%c0, %c0_0] : memref<8x1024xf32, #tpu.memory_space<vmem>>, vector<8x1024xf32>
    %cst = arith.constant 2.000000e+01 : f32
    %1 = vector.broadcast %cst : f32 to vector<8x1024xf32>
    %2 = arith.mulf %0, %1 : vector<8x1024xf32>
    %3 = math.roundeven %2 : vector<8x1024xf32>
    %cst_1 = arith.constant -1.280000e+02 : f32
    %cst_2 = arith.constant 1.270000e+02 : f32
    %4 = vector.broadcast %cst_1 : f32 to vector<8x1024xf32>
    %5 = arith.maximumf %4, %3 : vector<8x1024xf32>
    %6 = vector.broadcast %cst_2 : f32 to vector<8x1024xf32>
    %7 = arith.minimumf %6, %5 : vector<8x1024xf32>
    %cst_3 = arith.constant 5.000000e-02 : f32
    %8 = vector.broadcast %cst_3 : f32 to vector<8x1024xf32>
    %9 = arith.mulf %7, %8 : vector<8x1024xf32>
    %10 = arith.truncf %9 : vector<8x1024xf32> to vector<8x1024xbf16>
    %c0_4 = arith.constant 0 : index
    %c0_5 = arith.constant 0 : index
    %11 = vector.load %arg2[%c0_4, %c0_5] : memref<8x1024xbf16, #tpu.memory_space<vmem>>, vector<8x1024xbf16>
    tpu.vector_store %arg2[%c0_4, %c0_5], %10 {strides = array<i32>} : memref<8x1024xbf16, #tpu.memory_space<vmem>>, vector<8x1024xbf16>,
    return
  }
  func.func @transform_0(%arg0: i32) -> (i32, i32) {
    %c0_i32 = arith.constant 0 : i32
    %c0_i32_0 = arith.constant 0 : i32
    return %arg0, %c0_i32 : i32, i32
  }
  func.func @transform_1(%arg0: i32) -> (i32, i32) {
    %c0_i32 = arith.constant 0 : i32
    %c0_i32_0 = arith.constant 0 : i32
    return %arg0, %c0_i32 : i32, i32
  }
}

module attributes {stable_mosaic.version = 11 : i64} {
  func.func @_gemm_kernel(%arg0: i32, %arg1: i32, %arg2: i32, %arg3: memref<512x256xbf16, #tpu.memory_space<vmem>>, %arg4: memref<256x64xbf16, #tpu.memory_space<vmem>>, %arg5: memref<1x64xf32, #tpu.memory_space<vmem>>, %arg6: memref<512x64xbf16, #tpu.memory_space<vmem>>, %arg7: memref<512x64xf32, #tpu.memory_space<vmem>>) attributes {dimension_semantics = [#tpu.dimension_semantics<parallel>, #tpu.dimension_semantics<parallel>, #tpu.dimension_semantics<arbitrary>], iteration_bounds = array<i64: 1, 1, 1>, scalar_prefetch = 0 : i64, scratch_operands = 1 : i64, tpu.core_type = #tpu.core_type<tc>, window_params = [{transform_indices = @transform_0, window_bounds = array<i64: 512, 256>}, {transform_indices = @transform_1, window_bounds = array<i64: 256, 64>}, {transform_indices = @transform_2, window_bounds = array<i64: 1, 64>}, {transform_indices = @transform_3, window_bounds = array<i64: 512, 64>}]} {
    %c0_i32 = arith.constant 0 : i32
    %0 = arith.cmpi eq, %arg2, %c0_i32 : i32
    %1 = arith.extui %0 : i1 to i32
    %c0_i32_0 = arith.constant 0 : i32
    %2 = arith.cmpi ne, %1, %c0_i32_0 : i32
    scf.if %2 {
      %cst_10 = arith.constant 0.000000e+00 : f32
      %12 = vector.broadcast %cst_10 : f32 to vector<512x64xf32>
      %c0_11 = arith.constant 0 : index
      %c0_12 = arith.constant 0 : index
      %13 = vector.load %arg7[%c0_11, %c0_12] : memref<512x64xf32, #tpu.memory_space<vmem>>, vector<512x64xf32>
      tpu.vector_store %arg7[%c0_11, %c0_12], %12 {strides = array<i32>} : memref<512x64xf32, #tpu.memory_space<vmem>>, vector<512x64xf32>,
    } else {
    }
    %c0 = arith.constant 0 : index
    %c0_1 = arith.constant 0 : index
    %3 = vector.load %arg7[%c0, %c0_1] : memref<512x64xf32, #tpu.memory_space<vmem>>, vector<512x64xf32>
    %c0_2 = arith.constant 0 : index
    %c0_3 = arith.constant 0 : index
    %4 = vector.load %arg3[%c0_2, %c0_3] : memref<512x256xbf16, #tpu.memory_space<vmem>>, vector<512x256xbf16>
    %c0_4 = arith.constant 0 : index
    %c0_5 = arith.constant 0 : index
    %5 = vector.load %arg4[%c0_4, %c0_5] : memref<256x64xbf16, #tpu.memory_space<vmem>>, vector<256x64xbf16>
    %cst = arith.constant dense<0.000000e+00> : vector<512x64xf32>
    %6 = tpu.matmul %4, %5, %cst {dimension_numbers = #tpu.dot_dimension_numbers<[1], [0], [0], [1], [0, 0, 1, 1], [], []>} : vector<512x256xbf16>, vector<256x64xbf16>, vector<512x64xf32> -> vector<512x64xf32>
    %7 = arith.addf %3, %6 : vector<512x64xf32>
    %c0_6 = arith.constant 0 : index
    %c0_7 = arith.constant 0 : index
    %8 = vector.load %arg7[%c0_6, %c0_7] : memref<512x64xf32, #tpu.memory_space<vmem>>, vector<512x64xf32>
    tpu.vector_store %arg7[%c0_6, %c0_7], %7 {strides = array<i32>} : memref<512x64xf32, #tpu.memory_space<vmem>>, vector<512x64xf32>,
    %c0_i32_8 = arith.constant 0 : i32
    %9 = arith.cmpi eq, %arg2, %c0_i32_8 : i32
    %10 = arith.extui %9 : i1 to i32
    %c0_i32_9 = arith.constant 0 : i32
    %11 = arith.cmpi ne, %10, %c0_i32_9 : i32
    scf.if %11 {
      %c0_10 = arith.constant 0 : index
      %c0_11 = arith.constant 0 : index
      %12 = vector.load %arg7[%c0_10, %c0_11] : memref<512x64xf32, #tpu.memory_space<vmem>>, vector<512x64xf32>
      %c0_12 = arith.constant 0 : index
      %c0_13 = arith.constant 0 : index
      %13 = vector.load %arg5[%c0_12, %c0_13] : memref<1x64xf32, #tpu.memory_space<vmem>>, vector<1x64xf32>
      %14 = vector.broadcast %13 : vector<1x64xf32> to vector<512x64xf32>
      %15 = arith.addf %12, %14 : vector<512x64xf32>
      %cst_14 = arith.constant 0.000000e+00 : f32
      %16 = vector.broadcast %cst_14 : f32 to vector<512x64xf32>
      %17 = arith.maximumf %15, %16 : vector<512x64xf32>
      %18 = arith.truncf %17 : vector<512x64xf32> to vector<512x64xbf16>
      %c0_15 = arith.constant 0 : index
      %c0_16 = arith.constant 0 : index
      %19 = vector.load %arg6[%c0_15, %c0_16] : memref<512x64xbf16, #tpu.memory_space<vmem>>, vector<512x64xbf16>
      tpu.vector_store %arg6[%c0_15, %c0_16], %18 {strides = array<i32>} : memref<512x64xbf16, #tpu.memory_space<vmem>>, vector<512x64xbf16>,
    } else {
    }
    return
  }
  func.func @transform_0(%arg0: i32, %arg1: i32, %arg2: i32) -> (i32, i32) {
    %c0_i32 = arith.constant 0 : i32
    return %arg0, %arg2 : i32, i32
  }
  func.func @transform_1(%arg0: i32, %arg1: i32, %arg2: i32) -> (i32, i32) {
    %c0_i32 = arith.constant 0 : i32
    return %arg2, %arg1 : i32, i32
  }
  func.func @transform_2(%arg0: i32, %arg1: i32, %arg2: i32) -> (i32, i32) {
    %c0_i32 = arith.constant 0 : i32
    %c0_i32_0 = arith.constant 0 : i32
    return %c0_i32, %arg1 : i32, i32
  }
  func.func @transform_3(%arg0: i32, %arg1: i32, %arg2: i32) -> (i32, i32) {
    %c0_i32 = arith.constant 0 : i32
    return %arg0, %arg1 : i32, i32
  }
}

module attributes {stable_mosaic.version = 11 : i64} {
  func.func @_max9_kernel(%arg0: i32, %arg1: memref<9x16x512xbf16, #tpu.memory_space<vmem>>, %arg2: memref<16x512xbf16, #tpu.memory_space<vmem>>) attributes {dimension_semantics = [#tpu.dimension_semantics<parallel>], iteration_bounds = array<i64: 1>, scalar_prefetch = 0 : i64, scratch_operands = 0 : i64, tpu.core_type = #tpu.core_type<tc>, window_params = [{transform_indices = @transform_0, window_bounds = array<i64: 9, 16, 512>}, {transform_indices = @transform_1, window_bounds = array<i64: 16, 512>}]} {
    %c0 = arith.constant 0 : index
    %c0_0 = arith.constant 0 : index
    %c0_1 = arith.constant 0 : index
    %0 = vector.load %arg1[%c0, %c0_0, %c0_1] : memref<9x16x512xbf16, #tpu.memory_space<vmem>>, vector<1x16x512xbf16>
    %1 = vector.shape_cast %0 : vector<1x16x512xbf16> to vector<16x512xbf16>
    %c1 = arith.constant 1 : index
    %c0_2 = arith.constant 0 : index
    %c0_3 = arith.constant 0 : index
    %2 = vector.load %arg1[%c1, %c0_2, %c0_3] : memref<9x16x512xbf16, #tpu.memory_space<vmem>>, vector<1x16x512xbf16>
    %3 = vector.shape_cast %2 : vector<1x16x512xbf16> to vector<16x512xbf16>
    %4 = arith.maximumf %1, %3 : vector<16x512xbf16>
    %c2 = arith.constant 2 : index
    %c0_4 = arith.constant 0 : index
    %c0_5 = arith.constant 0 : index
    %5 = vector.load %arg1[%c2, %c0_4, %c0_5] : memref<9x16x512xbf16, #tpu.memory_space<vmem>>, vector<1x16x512xbf16>
    %6 = vector.shape_cast %5 : vector<1x16x512xbf16> to vector<16x512xbf16>
    %7 = arith.maximumf %4, %6 : vector<16x512xbf16>
    %c3 = arith.constant 3 : index
    %c0_6 = arith.constant 0 : index
    %c0_7 = arith.constant 0 : index
    %8 = vector.load %arg1[%c3, %c0_6, %c0_7] : memref<9x16x512xbf16, #tpu.memory_space<vmem>>, vector<1x16x512xbf16>
    %9 = vector.shape_cast %8 : vector<1x16x512xbf16> to vector<16x512xbf16>
    %10 = arith.maximumf %7, %9 : vector<16x512xbf16>
    %c4 = arith.constant 4 : index
    %c0_8 = arith.constant 0 : index
    %c0_9 = arith.constant 0 : index
    %11 = vector.load %arg1[%c4, %c0_8, %c0_9] : memref<9x16x512xbf16, #tpu.memory_space<vmem>>, vector<1x16x512xbf16>
    %12 = vector.shape_cast %11 : vector<1x16x512xbf16> to vector<16x512xbf16>
    %13 = arith.maximumf %10, %12 : vector<16x512xbf16>
    %c5 = arith.constant 5 : index
    %c0_10 = arith.constant 0 : index
    %c0_11 = arith.constant 0 : index
    %14 = vector.load %arg1[%c5, %c0_10, %c0_11] : memref<9x16x512xbf16, #tpu.memory_space<vmem>>, vector<1x16x512xbf16>
    %15 = vector.shape_cast %14 : vector<1x16x512xbf16> to vector<16x512xbf16>
    %16 = arith.maximumf %13, %15 : vector<16x512xbf16>
    %c6 = arith.constant 6 : index
    %c0_12 = arith.constant 0 : index
    %c0_13 = arith.constant 0 : index
    %17 = vector.load %arg1[%c6, %c0_12, %c0_13] : memref<9x16x512xbf16, #tpu.memory_space<vmem>>, vector<1x16x512xbf16>
    %18 = vector.shape_cast %17 : vector<1x16x512xbf16> to vector<16x512xbf16>
    %19 = arith.maximumf %16, %18 : vector<16x512xbf16>
    %c7 = arith.constant 7 : index
    %c0_14 = arith.constant 0 : index
    %c0_15 = arith.constant 0 : index
    %20 = vector.load %arg1[%c7, %c0_14, %c0_15] : memref<9x16x512xbf16, #tpu.memory_space<vmem>>, vector<1x16x512xbf16>
    %21 = vector.shape_cast %20 : vector<1x16x512xbf16> to vector<16x512xbf16>
    %22 = arith.maximumf %19, %21 : vector<16x512xbf16>
    %c8 = arith.constant 8 : index
    %c0_16 = arith.constant 0 : index
    %c0_17 = arith.constant 0 : index
    %23 = vector.load %arg1[%c8, %c0_16, %c0_17] : memref<9x16x512xbf16, #tpu.memory_space<vmem>>, vector<1x16x512xbf16>
    %24 = vector.shape_cast %23 : vector<1x16x512xbf16> to vector<16x512xbf16>
    %25 = arith.maximumf %22, %24 : vector<16x512xbf16>
    %c0_18 = arith.constant 0 : index
    %c0_19 = arith.constant 0 : index
    %26 = vector.load %arg2[%c0_18, %c0_19] : memref<16x512xbf16, #tpu.memory_space<vmem>>, vector<16x512xbf16>
    tpu.vector_store %arg2[%c0_18, %c0_19], %25 {strides = array<i32>} : memref<16x512xbf16, #tpu.memory_space<vmem>>, vector<16x512xbf16>,
    return
  }
  func.func @transform_0(%arg0: i32) -> (i32, i32, i32) {
    %c0_i32 = arith.constant 0 : i32
    %c0_i32_0 = arith.constant 0 : i32
    %c0_i32_1 = arith.constant 0 : i32
    return %c0_i32, %arg0, %c0_i32_0 : i32, i32, i32
  }
  func.func @transform_1(%arg0: i32) -> (i32, i32) {
    %c0_i32 = arith.constant 0 : i32
    %c0_i32_0 = arith.constant 0 : i32
    return %arg0, %c0_i32 : i32, i32
  }
}

module attributes {stable_mosaic.version = 11 : i64} {
  func.func @_gemm_kernel(%arg0: i32, %arg1: i32, %arg2: i32, %arg3: memref<128x576xbf16, #tpu.memory_space<vmem>>, %arg4: memref<576x64xbf16, #tpu.memory_space<vmem>>, %arg5: memref<1x64xf32, #tpu.memory_space<vmem>>, %arg6: memref<128x64xbf16, #tpu.memory_space<vmem>>, %arg7: memref<128x64xf32, #tpu.memory_space<vmem>>) attributes {dimension_semantics = [#tpu.dimension_semantics<parallel>, #tpu.dimension_semantics<parallel>, #tpu.dimension_semantics<arbitrary>], iteration_bounds = array<i64: 1, 1, 1>, scalar_prefetch = 0 : i64, scratch_operands = 1 : i64, tpu.core_type = #tpu.core_type<tc>, window_params = [{transform_indices = @transform_0, window_bounds = array<i64: 128, 576>}, {transform_indices = @transform_1, window_bounds = array<i64: 576, 64>}, {transform_indices = @transform_2, window_bounds = array<i64: 1, 64>}, {transform_indices = @transform_3, window_bounds = array<i64: 128, 64>}]} {
    %c0_i32 = arith.constant 0 : i32
    %0 = arith.cmpi eq, %arg2, %c0_i32 : i32
    %1 = arith.extui %0 : i1 to i32
    %c0_i32_0 = arith.constant 0 : i32
    %2 = arith.cmpi ne, %1, %c0_i32_0 : i32
    scf.if %2 {
      %cst_10 = arith.constant 0.000000e+00 : f32
      %12 = vector.broadcast %cst_10 : f32 to vector<128x64xf32>
      %c0_11 = arith.constant 0 : index
      %c0_12 = arith.constant 0 : index
      %13 = vector.load %arg7[%c0_11, %c0_12] : memref<128x64xf32, #tpu.memory_space<vmem>>, vector<128x64xf32>
      tpu.vector_store %arg7[%c0_11, %c0_12], %12 {strides = array<i32>} : memref<128x64xf32, #tpu.memory_space<vmem>>, vector<128x64xf32>,
    } else {
    }
    %c0 = arith.constant 0 : index
    %c0_1 = arith.constant 0 : index
    %3 = vector.load %arg7[%c0, %c0_1] : memref<128x64xf32, #tpu.memory_space<vmem>>, vector<128x64xf32>
    %c0_2 = arith.constant 0 : index
    %c0_3 = arith.constant 0 : index
    %4 = vector.load %arg3[%c0_2, %c0_3] : memref<128x576xbf16, #tpu.memory_space<vmem>>, vector<128x576xbf16>
    %c0_4 = arith.constant 0 : index
    %c0_5 = arith.constant 0 : index
    %5 = vector.load %arg4[%c0_4, %c0_5] : memref<576x64xbf16, #tpu.memory_space<vmem>>, vector<576x64xbf16>
    %cst = arith.constant dense<0.000000e+00> : vector<128x64xf32>
    %6 = tpu.matmul %4, %5, %cst {dimension_numbers = #tpu.dot_dimension_numbers<[1], [0], [0], [1], [0, 0, 1, 1], [], []>} : vector<128x576xbf16>, vector<576x64xbf16>, vector<128x64xf32> -> vector<128x64xf32>
    %7 = arith.addf %3, %6 : vector<128x64xf32>
    %c0_6 = arith.constant 0 : index
    %c0_7 = arith.constant 0 : index
    %8 = vector.load %arg7[%c0_6, %c0_7] : memref<128x64xf32, #tpu.memory_space<vmem>>, vector<128x64xf32>
    tpu.vector_store %arg7[%c0_6, %c0_7], %7 {strides = array<i32>} : memref<128x64xf32, #tpu.memory_space<vmem>>, vector<128x64xf32>,
    %c0_i32_8 = arith.constant 0 : i32
    %9 = arith.cmpi eq, %arg2, %c0_i32_8 : i32
    %10 = arith.extui %9 : i1 to i32
    %c0_i32_9 = arith.constant 0 : i32
    %11 = arith.cmpi ne, %10, %c0_i32_9 : i32
    scf.if %11 {
      %c0_10 = arith.constant 0 : index
      %c0_11 = arith.constant 0 : index
      %12 = vector.load %arg7[%c0_10, %c0_11] : memref<128x64xf32, #tpu.memory_space<vmem>>, vector<128x64xf32>
      %c0_12 = arith.constant 0 : index
      %c0_13 = arith.constant 0 : index
      %13 = vector.load %arg5[%c0_12, %c0_13] : memref<1x64xf32, #tpu.memory_space<vmem>>, vector<1x64xf32>
      %14 = vector.broadcast %13 : vector<1x64xf32> to vector<128x64xf32>
      %15 = arith.addf %12, %14 : vector<128x64xf32>
      %cst_14 = arith.constant 0.000000e+00 : f32
      %16 = vector.broadcast %cst_14 : f32 to vector<128x64xf32>
      %17 = arith.maximumf %15, %16 : vector<128x64xf32>
      %18 = arith.truncf %17 : vector<128x64xf32> to vector<128x64xbf16>
      %c0_15 = arith.constant 0 : index
      %c0_16 = arith.constant 0 : index
      %19 = vector.load %arg6[%c0_15, %c0_16] : memref<128x64xbf16, #tpu.memory_space<vmem>>, vector<128x64xbf16>
      tpu.vector_store %arg6[%c0_15, %c0_16], %18 {strides = array<i32>} : memref<128x64xbf16, #tpu.memory_space<vmem>>, vector<128x64xbf16>,
    } else {
    }
    return
  }
  func.func @transform_0(%arg0: i32, %arg1: i32, %arg2: i32) -> (i32, i32) {
    %c0_i32 = arith.constant 0 : i32
    return %arg0, %arg2 : i32, i32
  }
  func.func @transform_1(%arg0: i32, %arg1: i32, %arg2: i32) -> (i32, i32) {
    %c0_i32 = arith.constant 0 : i32
    return %arg2, %arg1 : i32, i32
  }
  func.func @transform_2(%arg0: i32, %arg1: i32, %arg2: i32) -> (i32, i32) {
    %c0_i32 = arith.constant 0 : i32
    %c0_i32_0 = arith.constant 0 : i32
    return %c0_i32, %arg1 : i32, i32
  }
  func.func @transform_3(%arg0: i32, %arg1: i32, %arg2: i32) -> (i32, i32) {
    %c0_i32 = arith.constant 0 : i32
    return %arg0, %arg1 : i32, i32
  }
}

module attributes {stable_mosaic.version = 11 : i64} {
  func.func @_gemm_res_kernel(%arg0: i32, %arg1: i32, %arg2: i32, %arg3: memref<128x576xbf16, #tpu.memory_space<vmem>>, %arg4: memref<576x64xbf16, #tpu.memory_space<vmem>>, %arg5: memref<1x64xf32, #tpu.memory_space<vmem>>, %arg6: memref<128x64xbf16, #tpu.memory_space<vmem>>, %arg7: memref<128x64xbf16, #tpu.memory_space<vmem>>, %arg8: memref<128x64xf32, #tpu.memory_space<vmem>>) attributes {dimension_semantics = [#tpu.dimension_semantics<parallel>, #tpu.dimension_semantics<parallel>, #tpu.dimension_semantics<arbitrary>], iteration_bounds = array<i64: 1, 1, 1>, scalar_prefetch = 0 : i64, scratch_operands = 1 : i64, tpu.core_type = #tpu.core_type<tc>, window_params = [{transform_indices = @transform_0, window_bounds = array<i64: 128, 576>}, {transform_indices = @transform_1, window_bounds = array<i64: 576, 64>}, {transform_indices = @transform_2, window_bounds = array<i64: 1, 64>}, {transform_indices = @transform_3, window_bounds = array<i64: 128, 64>}, {transform_indices = @transform_4, window_bounds = array<i64: 128, 64>}]} {
    %c0_i32 = arith.constant 0 : i32
    %0 = arith.cmpi eq, %arg2, %c0_i32 : i32
    %1 = arith.extui %0 : i1 to i32
    %c0_i32_0 = arith.constant 0 : i32
    %2 = arith.cmpi ne, %1, %c0_i32_0 : i32
    scf.if %2 {
      %cst_10 = arith.constant 0.000000e+00 : f32
      %12 = vector.broadcast %cst_10 : f32 to vector<128x64xf32>
      %c0_11 = arith.constant 0 : index
      %c0_12 = arith.constant 0 : index
      %13 = vector.load %arg8[%c0_11, %c0_12] : memref<128x64xf32, #tpu.memory_space<vmem>>, vector<128x64xf32>
      tpu.vector_store %arg8[%c0_11, %c0_12], %12 {strides = array<i32>} : memref<128x64xf32, #tpu.memory_space<vmem>>, vector<128x64xf32>,
    } else {
    }
    %c0 = arith.constant 0 : index
    %c0_1 = arith.constant 0 : index
    %3 = vector.load %arg8[%c0, %c0_1] : memref<128x64xf32, #tpu.memory_space<vmem>>, vector<128x64xf32>
    %c0_2 = arith.constant 0 : index
    %c0_3 = arith.constant 0 : index
    %4 = vector.load %arg3[%c0_2, %c0_3] : memref<128x576xbf16, #tpu.memory_space<vmem>>, vector<128x576xbf16>
    %c0_4 = arith.constant 0 : index
    %c0_5 = arith.constant 0 : index
    %5 = vector.load %arg4[%c0_4, %c0_5] : memref<576x64xbf16, #tpu.memory_space<vmem>>, vector<576x64xbf16>
    %cst = arith.constant dense<0.000000e+00> : vector<128x64xf32>
    %6 = tpu.matmul %4, %5, %cst {dimension_numbers = #tpu.dot_dimension_numbers<[1], [0], [0], [1], [0, 0, 1, 1], [], []>} : vector<128x576xbf16>, vector<576x64xbf16>, vector<128x64xf32> -> vector<128x64xf32>
    %7 = arith.addf %3, %6 : vector<128x64xf32>
    %c0_6 = arith.constant 0 : index
    %c0_7 = arith.constant 0 : index
    %8 = vector.load %arg8[%c0_6, %c0_7] : memref<128x64xf32, #tpu.memory_space<vmem>>, vector<128x64xf32>
    tpu.vector_store %arg8[%c0_6, %c0_7], %7 {strides = array<i32>} : memref<128x64xf32, #tpu.memory_space<vmem>>, vector<128x64xf32>,
    %c0_i32_8 = arith.constant 0 : i32
    %9 = arith.cmpi eq, %arg2, %c0_i32_8 : i32
    %10 = arith.extui %9 : i1 to i32
    %c0_i32_9 = arith.constant 0 : i32
    %11 = arith.cmpi ne, %10, %c0_i32_9 : i32
    scf.if %11 {
      %c0_10 = arith.constant 0 : index
      %c0_11 = arith.constant 0 : index
      %12 = vector.load %arg8[%c0_10, %c0_11] : memref<128x64xf32, #tpu.memory_space<vmem>>, vector<128x64xf32>
      %c0_12 = arith.constant 0 : index
      %c0_13 = arith.constant 0 : index
      %13 = vector.load %arg5[%c0_12, %c0_13] : memref<1x64xf32, #tpu.memory_space<vmem>>, vector<1x64xf32>
      %14 = vector.broadcast %13 : vector<1x64xf32> to vector<128x64xf32>
      %15 = arith.addf %12, %14 : vector<128x64xf32>
      %c0_14 = arith.constant 0 : index
      %c0_15 = arith.constant 0 : index
      %16 = vector.load %arg6[%c0_14, %c0_15] : memref<128x64xbf16, #tpu.memory_space<vmem>>, vector<128x64xbf16>
      %17 = arith.extf %16 : vector<128x64xbf16> to vector<128x64xf32>
      %18 = arith.addf %15, %17 : vector<128x64xf32>
      %cst_16 = arith.constant 0.000000e+00 : f32
      %19 = vector.broadcast %cst_16 : f32 to vector<128x64xf32>
      %20 = arith.maximumf %18, %19 : vector<128x64xf32>
      %21 = arith.truncf %20 : vector<128x64xf32> to vector<128x64xbf16>
      %c0_17 = arith.constant 0 : index
      %c0_18 = arith.constant 0 : index
      %22 = vector.load %arg7[%c0_17, %c0_18] : memref<128x64xbf16, #tpu.memory_space<vmem>>, vector<128x64xbf16>
      tpu.vector_store %arg7[%c0_17, %c0_18], %21 {strides = array<i32>} : memref<128x64xbf16, #tpu.memory_space<vmem>>, vector<128x64xbf16>,
    } else {
    }
    return
  }
  func.func @transform_0(%arg0: i32, %arg1: i32, %arg2: i32) -> (i32, i32) {
    %c0_i32 = arith.constant 0 : i32
    return %arg0, %arg2 : i32, i32
  }
  func.func @transform_1(%arg0: i32, %arg1: i32, %arg2: i32) -> (i32, i32) {
    %c0_i32 = arith.constant 0 : i32
    return %arg2, %arg1 : i32, i32
  }
  func.func @transform_2(%arg0: i32, %arg1: i32, %arg2: i32) -> (i32, i32) {
    %c0_i32 = arith.constant 0 : i32
    %c0_i32_0 = arith.constant 0 : i32
    return %c0_i32, %arg1 : i32, i32
  }
  func.func @transform_3(%arg0: i32, %arg1: i32, %arg2: i32) -> (i32, i32) {
    %c0_i32 = arith.constant 0 : i32
    return %arg0, %arg1 : i32, i32
  }
  func.func @transform_4(%arg0: i32, %arg1: i32, %arg2: i32) -> (i32, i32) {
    %c0_i32 = arith.constant 0 : i32
    return %arg0, %arg1 : i32, i32
  }
}

module attributes {stable_mosaic.version = 11 : i64} {
  func.func @_gemm_kernel(%arg0: i32, %arg1: i32, %arg2: i32, %arg3: memref<32x576xbf16, #tpu.memory_space<vmem>>, %arg4: memref<576x128xbf16, #tpu.memory_space<vmem>>, %arg5: memref<1x128xf32, #tpu.memory_space<vmem>>, %arg6: memref<32x128xbf16, #tpu.memory_space<vmem>>, %arg7: memref<32x128xf32, #tpu.memory_space<vmem>>) attributes {dimension_semantics = [#tpu.dimension_semantics<parallel>, #tpu.dimension_semantics<parallel>, #tpu.dimension_semantics<arbitrary>], iteration_bounds = array<i64: 1, 1, 1>, scalar_prefetch = 0 : i64, scratch_operands = 1 : i64, tpu.core_type = #tpu.core_type<tc>, window_params = [{transform_indices = @transform_0, window_bounds = array<i64: 32, 576>}, {transform_indices = @transform_1, window_bounds = array<i64: 576, 128>}, {transform_indices = @transform_2, window_bounds = array<i64: 1, 128>}, {transform_indices = @transform_3, window_bounds = array<i64: 32, 128>}]} {
    %c0_i32 = arith.constant 0 : i32
    %0 = arith.cmpi eq, %arg2, %c0_i32 : i32
    %1 = arith.extui %0 : i1 to i32
    %c0_i32_0 = arith.constant 0 : i32
    %2 = arith.cmpi ne, %1, %c0_i32_0 : i32
    scf.if %2 {
      %cst_10 = arith.constant 0.000000e+00 : f32
      %12 = vector.broadcast %cst_10 : f32 to vector<32x128xf32>
      %c0_11 = arith.constant 0 : index
      %c0_12 = arith.constant 0 : index
      %13 = vector.load %arg7[%c0_11, %c0_12] : memref<32x128xf32, #tpu.memory_space<vmem>>, vector<32x128xf32>
      tpu.vector_store %arg7[%c0_11, %c0_12], %12 {strides = array<i32>} : memref<32x128xf32, #tpu.memory_space<vmem>>, vector<32x128xf32>,
    } else {
    }
    %c0 = arith.constant 0 : index
    %c0_1 = arith.constant 0 : index
    %3 = vector.load %arg7[%c0, %c0_1] : memref<32x128xf32, #tpu.memory_space<vmem>>, vector<32x128xf32>
    %c0_2 = arith.constant 0 : index
    %c0_3 = arith.constant 0 : index
    %4 = vector.load %arg3[%c0_2, %c0_3] : memref<32x576xbf16, #tpu.memory_space<vmem>>, vector<32x576xbf16>
    %c0_4 = arith.constant 0 : index
    %c0_5 = arith.constant 0 : index
    %5 = vector.load %arg4[%c0_4, %c0_5] : memref<576x128xbf16, #tpu.memory_space<vmem>>, vector<576x128xbf16>
    %cst = arith.constant dense<0.000000e+00> : vector<32x128xf32>
    %6 = tpu.matmul %4, %5, %cst {dimension_numbers = #tpu.dot_dimension_numbers<[1], [0], [0], [1], [0, 0, 1, 1], [], []>} : vector<32x576xbf16>, vector<576x128xbf16>, vector<32x128xf32> -> vector<32x128xf32>
    %7 = arith.addf %3, %6 : vector<32x128xf32>
    %c0_6 = arith.constant 0 : index
    %c0_7 = arith.constant 0 : index
    %8 = vector.load %arg7[%c0_6, %c0_7] : memref<32x128xf32, #tpu.memory_space<vmem>>, vector<32x128xf32>
    tpu.vector_store %arg7[%c0_6, %c0_7], %7 {strides = array<i32>} : memref<32x128xf32, #tpu.memory_space<vmem>>, vector<32x128xf32>,
    %c0_i32_8 = arith.constant 0 : i32
    %9 = arith.cmpi eq, %arg2, %c0_i32_8 : i32
    %10 = arith.extui %9 : i1 to i32
    %c0_i32_9 = arith.constant 0 : i32
    %11 = arith.cmpi ne, %10, %c0_i32_9 : i32
    scf.if %11 {
      %c0_10 = arith.constant 0 : index
      %c0_11 = arith.constant 0 : index
      %12 = vector.load %arg7[%c0_10, %c0_11] : memref<32x128xf32, #tpu.memory_space<vmem>>, vector<32x128xf32>
      %c0_12 = arith.constant 0 : index
      %c0_13 = arith.constant 0 : index
      %13 = vector.load %arg5[%c0_12, %c0_13] : memref<1x128xf32, #tpu.memory_space<vmem>>, vector<1x128xf32>
      %14 = vector.broadcast %13 : vector<1x128xf32> to vector<32x128xf32>
      %15 = arith.addf %12, %14 : vector<32x128xf32>
      %cst_14 = arith.constant 0.000000e+00 : f32
      %16 = vector.broadcast %cst_14 : f32 to vector<32x128xf32>
      %17 = arith.maximumf %15, %16 : vector<32x128xf32>
      %18 = arith.truncf %17 : vector<32x128xf32> to vector<32x128xbf16>
      %c0_15 = arith.constant 0 : index
      %c0_16 = arith.constant 0 : index
      %19 = vector.load %arg6[%c0_15, %c0_16] : memref<32x128xbf16, #tpu.memory_space<vmem>>, vector<32x128xbf16>
      tpu.vector_store %arg6[%c0_15, %c0_16], %18 {strides = array<i32>} : memref<32x128xbf16, #tpu.memory_space<vmem>>, vector<32x128xbf16>,
    } else {
    }
    return
  }
  func.func @transform_0(%arg0: i32, %arg1: i32, %arg2: i32) -> (i32, i32) {
    %c0_i32 = arith.constant 0 : i32
    return %arg0, %arg2 : i32, i32
  }
  func.func @transform_1(%arg0: i32, %arg1: i32, %arg2: i32) -> (i32, i32) {
    %c0_i32 = arith.constant 0 : i32
    return %arg2, %arg1 : i32, i32
  }
  func.func @transform_2(%arg0: i32, %arg1: i32, %arg2: i32) -> (i32, i32) {
    %c0_i32 = arith.constant 0 : i32
    %c0_i32_0 = arith.constant 0 : i32
    return %c0_i32, %arg1 : i32, i32
  }
  func.func @transform_3(%arg0: i32, %arg1: i32, %arg2: i32) -> (i32, i32) {
    %c0_i32 = arith.constant 0 : i32
    return %arg0, %arg1 : i32, i32
  }
}

module attributes {stable_mosaic.version = 11 : i64} {
  func.func @_gemm_kernel(%arg0: i32, %arg1: i32, %arg2: i32, %arg3: memref<32x64xbf16, #tpu.memory_space<vmem>>, %arg4: memref<64x128xbf16, #tpu.memory_space<vmem>>, %arg5: memref<1x128xf32, #tpu.memory_space<vmem>>, %arg6: memref<32x128xbf16, #tpu.memory_space<vmem>>, %arg7: memref<32x128xf32, #tpu.memory_space<vmem>>) attributes {dimension_semantics = [#tpu.dimension_semantics<parallel>, #tpu.dimension_semantics<parallel>, #tpu.dimension_semantics<arbitrary>], iteration_bounds = array<i64: 1, 1, 1>, scalar_prefetch = 0 : i64, scratch_operands = 1 : i64, tpu.core_type = #tpu.core_type<tc>, window_params = [{transform_indices = @transform_0, window_bounds = array<i64: 32, 64>}, {transform_indices = @transform_1, window_bounds = array<i64: 64, 128>}, {transform_indices = @transform_2, window_bounds = array<i64: 1, 128>}, {transform_indices = @transform_3, window_bounds = array<i64: 32, 128>}]} {
    %c0_i32 = arith.constant 0 : i32
    %0 = arith.cmpi eq, %arg2, %c0_i32 : i32
    %1 = arith.extui %0 : i1 to i32
    %c0_i32_0 = arith.constant 0 : i32
    %2 = arith.cmpi ne, %1, %c0_i32_0 : i32
    scf.if %2 {
      %cst_10 = arith.constant 0.000000e+00 : f32
      %12 = vector.broadcast %cst_10 : f32 to vector<32x128xf32>
      %c0_11 = arith.constant 0 : index
      %c0_12 = arith.constant 0 : index
      %13 = vector.load %arg7[%c0_11, %c0_12] : memref<32x128xf32, #tpu.memory_space<vmem>>, vector<32x128xf32>
      tpu.vector_store %arg7[%c0_11, %c0_12], %12 {strides = array<i32>} : memref<32x128xf32, #tpu.memory_space<vmem>>, vector<32x128xf32>,
    } else {
    }
    %c0 = arith.constant 0 : index
    %c0_1 = arith.constant 0 : index
    %3 = vector.load %arg7[%c0, %c0_1] : memref<32x128xf32, #tpu.memory_space<vmem>>, vector<32x128xf32>
    %c0_2 = arith.constant 0 : index
    %c0_3 = arith.constant 0 : index
    %4 = vector.load %arg3[%c0_2, %c0_3] : memref<32x64xbf16, #tpu.memory_space<vmem>>, vector<32x64xbf16>
    %c0_4 = arith.constant 0 : index
    %c0_5 = arith.constant 0 : index
    %5 = vector.load %arg4[%c0_4, %c0_5] : memref<64x128xbf16, #tpu.memory_space<vmem>>, vector<64x128xbf16>
    %cst = arith.constant dense<0.000000e+00> : vector<32x128xf32>
    %6 = tpu.matmul %4, %5, %cst {dimension_numbers = #tpu.dot_dimension_numbers<[1], [0], [0], [1], [0, 0, 1, 1], [], []>} : vector<32x64xbf16>, vector<64x128xbf16>, vector<32x128xf32> -> vector<32x128xf32>
    %7 = arith.addf %3, %6 : vector<32x128xf32>
    %c0_6 = arith.constant 0 : index
    %c0_7 = arith.constant 0 : index
    %8 = vector.load %arg7[%c0_6, %c0_7] : memref<32x128xf32, #tpu.memory_space<vmem>>, vector<32x128xf32>
    tpu.vector_store %arg7[%c0_6, %c0_7], %7 {strides = array<i32>} : memref<32x128xf32, #tpu.memory_space<vmem>>, vector<32x128xf32>,
    %c0_i32_8 = arith.constant 0 : i32
    %9 = arith.cmpi eq, %arg2, %c0_i32_8 : i32
    %10 = arith.extui %9 : i1 to i32
    %c0_i32_9 = arith.constant 0 : i32
    %11 = arith.cmpi ne, %10, %c0_i32_9 : i32
    scf.if %11 {
      %c0_10 = arith.constant 0 : index
      %c0_11 = arith.constant 0 : index
      %12 = vector.load %arg7[%c0_10, %c0_11] : memref<32x128xf32, #tpu.memory_space<vmem>>, vector<32x128xf32>
      %c0_12 = arith.constant 0 : index
      %c0_13 = arith.constant 0 : index
      %13 = vector.load %arg5[%c0_12, %c0_13] : memref<1x128xf32, #tpu.memory_space<vmem>>, vector<1x128xf32>
      %14 = vector.broadcast %13 : vector<1x128xf32> to vector<32x128xf32>
      %15 = arith.addf %12, %14 : vector<32x128xf32>
      %16 = arith.truncf %15 : vector<32x128xf32> to vector<32x128xbf16>
      %c0_14 = arith.constant 0 : index
      %c0_15 = arith.constant 0 : index
      %17 = vector.load %arg6[%c0_14, %c0_15] : memref<32x128xbf16, #tpu.memory_space<vmem>>, vector<32x128xbf16>
      tpu.vector_store %arg6[%c0_14, %c0_15], %16 {strides = array<i32>} : memref<32x128xbf16, #tpu.memory_space<vmem>>, vector<32x128xbf16>,
    } else {
    }
    return
  }
  func.func @transform_0(%arg0: i32, %arg1: i32, %arg2: i32) -> (i32, i32) {
    %c0_i32 = arith.constant 0 : i32
    return %arg0, %arg2 : i32, i32
  }
  func.func @transform_1(%arg0: i32, %arg1: i32, %arg2: i32) -> (i32, i32) {
    %c0_i32 = arith.constant 0 : i32
    return %arg2, %arg1 : i32, i32
  }
  func.func @transform_2(%arg0: i32, %arg1: i32, %arg2: i32) -> (i32, i32) {
    %c0_i32 = arith.constant 0 : i32
    %c0_i32_0 = arith.constant 0 : i32
    return %c0_i32, %arg1 : i32, i32
  }
  func.func @transform_3(%arg0: i32, %arg1: i32, %arg2: i32) -> (i32, i32) {
    %c0_i32 = arith.constant 0 : i32
    return %arg0, %arg1 : i32, i32
  }
}

module attributes {stable_mosaic.version = 11 : i64} {
  func.func @_gemm_kernel(%arg0: i32, %arg1: i32, %arg2: i32, %arg3: memref<32x384xbf16, #tpu.memory_space<vmem>>, %arg4: memref<384x128xbf16, #tpu.memory_space<vmem>>, %arg5: memref<1x128xf32, #tpu.memory_space<vmem>>, %arg6: memref<32x128xbf16, #tpu.memory_space<vmem>>, %arg7: memref<32x128xf32, #tpu.memory_space<vmem>>) attributes {dimension_semantics = [#tpu.dimension_semantics<parallel>, #tpu.dimension_semantics<parallel>, #tpu.dimension_semantics<arbitrary>], iteration_bounds = array<i64: 1, 1, 3>, scalar_prefetch = 0 : i64, scratch_operands = 1 : i64, tpu.core_type = #tpu.core_type<tc>, window_params = [{transform_indices = @transform_0, window_bounds = array<i64: 32, 384>}, {transform_indices = @transform_1, window_bounds = array<i64: 384, 128>}, {transform_indices = @transform_2, window_bounds = array<i64: 1, 128>}, {transform_indices = @transform_3, window_bounds = array<i64: 32, 128>}]} {
    %c0_i32 = arith.constant 0 : i32
    %0 = arith.cmpi eq, %arg2, %c0_i32 : i32
    %1 = arith.extui %0 : i1 to i32
    %c0_i32_0 = arith.constant 0 : i32
    %2 = arith.cmpi ne, %1, %c0_i32_0 : i32
    scf.if %2 {
      %cst_9 = arith.constant 0.000000e+00 : f32
      %12 = vector.broadcast %cst_9 : f32 to vector<32x128xf32>
      %c0_10 = arith.constant 0 : index
      %c0_11 = arith.constant 0 : index
      %13 = vector.load %arg7[%c0_10, %c0_11] : memref<32x128xf32, #tpu.memory_space<vmem>>, vector<32x128xf32>
      tpu.vector_store %arg7[%c0_10, %c0_11], %12 {strides = array<i32>} : memref<32x128xf32, #tpu.memory_space<vmem>>, vector<32x128xf32>,
    } else {
    }
    %c0 = arith.constant 0 : index
    %c0_1 = arith.constant 0 : index
    %3 = vector.load %arg7[%c0, %c0_1] : memref<32x128xf32, #tpu.memory_space<vmem>>, vector<32x128xf32>
    %c0_2 = arith.constant 0 : index
    %c0_3 = arith.constant 0 : index
    %4 = vector.load %arg3[%c0_2, %c0_3] : memref<32x384xbf16, #tpu.memory_space<vmem>>, vector<32x384xbf16>
    %c0_4 = arith.constant 0 : index
    %c0_5 = arith.constant 0 : index
    %5 = vector.load %arg4[%c0_4, %c0_5] : memref<384x128xbf16, #tpu.memory_space<vmem>>, vector<384x128xbf16>
    %cst = arith.constant dense<0.000000e+00> : vector<32x128xf32>
    %6 = tpu.matmul %4, %5, %cst {dimension_numbers = #tpu.dot_dimension_numbers<[1], [0], [0], [1], [0, 0, 1, 1], [], []>} : vector<32x384xbf16>, vector<384x128xbf16>, vector<32x128xf32> -> vector<32x128xf32>
    %7 = arith.addf %3, %6 : vector<32x128xf32>
    %c0_6 = arith.constant 0 : index
    %c0_7 = arith.constant 0 : index
    %8 = vector.load %arg7[%c0_6, %c0_7] : memref<32x128xf32, #tpu.memory_space<vmem>>, vector<32x128xf32>
    tpu.vector_store %arg7[%c0_6, %c0_7], %7 {strides = array<i32>} : memref<32x128xf32, #tpu.memory_space<vmem>>, vector<32x128xf32>,
    %c2_i32 = arith.constant 2 : i32
    %9 = arith.cmpi eq, %arg2, %c2_i32 : i32
    %10 = arith.extui %9 : i1 to i32
    %c0_i32_8 = arith.constant 0 : i32
    %11 = arith.cmpi ne, %10, %c0_i32_8 : i32
    scf.if %11 {
      %c0_9 = arith.constant 0 : index
      %c0_10 = arith.constant 0 : index
      %12 = vector.load %arg7[%c0_9, %c0_10] : memref<32x128xf32, #tpu.memory_space<vmem>>, vector<32x128xf32>
      %c0_11 = arith.constant 0 : index
      %c0_12 = arith.constant 0 : index
      %13 = vector.load %arg5[%c0_11, %c0_12] : memref<1x128xf32, #tpu.memory_space<vmem>>, vector<1x128xf32>
      %14 = vector.broadcast %13 : vector<1x128xf32> to vector<32x128xf32>
      %15 = arith.addf %12, %14 : vector<32x128xf32>
      %cst_13 = arith.constant 0.000000e+00 : f32
      %16 = vector.broadcast %cst_13 : f32 to vector<32x128xf32>
      %17 = arith.maximumf %15, %16 : vector<32x128xf32>
      %18 = arith.truncf %17 : vector<32x128xf32> to vector<32x128xbf16>
      %c0_14 = arith.constant 0 : index
      %c0_15 = arith.constant 0 : index
      %19 = vector.load %arg6[%c0_14, %c0_15] : memref<32x128xbf16, #tpu.memory_space<vmem>>, vector<32x128xbf16>
      tpu.vector_store %arg6[%c0_14, %c0_15], %18 {strides = array<i32>} : memref<32x128xbf16, #tpu.memory_space<vmem>>, vector<32x128xbf16>,
    } else {
    }
    return
  }
  func.func @transform_0(%arg0: i32, %arg1: i32, %arg2: i32) -> (i32, i32) {
    %c0_i32 = arith.constant 0 : i32
    return %arg0, %arg2 : i32, i32
  }
  func.func @transform_1(%arg0: i32, %arg1: i32, %arg2: i32) -> (i32, i32) {
    %c0_i32 = arith.constant 0 : i32
    return %arg2, %arg1 : i32, i32
  }
  func.func @transform_2(%arg0: i32, %arg1: i32, %arg2: i32) -> (i32, i32) {
    %c0_i32 = arith.constant 0 : i32
    %c0_i32_0 = arith.constant 0 : i32
    return %c0_i32, %arg1 : i32, i32
  }
  func.func @transform_3(%arg0: i32, %arg1: i32, %arg2: i32) -> (i32, i32) {
    %c0_i32 = arith.constant 0 : i32
    return %arg0, %arg1 : i32, i32
  }
}

module attributes {stable_mosaic.version = 11 : i64} {
  func.func @_gemm_res_kernel(%arg0: i32, %arg1: i32, %arg2: i32, %arg3: memref<32x384xbf16, #tpu.memory_space<vmem>>, %arg4: memref<384x128xbf16, #tpu.memory_space<vmem>>, %arg5: memref<1x128xf32, #tpu.memory_space<vmem>>, %arg6: memref<32x128xbf16, #tpu.memory_space<vmem>>, %arg7: memref<32x128xbf16, #tpu.memory_space<vmem>>, %arg8: memref<32x128xf32, #tpu.memory_space<vmem>>) attributes {dimension_semantics = [#tpu.dimension_semantics<parallel>, #tpu.dimension_semantics<parallel>, #tpu.dimension_semantics<arbitrary>], iteration_bounds = array<i64: 1, 1, 3>, scalar_prefetch = 0 : i64, scratch_operands = 1 : i64, tpu.core_type = #tpu.core_type<tc>, window_params = [{transform_indices = @transform_0, window_bounds = array<i64: 32, 384>}, {transform_indices = @transform_1, window_bounds = array<i64: 384, 128>}, {transform_indices = @transform_2, window_bounds = array<i64: 1, 128>}, {transform_indices = @transform_3, window_bounds = array<i64: 32, 128>}, {transform_indices = @transform_4, window_bounds = array<i64: 32, 128>}]} {
    %c0_i32 = arith.constant 0 : i32
    %0 = arith.cmpi eq, %arg2, %c0_i32 : i32
    %1 = arith.extui %0 : i1 to i32
    %c0_i32_0 = arith.constant 0 : i32
    %2 = arith.cmpi ne, %1, %c0_i32_0 : i32
    scf.if %2 {
      %cst_9 = arith.constant 0.000000e+00 : f32
      %12 = vector.broadcast %cst_9 : f32 to vector<32x128xf32>
      %c0_10 = arith.constant 0 : index
      %c0_11 = arith.constant 0 : index
      %13 = vector.load %arg8[%c0_10, %c0_11] : memref<32x128xf32, #tpu.memory_space<vmem>>, vector<32x128xf32>
      tpu.vector_store %arg8[%c0_10, %c0_11], %12 {strides = array<i32>} : memref<32x128xf32, #tpu.memory_space<vmem>>, vector<32x128xf32>,
    } else {
    }
    %c0 = arith.constant 0 : index
    %c0_1 = arith.constant 0 : index
    %3 = vector.load %arg8[%c0, %c0_1] : memref<32x128xf32, #tpu.memory_space<vmem>>, vector<32x128xf32>
    %c0_2 = arith.constant 0 : index
    %c0_3 = arith.constant 0 : index
    %4 = vector.load %arg3[%c0_2, %c0_3] : memref<32x384xbf16, #tpu.memory_space<vmem>>, vector<32x384xbf16>
    %c0_4 = arith.constant 0 : index
    %c0_5 = arith.constant 0 : index
    %5 = vector.load %arg4[%c0_4, %c0_5] : memref<384x128xbf16, #tpu.memory_space<vmem>>, vector<384x128xbf16>
    %cst = arith.constant dense<0.000000e+00> : vector<32x128xf32>
    %6 = tpu.matmul %4, %5, %cst {dimension_numbers = #tpu.dot_dimension_numbers<[1], [0], [0], [1], [0, 0, 1, 1], [], []>} : vector<32x384xbf16>, vector<384x128xbf16>, vector<32x128xf32> -> vector<32x128xf32>
    %7 = arith.addf %3, %6 : vector<32x128xf32>
    %c0_6 = arith.constant 0 : index
    %c0_7 = arith.constant 0 : index
    %8 = vector.load %arg8[%c0_6, %c0_7] : memref<32x128xf32, #tpu.memory_space<vmem>>, vector<32x128xf32>
    tpu.vector_store %arg8[%c0_6, %c0_7], %7 {strides = array<i32>} : memref<32x128xf32, #tpu.memory_space<vmem>>, vector<32x128xf32>,
    %c2_i32 = arith.constant 2 : i32
    %9 = arith.cmpi eq, %arg2, %c2_i32 : i32
    %10 = arith.extui %9 : i1 to i32
    %c0_i32_8 = arith.constant 0 : i32
    %11 = arith.cmpi ne, %10, %c0_i32_8 : i32
    scf.if %11 {
      %c0_9 = arith.constant 0 : index
      %c0_10 = arith.constant 0 : index
      %12 = vector.load %arg8[%c0_9, %c0_10] : memref<32x128xf32, #tpu.memory_space<vmem>>, vector<32x128xf32>
      %c0_11 = arith.constant 0 : index
      %c0_12 = arith.constant 0 : index
      %13 = vector.load %arg5[%c0_11, %c0_12] : memref<1x128xf32, #tpu.memory_space<vmem>>, vector<1x128xf32>
      %14 = vector.broadcast %13 : vector<1x128xf32> to vector<32x128xf32>
      %15 = arith.addf %12, %14 : vector<32x128xf32>
      %c0_13 = arith.constant 0 : index
      %c0_14 = arith.constant 0 : index
      %16 = vector.load %arg6[%c0_13, %c0_14] : memref<32x128xbf16, #tpu.memory_space<vmem>>, vector<32x128xbf16>
      %17 = arith.extf %16 : vector<32x128xbf16> to vector<32x128xf32>
      %18 = arith.addf %15, %17 : vector<32x128xf32>
      %cst_15 = arith.constant 0.000000e+00 : f32
      %19 = vector.broadcast %cst_15 : f32 to vector<32x128xf32>
      %20 = arith.maximumf %18, %19 : vector<32x128xf32>
      %21 = arith.truncf %20 : vector<32x128xf32> to vector<32x128xbf16>
      %c0_16 = arith.constant 0 : index
      %c0_17 = arith.constant 0 : index
      %22 = vector.load %arg7[%c0_16, %c0_17] : memref<32x128xbf16, #tpu.memory_space<vmem>>, vector<32x128xbf16>
      tpu.vector_store %arg7[%c0_16, %c0_17], %21 {strides = array<i32>} : memref<32x128xbf16, #tpu.memory_space<vmem>>, vector<32x128xbf16>,
    } else {
    }
    return
  }
  func.func @transform_0(%arg0: i32, %arg1: i32, %arg2: i32) -> (i32, i32) {
    %c0_i32 = arith.constant 0 : i32
    return %arg0, %arg2 : i32, i32
  }
  func.func @transform_1(%arg0: i32, %arg1: i32, %arg2: i32) -> (i32, i32) {
    %c0_i32 = arith.constant 0 : i32
    return %arg2, %arg1 : i32, i32
  }
  func.func @transform_2(%arg0: i32, %arg1: i32, %arg2: i32) -> (i32, i32) {
    %c0_i32 = arith.constant 0 : i32
    %c0_i32_0 = arith.constant 0 : i32
    return %c0_i32, %arg1 : i32, i32
  }
  func.func @transform_3(%arg0: i32, %arg1: i32, %arg2: i32) -> (i32, i32) {
    %c0_i32 = arith.constant 0 : i32
    return %arg0, %arg1 : i32, i32
  }
  func.func @transform_4(%arg0: i32, %arg1: i32, %arg2: i32) -> (i32, i32) {
    %c0_i32 = arith.constant 0 : i32
    return %arg0, %arg1 : i32, i32
  }
}

module attributes {stable_mosaic.version = 11 : i64} {
  func.func @_gemm_kernel(%arg0: i32, %arg1: i32, %arg2: i32, %arg3: memref<16x384xbf16, #tpu.memory_space<vmem>>, %arg4: memref<384x256xbf16, #tpu.memory_space<vmem>>, %arg5: memref<1x256xf32, #tpu.memory_space<vmem>>, %arg6: memref<16x256xbf16, #tpu.memory_space<vmem>>, %arg7: memref<16x256xf32, #tpu.memory_space<vmem>>) attributes {dimension_semantics = [#tpu.dimension_semantics<parallel>, #tpu.dimension_semantics<parallel>, #tpu.dimension_semantics<arbitrary>], iteration_bounds = array<i64: 1, 1, 3>, scalar_prefetch = 0 : i64, scratch_operands = 1 : i64, tpu.core_type = #tpu.core_type<tc>, window_params = [{transform_indices = @transform_0, window_bounds = array<i64: 16, 384>}, {transform_indices = @transform_1, window_bounds = array<i64: 384, 256>}, {transform_indices = @transform_2, window_bounds = array<i64: 1, 256>}, {transform_indices = @transform_3, window_bounds = array<i64: 16, 256>}]} {
    %c0_i32 = arith.constant 0 : i32
    %0 = arith.cmpi eq, %arg2, %c0_i32 : i32
    %1 = arith.extui %0 : i1 to i32
    %c0_i32_0 = arith.constant 0 : i32
    %2 = arith.cmpi ne, %1, %c0_i32_0 : i32
    scf.if %2 {
      %cst_9 = arith.constant 0.000000e+00 : f32
      %12 = vector.broadcast %cst_9 : f32 to vector<16x256xf32>
      %c0_10 = arith.constant 0 : index
      %c0_11 = arith.constant 0 : index
      %13 = vector.load %arg7[%c0_10, %c0_11] : memref<16x256xf32, #tpu.memory_space<vmem>>, vector<16x256xf32>
      tpu.vector_store %arg7[%c0_10, %c0_11], %12 {strides = array<i32>} : memref<16x256xf32, #tpu.memory_space<vmem>>, vector<16x256xf32>,
    } else {
    }
    %c0 = arith.constant 0 : index
    %c0_1 = arith.constant 0 : index
    %3 = vector.load %arg7[%c0, %c0_1] : memref<16x256xf32, #tpu.memory_space<vmem>>, vector<16x256xf32>
    %c0_2 = arith.constant 0 : index
    %c0_3 = arith.constant 0 : index
    %4 = vector.load %arg3[%c0_2, %c0_3] : memref<16x384xbf16, #tpu.memory_space<vmem>>, vector<16x384xbf16>
    %c0_4 = arith.constant 0 : index
    %c0_5 = arith.constant 0 : index
    %5 = vector.load %arg4[%c0_4, %c0_5] : memref<384x256xbf16, #tpu.memory_space<vmem>>, vector<384x256xbf16>
    %cst = arith.constant dense<0.000000e+00> : vector<16x256xf32>
    %6 = tpu.matmul %4, %5, %cst {dimension_numbers = #tpu.dot_dimension_numbers<[1], [0], [0], [1], [0, 0, 1, 1], [], []>} : vector<16x384xbf16>, vector<384x256xbf16>, vector<16x256xf32> -> vector<16x256xf32>
    %7 = arith.addf %3, %6 : vector<16x256xf32>
    %c0_6 = arith.constant 0 : index
    %c0_7 = arith.constant 0 : index
    %8 = vector.load %arg7[%c0_6, %c0_7] : memref<16x256xf32, #tpu.memory_space<vmem>>, vector<16x256xf32>
    tpu.vector_store %arg7[%c0_6, %c0_7], %7 {strides = array<i32>} : memref<16x256xf32, #tpu.memory_space<vmem>>, vector<16x256xf32>,
    %c2_i32 = arith.constant 2 : i32
    %9 = arith.cmpi eq, %arg2, %c2_i32 : i32
    %10 = arith.extui %9 : i1 to i32
    %c0_i32_8 = arith.constant 0 : i32
    %11 = arith.cmpi ne, %10, %c0_i32_8 : i32
    scf.if %11 {
      %c0_9 = arith.constant 0 : index
      %c0_10 = arith.constant 0 : index
      %12 = vector.load %arg7[%c0_9, %c0_10] : memref<16x256xf32, #tpu.memory_space<vmem>>, vector<16x256xf32>
      %c0_11 = arith.constant 0 : index
      %c0_12 = arith.constant 0 : index
      %13 = vector.load %arg5[%c0_11, %c0_12] : memref<1x256xf32, #tpu.memory_space<vmem>>, vector<1x256xf32>
      %14 = vector.broadcast %13 : vector<1x256xf32> to vector<16x256xf32>
      %15 = arith.addf %12, %14 : vector<16x256xf32>
      %cst_13 = arith.constant 0.000000e+00 : f32
      %16 = vector.broadcast %cst_13 : f32 to vector<16x256xf32>
      %17 = arith.maximumf %15, %16 : vector<16x256xf32>
      %18 = arith.truncf %17 : vector<16x256xf32> to vector<16x256xbf16>
      %c0_14 = arith.constant 0 : index
      %c0_15 = arith.constant 0 : index
      %19 = vector.load %arg6[%c0_14, %c0_15] : memref<16x256xbf16, #tpu.memory_space<vmem>>, vector<16x256xbf16>
      tpu.vector_store %arg6[%c0_14, %c0_15], %18 {strides = array<i32>} : memref<16x256xbf16, #tpu.memory_space<vmem>>, vector<16x256xbf16>,
    } else {
    }
    return
  }
  func.func @transform_0(%arg0: i32, %arg1: i32, %arg2: i32) -> (i32, i32) {
    %c0_i32 = arith.constant 0 : i32
    return %arg0, %arg2 : i32, i32
  }
  func.func @transform_1(%arg0: i32, %arg1: i32, %arg2: i32) -> (i32, i32) {
    %c0_i32 = arith.constant 0 : i32
    return %arg2, %arg1 : i32, i32
  }
  func.func @transform_2(%arg0: i32, %arg1: i32, %arg2: i32) -> (i32, i32) {
    %c0_i32 = arith.constant 0 : i32
    %c0_i32_0 = arith.constant 0 : i32
    return %c0_i32, %arg1 : i32, i32
  }
  func.func @transform_3(%arg0: i32, %arg1: i32, %arg2: i32) -> (i32, i32) {
    %c0_i32 = arith.constant 0 : i32
    return %arg0, %arg1 : i32, i32
  }
}

module attributes {stable_mosaic.version = 11 : i64} {
  func.func @_gemm_kernel(%arg0: i32, %arg1: i32, %arg2: i32, %arg3: memref<16x128xbf16, #tpu.memory_space<vmem>>, %arg4: memref<128x256xbf16, #tpu.memory_space<vmem>>, %arg5: memref<1x256xf32, #tpu.memory_space<vmem>>, %arg6: memref<16x256xbf16, #tpu.memory_space<vmem>>, %arg7: memref<16x256xf32, #tpu.memory_space<vmem>>) attributes {dimension_semantics = [#tpu.dimension_semantics<parallel>, #tpu.dimension_semantics<parallel>, #tpu.dimension_semantics<arbitrary>], iteration_bounds = array<i64: 1, 1, 1>, scalar_prefetch = 0 : i64, scratch_operands = 1 : i64, tpu.core_type = #tpu.core_type<tc>, window_params = [{transform_indices = @transform_0, window_bounds = array<i64: 16, 128>}, {transform_indices = @transform_1, window_bounds = array<i64: 128, 256>}, {transform_indices = @transform_2, window_bounds = array<i64: 1, 256>}, {transform_indices = @transform_3, window_bounds = array<i64: 16, 256>}]} {
    %c0_i32 = arith.constant 0 : i32
    %0 = arith.cmpi eq, %arg2, %c0_i32 : i32
    %1 = arith.extui %0 : i1 to i32
    %c0_i32_0 = arith.constant 0 : i32
    %2 = arith.cmpi ne, %1, %c0_i32_0 : i32
    scf.if %2 {
      %cst_10 = arith.constant 0.000000e+00 : f32
      %12 = vector.broadcast %cst_10 : f32 to vector<16x256xf32>
      %c0_11 = arith.constant 0 : index
      %c0_12 = arith.constant 0 : index
      %13 = vector.load %arg7[%c0_11, %c0_12] : memref<16x256xf32, #tpu.memory_space<vmem>>, vector<16x256xf32>
      tpu.vector_store %arg7[%c0_11, %c0_12], %12 {strides = array<i32>} : memref<16x256xf32, #tpu.memory_space<vmem>>, vector<16x256xf32>,
    } else {
    }
    %c0 = arith.constant 0 : index
    %c0_1 = arith.constant 0 : index
    %3 = vector.load %arg7[%c0, %c0_1] : memref<16x256xf32, #tpu.memory_space<vmem>>, vector<16x256xf32>
    %c0_2 = arith.constant 0 : index
    %c0_3 = arith.constant 0 : index
    %4 = vector.load %arg3[%c0_2, %c0_3] : memref<16x128xbf16, #tpu.memory_space<vmem>>, vector<16x128xbf16>
    %c0_4 = arith.constant 0 : index
    %c0_5 = arith.constant 0 : index
    %5 = vector.load %arg4[%c0_4, %c0_5] : memref<128x256xbf16, #tpu.memory_space<vmem>>, vector<128x256xbf16>
    %cst = arith.constant dense<0.000000e+00> : vector<16x256xf32>
    %6 = tpu.matmul %4, %5, %cst {dimension_numbers = #tpu.dot_dimension_numbers<[1], [0], [0], [1], [0, 0, 1, 1], [], []>} : vector<16x128xbf16>, vector<128x256xbf16>, vector<16x256xf32> -> vector<16x256xf32>
    %7 = arith.addf %3, %6 : vector<16x256xf32>
    %c0_6 = arith.constant 0 : index
    %c0_7 = arith.constant 0 : index
    %8 = vector.load %arg7[%c0_6, %c0_7] : memref<16x256xf32, #tpu.memory_space<vmem>>, vector<16x256xf32>
    tpu.vector_store %arg7[%c0_6, %c0_7], %7 {strides = array<i32>} : memref<16x256xf32, #tpu.memory_space<vmem>>, vector<16x256xf32>,
    %c0_i32_8 = arith.constant 0 : i32
    %9 = arith.cmpi eq, %arg2, %c0_i32_8 : i32
    %10 = arith.extui %9 : i1 to i32
    %c0_i32_9 = arith.constant 0 : i32
    %11 = arith.cmpi ne, %10, %c0_i32_9 : i32
    scf.if %11 {
      %c0_10 = arith.constant 0 : index
      %c0_11 = arith.constant 0 : index
      %12 = vector.load %arg7[%c0_10, %c0_11] : memref<16x256xf32, #tpu.memory_space<vmem>>, vector<16x256xf32>
      %c0_12 = arith.constant 0 : index
      %c0_13 = arith.constant 0 : index
      %13 = vector.load %arg5[%c0_12, %c0_13] : memref<1x256xf32, #tpu.memory_space<vmem>>, vector<1x256xf32>
      %14 = vector.broadcast %13 : vector<1x256xf32> to vector<16x256xf32>
      %15 = arith.addf %12, %14 : vector<16x256xf32>
      %16 = arith.truncf %15 : vector<16x256xf32> to vector<16x256xbf16>
      %c0_14 = arith.constant 0 : index
      %c0_15 = arith.constant 0 : index
      %17 = vector.load %arg6[%c0_14, %c0_15] : memref<16x256xbf16, #tpu.memory_space<vmem>>, vector<16x256xbf16>
      tpu.vector_store %arg6[%c0_14, %c0_15], %16 {strides = array<i32>} : memref<16x256xbf16, #tpu.memory_space<vmem>>, vector<16x256xbf16>,
    } else {
    }
    return
  }
  func.func @transform_0(%arg0: i32, %arg1: i32, %arg2: i32) -> (i32, i32) {
    %c0_i32 = arith.constant 0 : i32
    return %arg0, %arg2 : i32, i32
  }
  func.func @transform_1(%arg0: i32, %arg1: i32, %arg2: i32) -> (i32, i32) {
    %c0_i32 = arith.constant 0 : i32
    return %arg2, %arg1 : i32, i32
  }
  func.func @transform_2(%arg0: i32, %arg1: i32, %arg2: i32) -> (i32, i32) {
    %c0_i32 = arith.constant 0 : i32
    %c0_i32_0 = arith.constant 0 : i32
    return %c0_i32, %arg1 : i32, i32
  }
  func.func @transform_3(%arg0: i32, %arg1: i32, %arg2: i32) -> (i32, i32) {
    %c0_i32 = arith.constant 0 : i32
    return %arg0, %arg1 : i32, i32
  }
}

module attributes {stable_mosaic.version = 11 : i64} {
  func.func @_gemm_res_kernel(%arg0: i32, %arg1: i32, %arg2: i32, %arg3: memref<16x384xbf16, #tpu.memory_space<vmem>>, %arg4: memref<384x256xbf16, #tpu.memory_space<vmem>>, %arg5: memref<1x256xf32, #tpu.memory_space<vmem>>, %arg6: memref<16x256xbf16, #tpu.memory_space<vmem>>, %arg7: memref<16x256xbf16, #tpu.memory_space<vmem>>, %arg8: memref<16x256xf32, #tpu.memory_space<vmem>>) attributes {dimension_semantics = [#tpu.dimension_semantics<parallel>, #tpu.dimension_semantics<parallel>, #tpu.dimension_semantics<arbitrary>], iteration_bounds = array<i64: 1, 1, 6>, scalar_prefetch = 0 : i64, scratch_operands = 1 : i64, tpu.core_type = #tpu.core_type<tc>, window_params = [{transform_indices = @transform_0, window_bounds = array<i64: 16, 384>}, {transform_indices = @transform_1, window_bounds = array<i64: 384, 256>}, {transform_indices = @transform_2, window_bounds = array<i64: 1, 256>}, {transform_indices = @transform_3, window_bounds = array<i64: 16, 256>}, {transform_indices = @transform_4, window_bounds = array<i64: 16, 256>}]} {
    %c0_i32 = arith.constant 0 : i32
    %0 = arith.cmpi eq, %arg2, %c0_i32 : i32
    %1 = arith.extui %0 : i1 to i32
    %c0_i32_0 = arith.constant 0 : i32
    %2 = arith.cmpi ne, %1, %c0_i32_0 : i32
    scf.if %2 {
      %cst_9 = arith.constant 0.000000e+00 : f32
      %12 = vector.broadcast %cst_9 : f32 to vector<16x256xf32>
      %c0_10 = arith.constant 0 : index
      %c0_11 = arith.constant 0 : index
      %13 = vector.load %arg8[%c0_10, %c0_11] : memref<16x256xf32, #tpu.memory_space<vmem>>, vector<16x256xf32>
      tpu.vector_store %arg8[%c0_10, %c0_11], %12 {strides = array<i32>} : memref<16x256xf32, #tpu.memory_space<vmem>>, vector<16x256xf32>,
    } else {
    }
    %c0 = arith.constant 0 : index
    %c0_1 = arith.constant 0 : index
    %3 = vector.load %arg8[%c0, %c0_1] : memref<16x256xf32, #tpu.memory_space<vmem>>, vector<16x256xf32>
    %c0_2 = arith.constant 0 : index
    %c0_3 = arith.constant 0 : index
    %4 = vector.load %arg3[%c0_2, %c0_3] : memref<16x384xbf16, #tpu.memory_space<vmem>>, vector<16x384xbf16>
    %c0_4 = arith.constant 0 : index
    %c0_5 = arith.constant 0 : index
    %5 = vector.load %arg4[%c0_4, %c0_5] : memref<384x256xbf16, #tpu.memory_space<vmem>>, vector<384x256xbf16>
    %cst = arith.constant dense<0.000000e+00> : vector<16x256xf32>
    %6 = tpu.matmul %4, %5, %cst {dimension_numbers = #tpu.dot_dimension_numbers<[1], [0], [0], [1], [0, 0, 1, 1], [], []>} : vector<16x384xbf16>, vector<384x256xbf16>, vector<16x256xf32> -> vector<16x256xf32>
    %7 = arith.addf %3, %6 : vector<16x256xf32>
    %c0_6 = arith.constant 0 : index
    %c0_7 = arith.constant 0 : index
    %8 = vector.load %arg8[%c0_6, %c0_7] : memref<16x256xf32, #tpu.memory_space<vmem>>, vector<16x256xf32>
    tpu.vector_store %arg8[%c0_6, %c0_7], %7 {strides = array<i32>} : memref<16x256xf32, #tpu.memory_space<vmem>>, vector<16x256xf32>,
    %c5_i32 = arith.constant 5 : i32
    %9 = arith.cmpi eq, %arg2, %c5_i32 : i32
    %10 = arith.extui %9 : i1 to i32
    %c0_i32_8 = arith.constant 0 : i32
    %11 = arith.cmpi ne, %10, %c0_i32_8 : i32
    scf.if %11 {
      %c0_9 = arith.constant 0 : index
      %c0_10 = arith.constant 0 : index
      %12 = vector.load %arg8[%c0_9, %c0_10] : memref<16x256xf32, #tpu.memory_space<vmem>>, vector<16x256xf32>
      %c0_11 = arith.constant 0 : index
      %c0_12 = arith.constant 0 : index
      %13 = vector.load %arg5[%c0_11, %c0_12] : memref<1x256xf32, #tpu.memory_space<vmem>>, vector<1x256xf32>
      %14 = vector.broadcast %13 : vector<1x256xf32> to vector<16x256xf32>
      %15 = arith.addf %12, %14 : vector<16x256xf32>
      %c0_13 = arith.constant 0 : index
      %c0_14 = arith.constant 0 : index
      %16 = vector.load %arg6[%c0_13, %c0_14] : memref<16x256xbf16, #tpu.memory_space<vmem>>, vector<16x256xbf16>
      %17 = arith.extf %16 : vector<16x256xbf16> to vector<16x256xf32>
      %18 = arith.addf %15, %17 : vector<16x256xf32>
      %cst_15 = arith.constant 0.000000e+00 : f32
      %19 = vector.broadcast %cst_15 : f32 to vector<16x256xf32>
      %20 = arith.maximumf %18, %19 : vector<16x256xf32>
      %21 = arith.truncf %20 : vector<16x256xf32> to vector<16x256xbf16>
      %c0_16 = arith.constant 0 : index
      %c0_17 = arith.constant 0 : index
      %22 = vector.load %arg7[%c0_16, %c0_17] : memref<16x256xbf16, #tpu.memory_space<vmem>>, vector<16x256xbf16>
      tpu.vector_store %arg7[%c0_16, %c0_17], %21 {strides = array<i32>} : memref<16x256xbf16, #tpu.memory_space<vmem>>, vector<16x256xbf16>,
    } else {
    }
    return
  }
  func.func @transform_0(%arg0: i32, %arg1: i32, %arg2: i32) -> (i32, i32) {
    %c0_i32 = arith.constant 0 : i32
    return %arg0, %arg2 : i32, i32
  }
  func.func @transform_1(%arg0: i32, %arg1: i32, %arg2: i32) -> (i32, i32) {
    %c0_i32 = arith.constant 0 : i32
    return %arg2, %arg1 : i32, i32
  }
  func.func @transform_2(%arg0: i32, %arg1: i32, %arg2: i32) -> (i32, i32) {
    %c0_i32 = arith.constant 0 : i32
    %c0_i32_0 = arith.constant 0 : i32
    return %c0_i32, %arg1 : i32, i32
  }
  func.func @transform_3(%arg0: i32, %arg1: i32, %arg2: i32) -> (i32, i32) {
    %c0_i32 = arith.constant 0 : i32
    return %arg0, %arg1 : i32, i32
  }
  func.func @transform_4(%arg0: i32, %arg1: i32, %arg2: i32) -> (i32, i32) {
    %c0_i32 = arith.constant 0 : i32
    return %arg0, %arg1 : i32, i32
  }
}

module attributes {stable_mosaic.version = 11 : i64} {
  func.func @_gemm_kernel(%arg0: i32, %arg1: i32, %arg2: i32, %arg3: memref<16x384xbf16, #tpu.memory_space<vmem>>, %arg4: memref<384x256xbf16, #tpu.memory_space<vmem>>, %arg5: memref<1x256xf32, #tpu.memory_space<vmem>>, %arg6: memref<16x256xbf16, #tpu.memory_space<vmem>>, %arg7: memref<16x256xf32, #tpu.memory_space<vmem>>) attributes {dimension_semantics = [#tpu.dimension_semantics<parallel>, #tpu.dimension_semantics<parallel>, #tpu.dimension_semantics<arbitrary>], iteration_bounds = array<i64: 1, 1, 6>, scalar_prefetch = 0 : i64, scratch_operands = 1 : i64, tpu.core_type = #tpu.core_type<tc>, window_params = [{transform_indices = @transform_0, window_bounds = array<i64: 16, 384>}, {transform_indices = @transform_1, window_bounds = array<i64: 384, 256>}, {transform_indices = @transform_2, window_bounds = array<i64: 1, 256>}, {transform_indices = @transform_3, window_bounds = array<i64: 16, 256>}]} {
    %c0_i32 = arith.constant 0 : i32
    %0 = arith.cmpi eq, %arg2, %c0_i32 : i32
    %1 = arith.extui %0 : i1 to i32
    %c0_i32_0 = arith.constant 0 : i32
    %2 = arith.cmpi ne, %1, %c0_i32_0 : i32
    scf.if %2 {
      %cst_9 = arith.constant 0.000000e+00 : f32
      %12 = vector.broadcast %cst_9 : f32 to vector<16x256xf32>
      %c0_10 = arith.constant 0 : index
      %c0_11 = arith.constant 0 : index
      %13 = vector.load %arg7[%c0_10, %c0_11] : memref<16x256xf32, #tpu.memory_space<vmem>>, vector<16x256xf32>
      tpu.vector_store %arg7[%c0_10, %c0_11], %12 {strides = array<i32>} : memref<16x256xf32, #tpu.memory_space<vmem>>, vector<16x256xf32>,
    } else {
    }
    %c0 = arith.constant 0 : index
    %c0_1 = arith.constant 0 : index
    %3 = vector.load %arg7[%c0, %c0_1] : memref<16x256xf32, #tpu.memory_space<vmem>>, vector<16x256xf32>
    %c0_2 = arith.constant 0 : index
    %c0_3 = arith.constant 0 : index
    %4 = vector.load %arg3[%c0_2, %c0_3] : memref<16x384xbf16, #tpu.memory_space<vmem>>, vector<16x384xbf16>
    %c0_4 = arith.constant 0 : index
    %c0_5 = arith.constant 0 : index
    %5 = vector.load %arg4[%c0_4, %c0_5] : memref<384x256xbf16, #tpu.memory_space<vmem>>, vector<384x256xbf16>
    %cst = arith.constant dense<0.000000e+00> : vector<16x256xf32>
    %6 = tpu.matmul %4, %5, %cst {dimension_numbers = #tpu.dot_dimension_numbers<[1], [0], [0], [1], [0, 0, 1, 1], [], []>} : vector<16x384xbf16>, vector<384x256xbf16>, vector<16x256xf32> -> vector<16x256xf32>
    %7 = arith.addf %3, %6 : vector<16x256xf32>
    %c0_6 = arith.constant 0 : index
    %c0_7 = arith.constant 0 : index
    %8 = vector.load %arg7[%c0_6, %c0_7] : memref<16x256xf32, #tpu.memory_space<vmem>>, vector<16x256xf32>
    tpu.vector_store %arg7[%c0_6, %c0_7], %7 {strides = array<i32>} : memref<16x256xf32, #tpu.memory_space<vmem>>, vector<16x256xf32>,
    %c5_i32 = arith.constant 5 : i32
    %9 = arith.cmpi eq, %arg2, %c5_i32 : i32
    %10 = arith.extui %9 : i1 to i32
    %c0_i32_8 = arith.constant 0 : i32
    %11 = arith.cmpi ne, %10, %c0_i32_8 : i32
    scf.if %11 {
      %c0_9 = arith.constant 0 : index
      %c0_10 = arith.constant 0 : index
      %12 = vector.load %arg7[%c0_9, %c0_10] : memref<16x256xf32, #tpu.memory_space<vmem>>, vector<16x256xf32>
      %c0_11 = arith.constant 0 : index
      %c0_12 = arith.constant 0 : index
      %13 = vector.load %arg5[%c0_11, %c0_12] : memref<1x256xf32, #tpu.memory_space<vmem>>, vector<1x256xf32>
      %14 = vector.broadcast %13 : vector<1x256xf32> to vector<16x256xf32>
      %15 = arith.addf %12, %14 : vector<16x256xf32>
      %cst_13 = arith.constant 0.000000e+00 : f32
      %16 = vector.broadcast %cst_13 : f32 to vector<16x256xf32>
      %17 = arith.maximumf %15, %16 : vector<16x256xf32>
      %18 = arith.truncf %17 : vector<16x256xf32> to vector<16x256xbf16>
      %c0_14 = arith.constant 0 : index
      %c0_15 = arith.constant 0 : index
      %19 = vector.load %arg6[%c0_14, %c0_15] : memref<16x256xbf16, #tpu.memory_space<vmem>>, vector<16x256xbf16>
      tpu.vector_store %arg6[%c0_14, %c0_15], %18 {strides = array<i32>} : memref<16x256xbf16, #tpu.memory_space<vmem>>, vector<16x256xbf16>,
    } else {
    }
    return
  }
  func.func @transform_0(%arg0: i32, %arg1: i32, %arg2: i32) -> (i32, i32) {
    %c0_i32 = arith.constant 0 : i32
    return %arg0, %arg2 : i32, i32
  }
  func.func @transform_1(%arg0: i32, %arg1: i32, %arg2: i32) -> (i32, i32) {
    %c0_i32 = arith.constant 0 : i32
    return %arg2, %arg1 : i32, i32
  }
  func.func @transform_2(%arg0: i32, %arg1: i32, %arg2: i32) -> (i32, i32) {
    %c0_i32 = arith.constant 0 : i32
    %c0_i32_0 = arith.constant 0 : i32
    return %c0_i32, %arg1 : i32, i32
  }
  func.func @transform_3(%arg0: i32, %arg1: i32, %arg2: i32) -> (i32, i32) {
    %c0_i32 = arith.constant 0 : i32
    return %arg0, %arg1 : i32, i32
  }
}

module attributes {stable_mosaic.version = 11 : i64} {
  func.func @_gemm_kernel(%arg0: i32, %arg1: i32, %arg2: i32, %arg3: memref<16x384xbf16, #tpu.memory_space<vmem>>, %arg4: memref<384x256xbf16, #tpu.memory_space<vmem>>, %arg5: memref<1x256xf32, #tpu.memory_space<vmem>>, %arg6: memref<16x256xbf16, #tpu.memory_space<vmem>>, %arg7: memref<16x256xf32, #tpu.memory_space<vmem>>) attributes {dimension_semantics = [#tpu.dimension_semantics<parallel>, #tpu.dimension_semantics<parallel>, #tpu.dimension_semantics<arbitrary>], iteration_bounds = array<i64: 1, 2, 6>, scalar_prefetch = 0 : i64, scratch_operands = 1 : i64, tpu.core_type = #tpu.core_type<tc>, window_params = [{transform_indices = @transform_0, window_bounds = array<i64: 16, 384>}, {transform_indices = @transform_1, window_bounds = array<i64: 384, 256>}, {transform_indices = @transform_2, window_bounds = array<i64: 1, 256>}, {transform_indices = @transform_3, window_bounds = array<i64: 16, 256>}]} {
    %c0_i32 = arith.constant 0 : i32
    %0 = arith.cmpi eq, %arg2, %c0_i32 : i32
    %1 = arith.extui %0 : i1 to i32
    %c0_i32_0 = arith.constant 0 : i32
    %2 = arith.cmpi ne, %1, %c0_i32_0 : i32
    scf.if %2 {
      %cst_9 = arith.constant 0.000000e+00 : f32
      %12 = vector.broadcast %cst_9 : f32 to vector<16x256xf32>
      %c0_10 = arith.constant 0 : index
      %c0_11 = arith.constant 0 : index
      %13 = vector.load %arg7[%c0_10, %c0_11] : memref<16x256xf32, #tpu.memory_space<vmem>>, vector<16x256xf32>
      tpu.vector_store %arg7[%c0_10, %c0_11], %12 {strides = array<i32>} : memref<16x256xf32, #tpu.memory_space<vmem>>, vector<16x256xf32>,
    } else {
    }
    %c0 = arith.constant 0 : index
    %c0_1 = arith.constant 0 : index
    %3 = vector.load %arg7[%c0, %c0_1] : memref<16x256xf32, #tpu.memory_space<vmem>>, vector<16x256xf32>
    %c0_2 = arith.constant 0 : index
    %c0_3 = arith.constant 0 : index
    %4 = vector.load %arg3[%c0_2, %c0_3] : memref<16x384xbf16, #tpu.memory_space<vmem>>, vector<16x384xbf16>
    %c0_4 = arith.constant 0 : index
    %c0_5 = arith.constant 0 : index
    %5 = vector.load %arg4[%c0_4, %c0_5] : memref<384x256xbf16, #tpu.memory_space<vmem>>, vector<384x256xbf16>
    %cst = arith.constant dense<0.000000e+00> : vector<16x256xf32>
    %6 = tpu.matmul %4, %5, %cst {dimension_numbers = #tpu.dot_dimension_numbers<[1], [0], [0], [1], [0, 0, 1, 1], [], []>} : vector<16x384xbf16>, vector<384x256xbf16>, vector<16x256xf32> -> vector<16x256xf32>
    %7 = arith.addf %3, %6 : vector<16x256xf32>
    %c0_6 = arith.constant 0 : index
    %c0_7 = arith.constant 0 : index
    %8 = vector.load %arg7[%c0_6, %c0_7] : memref<16x256xf32, #tpu.memory_space<vmem>>, vector<16x256xf32>
    tpu.vector_store %arg7[%c0_6, %c0_7], %7 {strides = array<i32>} : memref<16x256xf32, #tpu.memory_space<vmem>>, vector<16x256xf32>,
    %c5_i32 = arith.constant 5 : i32
    %9 = arith.cmpi eq, %arg2, %c5_i32 : i32
    %10 = arith.extui %9 : i1 to i32
    %c0_i32_8 = arith.constant 0 : i32
    %11 = arith.cmpi ne, %10, %c0_i32_8 : i32
    scf.if %11 {
      %c0_9 = arith.constant 0 : index
      %c0_10 = arith.constant 0 : index
      %12 = vector.load %arg7[%c0_9, %c0_10] : memref<16x256xf32, #tpu.memory_space<vmem>>, vector<16x256xf32>
      %c0_11 = arith.constant 0 : index
      %c0_12 = arith.constant 0 : index
      %13 = vector.load %arg5[%c0_11, %c0_12] : memref<1x256xf32, #tpu.memory_space<vmem>>, vector<1x256xf32>
      %14 = vector.broadcast %13 : vector<1x256xf32> to vector<16x256xf32>
      %15 = arith.addf %12, %14 : vector<16x256xf32>
      %cst_13 = arith.constant 0.000000e+00 : f32
      %16 = vector.broadcast %cst_13 : f32 to vector<16x256xf32>
      %17 = arith.maximumf %15, %16 : vector<16x256xf32>
      %18 = arith.truncf %17 : vector<16x256xf32> to vector<16x256xbf16>
      %c0_14 = arith.constant 0 : index
      %c0_15 = arith.constant 0 : index
      %19 = vector.load %arg6[%c0_14, %c0_15] : memref<16x256xbf16, #tpu.memory_space<vmem>>, vector<16x256xbf16>
      tpu.vector_store %arg6[%c0_14, %c0_15], %18 {strides = array<i32>} : memref<16x256xbf16, #tpu.memory_space<vmem>>, vector<16x256xbf16>,
    } else {
    }
    return
  }
  func.func @transform_0(%arg0: i32, %arg1: i32, %arg2: i32) -> (i32, i32) {
    %c0_i32 = arith.constant 0 : i32
    return %arg0, %arg2 : i32, i32
  }
  func.func @transform_1(%arg0: i32, %arg1: i32, %arg2: i32) -> (i32, i32) {
    %c0_i32 = arith.constant 0 : i32
    return %arg2, %arg1 : i32, i32
  }
  func.func @transform_2(%arg0: i32, %arg1: i32, %arg2: i32) -> (i32, i32) {
    %c0_i32 = arith.constant 0 : i32
    %c0_i32_0 = arith.constant 0 : i32
    return %c0_i32, %arg1 : i32, i32
  }
  func.func @transform_3(%arg0: i32, %arg1: i32, %arg2: i32) -> (i32, i32) {
    %c0_i32 = arith.constant 0 : i32
    return %arg0, %arg1 : i32, i32
  }
}

module attributes {stable_mosaic.version = 11 : i64} {
  func.func @_gemm_kernel(%arg0: i32, %arg1: i32, %arg2: i32, %arg3: memref<16x256xbf16, #tpu.memory_space<vmem>>, %arg4: memref<256x256xbf16, #tpu.memory_space<vmem>>, %arg5: memref<1x256xf32, #tpu.memory_space<vmem>>, %arg6: memref<16x256xbf16, #tpu.memory_space<vmem>>, %arg7: memref<16x256xf32, #tpu.memory_space<vmem>>) attributes {dimension_semantics = [#tpu.dimension_semantics<parallel>, #tpu.dimension_semantics<parallel>, #tpu.dimension_semantics<arbitrary>], iteration_bounds = array<i64: 1, 2, 1>, scalar_prefetch = 0 : i64, scratch_operands = 1 : i64, tpu.core_type = #tpu.core_type<tc>, window_params = [{transform_indices = @transform_0, window_bounds = array<i64: 16, 256>}, {transform_indices = @transform_1, window_bounds = array<i64: 256, 256>}, {transform_indices = @transform_2, window_bounds = array<i64: 1, 256>}, {transform_indices = @transform_3, window_bounds = array<i64: 16, 256>}]} {
    %c0_i32 = arith.constant 0 : i32
    %0 = arith.cmpi eq, %arg2, %c0_i32 : i32
    %1 = arith.extui %0 : i1 to i32
    %c0_i32_0 = arith.constant 0 : i32
    %2 = arith.cmpi ne, %1, %c0_i32_0 : i32
    scf.if %2 {
      %cst_10 = arith.constant 0.000000e+00 : f32
      %12 = vector.broadcast %cst_10 : f32 to vector<16x256xf32>
      %c0_11 = arith.constant 0 : index
      %c0_12 = arith.constant 0 : index
      %13 = vector.load %arg7[%c0_11, %c0_12] : memref<16x256xf32, #tpu.memory_space<vmem>>, vector<16x256xf32>
      tpu.vector_store %arg7[%c0_11, %c0_12], %12 {strides = array<i32>} : memref<16x256xf32, #tpu.memory_space<vmem>>, vector<16x256xf32>,
    } else {
    }
    %c0 = arith.constant 0 : index
    %c0_1 = arith.constant 0 : index
    %3 = vector.load %arg7[%c0, %c0_1] : memref<16x256xf32, #tpu.memory_space<vmem>>, vector<16x256xf32>
    %c0_2 = arith.constant 0 : index
    %c0_3 = arith.constant 0 : index
    %4 = vector.load %arg3[%c0_2, %c0_3] : memref<16x256xbf16, #tpu.memory_space<vmem>>, vector<16x256xbf16>
    %c0_4 = arith.constant 0 : index
    %c0_5 = arith.constant 0 : index
    %5 = vector.load %arg4[%c0_4, %c0_5] : memref<256x256xbf16, #tpu.memory_space<vmem>>, vector<256x256xbf16>
    %cst = arith.constant dense<0.000000e+00> : vector<16x256xf32>
    %6 = tpu.matmul %4, %5, %cst {dimension_numbers = #tpu.dot_dimension_numbers<[1], [0], [0], [1], [0, 0, 1, 1], [], []>} : vector<16x256xbf16>, vector<256x256xbf16>, vector<16x256xf32> -> vector<16x256xf32>
    %7 = arith.addf %3, %6 : vector<16x256xf32>
    %c0_6 = arith.constant 0 : index
    %c0_7 = arith.constant 0 : index
    %8 = vector.load %arg7[%c0_6, %c0_7] : memref<16x256xf32, #tpu.memory_space<vmem>>, vector<16x256xf32>
    tpu.vector_store %arg7[%c0_6, %c0_7], %7 {strides = array<i32>} : memref<16x256xf32, #tpu.memory_space<vmem>>, vector<16x256xf32>,
    %c0_i32_8 = arith.constant 0 : i32
    %9 = arith.cmpi eq, %arg2, %c0_i32_8 : i32
    %10 = arith.extui %9 : i1 to i32
    %c0_i32_9 = arith.constant 0 : i32
    %11 = arith.cmpi ne, %10, %c0_i32_9 : i32
    scf.if %11 {
      %c0_10 = arith.constant 0 : index
      %c0_11 = arith.constant 0 : index
      %12 = vector.load %arg7[%c0_10, %c0_11] : memref<16x256xf32, #tpu.memory_space<vmem>>, vector<16x256xf32>
      %c0_12 = arith.constant 0 : index
      %c0_13 = arith.constant 0 : index
      %13 = vector.load %arg5[%c0_12, %c0_13] : memref<1x256xf32, #tpu.memory_space<vmem>>, vector<1x256xf32>
      %14 = vector.broadcast %13 : vector<1x256xf32> to vector<16x256xf32>
      %15 = arith.addf %12, %14 : vector<16x256xf32>
      %16 = arith.truncf %15 : vector<16x256xf32> to vector<16x256xbf16>
      %c0_14 = arith.constant 0 : index
      %c0_15 = arith.constant 0 : index
      %17 = vector.load %arg6[%c0_14, %c0_15] : memref<16x256xbf16, #tpu.memory_space<vmem>>, vector<16x256xbf16>
      tpu.vector_store %arg6[%c0_14, %c0_15], %16 {strides = array<i32>} : memref<16x256xbf16, #tpu.memory_space<vmem>>, vector<16x256xbf16>,
    } else {
    }
    return
  }
  func.func @transform_0(%arg0: i32, %arg1: i32, %arg2: i32) -> (i32, i32) {
    %c0_i32 = arith.constant 0 : i32
    return %arg0, %arg2 : i32, i32
  }
  func.func @transform_1(%arg0: i32, %arg1: i32, %arg2: i32) -> (i32, i32) {
    %c0_i32 = arith.constant 0 : i32
    return %arg2, %arg1 : i32, i32
  }
  func.func @transform_2(%arg0: i32, %arg1: i32, %arg2: i32) -> (i32, i32) {
    %c0_i32 = arith.constant 0 : i32
    %c0_i32_0 = arith.constant 0 : i32
    return %c0_i32, %arg1 : i32, i32
  }
  func.func @transform_3(%arg0: i32, %arg1: i32, %arg2: i32) -> (i32, i32) {
    %c0_i32 = arith.constant 0 : i32
    return %arg0, %arg1 : i32, i32
  }
}

module attributes {stable_mosaic.version = 11 : i64} {
  func.func @_gemm_res_kernel(%arg0: i32, %arg1: i32, %arg2: i32, %arg3: memref<16x512xbf16, #tpu.memory_space<vmem>>, %arg4: memref<512x256xbf16, #tpu.memory_space<vmem>>, %arg5: memref<1x256xf32, #tpu.memory_space<vmem>>, %arg6: memref<16x256xbf16, #tpu.memory_space<vmem>>, %arg7: memref<16x256xbf16, #tpu.memory_space<vmem>>, %arg8: memref<16x256xf32, #tpu.memory_space<vmem>>) attributes {dimension_semantics = [#tpu.dimension_semantics<parallel>, #tpu.dimension_semantics<parallel>, #tpu.dimension_semantics<arbitrary>], iteration_bounds = array<i64: 1, 2, 9>, scalar_prefetch = 0 : i64, scratch_operands = 1 : i64, tpu.core_type = #tpu.core_type<tc>, window_params = [{transform_indices = @transform_0, window_bounds = array<i64: 16, 512>}, {transform_indices = @transform_1, window_bounds = array<i64: 512, 256>}, {transform_indices = @transform_2, window_bounds = array<i64: 1, 256>}, {transform_indices = @transform_3, window_bounds = array<i64: 16, 256>}, {transform_indices = @transform_4, window_bounds = array<i64: 16, 256>}]} {
    %c0_i32 = arith.constant 0 : i32
    %0 = arith.cmpi eq, %arg2, %c0_i32 : i32
    %1 = arith.extui %0 : i1 to i32
    %c0_i32_0 = arith.constant 0 : i32
    %2 = arith.cmpi ne, %1, %c0_i32_0 : i32
    scf.if %2 {
      %cst_9 = arith.constant 0.000000e+00 : f32
      %12 = vector.broadcast %cst_9 : f32 to vector<16x256xf32>
      %c0_10 = arith.constant 0 : index
      %c0_11 = arith.constant 0 : index
      %13 = vector.load %arg8[%c0_10, %c0_11] : memref<16x256xf32, #tpu.memory_space<vmem>>, vector<16x256xf32>
      tpu.vector_store %arg8[%c0_10, %c0_11], %12 {strides = array<i32>} : memref<16x256xf32, #tpu.memory_space<vmem>>, vector<16x256xf32>,
    } else {
    }
    %c0 = arith.constant 0 : index
    %c0_1 = arith.constant 0 : index
    %3 = vector.load %arg8[%c0, %c0_1] : memref<16x256xf32, #tpu.memory_space<vmem>>, vector<16x256xf32>
    %c0_2 = arith.constant 0 : index
    %c0_3 = arith.constant 0 : index
    %4 = vector.load %arg3[%c0_2, %c0_3] : memref<16x512xbf16, #tpu.memory_space<vmem>>, vector<16x512xbf16>
    %c0_4 = arith.constant 0 : index
    %c0_5 = arith.constant 0 : index
    %5 = vector.load %arg4[%c0_4, %c0_5] : memref<512x256xbf16, #tpu.memory_space<vmem>>, vector<512x256xbf16>
    %cst = arith.constant dense<0.000000e+00> : vector<16x256xf32>
    %6 = tpu.matmul %4, %5, %cst {dimension_numbers = #tpu.dot_dimension_numbers<[1], [0], [0], [1], [0, 0, 1, 1], [], []>} : vector<16x512xbf16>, vector<512x256xbf16>, vector<16x256xf32> -> vector<16x256xf32>
    %7 = arith.addf %3, %6 : vector<16x256xf32>
    %c0_6 = arith.constant 0 : index
    %c0_7 = arith.constant 0 : index
    %8 = vector.load %arg8[%c0_6, %c0_7] : memref<16x256xf32, #tpu.memory_space<vmem>>, vector<16x256xf32>
    tpu.vector_store %arg8[%c0_6, %c0_7], %7 {strides = array<i32>} : memref<16x256xf32, #tpu.memory_space<vmem>>, vector<16x256xf32>,
    %c8_i32 = arith.constant 8 : i32
    %9 = arith.cmpi eq, %arg2, %c8_i32 : i32
    %10 = arith.extui %9 : i1 to i32
    %c0_i32_8 = arith.constant 0 : i32
    %11 = arith.cmpi ne, %10, %c0_i32_8 : i32
    scf.if %11 {
      %c0_9 = arith.constant 0 : index
      %c0_10 = arith.constant 0 : index
      %12 = vector.load %arg8[%c0_9, %c0_10] : memref<16x256xf32, #tpu.memory_space<vmem>>, vector<16x256xf32>
      %c0_11 = arith.constant 0 : index
      %c0_12 = arith.constant 0 : index
      %13 = vector.load %arg5[%c0_11, %c0_12] : memref<1x256xf32, #tpu.memory_space<vmem>>, vector<1x256xf32>
      %14 = vector.broadcast %13 : vector<1x256xf32> to vector<16x256xf32>
      %15 = arith.addf %12, %14 : vector<16x256xf32>
      %c0_13 = arith.constant 0 : index
      %c0_14 = arith.constant 0 : index
      %16 = vector.load %arg6[%c0_13, %c0_14] : memref<16x256xbf16, #tpu.memory_space<vmem>>, vector<16x256xbf16>
      %17 = arith.extf %16 : vector<16x256xbf16> to vector<16x256xf32>
      %18 = arith.addf %15, %17 : vector<16x256xf32>
      %cst_15 = arith.constant 0.000000e+00 : f32
      %19 = vector.broadcast %cst_15 : f32 to vector<16x256xf32>
      %20 = arith.maximumf %18, %19 : vector<16x256xf32>
      %21 = arith.truncf %20 : vector<16x256xf32> to vector<16x256xbf16>
      %c0_16 = arith.constant 0 : index
      %c0_17 = arith.constant 0 : index
      %22 = vector.load %arg7[%c0_16, %c0_17] : memref<16x256xbf16, #tpu.memory_space<vmem>>, vector<16x256xbf16>
      tpu.vector_store %arg7[%c0_16, %c0_17], %21 {strides = array<i32>} : memref<16x256xbf16, #tpu.memory_space<vmem>>, vector<16x256xbf16>,
    } else {
    }
    return
  }
  func.func @transform_0(%arg0: i32, %arg1: i32, %arg2: i32) -> (i32, i32) {
    %c0_i32 = arith.constant 0 : i32
    return %arg0, %arg2 : i32, i32
  }
  func.func @transform_1(%arg0: i32, %arg1: i32, %arg2: i32) -> (i32, i32) {
    %c0_i32 = arith.constant 0 : i32
    return %arg2, %arg1 : i32, i32
  }
  func.func @transform_2(%arg0: i32, %arg1: i32, %arg2: i32) -> (i32, i32) {
    %c0_i32 = arith.constant 0 : i32
    %c0_i32_0 = arith.constant 0 : i32
    return %c0_i32, %arg1 : i32, i32
  }
  func.func @transform_3(%arg0: i32, %arg1: i32, %arg2: i32) -> (i32, i32) {
    %c0_i32 = arith.constant 0 : i32
    return %arg0, %arg1 : i32, i32
  }
  func.func @transform_4(%arg0: i32, %arg1: i32, %arg2: i32) -> (i32, i32) {
    %c0_i32 = arith.constant 0 : i32
    return %arg0, %arg1 : i32, i32
  }
}

module attributes {stable_mosaic.version = 11 : i64} {
  func.func @_gemm_kernel(%arg0: i32, %arg1: i32, %arg2: i32, %arg3: memref<16x512xbf16, #tpu.memory_space<vmem>>, %arg4: memref<512x256xbf16, #tpu.memory_space<vmem>>, %arg5: memref<1x256xf32, #tpu.memory_space<vmem>>, %arg6: memref<16x256xbf16, #tpu.memory_space<vmem>>, %arg7: memref<16x256xf32, #tpu.memory_space<vmem>>) attributes {dimension_semantics = [#tpu.dimension_semantics<parallel>, #tpu.dimension_semantics<parallel>, #tpu.dimension_semantics<arbitrary>], iteration_bounds = array<i64: 1, 2, 9>, scalar_prefetch = 0 : i64, scratch_operands = 1 : i64, tpu.core_type = #tpu.core_type<tc>, window_params = [{transform_indices = @transform_0, window_bounds = array<i64: 16, 512>}, {transform_indices = @transform_1, window_bounds = array<i64: 512, 256>}, {transform_indices = @transform_2, window_bounds = array<i64: 1, 256>}, {transform_indices = @transform_3, window_bounds = array<i64: 16, 256>}]} {
    %c0_i32 = arith.constant 0 : i32
    %0 = arith.cmpi eq, %arg2, %c0_i32 : i32
    %1 = arith.extui %0 : i1 to i32
    %c0_i32_0 = arith.constant 0 : i32
    %2 = arith.cmpi ne, %1, %c0_i32_0 : i32
    scf.if %2 {
      %cst_9 = arith.constant 0.000000e+00 : f32
      %12 = vector.broadcast %cst_9 : f32 to vector<16x256xf32>
      %c0_10 = arith.constant 0 : index
      %c0_11 = arith.constant 0 : index
      %13 = vector.load %arg7[%c0_10, %c0_11] : memref<16x256xf32, #tpu.memory_space<vmem>>, vector<16x256xf32>
      tpu.vector_store %arg7[%c0_10, %c0_11], %12 {strides = array<i32>} : memref<16x256xf32, #tpu.memory_space<vmem>>, vector<16x256xf32>,
    } else {
    }
    %c0 = arith.constant 0 : index
    %c0_1 = arith.constant 0 : index
    %3 = vector.load %arg7[%c0, %c0_1] : memref<16x256xf32, #tpu.memory_space<vmem>>, vector<16x256xf32>
    %c0_2 = arith.constant 0 : index
    %c0_3 = arith.constant 0 : index
    %4 = vector.load %arg3[%c0_2, %c0_3] : memref<16x512xbf16, #tpu.memory_space<vmem>>, vector<16x512xbf16>
    %c0_4 = arith.constant 0 : index
    %c0_5 = arith.constant 0 : index
    %5 = vector.load %arg4[%c0_4, %c0_5] : memref<512x256xbf16, #tpu.memory_space<vmem>>, vector<512x256xbf16>
    %cst = arith.constant dense<0.000000e+00> : vector<16x256xf32>
    %6 = tpu.matmul %4, %5, %cst {dimension_numbers = #tpu.dot_dimension_numbers<[1], [0], [0], [1], [0, 0, 1, 1], [], []>} : vector<16x512xbf16>, vector<512x256xbf16>, vector<16x256xf32> -> vector<16x256xf32>
    %7 = arith.addf %3, %6 : vector<16x256xf32>
    %c0_6 = arith.constant 0 : index
    %c0_7 = arith.constant 0 : index
    %8 = vector.load %arg7[%c0_6, %c0_7] : memref<16x256xf32, #tpu.memory_space<vmem>>, vector<16x256xf32>
    tpu.vector_store %arg7[%c0_6, %c0_7], %7 {strides = array<i32>} : memref<16x256xf32, #tpu.memory_space<vmem>>, vector<16x256xf32>,
    %c8_i32 = arith.constant 8 : i32
    %9 = arith.cmpi eq, %arg2, %c8_i32 : i32
    %10 = arith.extui %9 : i1 to i32
    %c0_i32_8 = arith.constant 0 : i32
    %11 = arith.cmpi ne, %10, %c0_i32_8 : i32
    scf.if %11 {
      %c0_9 = arith.constant 0 : index
      %c0_10 = arith.constant 0 : index
      %12 = vector.load %arg7[%c0_9, %c0_10] : memref<16x256xf32, #tpu.memory_space<vmem>>, vector<16x256xf32>
      %c0_11 = arith.constant 0 : index
      %c0_12 = arith.constant 0 : index
      %13 = vector.load %arg5[%c0_11, %c0_12] : memref<1x256xf32, #tpu.memory_space<vmem>>, vector<1x256xf32>
      %14 = vector.broadcast %13 : vector<1x256xf32> to vector<16x256xf32>
      %15 = arith.addf %12, %14 : vector<16x256xf32>
      %cst_13 = arith.constant 0.000000e+00 : f32
      %16 = vector.broadcast %cst_13 : f32 to vector<16x256xf32>
      %17 = arith.maximumf %15, %16 : vector<16x256xf32>
      %18 = arith.truncf %17 : vector<16x256xf32> to vector<16x256xbf16>
      %c0_14 = arith.constant 0 : index
      %c0_15 = arith.constant 0 : index
      %19 = vector.load %arg6[%c0_14, %c0_15] : memref<16x256xbf16, #tpu.memory_space<vmem>>, vector<16x256xbf16>
      tpu.vector_store %arg6[%c0_14, %c0_15], %18 {strides = array<i32>} : memref<16x256xbf16, #tpu.memory_space<vmem>>, vector<16x256xbf16>,
    } else {
    }
    return
  }
  func.func @transform_0(%arg0: i32, %arg1: i32, %arg2: i32) -> (i32, i32) {
    %c0_i32 = arith.constant 0 : i32
    return %arg0, %arg2 : i32, i32
  }
  func.func @transform_1(%arg0: i32, %arg1: i32, %arg2: i32) -> (i32, i32) {
    %c0_i32 = arith.constant 0 : i32
    return %arg2, %arg1 : i32, i32
  }
  func.func @transform_2(%arg0: i32, %arg1: i32, %arg2: i32) -> (i32, i32) {
    %c0_i32 = arith.constant 0 : i32
    %c0_i32_0 = arith.constant 0 : i32
    return %c0_i32, %arg1 : i32, i32
  }
  func.func @transform_3(%arg0: i32, %arg1: i32, %arg2: i32) -> (i32, i32) {
    %c0_i32 = arith.constant 0 : i32
    return %arg0, %arg1 : i32, i32
  }
}

module attributes {stable_mosaic.version = 11 : i64} {
  func.func @_avgpool_kernel(%arg0: i32, %arg1: memref<2x1x512xbf16, #tpu.memory_space<vmem>>, %arg2: memref<2x512xf32, #tpu.memory_space<vmem>>) attributes {dimension_semantics = [#tpu.dimension_semantics<parallel>], iteration_bounds = array<i64: 1>, scalar_prefetch = 0 : i64, scratch_operands = 0 : i64, tpu.core_type = #tpu.core_type<tc>, window_params = [{transform_indices = @transform_0, window_bounds = array<i64: 2, 1, 512>}, {transform_indices = @transform_1, window_bounds = array<i64: 2, 512>}]} {
    %c0 = arith.constant 0 : index
    %c0_0 = arith.constant 0 : index
    %c0_1 = arith.constant 0 : index
    %0 = vector.load %arg1[%c0, %c0_0, %c0_1] : memref<2x1x512xbf16, #tpu.memory_space<vmem>>, vector<2x1x512xbf16>
    %1 = arith.extf %0 : vector<2x1x512xbf16> to vector<2x1x512xf32>
    %cst = arith.constant dense<0.000000e+00> : vector<2x512xf32>
    %2 = vector.multi_reduction <add>, %1, %cst [1] : vector<2x1x512xf32> to vector<2x512xf32>
    %cst_2 = arith.constant 1.000000e+00 : f32
    %3 = vector.broadcast %cst_2 : f32 to vector<2x512xf32>
    %4 = arith.divf %2, %3 : vector<2x512xf32>
    %c0_3 = arith.constant 0 : index
    %c0_4 = arith.constant 0 : index
    %5 = vector.load %arg2[%c0_3, %c0_4] : memref<2x512xf32, #tpu.memory_space<vmem>>, vector<2x512xf32>
    tpu.vector_store %arg2[%c0_3, %c0_4], %4 {strides = array<i32>} : memref<2x512xf32, #tpu.memory_space<vmem>>, vector<2x512xf32>,
    return
  }
  func.func @transform_0(%arg0: i32) -> (i32, i32, i32) {
    %c0_i32 = arith.constant 0 : i32
    %c0_i32_0 = arith.constant 0 : i32
    %c0_i32_1 = arith.constant 0 : i32
    return %arg0, %c0_i32, %c0_i32_0 : i32, i32, i32
  }
  func.func @transform_1(%arg0: i32) -> (i32, i32) {
    %c0_i32 = arith.constant 0 : i32
    %c0_i32_0 = arith.constant 0 : i32
    return %arg0, %c0_i32 : i32, i32
  }
}

module attributes {stable_mosaic.version = 11 : i64} {
  func.func @_gemm_kernel(%arg0: i32, %arg1: i32, %arg2: i32, %arg3: memref<16x512xbf16, #tpu.memory_space<vmem>>, %arg4: memref<512x256xbf16, #tpu.memory_space<vmem>>, %arg5: memref<1x256xf32, #tpu.memory_space<vmem>>, %arg6: memref<16x256xf32, #tpu.memory_space<vmem>>, %arg7: memref<16x256xf32, #tpu.memory_space<vmem>>) attributes {dimension_semantics = [#tpu.dimension_semantics<parallel>, #tpu.dimension_semantics<parallel>, #tpu.dimension_semantics<arbitrary>], iteration_bounds = array<i64: 1, 4, 1>, scalar_prefetch = 0 : i64, scratch_operands = 1 : i64, tpu.core_type = #tpu.core_type<tc>, window_params = [{transform_indices = @transform_0, window_bounds = array<i64: 16, 512>}, {transform_indices = @transform_1, window_bounds = array<i64: 512, 256>}, {transform_indices = @transform_2, window_bounds = array<i64: 1, 256>}, {transform_indices = @transform_3, window_bounds = array<i64: 16, 256>}]} {
    %c0_i32 = arith.constant 0 : i32
    %0 = arith.cmpi eq, %arg2, %c0_i32 : i32
    %1 = arith.extui %0 : i1 to i32
    %c0_i32_0 = arith.constant 0 : i32
    %2 = arith.cmpi ne, %1, %c0_i32_0 : i32
    scf.if %2 {
      %cst_10 = arith.constant 0.000000e+00 : f32
      %12 = vector.broadcast %cst_10 : f32 to vector<16x256xf32>
      %c0_11 = arith.constant 0 : index
      %c0_12 = arith.constant 0 : index
      %13 = vector.load %arg7[%c0_11, %c0_12] : memref<16x256xf32, #tpu.memory_space<vmem>>, vector<16x256xf32>
      tpu.vector_store %arg7[%c0_11, %c0_12], %12 {strides = array<i32>} : memref<16x256xf32, #tpu.memory_space<vmem>>, vector<16x256xf32>,
    } else {
    }
    %c0 = arith.constant 0 : index
    %c0_1 = arith.constant 0 : index
    %3 = vector.load %arg7[%c0, %c0_1] : memref<16x256xf32, #tpu.memory_space<vmem>>, vector<16x256xf32>
    %c0_2 = arith.constant 0 : index
    %c0_3 = arith.constant 0 : index
    %4 = vector.load %arg3[%c0_2, %c0_3] : memref<16x512xbf16, #tpu.memory_space<vmem>>, vector<16x512xbf16>
    %c0_4 = arith.constant 0 : index
    %c0_5 = arith.constant 0 : index
    %5 = vector.load %arg4[%c0_4, %c0_5] : memref<512x256xbf16, #tpu.memory_space<vmem>>, vector<512x256xbf16>
    %cst = arith.constant dense<0.000000e+00> : vector<16x256xf32>
    %6 = tpu.matmul %4, %5, %cst {dimension_numbers = #tpu.dot_dimension_numbers<[1], [0], [0], [1], [0, 0, 1, 1], [], []>} : vector<16x512xbf16>, vector<512x256xbf16>, vector<16x256xf32> -> vector<16x256xf32>
    %7 = arith.addf %3, %6 : vector<16x256xf32>
    %c0_6 = arith.constant 0 : index
    %c0_7 = arith.constant 0 : index
    %8 = vector.load %arg7[%c0_6, %c0_7] : memref<16x256xf32, #tpu.memory_space<vmem>>, vector<16x256xf32>
    tpu.vector_store %arg7[%c0_6, %c0_7], %7 {strides = array<i32>} : memref<16x256xf32, #tpu.memory_space<vmem>>, vector<16x256xf32>,
    %c0_i32_8 = arith.constant 0 : i32
    %9 = arith.cmpi eq, %arg2, %c0_i32_8 : i32
    %10 = arith.extui %9 : i1 to i32
    %c0_i32_9 = arith.constant 0 : i32
    %11 = arith.cmpi ne, %10, %c0_i32_9 : i32
    scf.if %11 {
      %c0_10 = arith.constant 0 : index
      %c0_11 = arith.constant 0 : index
      %12 = vector.load %arg7[%c0_10, %c0_11] : memref<16x256xf32, #tpu.memory_space<vmem>>, vector<16x256xf32>
      %c0_12 = arith.constant 0 : index
      %c0_13 = arith.constant 0 : index
      %13 = vector.load %arg5[%c0_12, %c0_13] : memref<1x256xf32, #tpu.memory_space<vmem>>, vector<1x256xf32>
      %14 = vector.broadcast %13 : vector<1x256xf32> to vector<16x256xf32>
      %15 = arith.addf %12, %14 : vector<16x256xf32>
      %c0_14 = arith.constant 0 : index
      %c0_15 = arith.constant 0 : index
      %16 = vector.load %arg6[%c0_14, %c0_15] : memref<16x256xf32, #tpu.memory_space<vmem>>, vector<16x256xf32>
      tpu.vector_store %arg6[%c0_14, %c0_15], %15 {strides = array<i32>} : memref<16x256xf32, #tpu.memory_space<vmem>>, vector<16x256xf32>,
    } else {
    }
    return
  }
  func.func @transform_0(%arg0: i32, %arg1: i32, %arg2: i32) -> (i32, i32) {
    %c0_i32 = arith.constant 0 : i32
    return %arg0, %arg2 : i32, i32
  }
  func.func @transform_1(%arg0: i32, %arg1: i32, %arg2: i32) -> (i32, i32) {
    %c0_i32 = arith.constant 0 : i32
    return %arg2, %arg1 : i32, i32
  }
  func.func @transform_2(%arg0: i32, %arg1: i32, %arg2: i32) -> (i32, i32) {
    %c0_i32 = arith.constant 0 : i32
    %c0_i32_0 = arith.constant 0 : i32
    return %c0_i32, %arg1 : i32, i32
  }
  func.func @transform_3(%arg0: i32, %arg1: i32, %arg2: i32) -> (i32, i32) {
    %c0_i32 = arith.constant 0 : i32
    return %arg0, %arg1 : i32, i32
  }
}

</mosaic_0001>

<bundles_post_ra>
// kernel: quantized_resnet18_forward.24
= control target key start
LH: loop header
LB: loop body
LE: loop exit
PB: predicated region body
PF: predicated region fallthrough
CT: control target
= control target key end

     0   :  { %s256_s0 = inlined_call_operand.vmem [shape: f32[8,1024], index: 0, kind: input, shape index: {}]   ;;  %s257_s1 = inlined_call_operand.vmem [shape: bf16[8,1024], index: 1, kind: output, shape index: {}]  }
   0x1   :  { %v8_v0 = vld [vmem:[%s256_s0] sm:$0xff]  ;;  %v9_v1 = vld [vmem:[%s256_s0 + $0x8] sm:$0xff]  ;;  %v10_v2 = vld [vmem:[%s256_s0 + $0x10] sm:$0xff] }
   0x2   :  { %v16_v3 = vmul.f32 20.0, %v8_v0  ;;  %v17_v4 = vmul.f32 20.0, %v9_v1  ;;  %v11_v5 = vld [vmem:[%s256_s0 + $0x18] sm:$0xff]  ;;  %v18_v6 = vmul.f32 20.0, %v10_v2  ;;  %v12_v7 = vld [vmem:[%s256_s0 + $0x20] sm:$0xff]  ;;  %v13_v8 = vld [vmem:[%s256_s0 + $0x28] sm:$0xff] }
   0x3   :  { %v19_v9 = vmul.f32 20.0, %v11_v5  ;;  %v20_v10 = vmul.f32 20.0, %v12_v7  ;;  %v196_v14 = vmul.f32 20.0, %v13_v8  ;;  %v14_v47 = vld [vmem:[%s256_s0 + $0x30] sm:$0xff]  ;;  %v15_v52 = vld [vmem:[%s256_s0 + $0x38] sm:$0xff] }
   0x4   :  { %v104_v11 = vand.u32 2147483647, %v16_v3  ;;  %v106_v12 = vcvt.f32.s32 %v16_v3  ;;  %v112_v13 = vand.u32 2147483647, %v17_v4  ;;  %v109_v15 = vand.u32 2147483648, %v16_v3 }
   0x5   :  { %v114_v16 = vcvt.f32.s32 %v17_v4  ;;  %v120_v17 = vand.u32 2147483647, %v18_v6  ;;  %v122_v18 = vcvt.f32.s32 %v18_v6  ;;  %v117_v22 = vand.u32 2147483648, %v17_v4 }
   0x6   :  { %vm198_vm0 = vcmp.lt.f32.partialorder %v104_v11, 8388608.0  ;;  %v107_v20 = vcvt.s32.f32 %v106_v12  ;;  %vm202_vm1 = vcmp.lt.f32.partialorder %v112_v13, 8388608.0  ;;  %v125_v25 = vand.u32 2147483648, %v18_v6 }
   0x7   :  { %v115_v23 = vcvt.s32.f32 %v114_v16  ;;  %v123_v24 = vcvt.s32.f32 %v122_v18  ;;  %v128_v26 = vand.u32 2147483647, %v19_v9  ;;  %vm206_vm2 = vcmp.lt.f32.partialorder %v120_v17, 8388608.0 }
   0x8   :  { %v108_v27 = vand.u32 2147483647, %v107_v20  ;;  %v130_v29 = vcvt.f32.s32 %v19_v9  ;;  %v136_v30 = vand.u32 2147483647, %v20_v10  ;;  %v133_v33 = vand.u32 2147483648, %v19_v9 }
   0x9   :  { %v116_v31 = vand.u32 2147483647, %v115_v23  ;;  %v124_v32 = vand.u32 2147483647, %v123_v24  ;;  %v138_v34 = vcvt.f32.s32 %v20_v10  ;;  %vm210_vm3 = vcmp.lt.f32.partialorder %v128_v26, 8388608.0 }
   0xa   :  { %v110_v35 = vor.u32 %v109_v15, %v108_v27  ;;  %v131_v37 = vcvt.s32.f32 %v130_v29  ;;  %vm214_vm4 = vcmp.lt.f32.partialorder %v136_v30, 8388608.0  ;;  %v141_v42 = vand.u32 2147483648, %v20_v10 }
   0xb   :  { %v118_v39 = vor.u32 %v117_v22, %v116_v31  ;;  %v126_v40 = vor.u32 %v125_v25, %v124_v32  ;;  %v139_v41 = vcvt.s32.f32 %v138_v34  ;;  %v144_v45 = vand.u32 2147483647, %v196_v14 }
   0xc   :  { %v111_v43 = vsel %vm198_vm0, %v110_v35, %v16_v3  ;;  %v132_v44 = vand.u32 2147483647, %v131_v37  ;;  %v146_v46 = vcvt.f32.s32 %v196_v14  ;;  %v149_v56 = vand.u32 2147483648, %v196_v14 }
   0xd   :  { %v119_v48 = vsel %vm202_vm1, %v118_v39, %v17_v4  ;;  %v32_v49 = vmax.f32 %v111_v43, -128.0  ;;  %v127_v50 = vsel %vm206_vm2, %v126_v40, %v18_v6  ;;  %v140_v51 = vand.u32 2147483647, %v139_v41 }
   0xe   :  { %v33_v53 = vmax.f32 %v119_v48, -128.0  ;;  %v134_v54 = vor.u32 %v133_v33, %v132_v44  ;;  %v34_v55 = vmax.f32 %v127_v50, -128.0  ;;  %v147_v59 = vcvt.s32.f32 %v146_v46 }
   0xf   :  { %v40_v57 = vmin.f32 %v32_v49, 127.0  ;;  %v142_v58 = vor.u32 %v141_v42, %v140_v51  ;;  %v22_v60 = vmul.f32 20.0, %v14_v47  ;;  %v23_v0 = vmul.f32 20.0, %v15_v52 }
  0x10   :  { %v41_v61 = vmin.f32 %v33_v53, 127.0  ;;  %v135_v62 = vsel %vm210_vm3, %v134_v54, %v19_v9  ;;  %v42_v63 = vmin.f32 %v34_v55, 127.0  ;;  %v148_v4 = vand.u32 2147483647, %v147_v59 }
  0x11   :  { %v48_v1 = vmul.f32 0.05, %v40_v57  ;;  %v35_v2 = vmax.f32 %v135_v62, -128.0  ;;  %v143_v3 = vsel %vm214_vm4, %v142_v58, %v20_v10  ;;  %vm237_vm5 = vcmp.lt.f32.partialorder %v144_v45, 8388608.0 }
  0x12   :  { %v49_v5 = vmul.f32 0.05, %v41_v61  ;;  %v36_v7 = vmax.f32 %v143_v3, -128.0  ;;  %v154_v8 = vcvt.f32.s32 %v22_v60  ;;  %v50_v12 = vmul.f32 0.05, %v42_v63 }
  0x13   :  { %v43_v11 = vmin.f32 %v35_v2, 127.0  ;;  %v150_v13 = vor.u32 %v149_v56, %v148_v4  ;;  %v152_v15 = vand.u32 2147483647, %v22_v60  ;;  %v157_v18 = vand.u32 2147483648, %v22_v60 }
  0x14   :  { %v100_v9 = vpack.c.bf16 %v49_v5, %v48_v1  ;;  %v44_v16 = vmin.f32 %v36_v7, 127.0  ;;  %v155_v17 = vcvt.s32.f32 %v154_v8  ;;  %v162_v20 = vcvt.f32.s32 %v23_v0 }
  0x15   :  { %v51_v19 = vmul.f32 0.05, %v43_v11  ;;  %v151_v10 = vsel %vm237_vm5, %v150_v13, %v196_v14  ;;  %v160_v23 = vand.u32 2147483647, %v23_v0  ;;  %vm153_vm6 = vcmp.lt.f32.partialorder %v152_v15, 8388608.0 }
  0x16   :  { %88 = vst [vmem:[%s257_s1] sm:$0xff] %v100_v9  ;;  %v37_v21 = vmax.f32 %v151_v10, -128.0  ;;  %v156_v22 = vand.u32 2147483647, %v155_v17  ;;  %v163_v25 = vcvt.s32.f32 %v162_v20  ;;  %v165_v26 = vand.u32 2147483648, %v23_v0 }
  0x17   :  { %v101_v24 = vpack.c.bf16 %v51_v19, %v50_v12  ;;  %v52_v28 = vmul.f32 0.05, %v44_v16  ;;  %vm161_vm7 = vcmp.lt.f32.partialorder %v160_v23, 8388608.0 }
  0x18   :  { %v45_v27 = vmin.f32 %v37_v21, 127.0  ;;  %v158_v29 = vor.u32 %v157_v18, %v156_v22  ;;  %v164_v14 = vand.u32 2147483647, %v163_v25 }
  0x19   :  { %89 = vst [vmem:[%s257_s1 + $0x8] sm:$0xff] %v101_v24 }
  0x1a   :  { %v53_v30 = vmul.f32 0.05, %v45_v27  ;;  %v159_v31 = vsel %vm153_vm6, %v158_v29, %v22_v60  ;;  %v166_v32 = vor.u32 %v165_v26, %v164_v14 }
  0x1b   :  { %v38_v33 = vmax.f32 %v159_v31, -128.0 }
  0x1c   :  { %v102_v34 = vpack.c.bf16 %v53_v30, %v52_v28  ;;  %v167_v35 = vsel %vm161_vm7, %v166_v32, %v23_v0 }
  0x1d   :  { %v46_v36 = vmin.f32 %v38_v33, 127.0  ;;  %v39_v37 = vmax.f32 %v167_v35, -128.0 }
  0x1e   :  { %90 = vst [vmem:[%s257_s1 + $0x10] sm:$0xff] %v102_v34 }
  0x1f   :  { %v47_v38 = vmin.f32 %v39_v37, 127.0  ;;  %v54_v39 = vmul.f32 0.05, %v46_v36 }
  0x21   :  { %v55_v40 = vmul.f32 0.05, %v47_v38 }
  0x23   :  { %v103_v41 = vpack.c.bf16 %v55_v40, %v54_v39 }
  0x25   :  { %91 = vst [vmem:[%s257_s1 + $0x18] sm:$0xff] %v103_v41 }

// kernel: quantized_resnet18_forward.25
= control target key start
LH: loop header
LB: loop body
LE: loop exit
PB: predicated region body
PF: predicated region fallthrough
CT: control target
= control target key end

     0   :  { %v1961_v0 = vmov 0   ;;  %vm19_vm0 = vcmask 523264   ;;  %v1962_v19 = vmov 0.0   ;;  %vm1536_vm1 = vcmask 519168   ;;  %s2781_s1 = inlined_call_operand.vmem [shape: bf16[256,64], index: 1, kind: input, shape index: {}]   ;;  %s2782_s0 = inlined_call_operand.vmem [shape: bf16[512,256], index: 0, kind: input, shape index: {}]   ;;  %s2783_s2 = inlined_call_operand.vmem [shape: f32[1,64], index: 2, kind: input, shape index: {}]   ;;  %s2784_s3 = inlined_call_operand.vmem [shape: bf16[512,64], index: 3, kind: output, shape index: {}]  }
   0x1   :  { %660 = vmatprep.subr.bf16.mxu0 %v1961_v0  ;;  %1814 = vmatprep.subr.bf16.mxu1 %v1961_v0  ;;  %v1848_v1 = vld [vmem:[%s2781_s1 + $0x38] sm:$0xff]   ;;  %v1849_v2 = vld [vmem:[%s2781_s1 + $0x30] sm:$0xff]   ;;  %v1850_v3 = vld [vmem:[%s2781_s1 + $0x28] sm:$0xff]   ;;  %20 = vst.msk [vmem:[#allocation2] sm:$0xff] %vm19_vm0, %v1962_v19 }
   0x2   :  { %661 = vmatpush1.bf16.msra.mxu0 %v1848_v1  ;;  %1830 = vmatpush1.bf16.msra.mxu1 %v1848_v1  ;;  %v1851_v4 = vld [vmem:[%s2781_s1 + $0x20] sm:$0xff]   ;;  %v1852_v5 = vld [vmem:[%s2781_s1 + $0x18] sm:$0xff]   ;;  %v1853_v7 = vld [vmem:[%s2781_s1 + $0x10] sm:$0xff]   ;;  %21 = vst.msk [vmem:[#allocation2 + $0x8] sm:$0xff] %vm19_vm0, %v1962_v19 }
   0x3   :  { %662 = vmatprep.subr.bf16.mxu0 %v1961_v0  ;;  %1815 = vmatprep.subr.bf16.mxu1 %v1961_v0  ;;  %v1866_v6 = vld [vmem:[%s2782_s0 + $0x4] ss:$8 sps:$4 sm:$0xff]   ;;  %v1856_v11 = vld [vmem:[%s2781_s1 + $0x78] sm:$0xff]   ;;  %v1857_v12 = vld [vmem:[%s2781_s1 + $0x70] sm:$0xff]   ;;  %22 = vst.msk [vmem:[#allocation2 + $0x10] sm:$0xff] %vm19_vm0, %v1962_v19 }
   0x4   :  { %v1869_v8 = vld [vmem:[%s2782_s0 + $0x104] ss:$8 sps:$4 sm:$0xff]   ;;  %692 = vmatprep.mubr.bf16.mxu0 %v1866_v6  ;;  %v1860_v15 = vld [vmem:[%s2781_s1 + $0x58] sm:$0xff]   ;;  %v1861_v16 = vld [vmem:[%s2781_s1 + $0x50] sm:$0xff]   ;;  %23 = vst.msk [vmem:[#allocation2 + $0x18] sm:$0xff] %vm19_vm0, %v1962_v19 }
   0x5   :  { %820 = vmatprep.mubr.bf16.mxu1 %v1869_v8  ;;  %v1854_v9 = vld [vmem:[%s2781_s1 + $0x8] sm:$0xff]   ;;  %v1855_v10 = vld [vmem:[%s2781_s1] sm:$0xff]   ;;  %24 = vst.msk [vmem:[#allocation2 + $0x20] sm:$0xff] %vm19_vm0, %v1962_v19  ;;  %25 = vst.msk [vmem:[#allocation2 + $0x28] sm:$0xff] %vm19_vm0, %v1962_v19 }
   0x6   :  { %663 = vmatpush1.bf16.msra.mxu0 %v1849_v2  ;;  %1831 = vmatpush1.bf16.msra.mxu1 %v1849_v2  ;;  %v1858_v13 = vld [vmem:[%s2781_s1 + $0x68] sm:$0xff]   ;;  %v1859_v14 = vld [vmem:[%s2781_s1 + $0x60] sm:$0xff]   ;;  %26 = vst.msk [vmem:[#allocation2 + $0x30] sm:$0xff] %vm19_vm0, %v1962_v19  ;;  %27 = vst.msk [vmem:[#allocation2 + $0x38] sm:$0xff] %vm19_vm0, %v1962_v19 }
   0x7   :  { %664 = vmatprep.subr.bf16.mxu0 %v1961_v0  ;;  %1816 = vmatprep.subr.bf16.mxu1 %v1961_v0  ;;  %v1862_v17 = vld [vmem:[%s2781_s1 + $0x48] sm:$0xff]   ;;  %v2067_v18 = vld [vmem:[%s2781_s1 + $0x40] sm:$0xff]   ;;  %28 = vst.msk [vmem:[#allocation2 + $0x40] sm:$0xff] %vm19_vm0, %v1962_v19  ;;  %29 = vst.msk [vmem:[#allocation2 + $0x48] sm:$0xff] %vm19_vm0, %v1962_v19 }
   0x8   :  { %30 = vst.msk [vmem:[#allocation2 + $0x50] sm:$0xff] %vm19_vm0, %v1962_v19  ;;  %31 = vst.msk [vmem:[#allocation2 + $0x58] sm:$0xff] %vm19_vm0, %v1962_v19  ;;  %v1864_v20 = vld [vmem:[%s2782_s0] ss:$8 sps:$4 sm:$0xff]   ;;  %v1870_v22 = vld [vmem:[%s2782_s0 + $0x14] ss:$8 sps:$4 sm:$0xff]  }
   0x9   :  { %32 = vst.msk [vmem:[#allocation2 + $0x60] sm:$0xff] %vm19_vm0, %v1962_v19  ;;  %33 = vst.msk [vmem:[#allocation2 + $0x68] sm:$0xff] %vm19_vm0, %v1962_v19  ;;  %v1867_v21 = vld [vmem:[%s2782_s0 + $0x100] ss:$8 sps:$4 sm:$0xff]   ;;  %v1872_v23 = vld [vmem:[%s2782_s0 + $0x114] ss:$8 sps:$4 sm:$0xff]  }
   0xa   :  { %665 = vmatpush1.bf16.msra.mxu0 %v1850_v3  ;;  %1832 = vmatpush1.bf16.msra.mxu1 %v1850_v3  ;;  %34 = vst.msk [vmem:[#allocation2 + $0x70] sm:$0xff] %vm19_vm0, %v1962_v19  ;;  %35 = vst.msk [vmem:[#allocation2 + $0x78] sm:$0xff] %vm19_vm0, %v1962_v19  ;;  %v1874_v24 = vld [vmem:[%s2782_s0 + $0x10] ss:$8 sps:$4 sm:$0xff]   ;;  %v1876_v26 = vld [vmem:[%s2782_s0 + $0x24] ss:$8 sps:$4 sm:$0xff]  }
   0xb   :  { %666 = vmatprep.subr.bf16.mxu0 %v1961_v0  ;;  %1817 = vmatprep.subr.bf16.mxu1 %v1961_v0  ;;  %36 = vst.msk [vmem:[#allocation2 + $0x80] sm:$0xff] %vm19_vm0, %v1962_v19  ;;  %37 = vst.msk [vmem:[#allocation2 + $0x88] sm:$0xff] %vm19_vm0, %v1962_v19  ;;  %v1875_v25 = vld [vmem:[%s2782_s0 + $0x110] ss:$8 sps:$4 sm:$0xff]   ;;  %v1878_v27 = vld [vmem:[%s2782_s0 + $0x124] ss:$8 sps:$4 sm:$0xff]  }
   0xc   :  { %38 = vst.msk [vmem:[#allocation2 + $0x90] sm:$0xff] %vm19_vm0, %v1962_v19  ;;  %39 = vst.msk [vmem:[#allocation2 + $0x98] sm:$0xff] %vm19_vm0, %v1962_v19  ;;  %v1880_v28 = vld [vmem:[%s2782_s0 + $0x20] ss:$8 sps:$4 sm:$0xff]   ;;  %v1882_v30 = vld [vmem:[%s2782_s0 + $0x34] ss:$8 sps:$4 sm:$0xff]  }
   0xd   :  { %40 = vst.msk [vmem:[#allocation2 + $0xa0] sm:$0xff] %vm19_vm0, %v1962_v19  ;;  %41 = vst.msk [vmem:[#allocation2 + $0xa8] sm:$0xff] %vm19_vm0, %v1962_v19  ;;  %v1881_v29 = vld [vmem:[%s2782_s0 + $0x120] ss:$8 sps:$4 sm:$0xff]   ;;  %v1884_v31 = vld [vmem:[%s2782_s0 + $0x134] ss:$8 sps:$4 sm:$0xff]  }
   0xe   :  { %667 = vmatpush1.bf16.msra.mxu0 %v1851_v4  ;;  %1833 = vmatpush1.bf16.msra.mxu1 %v1851_v4  ;;  %42 = vst.msk [vmem:[#allocation2 + $0xb0] sm:$0xff] %vm19_vm0, %v1962_v19  ;;  %43 = vst.msk [vmem:[#allocation2 + $0xb8] sm:$0xff] %vm19_vm0, %v1962_v19  ;;  %v1886_v32 = vld [vmem:[%s2782_s0 + $0x30] ss:$8 sps:$4 sm:$0xff]   ;;  %v1888_v34 = vld [vmem:[%s2782_s0 + $0x44] ss:$8 sps:$4 sm:$0xff]  }
   0xf   :  { %668 = vmatprep.subr.bf16.mxu0 %v1961_v0  ;;  %1818 = vmatprep.subr.bf16.mxu1 %v1961_v0  ;;  %44 = vst.msk [vmem:[#allocation2 + $0xc0] sm:$0xff] %vm19_vm0, %v1962_v19  ;;  %45 = vst.msk [vmem:[#allocation2 + $0xc8] sm:$0xff] %vm19_vm0, %v1962_v19  ;;  %v1887_v33 = vld [vmem:[%s2782_s0 + $0x130] ss:$8 sps:$4 sm:$0xff]   ;;  %v1890_v35 = vld [vmem:[%s2782_s0 + $0x144] ss:$8 sps:$4 sm:$0xff]  }
  0x10   :  { %46 = vst.msk [vmem:[#allocation2 + $0xd0] sm:$0xff] %vm19_vm0, %v1962_v19  ;;  %47 = vst.msk [vmem:[#allocation2 + $0xd8] sm:$0xff] %vm19_vm0, %v1962_v19  ;;  %v1892_v36 = vld [vmem:[%s2782_s0 + $0x40] ss:$8 sps:$4 sm:$0xff]   ;;  %v1894_v38 = vld [vmem:[%s2782_s0 + $0x54] ss:$8 sps:$4 sm:$0xff]  }
  0x11   :  { %48 = vst.msk [vmem:[#allocation2 + $0xe0] sm:$0xff] %vm19_vm0, %v1962_v19  ;;  %49 = vst.msk [vmem:[#allocation2 + $0xe8] sm:$0xff] %vm19_vm0, %v1962_v19  ;;  %v1893_v37 = vld [vmem:[%s2782_s0 + $0x140] ss:$8 sps:$4 sm:$0xff]   ;;  %v1896_v39 = vld [vmem:[%s2782_s0 + $0x154] ss:$8 sps:$4 sm:$0xff]  }
  0x12   :  { %669 = vmatpush1.bf16.msra.mxu0 %v1852_v5  ;;  %1834 = vmatpush1.bf16.msra.mxu1 %v1852_v5  ;;  %50 = vst.msk [vmem:[#allocation2 + $0xf0] sm:$0xff] %vm19_vm0, %v1962_v19  ;;  %51 = vst.msk [vmem:[#allocation2 + $0xf8] sm:$0xff] %vm19_vm0, %v1962_v19  ;;  %v1898_v40 = vld [vmem:[%s2782_s0 + $0x50] ss:$8 sps:$4 sm:$0xff]   ;;  %v1900_v42 = vld [vmem:[%s2782_s0 + $0x64] ss:$8 sps:$4 sm:$0xff]  }
  0x13   :  { %670 = vmatprep.subr.bf16.mxu0 %v1961_v0  ;;  %1819 = vmatprep.subr.bf16.mxu1 %v1961_v0  ;;  %52 = vst.msk [vmem:[#allocation2 + $0x100] sm:$0xff] %vm19_vm0, %v1962_v19  ;;  %53 = vst.msk [vmem:[#allocation2 + $0x108] sm:$0xff] %vm19_vm0, %v1962_v19  ;;  %v1899_v41 = vld [vmem:[%s2782_s0 + $0x150] ss:$8 sps:$4 sm:$0xff]   ;;  %v1902_v43 = vld [vmem:[%s2782_s0 + $0x164] ss:$8 sps:$4 sm:$0xff]  }
  0x14   :  { %54 = vst.msk [vmem:[#allocation2 + $0x110] sm:$0xff] %vm19_vm0, %v1962_v19  ;;  %55 = vst.msk [vmem:[#allocation2 + $0x118] sm:$0xff] %vm19_vm0, %v1962_v19  ;;  %v1904_v44 = vld [vmem:[%s2782_s0 + $0x60] ss:$8 sps:$4 sm:$0xff]   ;;  %v1906_v46 = vld [vmem:[%s2782_s0 + $0x74] ss:$8 sps:$4 sm:$0xff]  }
  0x15   :  { %56 = vst.msk [vmem:[#allocation2 + $0x120] sm:$0xff] %vm19_vm0, %v1962_v19  ;;  %57 = vst.msk [vmem:[#allocation2 + $0x128] sm:$0xff] %vm19_vm0, %v1962_v19  ;;  %v1905_v45 = vld [vmem:[%s2782_s0 + $0x160] ss:$8 sps:$4 sm:$0xff]   ;;  %v1908_v47 = vld [vmem:[%s2782_s0 + $0x174] ss:$8 sps:$4 sm:$0xff]  }
  0x16   :  { %671 = vmatpush1.bf16.msra.mxu0 %v1853_v7  ;;  %1835 = vmatpush1.bf16.msra.mxu1 %v1853_v7  ;;  %58 = vst.msk [vmem:[#allocation2 + $0x130] sm:$0xff] %vm19_vm0, %v1962_v19  ;;  %59 = vst.msk [vmem:[#allocation2 + $0x138] sm:$0xff] %vm19_vm0, %v1962_v19  ;;  %v1910_v48 = vld [vmem:[%s2782_s0 + $0x70] ss:$8 sps:$4 sm:$0xff]   ;;  %v1912_v50 = vld [vmem:[%s2782_s0 + $0x84] ss:$8 sps:$4 sm:$0xff]  }
  0x17   :  { %672 = vmatprep.subr.bf16.mxu0 %v1961_v0  ;;  %1820 = vmatprep.subr.bf16.mxu1 %v1961_v0  ;;  %60 = vst.msk [vmem:[#allocation2 + $0x140] sm:$0xff] %vm19_vm0, %v1962_v19  ;;  %61 = vst.msk [vmem:[#allocation2 + $0x148] sm:$0xff] %vm19_vm0, %v1962_v19  ;;  %v1911_v49 = vld [vmem:[%s2782_s0 + $0x170] ss:$8 sps:$4 sm:$0xff]   ;;  %v1914_v51 = vld [vmem:[%s2782_s0 + $0x184] ss:$8 sps:$4 sm:$0xff]  }
  0x18   :  { %62 = vst.msk [vmem:[#allocation2 + $0x150] sm:$0xff] %vm19_vm0, %v1962_v19  ;;  %63 = vst.msk [vmem:[#allocation2 + $0x158] sm:$0xff] %vm19_vm0, %v1962_v19  ;;  %v1916_v52 = vld [vmem:[%s2782_s0 + $0x80] ss:$8 sps:$4 sm:$0xff]   ;;  %v1918_v54 = vld [vmem:[%s2782_s0 + $0x94] ss:$8 sps:$4 sm:$0xff]  }
  0x19   :  { %64 = vst.msk [vmem:[#allocation2 + $0x160] sm:$0xff] %vm19_vm0, %v1962_v19  ;;  %65 = vst.msk [vmem:[#allocation2 + $0x168] sm:$0xff] %vm19_vm0, %v1962_v19  ;;  %v1917_v53 = vld [vmem:[%s2782_s0 + $0x180] ss:$8 sps:$4 sm:$0xff]   ;;  %v1920_v55 = vld [vmem:[%s2782_s0 + $0x194] ss:$8 sps:$4 sm:$0xff]  }
  0x1a   :  { %673 = vmatpush1.bf16.msra.mxu0 %v1854_v9  ;;  %1836 = vmatpush1.bf16.msra.mxu1 %v1854_v9  ;;  %66 = vst.msk [vmem:[#allocation2 + $0x170] sm:$0xff] %vm19_vm0, %v1962_v19  ;;  %67 = vst.msk [vmem:[#allocation2 + $0x178] sm:$0xff] %vm19_vm0, %v1962_v19  ;;  %v1922_v56 = vld [vmem:[%s2782_s0 + $0x90] ss:$8 sps:$4 sm:$0xff]   ;;  %v1924_v58 = vld [vmem:[%s2782_s0 + $0xa4] ss:$8 sps:$4 sm:$0xff]  }
  0x1b   :  { %674 = vmatprep.subr.bf16.mxu0 %v1961_v0  ;;  %1821 = vmatprep.subr.bf16.mxu1 %v1961_v0  ;;  %68 = vst.msk [vmem:[#allocation2 + $0x180] sm:$0xff] %vm19_vm0, %v1962_v19  ;;  %69 = vst.msk [vmem:[#allocation2 + $0x188] sm:$0xff] %vm19_vm0, %v1962_v19  ;;  %v1923_v57 = vld [vmem:[%s2782_s0 + $0x190] ss:$8 sps:$4 sm:$0xff]   ;;  %v1926_v59 = vld [vmem:[%s2782_s0 + $0x1a4] ss:$8 sps:$4 sm:$0xff]  }
  0x1c   :  { %70 = vst.msk [vmem:[#allocation2 + $0x190] sm:$0xff] %vm19_vm0, %v1962_v19  ;;  %71 = vst.msk [vmem:[#allocation2 + $0x198] sm:$0xff] %vm19_vm0, %v1962_v19  ;;  %v1928_v60 = vld [vmem:[%s2782_s0 + $0xa0] ss:$8 sps:$4 sm:$0xff]   ;;  %v1930_v62 = vld [vmem:[%s2782_s0 + $0xb4] ss:$8 sps:$4 sm:$0xff]  }
  0x1d   :  { %72 = vst.msk [vmem:[#allocation2 + $0x1a0] sm:$0xff] %vm19_vm0, %v1962_v19  ;;  %73 = vst.msk [vmem:[#allocation2 + $0x1a8] sm:$0xff] %vm19_vm0, %v1962_v19  ;;  %v1929_v61 = vld [vmem:[%s2782_s0 + $0x1a0] ss:$8 sps:$4 sm:$0xff]   ;;  %v1932_v63 = vld [vmem:[%s2782_s0 + $0x1b4] ss:$8 sps:$4 sm:$0xff]  }
  0x1e   :  { %675 = vmatpush1.bf16.msra.mxu0 %v1855_v10  ;;  %1837 = vmatpush1.bf16.msra.mxu1 %v1855_v10  ;;  %74 = vst.msk [vmem:[#allocation2 + $0x1b0] sm:$0xff] %vm19_vm0, %v1962_v19  ;;  %75 = vst.msk [vmem:[#allocation2 + $0x1b8] sm:$0xff] %vm19_vm0, %v1962_v19  ;;  %v1935_v1 = vld [vmem:[%s2782_s0 + $0x1b0] ss:$8 sps:$4 sm:$0xff]   ;;  %v1936_v2 = vld [vmem:[%s2782_s0 + $0xc4] ss:$8 sps:$4 sm:$0xff]  }
  0x1f   :  { %676 = vmatprep.subr.bf16.mxu0 %v1961_v0  ;;  %1822 = vmatprep.subr.bf16.mxu1 %v1961_v0  ;;  %76 = vst.msk [vmem:[#allocation2 + $0x1c0] sm:$0xff] %vm19_vm0, %v1962_v19  ;;  %77 = vst.msk [vmem:[#allocation2 + $0x1c8] sm:$0xff] %vm19_vm0, %v1962_v19  ;;  %v1938_v3 = vld [vmem:[%s2782_s0 + $0x1c4] ss:$8 sps:$4 sm:$0xff]   ;;  %v1940_v4 = vld [vmem:[%s2782_s0 + $0xc0] ss:$8 sps:$4 sm:$0xff]  }
  0x20   :  { %78 = vst.msk [vmem:[#allocation2 + $0x1d0] sm:$0xff] %vm19_vm0, %v1962_v19  ;;  %79 = vst.msk [vmem:[#allocation2 + $0x1d8] sm:$0xff] %vm19_vm0, %v1962_v19  ;;  %v1941_v5 = vld [vmem:[%s2782_s0 + $0x1c0] ss:$8 sps:$4 sm:$0xff]   ;;  %v1942_v6 = vld [vmem:[%s2782_s0 + $0xd4] ss:$8 sps:$4 sm:$0xff]  }
  0x21   :  { %80 = vst.msk [vmem:[#allocation2 + $0x1e0] sm:$0xff] %vm19_vm0, %v1962_v19  ;;  %81 = vst.msk [vmem:[#allocation2 + $0x1e8] sm:$0xff] %vm19_vm0, %v1962_v19  ;;  %v1944_v7 = vld [vmem:[%s2782_s0 + $0x1d4] ss:$8 sps:$4 sm:$0xff]   ;;  %v1946_v8 = vld [vmem:[%s2782_s0 + $0xd0] ss:$8 sps:$4 sm:$0xff]  }
  0x22   :  { %677 = vmatpush2.bf16.msra.mxu0 %v1856_v11  ;;  %1838 = vmatpush2.bf16.msra.mxu1 %v1856_v11  ;;  %82 = vst.msk [vmem:[#allocation2 + $0x1f0] sm:$0xff] %vm19_vm0, %v1962_v19  ;;  %83 = vst.msk [vmem:[#allocation2 + $0x1f8] sm:$0xff] %vm19_vm0, %v1962_v19  ;;  %v1947_v9 = vld [vmem:[%s2782_s0 + $0x1d0] ss:$8 sps:$4 sm:$0xff]   ;;  %v1948_v10 = vld [vmem:[%s2782_s0 + $0xe4] ss:$8 sps:$4 sm:$0xff]  }
  0x23   :  { %678 = vmatprep.subr.bf16.mxu0 %v1961_v0  ;;  %1823 = vmatprep.subr.bf16.mxu1 %v1961_v0  ;;  %v1950_v11 = vld [vmem:[%s2782_s0 + $0x1e4] ss:$8 sps:$4 sm:$0xff]  }
  0x24   :  { %v116_v19 = vld [vmem:[#allocation2 + $0x100] sm:$0xff] }
  0x26   :  { %679 = vmatpush2.bf16.msra.mxu0 %v1857_v12  ;;  %1839 = vmatpush2.bf16.msra.mxu1 %v1857_v12  ;;  %v1952_v12 = vld [vmem:[%s2782_s0 + $0xe0] ss:$8 sps:$4 sm:$0xff]  }
  0x27   :  { %680 = vmatprep.subr.bf16.mxu0 %v1961_v0  ;;  %1824 = vmatprep.subr.bf16.mxu1 %v1961_v0 }
  0x2a   :  { %681 = vmatpush2.bf16.msra.mxu0 %v1858_v13  ;;  %1840 = vmatpush2.bf16.msra.mxu1 %v1858_v13  ;;  %v1953_v13 = vld [vmem:[%s2782_s0 + $0x1e0] ss:$8 sps:$4 sm:$0xff]  }
  0x2b   :  { %682 = vmatprep.subr.bf16.mxu0 %v1961_v0  ;;  %1825 = vmatprep.subr.bf16.mxu1 %v1961_v0 }
  0x2e   :  { %683 = vmatpush2.bf16.msra.mxu0 %v1859_v14  ;;  %1841 = vmatpush2.bf16.msra.mxu1 %v1859_v14  ;;  %v1954_v14 = vld [vmem:[%s2782_s0 + $0xf4] ss:$8 sps:$4 sm:$0xff]  }
  0x2f   :  { %684 = vmatprep.subr.bf16.mxu0 %v1961_v0  ;;  %1826 = vmatprep.subr.bf16.mxu1 %v1961_v0 }
  0x32   :  { %685 = vmatpush2.bf16.msra.mxu0 %v1860_v15  ;;  %1842 = vmatpush2.bf16.msra.mxu1 %v1860_v15  ;;  %v1956_v15 = vld [vmem:[%s2782_s0 + $0x1f4] ss:$8 sps:$4 sm:$0xff]  }
  0x33   :  { %686 = vmatprep.subr.bf16.mxu0 %v1961_v0  ;;  %1827 = vmatprep.subr.bf16.mxu1 %v1961_v0 }
  0x36   :  { %687 = vmatpush2.bf16.msra.mxu0 %v1861_v16  ;;  %1843 = vmatpush2.bf16.msra.mxu1 %v1861_v16  ;;  %v1958_v16 = vld [vmem:[%s2782_s0 + $0xf0] ss:$8 sps:$4 sm:$0xff]  }
  0x37   :  { %688 = vmatprep.subr.bf16.mxu0 %v1961_v0  ;;  %1828 = vmatprep.subr.bf16.mxu1 %v1961_v0 }
  0x3a   :  { %689 = vmatpush2.bf16.msra.mxu0 %v1862_v17  ;;  %1844 = vmatpush2.bf16.msra.mxu1 %v1862_v17  ;;  %v1959_v17 = vld [vmem:[%s2782_s0 + $0x1f0] ss:$8 sps:$4 sm:$0xff]  }
  0x3b   :  { %690 = vmatprep.subr.bf16.mxu0 %v1961_v0  ;;  %1829 = vmatprep.subr.bf16.mxu1 %v1961_v0  ;;  %v1934_v0 = vld [vmem:[%s2782_s0 + $0xb0] ss:$8 sps:$4 sm:$0xff]  }
  0x3e   :  { %691 = vmatpush2.bf16.msra.mxu0 %v2067_v18  ;;  %1845 = vmatpush2.bf16.msra.mxu1 %v2067_v18  ;;  %v84_v18 = vld [vmem:[#allocation2] sm:$0xff] }
  0x41   :  { %693 = vmatmul.mubr.bf16.vlgmr.msra.gmra.mxu0 %v1864_v20  ;;  %821 = vmatmul.mubr.bf16.vlgmr.msra.gmra.mxu1 %v1867_v21 }
  0x42   :  { %700 = vmatprep.mubr.bf16.mxu0 %v1870_v22  ;;  %828 = vmatprep.mubr.bf16.mxu1 %v1872_v23 }
  0x49   :  { %701 = vmatmul.mubr.bf16.gmra.mxu0 %v1874_v24  ;;  %829 = vmatmul.mubr.bf16.gmra.mxu1 %v1875_v25 }
  0x4a   :  { %708 = vmatprep.mubr.bf16.mxu0 %v1876_v26  ;;  %836 = vmatprep.mubr.bf16.mxu1 %v1878_v27  ;;  %v85_v26 = vld [vmem:[#allocation2 + $0x8] sm:$0xff] }
  0x4b   :  { %v117_v27 = vld [vmem:[#allocation2 + $0x108] sm:$0xff] }
  0x51   :  { %709 = vmatmul.mubr.bf16.gmra.mxu0 %v1880_v28  ;;  %837 = vmatmul.mubr.bf16.gmra.mxu1 %v1881_v29 }
  0x52   :  { %716 = vmatprep.mubr.bf16.mxu0 %v1882_v30  ;;  %844 = vmatprep.mubr.bf16.mxu1 %v1884_v31 }
  0x59   :  { %717 = vmatmul.mubr.bf16.gmra.mxu0 %v1886_v32  ;;  %845 = vmatmul.mubr.bf16.gmra.mxu1 %v1887_v33 }
  0x5a   :  { %724 = vmatprep.mubr.bf16.mxu0 %v1888_v34  ;;  %852 = vmatprep.mubr.bf16.mxu1 %v1890_v35  ;;  %v86_v34 = vld [vmem:[#allocation2 + $0x10] sm:$0xff] }
  0x5b   :  { %v118_v35 = vld [vmem:[#allocation2 + $0x110] sm:$0xff] }
  0x61   :  { %725 = vmatmul.mubr.bf16.gmra.mxu0 %v1892_v36  ;;  %853 = vmatmul.mubr.bf16.gmra.mxu1 %v1893_v37  ;;  %v2394_v36 = vld [vmem:[%s2783_s2] ss:$0 sm:$0xff] }
  0x62   :  { %732 = vmatprep.mubr.bf16.mxu0 %v1894_v38  ;;  %860 = vmatprep.mubr.bf16.mxu1 %v1896_v39 }
  0x69   :  { %733 = vmatmul.mubr.bf16.gmra.mxu0 %v1898_v40  ;;  %861 = vmatmul.mubr.bf16.gmra.mxu1 %v1899_v41  ;;  %v87_v41 = vld [vmem:[#allocation2 + $0x18] sm:$0xff] }
  0x6a   :  { %740 = vmatprep.mubr.bf16.mxu0 %v1900_v42  ;;  %868 = vmatprep.mubr.bf16.mxu1 %v1902_v43 }
  0x71   :  { %741 = vmatmul.mubr.bf16.gmra.mxu0 %v1904_v44  ;;  %869 = vmatmul.mubr.bf16.gmra.mxu1 %v1905_v45 }
  0x72   :  { %748 = vmatprep.mubr.bf16.mxu0 %v1906_v46  ;;  %876 = vmatprep.mubr.bf16.mxu1 %v1908_v47  ;;  %v119_v46 = vld [vmem:[#allocation2 + $0x118] sm:$0xff] }
  0x79   :  { %749 = vmatmul.mubr.bf16.gmra.mxu0 %v1910_v48  ;;  %877 = vmatmul.mubr.bf16.gmra.mxu1 %v1911_v49 }
  0x7a   :  { %756 = vmatprep.mubr.bf16.mxu0 %v1912_v50  ;;  %884 = vmatprep.mubr.bf16.mxu1 %v1914_v51 }
  0x81   :  { %757 = vmatmul.mubr.bf16.gmra.mxu0 %v1916_v52  ;;  %885 = vmatmul.mubr.bf16.gmra.mxu1 %v1917_v53 }
  0x82   :  { %764 = vmatprep.mubr.bf16.mxu0 %v1918_v54  ;;  %892 = vmatprep.mubr.bf16.mxu1 %v1920_v55  ;;  %v88_v55 = vld [vmem:[#allocation2 + $0x20] sm:$0xff] }
  0x89   :  { %765 = vmatmul.mubr.bf16.gmra.mxu0 %v1922_v56  ;;  %893 = vmatmul.mubr.bf16.gmra.mxu1 %v1923_v57 }
  0x8a   :  { %772 = vmatprep.mubr.bf16.mxu0 %v1924_v58  ;;  %900 = vmatprep.mubr.bf16.mxu1 %v1926_v59 }
  0x91   :  { %773 = vmatmul.mubr.bf16.gmra.mxu0 %v1928_v60  ;;  %901 = vmatmul.mubr.bf16.gmra.mxu1 %v1929_v61  ;;  %v120_v60 = vld [vmem:[#allocation2 + $0x120] sm:$0xff] }
  0x92   :  { %780 = vmatprep.mubr.bf16.mxu0 %v1930_v62  ;;  %908 = vmatprep.mubr.bf16.mxu1 %v1932_v63 }
  0x99   :  { %781 = vmatmul.mubr.bf16.gmra.mxu0 %v1934_v0  ;;  %909 = vmatmul.mubr.bf16.gmra.mxu1 %v1935_v1 }
  0x9a   :  { %788 = vmatprep.mubr.bf16.mxu0 %v1936_v2  ;;  %916 = vmatprep.mubr.bf16.mxu1 %v1938_v3 }
  0xa1   :  { %789 = vmatmul.mubr.bf16.gmra.mxu0 %v1940_v4  ;;  %917 = vmatmul.mubr.bf16.gmra.mxu1 %v1941_v5 }
  0xa2   :  { %796 = vmatprep.mubr.bf16.mxu0 %v1942_v6  ;;  %924 = vmatprep.mubr.bf16.mxu1 %v1944_v7  ;;  %v89_v7 = vld [vmem:[#allocation2 + $0x28] sm:$0xff] }
  0xa9   :  { %797 = vmatmul.mubr.bf16.gmra.mxu0 %v1946_v8  ;;  %925 = vmatmul.mubr.bf16.gmra.mxu1 %v1947_v9 }
  0xaa   :  { %804 = vmatprep.mubr.bf16.mxu0 %v1948_v10  ;;  %932 = vmatprep.mubr.bf16.mxu1 %v1950_v11 }
  0xb1   :  { %805 = vmatmul.mubr.bf16.gmra.mxu0 %v1952_v12  ;;  %933 = vmatmul.mubr.bf16.gmra.mxu1 %v1953_v13  ;;  %v121_v12 = vld [vmem:[#allocation2 + $0x128] sm:$0xff] }
  0xb2   :  { %812 = vmatprep.mubr.bf16.mxu0 %v1954_v14  ;;  %940 = vmatprep.mubr.bf16.mxu1 %v1956_v15 }
  0xb9   :  { %813 = vmatmul.mubr.bf16.gmra.mxu0 %v1958_v16  ;;  %941 = vmatmul.mubr.bf16.gmra.mxu1 %v1959_v17 }
 0x101   :  { %v694_v20 = vpop.f32.mrf.mxu0  ;;  %v822_v21 = vpop.f32.mrf.mxu1 }
 0x102   :  { %v949_v22 = vadd.f32 %v694_v20, %v84_v18  ;;  %v981_v23 = vadd.f32 %v822_v21, %v116_v19 }
 0x103   :  { %v696_v24 = vpop.f32.mrf.mxu0  ;;  %v824_v25 = vpop.f32.mrf.mxu1 }
 0x104   :  { %1014 = vst.msk [vmem:[#allocation2] sm:$0xff] %vm19_vm0, %v949_v22  ;;  %1046 = vst.msk [vmem:[#allocation2 + $0x100] sm:$0xff] %vm19_vm0, %v981_v23  ;;  %v90_v23 = vld [vmem:[#allocation2 + $0x30] sm:$0xff] }
 0x105   :  { %v697_v28 = vpop.f32.mrf.mxu0  ;;  %v825_v29 = vpop.f32.mrf.mxu1 }
 0x106   :  { %v950_v30 = vadd.f32 %v697_v28, %v85_v26  ;;  %v982_v31 = vadd.f32 %v825_v29, %v117_v27  ;;  %v122_v28 = vld [vmem:[#allocation2 + $0x130] sm:$0xff] }
 0x107   :  { %v699_v32 = vpop.f32.mrf.mxu0  ;;  %v827_v33 = vpop.f32.mrf.mxu1 }
 0x108   :  { %1015 = vst.msk [vmem:[#allocation2 + $0x8] sm:$0xff] %vm19_vm0, %v950_v30  ;;  %1047 = vst.msk [vmem:[#allocation2 + $0x108] sm:$0xff] %vm19_vm0, %v982_v31 }
 0x109   :  { %v702_v37 = vpop.f32.mrf.mxu0  ;;  %v830_v38 = vpop.f32.mrf.mxu1 }
 0x10a   :  { %v951_v39 = vadd.f32 %v702_v37, %v86_v34  ;;  %v983_v40 = vadd.f32 %v830_v38, %v118_v35 }
 0x10b   :  { %v1081_v42 = vld [vmem:[#allocation2] sm:$0xff]  ;;  %v704_v44 = vpop.f32.mrf.mxu0  ;;  %v832_v45 = vpop.f32.mrf.mxu1 }
 0x10c   :  { %v1113_v43 = vld [vmem:[#allocation2 + $0x100] sm:$0xff]  ;;  %v1152_v47 = vadd.f32 %v2394_v36, %v1081_v42  ;;  %1016 = vst.msk [vmem:[#allocation2 + $0x10] sm:$0xff] %vm19_vm0, %v951_v39  ;;  %1048 = vst.msk [vmem:[#allocation2 + $0x110] sm:$0xff] %vm19_vm0, %v983_v40  ;;  %v91_v40 = vld [vmem:[#allocation2 + $0x38] sm:$0xff] }
 0x10d   :  { %v1184_v48 = vadd.f32 %v2394_v36, %v1113_v43  ;;  %v705_v49 = vpop.f32.mrf.mxu0  ;;  %v833_v50 = vpop.f32.mrf.mxu1  ;;  %v123_v45 = vld [vmem:[#allocation2 + $0x138] sm:$0xff] }
 0x10e   :  { %v1216_v51 = vmax.f32 %v1152_v47, 0.0  ;;  %v952_v53 = vadd.f32 %v705_v49, %v87_v41  ;;  %v984_v54 = vadd.f32 %v833_v50, %v119_v46 }
 0x10f   :  { %v1248_v52 = vmax.f32 %v1184_v48, 0.0  ;;  %v1082_v56 = vld [vmem:[#allocation2 + $0x8] sm:$0xff]  ;;  %v707_v58 = vpop.f32.mrf.mxu0  ;;  %v835_v59 = vpop.f32.mrf.mxu1 }
 0x110   :  { %v1114_v57 = vld [vmem:[#allocation2 + $0x108] sm:$0xff]  ;;  %v1750_v61 = vpack.c.bf16 %v1216_v51, %v1216_v51  ;;  %v1153_v63 = vadd.f32 %v2394_v36, %v1082_v56  ;;  %1017 = vst.msk [vmem:[#allocation2 + $0x18] sm:$0xff] %vm19_vm0, %v952_v53  ;;  %1049 = vst.msk [vmem:[#allocation2 + $0x118] sm:$0xff] %vm19_vm0, %v984_v54  ;;  %v92_v56 = vld [vmem:[#allocation2 + $0x40] sm:$0xff] }
 0x111   :  { %v1782_v62 = vpack.c.bf16 %v1248_v52, %v1248_v52  ;;  %v1185_v0 = vadd.f32 %v2394_v36, %v1114_v57  ;;  %v710_v1 = vpop.f32.mrf.mxu0  ;;  %v838_v2 = vpop.f32.mrf.mxu1 }
 0x112   :  { %1537 = vst.msk [vmem:[%s2784_s3] sm:$0xf] %vm1536_vm1, %v1750_v61  ;;  %v1217_v3 = vmax.f32 %v1153_v63, 0.0  ;;  %v953_v5 = vadd.f32 %v710_v1, %v88_v55  ;;  %v985_v6 = vadd.f32 %v838_v2, %v120_v60  ;;  %v124_v61 = vld [vmem:[#allocation2 + $0x140] sm:$0xff] }
 0x113   :  { %1569 = vst.msk [vmem:[%s2784_s3 + $0x80] sm:$0xf] %vm1536_vm1, %v1782_v62  ;;  %v1249_v4 = vmax.f32 %v1185_v0, 0.0  ;;  %v1083_v8 = vld [vmem:[#allocation2 + $0x10] sm:$0xff]  ;;  %v712_v10 = vpop.f32.mrf.mxu0  ;;  %v840_v11 = vpop.f32.mrf.mxu1 }
 0x114   :  { %v1115_v9 = vld [vmem:[#allocation2 + $0x110] sm:$0xff]  ;;  %v1751_v13 = vpack.c.bf16 %v1217_v3, %v1217_v3  ;;  %v1154_v15 = vadd.f32 %v2394_v36, %v1083_v8  ;;  %1018 = vst.msk [vmem:[#allocation2 + $0x20] sm:$0xff] %vm19_vm0, %v953_v5  ;;  %1050 = vst.msk [vmem:[#allocation2 + $0x120] sm:$0xff] %vm19_vm0, %v985_v6  ;;  %v93_v8 = vld [vmem:[#allocation2 + $0x48] sm:$0xff] }
 0x115   :  { %v1783_v14 = vpack.c.bf16 %v1249_v4, %v1249_v4  ;;  %v1186_v16 = vadd.f32 %v2394_v36, %v1115_v9  ;;  %v713_v17 = vpop.f32.mrf.mxu0  ;;  %v841_v18 = vpop.f32.mrf.mxu1 }
 0x116   :  { %1538 = vst.msk [vmem:[%s2784_s3 + $0x4] sm:$0xf] %vm1536_vm1, %v1751_v13  ;;  %v1218_v19 = vmax.f32 %v1154_v15, 0.0  ;;  %v954_v21 = vadd.f32 %v713_v17, %v89_v7  ;;  %v986_v22 = vadd.f32 %v841_v18, %v121_v12  ;;  %v125_v13 = vld [vmem:[#allocation2 + $0x148] sm:$0xff] }
 0x117   :  { %1570 = vst.msk [vmem:[%s2784_s3 + $0x84] sm:$0xf] %vm1536_vm1, %v1783_v14  ;;  %v1250_v20 = vmax.f32 %v1186_v16, 0.0  ;;  %v1084_v24 = vld [vmem:[#allocation2 + $0x18] sm:$0xff]  ;;  %v715_v26 = vpop.f32.mrf.mxu0  ;;  %v843_v27 = vpop.f32.mrf.mxu1 }
 0x118   :  { %v1116_v25 = vld [vmem:[#allocation2 + $0x118] sm:$0xff]  ;;  %v1752_v29 = vpack.c.bf16 %v1218_v19, %v1218_v19  ;;  %v1155_v31 = vadd.f32 %v2394_v36, %v1084_v24  ;;  %1019 = vst.msk [vmem:[#allocation2 + $0x28] sm:$0xff] %vm19_vm0, %v954_v21  ;;  %1051 = vst.msk [vmem:[#allocation2 + $0x128] sm:$0xff] %vm19_vm0, %v986_v22  ;;  %v94_v24 = vld [vmem:[#allocation2 + $0x50] sm:$0xff] }
 0x119   :  { %v1784_v30 = vpack.c.bf16 %v1250_v20, %v1250_v20  ;;  %v1187_v32 = vadd.f32 %v2394_v36, %v1116_v25  ;;  %v718_v33 = vpop.f32.mrf.mxu0  ;;  %v846_v34 = vpop.f32.mrf.mxu1 }
 0x11a   :  { %1539 = vst.msk [vmem:[%s2784_s3 + $0x8] sm:$0xf] %vm1536_vm1, %v1752_v29  ;;  %v1219_v35 = vmax.f32 %v1155_v31, 0.0  ;;  %v955_v38 = vadd.f32 %v718_v33, %v90_v23  ;;  %v987_v39 = vadd.f32 %v846_v34, %v122_v28  ;;  %v126_v29 = vld [vmem:[#allocation2 + $0x150] sm:$0xff] }
 0x11b   :  { %1571 = vst.msk [vmem:[%s2784_s3 + $0x88] sm:$0xf] %vm1536_vm1, %v1784_v30  ;;  %v1251_v37 = vmax.f32 %v1187_v32, 0.0  ;;  %v1085_v41 = vld [vmem:[#allocation2 + $0x20] sm:$0xff]  ;;  %v720_v43 = vpop.f32.mrf.mxu0  ;;  %v848_v44 = vpop.f32.mrf.mxu1 }
 0x11c   :  { %v1117_v42 = vld [vmem:[#allocation2 + $0x120] sm:$0xff]  ;;  %v1753_v46 = vpack.c.bf16 %v1219_v35, %v1219_v35  ;;  %v1156_v48 = vadd.f32 %v2394_v36, %v1085_v41  ;;  %1020 = vst.msk [vmem:[#allocation2 + $0x30] sm:$0xff] %vm19_vm0, %v955_v38  ;;  %1052 = vst.msk [vmem:[#allocation2 + $0x130] sm:$0xff] %vm19_vm0, %v987_v39  ;;  %v95_v41 = vld [vmem:[#allocation2 + $0x58] sm:$0xff] }
 0x11d   :  { %v1785_v47 = vpack.c.bf16 %v1251_v37, %v1251_v37  ;;  %v1188_v49 = vadd.f32 %v2394_v36, %v1117_v42  ;;  %v721_v50 = vpop.f32.mrf.mxu0  ;;  %v849_v51 = vpop.f32.mrf.mxu1 }
 0x11e   :  { %1540 = vst.msk [vmem:[%s2784_s3 + $0xc] sm:$0xf] %vm1536_vm1, %v1753_v46  ;;  %v1220_v52 = vmax.f32 %v1156_v48, 0.0  ;;  %v956_v54 = vadd.f32 %v721_v50, %v91_v40  ;;  %v988_v55 = vadd.f32 %v849_v51, %v123_v45  ;;  %v127_v46 = vld [vmem:[#allocation2 + $0x158] sm:$0xff] }
 0x11f   :  { %1572 = vst.msk [vmem:[%s2784_s3 + $0x8c] sm:$0xf] %vm1536_vm1, %v1785_v47  ;;  %v1252_v53 = vmax.f32 %v1188_v49, 0.0  ;;  %v1086_v57 = vld [vmem:[#allocation2 + $0x28] sm:$0xff]  ;;  %v723_v59 = vpop.f32.mrf.mxu0  ;;  %v851_v60 = vpop.f32.mrf.mxu1 }
 0x120   :  { %v1118_v58 = vld [vmem:[#allocation2 + $0x128] sm:$0xff]  ;;  %v1754_v62 = vpack.c.bf16 %v1220_v52, %v1220_v52  ;;  %v1157_v0 = vadd.f32 %v2394_v36, %v1086_v57  ;;  %1021 = vst.msk [vmem:[#allocation2 + $0x38] sm:$0xff] %vm19_vm0, %v956_v54  ;;  %1053 = vst.msk [vmem:[#allocation2 + $0x138] sm:$0xff] %vm19_vm0, %v988_v55  ;;  %v96_v57 = vld [vmem:[#allocation2 + $0x60] sm:$0xff] }
 0x121   :  { %v1786_v63 = vpack.c.bf16 %v1252_v53, %v1252_v53  ;;  %v1189_v1 = vadd.f32 %v2394_v36, %v1118_v58  ;;  %v726_v2 = vpop.f32.mrf.mxu0  ;;  %v854_v3 = vpop.f32.mrf.mxu1 }
 0x122   :  { %1541 = vst.msk [vmem:[%s2784_s3 + $0x10] sm:$0xf] %vm1536_vm1, %v1754_v62  ;;  %v1221_v4 = vmax.f32 %v1157_v0, 0.0  ;;  %v957_v6 = vadd.f32 %v726_v2, %v92_v56  ;;  %v989_v7 = vadd.f32 %v854_v3, %v124_v61  ;;  %v128_v62 = vld [vmem:[#allocation2 + $0x160] sm:$0xff] }
 0x123   :  { %1573 = vst.msk [vmem:[%s2784_s3 + $0x90] sm:$0xf] %vm1536_vm1, %v1786_v63  ;;  %v1253_v5 = vmax.f32 %v1189_v1, 0.0  ;;  %v1087_v9 = vld [vmem:[#allocation2 + $0x30] sm:$0xff]  ;;  %v728_v11 = vpop.f32.mrf.mxu0  ;;  %v856_v12 = vpop.f32.mrf.mxu1 }
 0x124   :  { %v1119_v10 = vld [vmem:[#allocation2 + $0x130] sm:$0xff]  ;;  %v1755_v14 = vpack.c.bf16 %v1221_v4, %v1221_v4  ;;  %v1158_v16 = vadd.f32 %v2394_v36, %v1087_v9  ;;  %1022 = vst.msk [vmem:[#allocation2 + $0x40] sm:$0xff] %vm19_vm0, %v957_v6  ;;  %1054 = vst.msk [vmem:[#allocation2 + $0x140] sm:$0xff] %vm19_vm0, %v989_v7  ;;  %v97_v9 = vld [vmem:[#allocation2 + $0x68] sm:$0xff] }
 0x125   :  { %v1787_v15 = vpack.c.bf16 %v1253_v5, %v1253_v5  ;;  %v1190_v17 = vadd.f32 %v2394_v36, %v1119_v10  ;;  %v729_v18 = vpop.f32.mrf.mxu0  ;;  %v857_v19 = vpop.f32.mrf.mxu1 }
 0x126   :  { %1542 = vst.msk [vmem:[%s2784_s3 + $0x14] sm:$0xf] %vm1536_vm1, %v1755_v14  ;;  %v1222_v20 = vmax.f32 %v1158_v16, 0.0  ;;  %v958_v22 = vadd.f32 %v729_v18, %v93_v8  ;;  %v990_v23 = vadd.f32 %v857_v19, %v125_v13  ;;  %v129_v14 = vld [vmem:[#allocation2 + $0x168] sm:$0xff] }
 0x127   :  { %1574 = vst.msk [vmem:[%s2784_s3 + $0x94] sm:$0xf] %vm1536_vm1, %v1787_v15  ;;  %v1254_v21 = vmax.f32 %v1190_v17, 0.0  ;;  %v1088_v25 = vld [vmem:[#allocation2 + $0x38] sm:$0xff]  ;;  %v731_v27 = vpop.f32.mrf.mxu0  ;;  %v859_v28 = vpop.f32.mrf.mxu1 }
 0x128   :  { %v1120_v26 = vld [vmem:[#allocation2 + $0x138] sm:$0xff]  ;;  %v1756_v30 = vpack.c.bf16 %v1222_v20, %v1222_v20  ;;  %v1159_v32 = vadd.f32 %v2394_v36, %v1088_v25  ;;  %1023 = vst.msk [vmem:[#allocation2 + $0x48] sm:$0xff] %vm19_vm0, %v958_v22  ;;  %1055 = vst.msk [vmem:[#allocation2 + $0x148] sm:$0xff] %vm19_vm0, %v990_v23  ;;  %v98_v25 = vld [vmem:[#allocation2 + $0x70] sm:$0xff] }
 0x129   :  { %v1788_v31 = vpack.c.bf16 %v1254_v21, %v1254_v21  ;;  %v1191_v33 = vadd.f32 %v2394_v36, %v1120_v26  ;;  %v734_v34 = vpop.f32.mrf.mxu0  ;;  %v862_v35 = vpop.f32.mrf.mxu1 }
 0x12a   :  { %1543 = vst.msk [vmem:[%s2784_s3 + $0x18] sm:$0xf] %vm1536_vm1, %v1756_v30  ;;  %v1223_v37 = vmax.f32 %v1159_v32, 0.0  ;;  %v959_v39 = vadd.f32 %v734_v34, %v94_v24  ;;  %v991_v40 = vadd.f32 %v862_v35, %v126_v29  ;;  %v130_v30 = vld [vmem:[#allocation2 + $0x170] sm:$0xff] }
 0x12b   :  { %1575 = vst.msk [vmem:[%s2784_s3 + $0x98] sm:$0xf] %vm1536_vm1, %v1788_v31  ;;  %v1255_v38 = vmax.f32 %v1191_v33, 0.0  ;;  %v1089_v42 = vld [vmem:[#allocation2 + $0x40] sm:$0xff]  ;;  %v736_v44 = vpop.f32.mrf.mxu0  ;;  %v864_v45 = vpop.f32.mrf.mxu1 }
 0x12c   :  { %v1121_v43 = vld [vmem:[#allocation2 + $0x140] sm:$0xff]  ;;  %v1757_v47 = vpack.c.bf16 %v1223_v37, %v1223_v37  ;;  %v1160_v49 = vadd.f32 %v2394_v36, %v1089_v42  ;;  %1024 = vst.msk [vmem:[#allocation2 + $0x50] sm:$0xff] %vm19_vm0, %v959_v39  ;;  %1056 = vst.msk [vmem:[#allocation2 + $0x150] sm:$0xff] %vm19_vm0, %v991_v40  ;;  %v99_v42 = vld [vmem:[#allocation2 + $0x78] sm:$0xff] }
 0x12d   :  { %v1789_v48 = vpack.c.bf16 %v1255_v38, %v1255_v38  ;;  %v1192_v50 = vadd.f32 %v2394_v36, %v1121_v43  ;;  %v737_v51 = vpop.f32.mrf.mxu0  ;;  %v865_v52 = vpop.f32.mrf.mxu1 }
 0x12e   :  { %1544 = vst.msk [vmem:[%s2784_s3 + $0x1c] sm:$0xf] %vm1536_vm1, %v1757_v47  ;;  %v1224_v53 = vmax.f32 %v1160_v49, 0.0  ;;  %v960_v55 = vadd.f32 %v737_v51, %v95_v41  ;;  %v992_v56 = vadd.f32 %v865_v52, %v127_v46  ;;  %v131_v47 = vld [vmem:[#allocation2 + $0x178] sm:$0xff] }
 0x12f   :  { %1576 = vst.msk [vmem:[%s2784_s3 + $0x9c] sm:$0xf] %vm1536_vm1, %v1789_v48  ;;  %v1256_v54 = vmax.f32 %v1192_v50, 0.0  ;;  %v1090_v58 = vld [vmem:[#allocation2 + $0x48] sm:$0xff]  ;;  %v739_v60 = vpop.f32.mrf.mxu0  ;;  %v867_v61 = vpop.f32.mrf.mxu1 }
 0x130   :  { %v1122_v59 = vld [vmem:[#allocation2 + $0x148] sm:$0xff]  ;;  %v1758_v63 = vpack.c.bf16 %v1224_v53, %v1224_v53  ;;  %v1161_v1 = vadd.f32 %v2394_v36, %v1090_v58  ;;  %1025 = vst.msk [vmem:[#allocation2 + $0x58] sm:$0xff] %vm19_vm0, %v960_v55  ;;  %1057 = vst.msk [vmem:[#allocation2 + $0x158] sm:$0xff] %vm19_vm0, %v992_v56  ;;  %v100_v58 = vld [vmem:[#allocation2 + $0x80] sm:$0xff] }
 0x131   :  { %v1790_v0 = vpack.c.bf16 %v1256_v54, %v1256_v54  ;;  %v1193_v2 = vadd.f32 %v2394_v36, %v1122_v59  ;;  %v742_v3 = vpop.f32.mrf.mxu0  ;;  %v870_v4 = vpop.f32.mrf.mxu1 }
 0x132   :  { %1545 = vst.msk [vmem:[%s2784_s3 + $0x20] sm:$0xf] %vm1536_vm1, %v1758_v63  ;;  %v1225_v5 = vmax.f32 %v1161_v1, 0.0  ;;  %v961_v7 = vadd.f32 %v742_v3, %v96_v57  ;;  %v993_v8 = vadd.f32 %v870_v4, %v128_v62  ;;  %v132_v63 = vld [vmem:[#allocation2 + $0x180] sm:$0xff] }
 0x133   :  { %1577 = vst.msk [vmem:[%s2784_s3 + $0xa0] sm:$0xf] %vm1536_vm1, %v1790_v0  ;;  %v1257_v6 = vmax.f32 %v1193_v2, 0.0  ;;  %v1091_v10 = vld [vmem:[#allocation2 + $0x50] sm:$0xff]  ;;  %v744_v12 = vpop.f32.mrf.mxu0  ;;  %v872_v13 = vpop.f32.mrf.mxu1 }
 0x134   :  { %v1123_v11 = vld [vmem:[#allocation2 + $0x150] sm:$0xff]  ;;  %v1759_v15 = vpack.c.bf16 %v1225_v5, %v1225_v5  ;;  %v1162_v17 = vadd.f32 %v2394_v36, %v1091_v10  ;;  %1026 = vst.msk [vmem:[#allocation2 + $0x60] sm:$0xff] %vm19_vm0, %v961_v7  ;;  %1058 = vst.msk [vmem:[#allocation2 + $0x160] sm:$0xff] %vm19_vm0, %v993_v8  ;;  %v101_v10 = vld [vmem:[#allocation2 + $0x88] sm:$0xff] }
 0x135   :  { %v1791_v16 = vpack.c.bf16 %v1257_v6, %v1257_v6  ;;  %v1194_v18 = vadd.f32 %v2394_v36, %v1123_v11  ;;  %v745_v19 = vpop.f32.mrf.mxu0  ;;  %v873_v20 = vpop.f32.mrf.mxu1 }
 0x136   :  { %1546 = vst.msk [vmem:[%s2784_s3 + $0x24] sm:$0xf] %vm1536_vm1, %v1759_v15  ;;  %v1226_v21 = vmax.f32 %v1162_v17, 0.0  ;;  %v962_v23 = vadd.f32 %v745_v19, %v97_v9  ;;  %v994_v24 = vadd.f32 %v873_v20, %v129_v14  ;;  %v133_v15 = vld [vmem:[#allocation2 + $0x188] sm:$0xff] }
 0x137   :  { %1578 = vst.msk [vmem:[%s2784_s3 + $0xa4] sm:$0xf] %vm1536_vm1, %v1791_v16  ;;  %v1258_v22 = vmax.f32 %v1194_v18, 0.0  ;;  %v1092_v26 = vld [vmem:[#allocation2 + $0x58] sm:$0xff]  ;;  %v747_v28 = vpop.f32.mrf.mxu0  ;;  %v875_v29 = vpop.f32.mrf.mxu1 }
 0x138   :  { %v1124_v27 = vld [vmem:[#allocation2 + $0x158] sm:$0xff]  ;;  %v1760_v31 = vpack.c.bf16 %v1226_v21, %v1226_v21  ;;  %v1163_v33 = vadd.f32 %v2394_v36, %v1092_v26  ;;  %1027 = vst.msk [vmem:[#allocation2 + $0x68] sm:$0xff] %vm19_vm0, %v962_v23  ;;  %1059 = vst.msk [vmem:[#allocation2 + $0x168] sm:$0xff] %vm19_vm0, %v994_v24  ;;  %v102_v26 = vld [vmem:[#allocation2 + $0x90] sm:$0xff] }
 0x139   :  { %v1792_v32 = vpack.c.bf16 %v1258_v22, %v1258_v22  ;;  %v1195_v34 = vadd.f32 %v2394_v36, %v1124_v27  ;;  %v750_v35 = vpop.f32.mrf.mxu0  ;;  %v878_v37 = vpop.f32.mrf.mxu1 }
 0x13a   :  { %1547 = vst.msk [vmem:[%s2784_s3 + $0x28] sm:$0xf] %vm1536_vm1, %v1760_v31  ;;  %v1227_v38 = vmax.f32 %v1163_v33, 0.0  ;;  %v963_v40 = vadd.f32 %v750_v35, %v98_v25  ;;  %v995_v41 = vadd.f32 %v878_v37, %v130_v30  ;;  %v134_v31 = vld [vmem:[#allocation2 + $0x190] sm:$0xff] }
 0x13b   :  { %1579 = vst.msk [vmem:[%s2784_s3 + $0xa8] sm:$0xf] %vm1536_vm1, %v1792_v32  ;;  %v1259_v39 = vmax.f32 %v1195_v34, 0.0  ;;  %v1093_v43 = vld [vmem:[#allocation2 + $0x60] sm:$0xff]  ;;  %v752_v45 = vpop.f32.mrf.mxu0  ;;  %v880_v46 = vpop.f32.mrf.mxu1 }
 0x13c   :  { %v1125_v44 = vld [vmem:[#allocation2 + $0x160] sm:$0xff]  ;;  %v1761_v48 = vpack.c.bf16 %v1227_v38, %v1227_v38  ;;  %v1164_v50 = vadd.f32 %v2394_v36, %v1093_v43  ;;  %1028 = vst.msk [vmem:[#allocation2 + $0x70] sm:$0xff] %vm19_vm0, %v963_v40  ;;  %1060 = vst.msk [vmem:[#allocation2 + $0x170] sm:$0xff] %vm19_vm0, %v995_v41  ;;  %v103_v43 = vld [vmem:[#allocation2 + $0x98] sm:$0xff] }
 0x13d   :  { %v1793_v49 = vpack.c.bf16 %v1259_v39, %v1259_v39  ;;  %v1196_v51 = vadd.f32 %v2394_v36, %v1125_v44  ;;  %v753_v52 = vpop.f32.mrf.mxu0  ;;  %v881_v53 = vpop.f32.mrf.mxu1 }
 0x13e   :  { %1548 = vst.msk [vmem:[%s2784_s3 + $0x2c] sm:$0xf] %vm1536_vm1, %v1761_v48  ;;  %v1228_v54 = vmax.f32 %v1164_v50, 0.0  ;;  %v964_v56 = vadd.f32 %v753_v52, %v99_v42  ;;  %v996_v57 = vadd.f32 %v881_v53, %v131_v47  ;;  %v135_v48 = vld [vmem:[#allocation2 + $0x198] sm:$0xff] }
 0x13f   :  { %1580 = vst.msk [vmem:[%s2784_s3 + $0xac] sm:$0xf] %vm1536_vm1, %v1793_v49  ;;  %v1260_v55 = vmax.f32 %v1196_v51, 0.0  ;;  %v1094_v59 = vld [vmem:[#allocation2 + $0x68] sm:$0xff]  ;;  %v755_v61 = vpop.f32.mrf.mxu0  ;;  %v883_v62 = vpop.f32.mrf.mxu1 }
 0x140   :  { %v1126_v60 = vld [vmem:[#allocation2 + $0x168] sm:$0xff]  ;;  %v1762_v0 = vpack.c.bf16 %v1228_v54, %v1228_v54  ;;  %v1165_v2 = vadd.f32 %v2394_v36, %v1094_v59  ;;  %1029 = vst.msk [vmem:[#allocation2 + $0x78] sm:$0xff] %vm19_vm0, %v964_v56  ;;  %1061 = vst.msk [vmem:[#allocation2 + $0x178] sm:$0xff] %vm19_vm0, %v996_v57  ;;  %v104_v59 = vld [vmem:[#allocation2 + $0xa0] sm:$0xff] }
 0x141   :  { %v1794_v1 = vpack.c.bf16 %v1260_v55, %v1260_v55  ;;  %v1197_v3 = vadd.f32 %v2394_v36, %v1126_v60  ;;  %v758_v4 = vpop.f32.mrf.mxu0  ;;  %v886_v5 = vpop.f32.mrf.mxu1 }
 0x142   :  { %1549 = vst.msk [vmem:[%s2784_s3 + $0x30] sm:$0xf] %vm1536_vm1, %v1762_v0  ;;  %v1229_v6 = vmax.f32 %v1165_v2, 0.0  ;;  %v965_v8 = vadd.f32 %v758_v4, %v100_v58  ;;  %v997_v9 = vadd.f32 %v886_v5, %v132_v63  ;;  %v136_v0 = vld [vmem:[#allocation2 + $0x1a0] sm:$0xff] }
 0x143   :  { %1581 = vst.msk [vmem:[%s2784_s3 + $0xb0] sm:$0xf] %vm1536_vm1, %v1794_v1  ;;  %v1261_v7 = vmax.f32 %v1197_v3, 0.0  ;;  %v1095_v11 = vld [vmem:[#allocation2 + $0x70] sm:$0xff]  ;;  %v760_v13 = vpop.f32.mrf.mxu0  ;;  %v888_v14 = vpop.f32.mrf.mxu1 }
 0x144   :  { %v1127_v12 = vld [vmem:[#allocation2 + $0x170] sm:$0xff]  ;;  %v1763_v16 = vpack.c.bf16 %v1229_v6, %v1229_v6  ;;  %v1166_v18 = vadd.f32 %v2394_v36, %v1095_v11  ;;  %1030 = vst.msk [vmem:[#allocation2 + $0x80] sm:$0xff] %vm19_vm0, %v965_v8  ;;  %1062 = vst.msk [vmem:[#allocation2 + $0x180] sm:$0xff] %vm19_vm0, %v997_v9  ;;  %v105_v11 = vld [vmem:[#allocation2 + $0xa8] sm:$0xff] }
 0x145   :  { %v1795_v17 = vpack.c.bf16 %v1261_v7, %v1261_v7  ;;  %v1198_v19 = vadd.f32 %v2394_v36, %v1127_v12  ;;  %v761_v20 = vpop.f32.mrf.mxu0  ;;  %v889_v21 = vpop.f32.mrf.mxu1 }
 0x146   :  { %1550 = vst.msk [vmem:[%s2784_s3 + $0x34] sm:$0xf] %vm1536_vm1, %v1763_v16  ;;  %v1230_v22 = vmax.f32 %v1166_v18, 0.0  ;;  %v966_v24 = vadd.f32 %v761_v20, %v101_v10  ;;  %v998_v25 = vadd.f32 %v889_v21, %v133_v15  ;;  %v137_v16 = vld [vmem:[#allocation2 + $0x1a8] sm:$0xff] }
 0x147   :  { %1582 = vst.msk [vmem:[%s2784_s3 + $0xb4] sm:$0xf] %vm1536_vm1, %v1795_v17  ;;  %v1262_v23 = vmax.f32 %v1198_v19, 0.0  ;;  %v1096_v27 = vld [vmem:[#allocation2 + $0x78] sm:$0xff]  ;;  %v763_v29 = vpop.f32.mrf.mxu0  ;;  %v891_v30 = vpop.f32.mrf.mxu1 }
 0x148   :  { %v1128_v28 = vld [vmem:[#allocation2 + $0x178] sm:$0xff]  ;;  %v1764_v32 = vpack.c.bf16 %v1230_v22, %v1230_v22  ;;  %v1167_v34 = vadd.f32 %v2394_v36, %v1096_v27  ;;  %1031 = vst.msk [vmem:[#allocation2 + $0x88] sm:$0xff] %vm19_vm0, %v966_v24  ;;  %1063 = vst.msk [vmem:[#allocation2 + $0x188] sm:$0xff] %vm19_vm0, %v998_v25  ;;  %v106_v27 = vld [vmem:[#allocation2 + $0xb0] sm:$0xff] }
 0x149   :  { %v1796_v33 = vpack.c.bf16 %v1262_v23, %v1262_v23  ;;  %v1199_v35 = vadd.f32 %v2394_v36, %v1128_v28  ;;  %v766_v37 = vpop.f32.mrf.mxu0  ;;  %v894_v38 = vpop.f32.mrf.mxu1 }
 0x14a   :  { %1551 = vst.msk [vmem:[%s2784_s3 + $0x38] sm:$0xf] %vm1536_vm1, %v1764_v32  ;;  %v1231_v39 = vmax.f32 %v1167_v34, 0.0  ;;  %v967_v41 = vadd.f32 %v766_v37, %v102_v26  ;;  %v999_v42 = vadd.f32 %v894_v38, %v134_v31  ;;  %v138_v32 = vld [vmem:[#allocation2 + $0x1b0] sm:$0xff] }
 0x14b   :  { %1583 = vst.msk [vmem:[%s2784_s3 + $0xb8] sm:$0xf] %vm1536_vm1, %v1796_v33  ;;  %v1263_v40 = vmax.f32 %v1199_v35, 0.0  ;;  %v1097_v44 = vld [vmem:[#allocation2 + $0x80] sm:$0xff]  ;;  %v768_v46 = vpop.f32.mrf.mxu0  ;;  %v896_v47 = vpop.f32.mrf.mxu1 }
 0x14c   :  { %v1129_v45 = vld [vmem:[#allocation2 + $0x180] sm:$0xff]  ;;  %v1765_v49 = vpack.c.bf16 %v1231_v39, %v1231_v39  ;;  %v1168_v51 = vadd.f32 %v2394_v36, %v1097_v44  ;;  %1032 = vst.msk [vmem:[#allocation2 + $0x90] sm:$0xff] %vm19_vm0, %v967_v41  ;;  %1064 = vst.msk [vmem:[#allocation2 + $0x190] sm:$0xff] %vm19_vm0, %v999_v42  ;;  %v107_v44 = vld [vmem:[#allocation2 + $0xb8] sm:$0xff] }
 0x14d   :  { %v1797_v50 = vpack.c.bf16 %v1263_v40, %v1263_v40  ;;  %v1200_v52 = vadd.f32 %v2394_v36, %v1129_v45  ;;  %v769_v53 = vpop.f32.mrf.mxu0  ;;  %v897_v54 = vpop.f32.mrf.mxu1 }
 0x14e   :  { %1552 = vst.msk [vmem:[%s2784_s3 + $0x3c] sm:$0xf] %vm1536_vm1, %v1765_v49  ;;  %v1232_v55 = vmax.f32 %v1168_v51, 0.0  ;;  %v968_v57 = vadd.f32 %v769_v53, %v103_v43  ;;  %v1000_v58 = vadd.f32 %v897_v54, %v135_v48  ;;  %v139_v49 = vld [vmem:[#allocation2 + $0x1b8] sm:$0xff] }
 0x14f   :  { %1584 = vst.msk [vmem:[%s2784_s3 + $0xbc] sm:$0xf] %vm1536_vm1, %v1797_v50  ;;  %v1264_v56 = vmax.f32 %v1200_v52, 0.0  ;;  %v1098_v60 = vld [vmem:[#allocation2 + $0x88] sm:$0xff]  ;;  %v771_v62 = vpop.f32.mrf.mxu0  ;;  %v899_v63 = vpop.f32.mrf.mxu1 }
 0x150   :  { %v1130_v61 = vld [vmem:[#allocation2 + $0x188] sm:$0xff]  ;;  %v1766_v1 = vpack.c.bf16 %v1232_v55, %v1232_v55  ;;  %v1169_v3 = vadd.f32 %v2394_v36, %v1098_v60  ;;  %1033 = vst.msk [vmem:[#allocation2 + $0x98] sm:$0xff] %vm19_vm0, %v968_v57  ;;  %1065 = vst.msk [vmem:[#allocation2 + $0x198] sm:$0xff] %vm19_vm0, %v1000_v58  ;;  %v108_v60 = vld [vmem:[#allocation2 + $0xc0] sm:$0xff] }
 0x151   :  { %v1798_v2 = vpack.c.bf16 %v1264_v56, %v1264_v56  ;;  %v1201_v4 = vadd.f32 %v2394_v36, %v1130_v61  ;;  %v774_v5 = vpop.f32.mrf.mxu0  ;;  %v902_v6 = vpop.f32.mrf.mxu1 }
 0x152   :  { %1553 = vst.msk [vmem:[%s2784_s3 + $0x40] sm:$0xf] %vm1536_vm1, %v1766_v1  ;;  %v1233_v7 = vmax.f32 %v1169_v3, 0.0  ;;  %v969_v9 = vadd.f32 %v774_v5, %v104_v59  ;;  %v1001_v10 = vadd.f32 %v902_v6, %v136_v0  ;;  %v140_v1 = vld [vmem:[#allocation2 + $0x1c0] sm:$0xff] }
 0x153   :  { %1585 = vst.msk [vmem:[%s2784_s3 + $0xc0] sm:$0xf] %vm1536_vm1, %v1798_v2  ;;  %v1265_v8 = vmax.f32 %v1201_v4, 0.0  ;;  %v1099_v12 = vld [vmem:[#allocation2 + $0x90] sm:$0xff]  ;;  %v776_v14 = vpop.f32.mrf.mxu0  ;;  %v904_v15 = vpop.f32.mrf.mxu1 }
 0x154   :  { %v1131_v13 = vld [vmem:[#allocation2 + $0x190] sm:$0xff]  ;;  %v1767_v17 = vpack.c.bf16 %v1233_v7, %v1233_v7  ;;  %v1170_v19 = vadd.f32 %v2394_v36, %v1099_v12  ;;  %1034 = vst.msk [vmem:[#allocation2 + $0xa0] sm:$0xff] %vm19_vm0, %v969_v9  ;;  %1066 = vst.msk [vmem:[#allocation2 + $0x1a0] sm:$0xff] %vm19_vm0, %v1001_v10  ;;  %v109_v12 = vld [vmem:[#allocation2 + $0xc8] sm:$0xff] }
 0x155   :  { %v1799_v18 = vpack.c.bf16 %v1265_v8, %v1265_v8  ;;  %v1202_v20 = vadd.f32 %v2394_v36, %v1131_v13  ;;  %v777_v21 = vpop.f32.mrf.mxu0  ;;  %v905_v22 = vpop.f32.mrf.mxu1 }
 0x156   :  { %1554 = vst.msk [vmem:[%s2784_s3 + $0x44] sm:$0xf] %vm1536_vm1, %v1767_v17  ;;  %v1234_v23 = vmax.f32 %v1170_v19, 0.0  ;;  %v970_v25 = vadd.f32 %v777_v21, %v105_v11  ;;  %v1002_v26 = vadd.f32 %v905_v22, %v137_v16  ;;  %v141_v17 = vld [vmem:[#allocation2 + $0x1c8] sm:$0xff] }
 0x157   :  { %1586 = vst.msk [vmem:[%s2784_s3 + $0xc4] sm:$0xf] %vm1536_vm1, %v1799_v18  ;;  %v1266_v24 = vmax.f32 %v1202_v20, 0.0  ;;  %v1100_v28 = vld [vmem:[#allocation2 + $0x98] sm:$0xff]  ;;  %v779_v30 = vpop.f32.mrf.mxu0  ;;  %v907_v31 = vpop.f32.mrf.mxu1 }
 0x158   :  { %v1132_v29 = vld [vmem:[#allocation2 + $0x198] sm:$0xff]  ;;  %v1768_v33 = vpack.c.bf16 %v1234_v23, %v1234_v23  ;;  %v1171_v35 = vadd.f32 %v2394_v36, %v1100_v28  ;;  %1035 = vst.msk [vmem:[#allocation2 + $0xa8] sm:$0xff] %vm19_vm0, %v970_v25  ;;  %1067 = vst.msk [vmem:[#allocation2 + $0x1a8] sm:$0xff] %vm19_vm0, %v1002_v26  ;;  %v110_v28 = vld [vmem:[#allocation2 + $0xd0] sm:$0xff] }
 0x159   :  { %v1800_v34 = vpack.c.bf16 %v1266_v24, %v1266_v24  ;;  %v1203_v37 = vadd.f32 %v2394_v36, %v1132_v29  ;;  %v782_v38 = vpop.f32.mrf.mxu0  ;;  %v910_v39 = vpop.f32.mrf.mxu1 }
 0x15a   :  { %1555 = vst.msk [vmem:[%s2784_s3 + $0x48] sm:$0xf] %vm1536_vm1, %v1768_v33  ;;  %v1235_v40 = vmax.f32 %v1171_v35, 0.0  ;;  %v971_v42 = vadd.f32 %v782_v38, %v106_v27  ;;  %v1003_v43 = vadd.f32 %v910_v39, %v138_v32  ;;  %v142_v33 = vld [vmem:[#allocation2 + $0x1d0] sm:$0xff] }
 0x15b   :  { %1587 = vst.msk [vmem:[%s2784_s3 + $0xc8] sm:$0xf] %vm1536_vm1, %v1800_v34  ;;  %v1267_v41 = vmax.f32 %v1203_v37, 0.0  ;;  %v1101_v45 = vld [vmem:[#allocation2 + $0xa0] sm:$0xff]  ;;  %v784_v47 = vpop.f32.mrf.mxu0  ;;  %v912_v48 = vpop.f32.mrf.mxu1 }
 0x15c   :  { %v1133_v46 = vld [vmem:[#allocation2 + $0x1a0] sm:$0xff]  ;;  %v1769_v50 = vpack.c.bf16 %v1235_v40, %v1235_v40  ;;  %v1172_v52 = vadd.f32 %v2394_v36, %v1101_v45  ;;  %1036 = vst.msk [vmem:[#allocation2 + $0xb0] sm:$0xff] %vm19_vm0, %v971_v42  ;;  %1068 = vst.msk [vmem:[#allocation2 + $0x1b0] sm:$0xff] %vm19_vm0, %v1003_v43  ;;  %v111_v45 = vld [vmem:[#allocation2 + $0xd8] sm:$0xff] }
 0x15d   :  { %v1801_v51 = vpack.c.bf16 %v1267_v41, %v1267_v41  ;;  %v1204_v53 = vadd.f32 %v2394_v36, %v1133_v46  ;;  %v785_v54 = vpop.f32.mrf.mxu0  ;;  %v913_v55 = vpop.f32.mrf.mxu1 }
 0x15e   :  { %1556 = vst.msk [vmem:[%s2784_s3 + $0x4c] sm:$0xf] %vm1536_vm1, %v1769_v50  ;;  %v1236_v56 = vmax.f32 %v1172_v52, 0.0  ;;  %v972_v58 = vadd.f32 %v785_v54, %v107_v44  ;;  %v1004_v59 = vadd.f32 %v913_v55, %v139_v49  ;;  %v143_v50 = vld [vmem:[#allocation2 + $0x1d8] sm:$0xff] }
 0x15f   :  { %1588 = vst.msk [vmem:[%s2784_s3 + $0xcc] sm:$0xf] %vm1536_vm1, %v1801_v51  ;;  %v1268_v57 = vmax.f32 %v1204_v53, 0.0  ;;  %v1102_v61 = vld [vmem:[#allocation2 + $0xa8] sm:$0xff]  ;;  %v787_v63 = vpop.f32.mrf.mxu0  ;;  %v915_v0 = vpop.f32.mrf.mxu1 }
 0x160   :  { %v1134_v62 = vld [vmem:[#allocation2 + $0x1a8] sm:$0xff]  ;;  %v1770_v2 = vpack.c.bf16 %v1236_v56, %v1236_v56  ;;  %v1173_v4 = vadd.f32 %v2394_v36, %v1102_v61  ;;  %1037 = vst.msk [vmem:[#allocation2 + $0xb8] sm:$0xff] %vm19_vm0, %v972_v58  ;;  %1069 = vst.msk [vmem:[#allocation2 + $0x1b8] sm:$0xff] %vm19_vm0, %v1004_v59  ;;  %v112_v61 = vld [vmem:[#allocation2 + $0xe0] sm:$0xff] }
 0x161   :  { %v1802_v3 = vpack.c.bf16 %v1268_v57, %v1268_v57  ;;  %v1205_v5 = vadd.f32 %v2394_v36, %v1134_v62  ;;  %v790_v6 = vpop.f32.mrf.mxu0  ;;  %v918_v7 = vpop.f32.mrf.mxu1 }
 0x162   :  { %1557 = vst.msk [vmem:[%s2784_s3 + $0x50] sm:$0xf] %vm1536_vm1, %v1770_v2  ;;  %v1237_v8 = vmax.f32 %v1173_v4, 0.0  ;;  %v973_v10 = vadd.f32 %v790_v6, %v108_v60  ;;  %v1005_v11 = vadd.f32 %v918_v7, %v140_v1  ;;  %v144_v2 = vld [vmem:[#allocation2 + $0x1e0] sm:$0xff] }
 0x163   :  { %1589 = vst.msk [vmem:[%s2784_s3 + $0xd0] sm:$0xf] %vm1536_vm1, %v1802_v3  ;;  %v1269_v9 = vmax.f32 %v1205_v5, 0.0  ;;  %v1103_v13 = vld [vmem:[#allocation2 + $0xb0] sm:$0xff]  ;;  %v792_v15 = vpop.f32.mrf.mxu0  ;;  %v920_v16 = vpop.f32.mrf.mxu1  ;;  %v2692_v6 = vld [vmem:[%s2783_s2] ss:$0 sm:$0xff] }
 0x164   :  { %v1135_v14 = vld [vmem:[#allocation2 + $0x1b0] sm:$0xff]  ;;  %v1771_v18 = vpack.c.bf16 %v1237_v8, %v1237_v8  ;;  %v1174_v20 = vadd.f32 %v2394_v36, %v1103_v13  ;;  %1038 = vst.msk [vmem:[#allocation2 + $0xc0] sm:$0xff] %vm19_vm0, %v973_v10  ;;  %1070 = vst.msk [vmem:[#allocation2 + $0x1c0] sm:$0xff] %vm19_vm0, %v1005_v11  ;;  %v113_v13 = vld [vmem:[#allocation2 + $0xe8] sm:$0xff] }
 0x165   :  { %v1803_v19 = vpack.c.bf16 %v1269_v9, %v1269_v9  ;;  %v1206_v21 = vadd.f32 %v2394_v36, %v1135_v14  ;;  %v793_v22 = vpop.f32.mrf.mxu0  ;;  %v921_v23 = vpop.f32.mrf.mxu1 }
 0x166   :  { %1558 = vst.msk [vmem:[%s2784_s3 + $0x54] sm:$0xf] %vm1536_vm1, %v1771_v18  ;;  %v1238_v24 = vmax.f32 %v1174_v20, 0.0  ;;  %v974_v26 = vadd.f32 %v793_v22, %v109_v12  ;;  %v1006_v27 = vadd.f32 %v921_v23, %v141_v17  ;;  %v145_v18 = vld [vmem:[#allocation2 + $0x1e8] sm:$0xff] }
 0x167   :  { %1590 = vst.msk [vmem:[%s2784_s3 + $0xd4] sm:$0xf] %vm1536_vm1, %v1803_v19  ;;  %v1270_v25 = vmax.f32 %v1206_v21, 0.0  ;;  %v1104_v29 = vld [vmem:[#allocation2 + $0xb8] sm:$0xff]  ;;  %v795_v31 = vpop.f32.mrf.mxu0  ;;  %v923_v32 = vpop.f32.mrf.mxu1 }
 0x168   :  { %v1136_v30 = vld [vmem:[#allocation2 + $0x1b8] sm:$0xff]  ;;  %v1772_v34 = vpack.c.bf16 %v1238_v24, %v1238_v24  ;;  %v1175_v37 = vadd.f32 %v2394_v36, %v1104_v29  ;;  %1039 = vst.msk [vmem:[#allocation2 + $0xc8] sm:$0xff] %vm19_vm0, %v974_v26  ;;  %1071 = vst.msk [vmem:[#allocation2 + $0x1c8] sm:$0xff] %vm19_vm0, %v1006_v27  ;;  %v114_v29 = vld [vmem:[#allocation2 + $0xf0] sm:$0xff] }
 0x169   :  { %v1804_v35 = vpack.c.bf16 %v1270_v25, %v1270_v25  ;;  %v1207_v38 = vadd.f32 %v2394_v36, %v1136_v30  ;;  %v798_v39 = vpop.f32.mrf.mxu0  ;;  %v926_v40 = vpop.f32.mrf.mxu1 }
 0x16a   :  { %1559 = vst.msk [vmem:[%s2784_s3 + $0x58] sm:$0xf] %vm1536_vm1, %v1772_v34  ;;  %v1239_v41 = vmax.f32 %v1175_v37, 0.0  ;;  %v975_v43 = vadd.f32 %v798_v39, %v110_v28  ;;  %v1007_v44 = vadd.f32 %v926_v40, %v142_v33  ;;  %v146_v34 = vld [vmem:[#allocation2 + $0x1f0] sm:$0xff] }
 0x16b   :  { %1591 = vst.msk [vmem:[%s2784_s3 + $0xd8] sm:$0xf] %vm1536_vm1, %v1804_v35  ;;  %v1271_v42 = vmax.f32 %v1207_v38, 0.0  ;;  %v1105_v46 = vld [vmem:[#allocation2 + $0xc0] sm:$0xff]  ;;  %v800_v48 = vpop.f32.mrf.mxu0  ;;  %v928_v49 = vpop.f32.mrf.mxu1 }
 0x16c   :  { %v1137_v47 = vld [vmem:[#allocation2 + $0x1c0] sm:$0xff]  ;;  %v1773_v51 = vpack.c.bf16 %v1239_v41, %v1239_v41  ;;  %v1176_v53 = vadd.f32 %v2394_v36, %v1105_v46  ;;  %1040 = vst.msk [vmem:[#allocation2 + $0xd0] sm:$0xff] %vm19_vm0, %v975_v43  ;;  %1072 = vst.msk [vmem:[#allocation2 + $0x1d0] sm:$0xff] %vm19_vm0, %v1007_v44  ;;  %v115_v46 = vld [vmem:[#allocation2 + $0xf8] sm:$0xff] }
 0x16d   :  { %v1805_v52 = vpack.c.bf16 %v1271_v42, %v1271_v42  ;;  %v1208_v54 = vadd.f32 %v2394_v36, %v1137_v47  ;;  %v801_v55 = vpop.f32.mrf.mxu0  ;;  %v929_v56 = vpop.f32.mrf.mxu1 }
 0x16e   :  { %1560 = vst.msk [vmem:[%s2784_s3 + $0x5c] sm:$0xf] %vm1536_vm1, %v1773_v51  ;;  %v1240_v57 = vmax.f32 %v1176_v53, 0.0  ;;  %v976_v59 = vadd.f32 %v801_v55, %v111_v45  ;;  %v1008_v60 = vadd.f32 %v929_v56, %v143_v50  ;;  %v147_v51 = vld [vmem:[#allocation2 + $0x1f8] sm:$0xff] }
 0x16f   :  { %1592 = vst.msk [vmem:[%s2784_s3 + $0xdc] sm:$0xf] %vm1536_vm1, %v1805_v52  ;;  %v1272_v58 = vmax.f32 %v1208_v54, 0.0  ;;  %v1106_v62 = vld [vmem:[#allocation2 + $0xc8] sm:$0xff]  ;;  %v803_v0 = vpop.f32.mrf.mxu0  ;;  %v931_v1 = vpop.f32.mrf.mxu1 }
 0x170   :  { %v1138_v63 = vld [vmem:[#allocation2 + $0x1c8] sm:$0xff]  ;;  %v1774_v3 = vpack.c.bf16 %v1240_v57, %v1240_v57  ;;  %v1177_v5 = vadd.f32 %v2394_v36, %v1106_v62  ;;  %1041 = vst.msk [vmem:[#allocation2 + $0xd8] sm:$0xff] %vm19_vm0, %v976_v59  ;;  %1073 = vst.msk [vmem:[#allocation2 + $0x1d8] sm:$0xff] %vm19_vm0, %v1008_v60 }
 0x171   :  { %v1806_v4 = vpack.c.bf16 %v1272_v58, %v1272_v58  ;;  %v1209_v7 = vadd.f32 %v2692_v6, %v1138_v63  ;;  %v806_v8 = vpop.f32.mrf.mxu0  ;;  %v934_v9 = vpop.f32.mrf.mxu1 }
 0x172   :  { %1561 = vst.msk [vmem:[%s2784_s3 + $0x60] sm:$0xf] %vm1536_vm1, %v1774_v3  ;;  %v1241_v36 = vmax.f32 %v1177_v5, 0.0  ;;  %v977_v11 = vadd.f32 %v806_v8, %v112_v61  ;;  %v1009_v12 = vadd.f32 %v934_v9, %v144_v2 }
 0x173   :  { %1593 = vst.msk [vmem:[%s2784_s3 + $0xe0] sm:$0xf] %vm1536_vm1, %v1806_v4  ;;  %v1273_v10 = vmax.f32 %v1209_v7, 0.0  ;;  %v1107_v14 = vld [vmem:[#allocation2 + $0xd0] sm:$0xff]  ;;  %v808_v16 = vpop.f32.mrf.mxu0  ;;  %v936_v17 = vpop.f32.mrf.mxu1 }
 0x174   :  { %v1139_v15 = vld [vmem:[#allocation2 + $0x1d0] sm:$0xff]  ;;  %v1775_v19 = vpack.c.bf16 %v1241_v36, %v1241_v36  ;;  %v1178_v21 = vadd.f32 %v2692_v6, %v1107_v14  ;;  %1042 = vst.msk [vmem:[#allocation2 + $0xe0] sm:$0xff] %vm19_vm0, %v977_v11  ;;  %1074 = vst.msk [vmem:[#allocation2 + $0x1e0] sm:$0xff] %vm19_vm0, %v1009_v12 }
 0x175   :  { %v1807_v20 = vpack.c.bf16 %v1273_v10, %v1273_v10  ;;  %v1210_v22 = vadd.f32 %v2692_v6, %v1139_v15  ;;  %v809_v23 = vpop.f32.mrf.mxu0  ;;  %v937_v24 = vpop.f32.mrf.mxu1 }
 0x176   :  { %1562 = vst.msk [vmem:[%s2784_s3 + $0x64] sm:$0xf] %vm1536_vm1, %v1775_v19  ;;  %v1242_v25 = vmax.f32 %v1178_v21, 0.0  ;;  %v978_v27 = vadd.f32 %v809_v23, %v113_v13  ;;  %v1010_v28 = vadd.f32 %v937_v24, %v145_v18 }
 0x177   :  { %1594 = vst.msk [vmem:[%s2784_s3 + $0xe4] sm:$0xf] %vm1536_vm1, %v1807_v20  ;;  %v1274_v26 = vmax.f32 %v1210_v22, 0.0  ;;  %v1108_v30 = vld [vmem:[#allocation2 + $0xd8] sm:$0xff]  ;;  %v811_v32 = vpop.f32.mrf.mxu0  ;;  %v939_v33 = vpop.f32.mrf.mxu1 }
 0x178   :  { %v1140_v31 = vld [vmem:[#allocation2 + $0x1d8] sm:$0xff]  ;;  %v1776_v35 = vpack.c.bf16 %v1242_v25, %v1242_v25  ;;  %v1179_v38 = vadd.f32 %v2692_v6, %v1108_v30  ;;  %1043 = vst.msk [vmem:[#allocation2 + $0xe8] sm:$0xff] %vm19_vm0, %v978_v27  ;;  %1075 = vst.msk [vmem:[#allocation2 + $0x1e8] sm:$0xff] %vm19_vm0, %v1010_v28 }
 0x179   :  { %v1808_v37 = vpack.c.bf16 %v1274_v26, %v1274_v26  ;;  %v1211_v39 = vadd.f32 %v2692_v6, %v1140_v31  ;;  %v814_v40 = vpop.f32.mrf.mxu0  ;;  %v942_v41 = vpop.f32.mrf.mxu1 }
 0x17a   :  { %1563 = vst.msk [vmem:[%s2784_s3 + $0x68] sm:$0xf] %vm1536_vm1, %v1776_v35  ;;  %v1243_v42 = vmax.f32 %v1179_v38, 0.0  ;;  %v979_v44 = vadd.f32 %v814_v40, %v114_v29  ;;  %v1011_v45 = vadd.f32 %v942_v41, %v146_v34 }
 0x17b   :  { %1595 = vst.msk [vmem:[%s2784_s3 + $0xe8] sm:$0xf] %vm1536_vm1, %v1808_v37  ;;  %v1275_v43 = vmax.f32 %v1211_v39, 0.0  ;;  %v1109_v47 = vld [vmem:[#allocation2 + $0xe0] sm:$0xff]  ;;  %v816_v49 = vpop.f32.mrf.mxu0  ;;  %v944_v50 = vpop.f32.mrf.mxu1 }
 0x17c   :  { %v1141_v48 = vld [vmem:[#allocation2 + $0x1e0] sm:$0xff]  ;;  %v1777_v52 = vpack.c.bf16 %v1243_v42, %v1243_v42  ;;  %v1180_v54 = vadd.f32 %v2692_v6, %v1109_v47  ;;  %1044 = vst.msk [vmem:[#allocation2 + $0xf0] sm:$0xff] %vm19_vm0, %v979_v44  ;;  %1076 = vst.msk [vmem:[#allocation2 + $0x1f0] sm:$0xff] %vm19_vm0, %v1011_v45 }
 0x17d   :  { %v1809_v53 = vpack.c.bf16 %v1275_v43, %v1275_v43  ;;  %v1212_v55 = vadd.f32 %v2692_v6, %v1141_v48  ;;  %v817_v56 = vpop.f32.mrf.mxu0  ;;  %v945_v57 = vpop.f32.mrf.mxu1 }
 0x17e   :  { %1564 = vst.msk [vmem:[%s2784_s3 + $0x6c] sm:$0xf] %vm1536_vm1, %v1777_v52  ;;  %v1244_v58 = vmax.f32 %v1180_v54, 0.0  ;;  %v980_v60 = vadd.f32 %v817_v56, %v115_v46  ;;  %v1012_v61 = vadd.f32 %v945_v57, %v147_v51 }
 0x17f   :  { %1596 = vst.msk [vmem:[%s2784_s3 + $0xec] sm:$0xf] %vm1536_vm1, %v1809_v53  ;;  %v1276_v59 = vmax.f32 %v1212_v55, 0.0  ;;  %v1110_v62 = vld [vmem:[#allocation2 + $0xe8] sm:$0xff]  ;;  %v819_v0 = vpop.f32.mrf.mxu0  ;;  %v947_v1 = vpop.f32.mrf.mxu1 }
 0x180   :  { %v1142_v63 = vld [vmem:[#allocation2 + $0x1e8] sm:$0xff]  ;;  %v1778_v2 = vpack.c.bf16 %v1244_v58, %v1244_v58  ;;  %v1181_v4 = vadd.f32 %v2692_v6, %v1110_v62  ;;  %1045 = vst.msk [vmem:[#allocation2 + $0xf8] sm:$0xff] %vm19_vm0, %v980_v60  ;;  %1077 = vst.msk [vmem:[#allocation2 + $0x1f8] sm:$0xff] %vm19_vm0, %v1012_v61 }
 0x181   :  { %v1810_v3 = vpack.c.bf16 %v1276_v59, %v1276_v59  ;;  %v1213_v5 = vadd.f32 %v2692_v6, %v1142_v63 }
 0x182   :  { %1565 = vst.msk [vmem:[%s2784_s3 + $0x70] sm:$0xf] %vm1536_vm1, %v1778_v2  ;;  %v1245_v7 = vmax.f32 %v1181_v4, 0.0 }
 0x183   :  { %1597 = vst.msk [vmem:[%s2784_s3 + $0xf0] sm:$0xf] %vm1536_vm1, %v1810_v3  ;;  %v1277_v8 = vmax.f32 %v1213_v5, 0.0  ;;  %v1111_v9 = vld [vmem:[#allocation2 + $0xf0] sm:$0xff] }
 0x184   :  { %v1143_v36 = vld [vmem:[#allocation2 + $0x1f0] sm:$0xff]  ;;  %v1779_v10 = vpack.c.bf16 %v1245_v7, %v1245_v7  ;;  %v1182_v12 = vadd.f32 %v2692_v6, %v1111_v9 }
 0x185   :  { %v1811_v11 = vpack.c.bf16 %v1277_v8, %v1277_v8  ;;  %v1214_v13 = vadd.f32 %v2692_v6, %v1143_v36 }
 0x186   :  { %1566 = vst.msk [vmem:[%s2784_s3 + $0x74] sm:$0xf] %vm1536_vm1, %v1779_v10  ;;  %v1246_v14 = vmax.f32 %v1182_v12, 0.0 }
 0x187   :  { %1598 = vst.msk [vmem:[%s2784_s3 + $0xf4] sm:$0xf] %vm1536_vm1, %v1811_v11  ;;  %v1278_v15 = vmax.f32 %v1214_v13, 0.0  ;;  %v1112_v16 = vld [vmem:[#allocation2 + $0xf8] sm:$0xff] }
 0x188   :  { %v1144_v17 = vld [vmem:[#allocation2 + $0x1f8] sm:$0xff]  ;;  %v1780_v18 = vpack.c.bf16 %v1246_v14, %v1246_v14  ;;  %v1183_v20 = vadd.f32 %v2692_v6, %v1112_v16 }
 0x189   :  { %v1812_v19 = vpack.c.bf16 %v1278_v15, %v1278_v15  ;;  %v1215_v21 = vadd.f32 %v2692_v6, %v1144_v17 }
 0x18a   :  { %1567 = vst.msk [vmem:[%s2784_s3 + $0x78] sm:$0xf] %vm1536_vm1, %v1780_v18  ;;  %v1247_v22 = vmax.f32 %v1183_v20, 0.0 }
 0x18b   :  { %1599 = vst.msk [vmem:[%s2784_s3 + $0xf8] sm:$0xf] %vm1536_vm1, %v1812_v19  ;;  %v1279_v23 = vmax.f32 %v1215_v21, 0.0 }
 0x18c   :  { %v1781_v24 = vpack.c.bf16 %v1247_v22, %v1247_v22 }
 0x18d   :  { %v1813_v25 = vpack.c.bf16 %v1279_v23, %v1279_v23 }
 0x18e   :  { %1568 = vst.msk [vmem:[%s2784_s3 + $0x7c] sm:$0xf] %vm1536_vm1, %v1781_v24 }
 0x18f   :  { %1600 = vst.msk [vmem:[%s2784_s3 + $0xfc] sm:$0xf] %vm1536_vm1, %v1813_v25 }

// kernel: quantized_resnet18_forward.26
= control target key start
LH: loop header
LB: loop body
LE: loop exit
PB: predicated region body
PF: predicated region fallthrough
CT: control target
= control target key end

     0   :  { %s254_s0 = inlined_call_operand.vmem [shape: bf16[9,16,512], index: 0, kind: input, shape index: {}]   ;;  %s255_s1 = inlined_call_operand.vmem [shape: bf16[16,512], index: 1, kind: output, shape index: {}]  }
   0x1   :  { %v8_v0 = vld [vmem:[%s254_s0] sm:$0xff]  ;;  %v9_v6 = vld [vmem:[%s254_s0 + $0x8] sm:$0xff]  ;;  %v10_v15 = vld [vmem:[%s254_s0 + $0x10] sm:$0xff] }
   0x2   :  { %v92_v1 = vld [vmem:[%s254_s0 + $0x20] sm:$0xff]  ;;  %v93_v7 = vld [vmem:[%s254_s0 + $0x28] sm:$0xff]  ;;  %v94_v16 = vld [vmem:[%s254_s0 + $0x30] sm:$0xff] }
   0x3   :  { %v96_v2 = vld [vmem:[%s254_s0 + $0x40] sm:$0xff]  ;;  %v17_v3 = vmax.bf16 %v92_v1, %v8_v0  ;;  %v97_v8 = vld [vmem:[%s254_s0 + $0x48] sm:$0xff]  ;;  %v18_v10 = vmax.bf16 %v93_v7, %v9_v6  ;;  %v98_v17 = vld [vmem:[%s254_s0 + $0x50] sm:$0xff]  ;;  %v19_v20 = vmax.bf16 %v94_v16, %v10_v15 }
   0x4   :  { %v100_v4 = vld [vmem:[%s254_s0 + $0x60] sm:$0xff]  ;;  %v101_v13 = vld [vmem:[%s254_s0 + $0x68] sm:$0xff]  ;;  %v102_v24 = vld [vmem:[%s254_s0 + $0x70] sm:$0xff] }
   0x5   :  { %v26_v5 = vmax.bf16 %v96_v2, %v17_v3  ;;  %v104_v9 = vld [vmem:[%s254_s0 + $0x80] sm:$0xff]  ;;  %v27_v14 = vmax.bf16 %v97_v8, %v18_v10  ;;  %v105_v19 = vld [vmem:[%s254_s0 + $0x88] sm:$0xff]  ;;  %v28_v26 = vmax.bf16 %v98_v17, %v19_v20  ;;  %v11_v27 = vld [vmem:[%s254_s0 + $0x18] sm:$0xff] }
   0x6   :  { %v108_v12 = vld [vmem:[%s254_s0 + $0xa0] sm:$0xff]  ;;  %v109_v23 = vld [vmem:[%s254_s0 + $0xa8] sm:$0xff]  ;;  %v95_v28 = vld [vmem:[%s254_s0 + $0x38] sm:$0xff] }
   0x7   :  { %v35_v11 = vmax.bf16 %v100_v4, %v26_v5  ;;  %v112_v21 = vld [vmem:[%s254_s0 + $0xc0] sm:$0xff]  ;;  %v36_v22 = vmax.bf16 %v101_v13, %v27_v14  ;;  %v99_v29 = vld [vmem:[%s254_s0 + $0x58] sm:$0xff]  ;;  %v106_v32 = vld [vmem:[%s254_s0 + $0x90] sm:$0xff]  ;;  %v20_v33 = vmax.bf16 %v95_v28, %v11_v27  ;;  %v37_v36 = vmax.bf16 %v102_v24, %v28_v26 }
   0x8   :  { %v116_v30 = vld [vmem:[%s254_s0 + $0xe0] sm:$0xff]  ;;  %v113_v35 = vld [vmem:[%s254_s0 + $0xc8] sm:$0xff]  ;;  %v103_v37 = vld [vmem:[%s254_s0 + $0x78] sm:$0xff] }
   0x9   :  { %v44_v18 = vmax.bf16 %v104_v9, %v35_v11  ;;  %v45_v31 = vmax.bf16 %v105_v19, %v36_v22  ;;  %v120_v38 = vld [vmem:[%s254_s0 + $0x100] sm:$0xff]  ;;  %v110_v40 = vld [vmem:[%s254_s0 + $0xb0] sm:$0xff]  ;;  %v29_v41 = vmax.bf16 %v99_v29, %v20_v33  ;;  %v117_v43 = vld [vmem:[%s254_s0 + $0xe8] sm:$0xff]  ;;  %v46_v44 = vmax.bf16 %v106_v32, %v37_v36 }
   0xa   :  { %v107_v45 = vld [vmem:[%s254_s0 + $0x98] sm:$0xff]  ;;  %v114_v47 = vld [vmem:[%s254_s0 + $0xd0] sm:$0xff]  ;;  %v121_v50 = vld [vmem:[%s254_s0 + $0x108] sm:$0xff] }
   0xb   :  { %v53_v25 = vmax.bf16 %v108_v12, %v44_v18  ;;  %v54_v39 = vmax.bf16 %v109_v23, %v45_v31  ;;  %v38_v48 = vmax.bf16 %v103_v37, %v29_v41  ;;  %v55_v51 = vmax.bf16 %v110_v40, %v46_v44  ;;  %v111_v52 = vld [vmem:[%s254_s0 + $0xb8] sm:$0xff]  ;;  %v118_v54 = vld [vmem:[%s254_s0 + $0xf0] sm:$0xff] }
   0xc   :  { %v115_v57 = vld [vmem:[%s254_s0 + $0xd8] sm:$0xff]  ;;  %v122_v59 = vld [vmem:[%s254_s0 + $0x110] sm:$0xff] }
   0xd   :  { %v62_v34 = vmax.bf16 %v112_v21, %v53_v25  ;;  %v63_v46 = vmax.bf16 %v113_v35, %v54_v39  ;;  %v47_v55 = vmax.bf16 %v107_v45, %v38_v48  ;;  %v64_v56 = vmax.bf16 %v114_v47, %v55_v51  ;;  %v119_v62 = vld [vmem:[%s254_s0 + $0xf8] sm:$0xff] }
   0xe   :  { %v123_v1 = vld [vmem:[%s254_s0 + $0x118] sm:$0xff] }
   0xf   :  { %v71_v42 = vmax.bf16 %v116_v30, %v62_v34  ;;  %v72_v53 = vmax.bf16 %v117_v43, %v63_v46  ;;  %v56_v60 = vmax.bf16 %v111_v52, %v47_v55  ;;  %v73_v61 = vmax.bf16 %v118_v54, %v64_v56 }
  0x11   :  { %v80_v49 = vmax.bf16 %v120_v38, %v71_v42  ;;  %v81_v58 = vmax.bf16 %v121_v50, %v72_v53  ;;  %v65_v63 = vmax.bf16 %v115_v57, %v56_v60  ;;  %v82_v0 = vmax.bf16 %v122_v59, %v73_v61 }
  0x13   :  { %84 = vst [vmem:[%s255_s1] sm:$0xff] %v80_v49  ;;  %85 = vst [vmem:[%s255_s1 + $0x8] sm:$0xff] %v81_v58  ;;  %v74_v2 = vmax.bf16 %v119_v62, %v65_v63 }
  0x14   :  { %86 = vst [vmem:[%s255_s1 + $0x10] sm:$0xff] %v82_v0 }
  0x15   :  { %v83_v3 = vmax.bf16 %v123_v1, %v74_v2 }
  0x17   :  { %87 = vst [vmem:[%s255_s1 + $0x18] sm:$0xff] %v83_v3 }

// kernel: quantized_resnet18_forward.27
= control target key start
LH: loop header
LB: loop body
LE: loop exit
PB: predicated region body
PF: predicated region fallthrough
CT: control target
= control target key end

     0   :  { %vm19_vm0 = vcmask 523264   ;;  %vm1058_vm1 = vcmask 519168   ;;  %s1886_s1 = inlined_call_operand.vmem [shape: bf16[576,64], index: 1, kind: input, shape index: {}]   ;;  %s1887_s0 = inlined_call_operand.vmem [shape: bf16[128,576], index: 0, kind: input, shape index: {}]   ;;  %s1888_s2 = inlined_call_operand.vmem [shape: f32[1,64], index: 2, kind: input, shape index: {}]   ;;  %s1889_s3 = inlined_call_operand.vmem [shape: bf16[128,64], index: 3, kind: output, shape index: {}]  }
   0x1   :  { %v1369_v0 = vld [vmem:[%s1886_s1 + $0x78] sm:$0xff]   ;;  %v1373_v4 = vld [vmem:[%s1886_s1 + $0x70] sm:$0xff]   ;;  %v1377_v8 = vld [vmem:[%s1886_s1 + $0x68] sm:$0xff]  }
   0x2   :  { %v1370_v1 = vld [vmem:[%s1886_s1 + $0xf8] sm:$0xff]   ;;  %1196 = vmatprep.subr.bf16.mxu0 %v1369_v0  ;;  %v1374_v5 = vld [vmem:[%s1886_s1 + $0xf0] sm:$0xff]   ;;  %v1378_v9 = vld [vmem:[%s1886_s1 + $0xe8] sm:$0xff]  }
   0x3   :  { %v1371_v2 = vld [vmem:[%s1886_s1 + $0x38] sm:$0xff]   ;;  %1260 = vmatprep.subr.bf16.mxu1 %v1370_v1  ;;  %v1375_v6 = vld [vmem:[%s1886_s1 + $0x30] sm:$0xff]   ;;  %v1379_v10 = vld [vmem:[%s1886_s1 + $0x28] sm:$0xff]  }
   0x4   :  { %v1372_v3 = vld [vmem:[%s1886_s1 + $0xb8] sm:$0xff]   ;;  %1197 = vmatpush3.bf16.msra.mxu0 %v1371_v2  ;;  %v1376_v7 = vld [vmem:[%s1886_s1 + $0xb0] sm:$0xff]   ;;  %v1380_v11 = vld [vmem:[%s1886_s1 + $0xa8] sm:$0xff]  }
   0x5   :  { %1261 = vmatpush3.bf16.msra.mxu1 %v1372_v3  ;;  %1198 = vmatprep.subr.bf16.mxu0 %v1373_v4  ;;  %v1381_v12 = vld [vmem:[%s1886_s1 + $0x60] sm:$0xff]   ;;  %v1385_v16 = vld [vmem:[%s1886_s1 + $0x58] sm:$0xff]   ;;  %v1389_v20 = vld [vmem:[%s1886_s1 + $0x50] sm:$0xff]  }
   0x6   :  { %1262 = vmatprep.subr.bf16.mxu1 %v1374_v5  ;;  %v1382_v13 = vld [vmem:[%s1886_s1 + $0xe0] sm:$0xff]   ;;  %v1386_v17 = vld [vmem:[%s1886_s1 + $0xd8] sm:$0xff]   ;;  %v1390_v21 = vld [vmem:[%s1886_s1 + $0xd0] sm:$0xff]  }
   0x7   :  { %v1383_v14 = vld [vmem:[%s1886_s1 + $0x20] sm:$0xff]   ;;  %v1387_v18 = vld [vmem:[%s1886_s1 + $0x18] sm:$0xff]   ;;  %v1391_v22 = vld [vmem:[%s1886_s1 + $0x10] sm:$0xff]  }
   0x8   :  { %1199 = vmatpush3.bf16.msra.mxu0 %v1375_v6  ;;  %v1384_v15 = vld [vmem:[%s1886_s1 + $0xa0] sm:$0xff]   ;;  %v1388_v19 = vld [vmem:[%s1886_s1 + $0x98] sm:$0xff]   ;;  %v1392_v23 = vld [vmem:[%s1886_s1 + $0x90] sm:$0xff]  }
   0x9   :  { %1263 = vmatpush3.bf16.msra.mxu1 %v1376_v7  ;;  %1200 = vmatprep.subr.bf16.mxu0 %v1377_v8  ;;  %v1393_v24 = vld [vmem:[%s1886_s1 + $0x48] sm:$0xff]   ;;  %v1397_v28 = vld [vmem:[%s1886_s1 + $0x40] sm:$0xff]   ;;  %v1407_v36 = vld [vmem:[%s1886_s1 + $0x118] sm:$0xff]  }
   0xa   :  { %1264 = vmatprep.subr.bf16.mxu1 %v1378_v9  ;;  %v1394_v25 = vld [vmem:[%s1886_s1 + $0xc8] sm:$0xff]   ;;  %v1398_v29 = vld [vmem:[%s1886_s1 + $0xc0] sm:$0xff]   ;;  %v1420_v42 = vld [vmem:[%s1886_s1 + $0x110] sm:$0xff]  }
   0xb   :  { %v1395_v26 = vld [vmem:[%s1886_s1 + $0x8] sm:$0xff]   ;;  %v1399_v30 = vld [vmem:[%s1886_s1] sm:$0xff]   ;;  %v1416_v43 = vld [vmem:[%s1887_s0 + $0x5c] ss:$20 sps:$4 sm:$0xff]  }
   0xc   :  { %1201 = vmatpush3.bf16.msra.mxu0 %v1379_v10  ;;  %v1396_v27 = vld [vmem:[%s1886_s1 + $0x88] sm:$0xff]   ;;  %v1400_v31 = vld [vmem:[%s1886_s1 + $0x80] sm:$0xff]   ;;  %v1421_v47 = vld [vmem:[%s1887_s0 + $0x7c] ss:$20 sps:$4 sm:$0xff]  }
   0xd   :  { %1265 = vmatpush3.bf16.msra.mxu1 %v1380_v11  ;;  %1202 = vmatprep.subr.bf16.mxu0 %v1381_v12  ;;  %v1401_v32 = vld [vmem:[%s1887_s0] ss:$20 sps:$4 sm:$0xff]   ;;  %v1403_v33 = vld [vmem:[%s1887_s0 + $0x4] ss:$20 sps:$4 sm:$0xff]   ;;  %v1404_v34 = vld [vmem:[%s1887_s0 + $0x8] ss:$20 sps:$4 sm:$0xff]  }
   0xe   :  { %1266 = vmatprep.subr.bf16.mxu1 %v1382_v13  ;;  %v1406_v35 = vld [vmem:[%s1887_s0 + $0xc] ss:$20 sps:$4 sm:$0xff]   ;;  %645 = vmatprep.mubr.bf16.mxu0 %v1403_v33  ;;  %v1410_v38 = vld [vmem:[%s1887_s0 + $0x34] ss:$20 sps:$4 sm:$0xff]   ;;  %v1413_v40 = vld [vmem:[%s1887_s0 + $0x30] ss:$20 sps:$4 sm:$0xff]  }
   0xf   :  { %742 = vmatprep.mubr.bf16.mxu1 %v1406_v35  ;;  %v1408_v37 = vld [vmem:[%s1887_s0 + $0x2c] ss:$20 sps:$4 sm:$0xff]   ;;  %v1412_v39 = vld [vmem:[%s1887_s0 + $0x28] ss:$20 sps:$4 sm:$0xff]   ;;  %v1418_v44 = vld [vmem:[%s1887_s0 + $0x50] ss:$20 sps:$4 sm:$0xff]  }
  0x10   :  { %1203 = vmatpush3.bf16.msra.mxu0 %v1383_v14  ;;  %v1414_v41 = vld [vmem:[%s1887_s0 + $0x54] ss:$20 sps:$4 sm:$0xff]   ;;  %v1419_v45 = vld [vmem:[%s1887_s0 + $0x58] ss:$20 sps:$4 sm:$0xff]   ;;  %v1446_v49 = vld [vmem:[%s1886_s1 + $0x100] sm:$0xff]   ;;  %v1461_v12 = vmov 0.0  }
  0x11   :  { %1267 = vmatpush3.bf16.msra.mxu1 %v1384_v15  ;;  %1204 = vmatprep.subr.bf16.mxu0 %v1385_v16  ;;  %v1433_v46 = vld [vmem:[%s1886_s1 + $0x108] sm:$0xff]   ;;  %v1423_v48 = vld [vmem:[%s1887_s0 + $0x84] ss:$20 sps:$4 sm:$0xff]   ;;  %v1426_v51 = vld [vmem:[%s1887_s0 + $0x80] ss:$20 sps:$4 sm:$0xff]   ;;  %22 = vst.msk [vmem:[#allocation2 + $0x10] sm:$0xff] %vm19_vm0, %v1461_v12 }
  0x12   :  { %1268 = vmatprep.subr.bf16.mxu1 %v1386_v17  ;;  %v1425_v50 = vld [vmem:[%s1887_s0 + $0x78] ss:$20 sps:$4 sm:$0xff]   ;;  %v1431_v54 = vld [vmem:[%s1887_s0 + $0xa0] ss:$20 sps:$4 sm:$0xff]   ;;  %v1432_v55 = vld [vmem:[%s1887_s0 + $0xa8] ss:$20 sps:$4 sm:$0xff]  }
  0x13   :  { %v1427_v52 = vld [vmem:[%s1887_s0 + $0xa4] ss:$20 sps:$4 sm:$0xff]   ;;  %v1429_v53 = vld [vmem:[%s1887_s0 + $0xac] ss:$20 sps:$4 sm:$0xff]   ;;  %v1436_v57 = vld [vmem:[%s1887_s0 + $0xd4] ss:$20 sps:$4 sm:$0xff]  }
  0x14   :  { %1205 = vmatpush3.bf16.msra.mxu0 %v1387_v18  ;;  %v1434_v56 = vld [vmem:[%s1887_s0 + $0xcc] ss:$20 sps:$4 sm:$0xff]   ;;  %v1438_v58 = vld [vmem:[%s1887_s0 + $0xc8] ss:$20 sps:$4 sm:$0xff]   ;;  %v1439_v59 = vld [vmem:[%s1887_s0 + $0xd0] ss:$20 sps:$4 sm:$0xff]  }
  0x15   :  { %1269 = vmatpush3.bf16.msra.mxu1 %v1388_v19  ;;  %1206 = vmatprep.subr.bf16.mxu0 %v1389_v20  ;;  %v1440_v60 = vld [vmem:[%s1887_s0 + $0xf4] ss:$20 sps:$4 sm:$0xff]   ;;  %v1442_v61 = vld [vmem:[%s1887_s0 + $0xfc] ss:$20 sps:$4 sm:$0xff]   ;;  %v1445_v63 = vld [vmem:[%s1887_s0 + $0xf8] ss:$20 sps:$4 sm:$0xff]  }
  0x16   :  { %1270 = vmatprep.subr.bf16.mxu1 %v1390_v21  ;;  %v1444_v62 = vld [vmem:[%s1887_s0 + $0xf0] ss:$20 sps:$4 sm:$0xff]   ;;  %v1451_v2 = vld [vmem:[%s1887_s0 + $0x118] ss:$20 sps:$4 sm:$0xff]   ;;  %v1452_v3 = vld [vmem:[%s1887_s0 + $0x120] ss:$20 sps:$4 sm:$0xff]  }
  0x17   :  { %v1447_v0 = vld [vmem:[%s1887_s0 + $0x11c] ss:$20 sps:$4 sm:$0xff]   ;;  %v1449_v1 = vld [vmem:[%s1887_s0 + $0x124] ss:$20 sps:$4 sm:$0xff]   ;;  %v1457_v8 = vld [vmem:[%s1887_s0 + $0x60] ss:$20 sps:$4 sm:$0xff]  }
  0x18   :  { %1207 = vmatpush3.bf16.msra.mxu0 %v1391_v22  ;;  %v1453_v4 = vld [vmem:[%s1887_s0 + $0x10] ss:$20 sps:$4 sm:$0xff]   ;;  %v1455_v6 = vld [vmem:[%s1887_s0 + $0x38] ss:$20 sps:$4 sm:$0xff]   ;;  %v1458_v9 = vld [vmem:[%s1887_s0 + $0x100] ss:$20 sps:$4 sm:$0xff]  }
  0x19   :  { %1271 = vmatpush3.bf16.msra.mxu1 %v1392_v23  ;;  %1208 = vmatprep.subr.bf16.mxu0 %v1393_v24  ;;  %v1454_v5 = vld [vmem:[%s1887_s0 + $0xb0] ss:$20 sps:$4 sm:$0xff]   ;;  %v1456_v7 = vld [vmem:[%s1887_s0 + $0xd8] ss:$20 sps:$4 sm:$0xff]   ;;  %v1459_v10 = vld [vmem:[%s1887_s0 + $0x88] ss:$20 sps:$4 sm:$0xff]  }
  0x1a   :  { %1272 = vmatprep.subr.bf16.mxu1 %v1394_v25  ;;  %v1460_v11 = vld [vmem:[%s1887_s0 + $0x128] ss:$20 sps:$4 sm:$0xff]   ;;  %20 = vst.msk [vmem:[#allocation2] sm:$0xff] %vm19_vm0, %v1461_v12  ;;  %21 = vst.msk [vmem:[#allocation2 + $0x8] sm:$0xff] %vm19_vm0, %v1461_v12 }
  0x1b   :  { %23 = vst.msk [vmem:[#allocation2 + $0x18] sm:$0xff] %vm19_vm0, %v1461_v12  ;;  %24 = vst.msk [vmem:[#allocation2 + $0x20] sm:$0xff] %vm19_vm0, %v1461_v12 }
  0x1c   :  { %1209 = vmatpush3.bf16.msra.mxu0 %v1395_v26  ;;  %25 = vst.msk [vmem:[#allocation2 + $0x28] sm:$0xff] %vm19_vm0, %v1461_v12  ;;  %26 = vst.msk [vmem:[#allocation2 + $0x30] sm:$0xff] %vm19_vm0, %v1461_v12 }
  0x1d   :  { %1273 = vmatpush3.bf16.msra.mxu1 %v1396_v27  ;;  %1210 = vmatprep.subr.bf16.mxu0 %v1397_v28  ;;  %27 = vst.msk [vmem:[#allocation2 + $0x38] sm:$0xff] %vm19_vm0, %v1461_v12  ;;  %28 = vst.msk [vmem:[#allocation2 + $0x40] sm:$0xff] %vm19_vm0, %v1461_v12 }
  0x1e   :  { %1274 = vmatprep.subr.bf16.mxu1 %v1398_v29  ;;  %29 = vst.msk [vmem:[#allocation2 + $0x48] sm:$0xff] %vm19_vm0, %v1461_v12  ;;  %30 = vst.msk [vmem:[#allocation2 + $0x50] sm:$0xff] %vm19_vm0, %v1461_v12 }
  0x1f   :  { %31 = vst.msk [vmem:[#allocation2 + $0x58] sm:$0xff] %vm19_vm0, %v1461_v12  ;;  %32 = vst.msk [vmem:[#allocation2 + $0x60] sm:$0xff] %vm19_vm0, %v1461_v12 }
  0x20   :  { %1211 = vmatpush3.bf16.msra.mxu0 %v1399_v30  ;;  %33 = vst.msk [vmem:[#allocation2 + $0x68] sm:$0xff] %vm19_vm0, %v1461_v12  ;;  %34 = vst.msk [vmem:[#allocation2 + $0x70] sm:$0xff] %vm19_vm0, %v1461_v12 }
  0x21   :  { %1275 = vmatpush3.bf16.msra.mxu1 %v1400_v31  ;;  %1336 = vmatprep.subr.bf16.mxu0 %v1407_v36  ;;  %35 = vst.msk [vmem:[#allocation2 + $0x78] sm:$0xff] %vm19_vm0, %v1461_v12 }
  0x22   :  { %1360 = vmatprep.subr.bf16.mxu1 %v1407_v36 }
  0x23   :  { %646 = vmatmul.mubr.bf16.vlgmr.msra.gmra.mxu0 %v1401_v32 }
  0x24   :  { %743 = vmatmul.mubr.bf16.vlgmr.msra.gmra.mxu1 %v1404_v34  ;;  %1337 = vmatpush3.bf16.msra.mxu0 %v1407_v36 }
  0x25   :  { %1364 = vmatpush3.bf16.msra.mxu1 %v1407_v36  ;;  %653 = vmatprep.mubr.bf16.mxu0 %v1408_v37 }
  0x26   :  { %750 = vmatprep.mubr.bf16.mxu1 %v1410_v38  ;;  %1338 = vmatprep.subr.bf16.mxu0 %v1420_v42 }
  0x27   :  { %1361 = vmatprep.subr.bf16.mxu1 %v1420_v42 }
  0x28   :  { %1339 = vmatpush3.bf16.msra.mxu0 %v1420_v42 }
  0x29   :  { %1365 = vmatpush3.bf16.msra.mxu1 %v1420_v42  ;;  %1340 = vmatprep.subr.bf16.mxu0 %v1433_v46 }
  0x2a   :  { %1362 = vmatprep.subr.bf16.mxu1 %v1433_v46 }
  0x2b   :  { %654 = vmatmul.mubr.bf16.gmra.mxu0 %v1412_v39 }
  0x2c   :  { %751 = vmatmul.mubr.bf16.gmra.mxu1 %v1413_v40  ;;  %661 = vmatprep.mubr.bf16.mxu0 %v1414_v41 }
  0x2d   :  { %758 = vmatprep.mubr.bf16.mxu1 %v1416_v43  ;;  %1341 = vmatpush3.bf16.msra.mxu0 %v1433_v46 }
  0x2e   :  { %1366 = vmatpush3.bf16.msra.mxu1 %v1433_v46  ;;  %1342 = vmatprep.subr.bf16.mxu0 %v1446_v49 }
  0x2f   :  { %1363 = vmatprep.subr.bf16.mxu1 %v1446_v49 }
  0x31   :  { %1343 = vmatpush3.bf16.msra.mxu0 %v1446_v49 }
  0x32   :  { %1367 = vmatpush3.bf16.msra.mxu1 %v1446_v49 }
  0x33   :  { %662 = vmatmul.mubr.bf16.gmra.mxu0 %v1418_v44 }
  0x34   :  { %759 = vmatmul.mubr.bf16.gmra.mxu1 %v1419_v45  ;;  %669 = vmatprep.mubr.bf16.mxu0 %v1421_v47 }
  0x35   :  { %766 = vmatprep.mubr.bf16.mxu1 %v1423_v48 }
  0x3b   :  { %670 = vmatmul.mubr.bf16.gmra.mxu0 %v1425_v50 }
  0x3c   :  { %767 = vmatmul.mubr.bf16.gmra.mxu1 %v1426_v51  ;;  %677 = vmatprep.mubr.bf16.mxu0 %v1427_v52 }
  0x3d   :  { %774 = vmatprep.mubr.bf16.mxu1 %v1429_v53 }
  0x43   :  { %678 = vmatmul.mubr.bf16.gmra.mxu0 %v1431_v54 }
  0x44   :  { %775 = vmatmul.mubr.bf16.gmra.mxu1 %v1432_v55  ;;  %685 = vmatprep.mubr.bf16.mxu0 %v1434_v56 }
  0x45   :  { %782 = vmatprep.mubr.bf16.mxu1 %v1436_v57 }
  0x4b   :  { %686 = vmatmul.mubr.bf16.gmra.mxu0 %v1438_v58 }
  0x4c   :  { %783 = vmatmul.mubr.bf16.gmra.mxu1 %v1439_v59  ;;  %693 = vmatprep.mubr.bf16.mxu0 %v1440_v60 }
  0x4d   :  { %790 = vmatprep.mubr.bf16.mxu1 %v1442_v61 }
  0x53   :  { %694 = vmatmul.mubr.bf16.gmra.mxu0 %v1444_v62 }
  0x54   :  { %791 = vmatmul.mubr.bf16.gmra.mxu1 %v1445_v63  ;;  %701 = vmatprep.mubr.bf16.mxu0 %v1447_v0 }
  0x55   :  { %798 = vmatprep.mubr.bf16.mxu1 %v1449_v1 }
  0x5b   :  { %702 = vmatmul.mubr.bf16.gmra.mxu0 %v1451_v2 }
  0x5c   :  { %799 = vmatmul.mubr.bf16.gmra.mxu1 %v1452_v3  ;;  %1344 = vmatprep.mubr.msk.bf16.mxu0 %vm19_vm0, %v1453_v4 }
  0x5d   :  { %1352 = vmatprep.mubr.msk.bf16.mxu1 %vm19_vm0, %v1454_v5 }
  0x63   :  { %1345 = vmatmul.mubr.msk.bf16.vlgmr.msra.gmra.mxu0 %vm19_vm0, %v1455_v6 }
  0x64   :  { %1353 = vmatmul.mubr.msk.bf16.vlgmr.msra.gmra.mxu1 %vm19_vm0, %v1456_v7  ;;  %1348 = vmatprep.mubr.msk.bf16.mxu0 %vm19_vm0, %v1457_v8 }
  0x65   :  { %1356 = vmatprep.mubr.msk.bf16.mxu1 %vm19_vm0, %v1458_v9 }
  0x6b   :  { %1349 = vmatmul.mubr.msk.bf16.gmra.mxu0 %vm19_vm0, %v1459_v10 }
  0x6c   :  { %1357 = vmatmul.mubr.msk.bf16.gmra.mxu1 %vm19_vm0, %v1460_v11 }
  0xe3   :  { %v1212_v13 = vpop.f32.mrf.mxu0 }
  0xe4   :  { %v1276_v14 = vpop.f32.mrf.mxu1 }
  0xe5   :  { %v1213_v15 = vpop.f32.mrf.mxu0 }
  0xe6   :  { %v1277_v16 = vpop.f32.mrf.mxu1  ;;  %v1214_v7 = vadd.f32 %v1213_v15, %v1212_v13 }
  0xe7   :  { %v1215_v17 = vpop.f32.mrf.mxu0  ;;  %v1278_v8 = vadd.f32 %v1277_v16, %v1276_v14 }
  0xe8   :  { %v1279_v18 = vpop.f32.mrf.mxu1 }
  0xe9   :  { %v1216_v19 = vpop.f32.mrf.mxu0  ;;  %v745_v16 = vadd.f32 %v1278_v8, %v1214_v7 }
  0xea   :  { %v1280_v20 = vpop.f32.mrf.mxu1  ;;  %v1217_v10 = vadd.f32 %v1216_v19, %v1215_v17 }
  0xeb   :  { %v1218_v21 = vpop.f32.mrf.mxu0  ;;  %v1281_v11 = vadd.f32 %v1280_v20, %v1279_v18 }
  0xec   :  { %v1282_v22 = vpop.f32.mrf.mxu1 }
  0xed   :  { %v1219_v23 = vpop.f32.mrf.mxu0  ;;  %v748_v17 = vadd.f32 %v1281_v11, %v1217_v10 }
  0xee   :  { %v1283_v24 = vpop.f32.mrf.mxu1  ;;  %v1220_v12 = vadd.f32 %v1219_v23, %v1218_v21  ;;  %v38_v21 = vld [vmem:[#allocation2 + $0x10] sm:$0xff] }
  0xef   :  { %v1221_v25 = vpop.f32.mrf.mxu0 }
  0xf0   :  { %v1285_v26 = vpop.f32.mrf.mxu1 }
  0xf1   :  { %v1222_v27 = vpop.f32.mrf.mxu0 }
  0xf2   :  { %v1286_v28 = vpop.f32.mrf.mxu1 }
  0xf3   :  { %v1224_v29 = vpop.f32.mrf.mxu0 }
  0xf4   :  { %v1288_v30 = vpop.f32.mrf.mxu1 }
  0xf5   :  { %v1225_v31 = vpop.f32.mrf.mxu0 }
  0xf6   :  { %v1289_v32 = vpop.f32.mrf.mxu1 }
  0xf7   :  { %v1734_v33 = vpop.f32.mrf.mxu0 }
  0xf8   :  { %v1736_v34 = vpop.f32.mrf.mxu1 }
  0xf9   :  { %1890 = vst [vmem:[#allocation3_spill] sm:$0xff] %v1736_v34  ;;  %v1738_v35 = vpop.f32.mrf.mxu0 }
  0xfa   :  { %1891 = vst [vmem:[#allocation4_spill] sm:$0xff] %v1738_v35  ;;  %v1740_v36 = vpop.f32.mrf.mxu1 }
  0xfb   :  { %1892 = vst [vmem:[#allocation5_spill] sm:$0xff] %v1740_v36  ;;  %v1230_v37 = vpop.f32.mrf.mxu0  ;;  %v1284_v36 = vadd.f32 %v1283_v24, %v1282_v22 }
  0xfc   :  { %v1294_v38 = vpop.f32.mrf.mxu1 }
  0xfd   :  { %v1231_v39 = vpop.f32.mrf.mxu0  ;;  %v753_v15 = vadd.f32 %v1284_v36, %v1220_v12 }
  0xfe   :  { %v1295_v40 = vpop.f32.mrf.mxu1  ;;  %v1232_v13 = vadd.f32 %v1231_v39, %v1230_v37  ;;  %v36_v37 = vld [vmem:[#allocation2] sm:$0xff] }
  0xff   :  { %v1742_v41 = vpop.f32.mrf.mxu0  ;;  %v1296_v18 = vadd.f32 %v1295_v40, %v1294_v38 }
 0x100   :  { %1893 = vst [vmem:[#allocation6_spill] sm:$0xff] %v1742_v41  ;;  %v1744_v42 = vpop.f32.mrf.mxu1  ;;  %v1226_v41 = vadd.f32 %v1225_v31, %v1224_v29 }
 0x101   :  { %1894 = vst [vmem:[#allocation7_spill] sm:$0xff] %v1744_v42  ;;  %v1746_v43 = vpop.f32.mrf.mxu0  ;;  %v1903_v24 = vld [vmem:[#allocation4_spill] sm:$0xff] }
 0x102   :  { %1895 = vst [vmem:[#allocation8_spill] sm:$0xff] %v1746_v43  ;;  %v1748_v44 = vpop.f32.mrf.mxu1 }
 0x103   :  { %1896 = vst [vmem:[#allocation9_spill] sm:$0xff] %v1748_v44  ;;  %v1236_v45 = vpop.f32.mrf.mxu0 }
 0x104   :  { %v1300_v46 = vpop.f32.mrf.mxu1 }
 0x105   :  { %v1237_v47 = vpop.f32.mrf.mxu0 }
 0x106   :  { %v1301_v48 = vpop.f32.mrf.mxu1 }
 0x107   :  { %v1239_v49 = vpop.f32.mrf.mxu0 }
 0x108   :  { %v1303_v50 = vpop.f32.mrf.mxu1 }
 0x109   :  { %v1240_v51 = vpop.f32.mrf.mxu0 }
 0x10a   :  { %v1304_v52 = vpop.f32.mrf.mxu1  ;;  %v1241_v31 = vadd.f32 %v1240_v51, %v1239_v49 }
 0x10b   :  { %v1242_v53 = vpop.f32.mrf.mxu0 }
 0x10c   :  { %v1306_v54 = vpop.f32.mrf.mxu1 }
 0x10d   :  { %v1243_v55 = vpop.f32.mrf.mxu0 }
 0x10e   :  { %v1307_v56 = vpop.f32.mrf.mxu1  ;;  %v1244_v44 = vadd.f32 %v1243_v55, %v1242_v53  ;;  %v39_v53 = vld [vmem:[#allocation2 + $0x18] sm:$0xff] }
 0x10f   :  { %v1245_v57 = vpop.f32.mrf.mxu0  ;;  %v1308_v42 = vadd.f32 %v1307_v56, %v1306_v54  ;;  %v769_v56 = vadd.f32 %v1296_v18, %v1232_v13  ;;  %v42_v18 = vld [vmem:[#allocation2 + $0x30] sm:$0xff] }
 0x110   :  { %v1309_v58 = vpop.f32.mrf.mxu1 }
 0x111   :  { %v1246_v59 = vpop.f32.mrf.mxu0  ;;  %v785_v23 = vadd.f32 %v1308_v42, %v1244_v44  ;;  %v44_v44 = vld [vmem:[#allocation2 + $0x40] sm:$0xff] }
 0x112   :  { %v1310_v60 = vpop.f32.mrf.mxu1  ;;  %v1247_v19 = vadd.f32 %v1246_v59, %v1245_v57  ;;  %v1906_v59 = vld [vmem:[#allocation6_spill] sm:$0xff] }
 0x113   :  { %v1750_v61 = vpop.f32.mrf.mxu0  ;;  %v1311_v20 = vadd.f32 %v1310_v60, %v1309_v58  ;;  %v47_v58 = vld [vmem:[#allocation2 + $0x58] sm:$0xff]  ;;  %v1907_v60 = vld [vmem:[#allocation8_spill] sm:$0xff] }
 0x114   :  { %1897 = vst [vmem:[#allocation10_spill] sm:$0xff] %v1750_v61  ;;  %v1752_v62 = vpop.f32.mrf.mxu1  ;;  %v1302_v61 = vadd.f32 %v1301_v48, %v1300_v46 }
 0x115   :  { %1898 = vst [vmem:[#allocation11_spill] sm:$0xff] %v1752_v62  ;;  %v1249_v63 = vpop.f32.mrf.mxu0  ;;  %v788_v55 = vadd.f32 %v1311_v20, %v1247_v19  ;;  %v1910_v20 = vld [vmem:[#allocation3_spill] sm:$0xff] }
 0x116   :  { %v1313_v0 = vpop.f32.mrf.mxu1 }
 0x117   :  { %v1754_v1 = vpop.f32.mrf.mxu0 }
 0x118   :  { %1899 = vst [vmem:[#allocation12_spill] sm:$0xff] %v1754_v1  ;;  %v1756_v2 = vpop.f32.mrf.mxu1  ;;  %v1223_v1 = vadd.f32 %v1222_v27, %v1221_v25  ;;  %v1766_v25 = vadd.f32 %v1903_v24, %v1734_v33  ;;  %v46_v27 = vld [vmem:[#allocation2 + $0x50] sm:$0xff] }
 0x119   :  { %1900 = vst [vmem:[#allocation13_spill] sm:$0xff] %v1756_v2  ;;  %v1758_v3 = vpop.f32.mrf.mxu0  ;;  %v1287_v2 = vadd.f32 %v1286_v28, %v1285_v26 }
 0x11a   :  { %1901 = vst [vmem:[#allocation14_spill] sm:$0xff] %v1758_v3  ;;  %v1760_v4 = vpop.f32.mrf.mxu1  ;;  %v1290_v3 = vadd.f32 %v1289_v32, %v1288_v30  ;;  %v1305_v32 = vadd.f32 %v1304_v52, %v1303_v50 }
 0x11b   :  { %1902 = vst [vmem:[#allocation15_spill] sm:$0xff] %v1760_v4  ;;  %v1254_v5 = vpop.f32.mrf.mxu0  ;;  %v1238_v4 = vadd.f32 %v1237_v47, %v1236_v45  ;;  %v756_v29 = vadd.f32 %v1287_v2, %v1223_v1 }
 0x11c   :  { %v1318_v6 = vpop.f32.mrf.mxu1  ;;  %v1768_v30 = vadd.f32 %v1290_v3, %v1226_v41  ;;  %v1904_v41 = vld [vmem:[#allocation10_spill] sm:$0xff]  ;;  %v1905_v49 = vld [vmem:[#allocation11_spill] sm:$0xff]  ;;  %v37_v3 = vld [vmem:[#allocation2 + $0x8] sm:$0xff] }
 0x11d   :  { %v1255_v9 = vpop.f32.mrf.mxu0  ;;  %v777_v39 = vadd.f32 %v1302_v61, %v1238_v4  ;;  %v1250_v57 = vadd.f32 %v1249_v63, %v1904_v41  ;;  %v1314_v50 = vadd.f32 %v1313_v0, %v1905_v49  ;;  %v1235_v61 = vadd.f32 %v1907_v60, %v1906_v59  ;;  %v1909_v63 = vld [vmem:[#allocation9_spill] sm:$0xff]  ;;  %v41_v59 = vld [vmem:[#allocation2 + $0x28] sm:$0xff] }
 0x11e   :  { %v1319_v34 = vpop.f32.mrf.mxu1  ;;  %v1256_v40 = vadd.f32 %v1255_v9, %v1254_v5  ;;  %v780_v5 = vadd.f32 %v1305_v32, %v1241_v31  ;;  %v45_v9 = vld [vmem:[#allocation2 + $0x48] sm:$0xff]  ;;  %v1791_v31 = vld [vmem:[%s1888_s2] ss:$0 sm:$0xff] }
 0x11f   :  { %v1762_v43 = vpop.f32.mrf.mxu0  ;;  %v1320_v45 = vadd.f32 %v1319_v34, %v1318_v6  ;;  %v1908_v6 = vld [vmem:[#allocation7_spill] sm:$0xff] }
 0x120   :  { %v1321_v62 = vpop.f32.mrf.mxu1  ;;  %v1299_v7 = vadd.f32 %v1909_v63, %v1908_v6  ;;  %v49_v6 = vld [vmem:[#allocation2 + $0x68] sm:$0xff] }
 0x121   :  { %v1258_v35 = vpop.f32.mrf.mxu0  ;;  %v801_v11 = vadd.f32 %v1320_v45, %v1256_v40  ;;  %v48_v45 = vld [vmem:[#allocation2 + $0x60] sm:$0xff] }
 0x122   :  { %v1322_v14 = vpop.f32.mrf.mxu1  ;;  %v1259_v12 = vadd.f32 %v1258_v35, %v1762_v43  ;;  %v1914_v43 = vld [vmem:[#allocation13_spill] sm:$0xff] }
 0x123   :  { %v1346_v22 = vpop.f32.mrf.mxu0  ;;  %v1323_v13 = vadd.f32 %v1322_v14, %v1321_v62  ;;  %v1915_v62 = vld [vmem:[#allocation15_spill] sm:$0xff] }
 0x124   :  { %v850_v26 = vadd.f32 %v1346_v22, %v753_v15  ;;  %v1354_v28 = vpop.f32.mrf.mxu1  ;;  %v1317_v14 = vadd.f32 %v1915_v62, %v1914_v43 }
 0x125   :  { %v882_v36 = vadd.f32 %v1354_v28, %v785_v23  ;;  %v841_v38 = vpop.f32.mrf.mxu0  ;;  %v1912_v28 = vld [vmem:[#allocation12_spill] sm:$0xff] }
 0x126   :  { %v906_v46 = vadd.f32 %v850_v26, %v38_v21  ;;  %v842_v42 = vadd.f32 %v841_v38, %v745_v16  ;;  %v873_v47 = vpop.f32.mrf.mxu1  ;;  %v1911_v21 = vld [vmem:[#allocation5_spill] sm:$0xff] }
 0x127   :  { %v914_v33 = vadd.f32 %v882_v36, %v46_v27  ;;  %v874_v48 = vadd.f32 %v873_v47, %v777_v39  ;;  %v1347_v54 = vpop.f32.mrf.mxu0  ;;  %v1293_v22 = vadd.f32 %v1911_v21, %v1910_v20  ;;  %v793_v27 = vadd.f32 %v1314_v50, %v1250_v57 }
 0x128   :  { %922 = vst.msk [vmem:[#allocation2 + $0x10] sm:$0xff] %vm19_vm0, %v906_v46  ;;  %v904_v51 = vadd.f32 %v842_v42, %v36_v37  ;;  %v853_v52 = vadd.f32 %v1347_v54, %v756_v29  ;;  %v1355_v34 = vpop.f32.mrf.mxu1  ;;  %v1913_v29 = vld [vmem:[#allocation14_spill] sm:$0xff]  ;;  %v40_v37 = vld [vmem:[#allocation2 + $0x20] sm:$0xff]  ;;  %v772_v42 = vadd.f32 %v1299_v7, %v1235_v61  ;;  %v804_v54 = vadd.f32 %v1323_v13, %v1259_v12 }
 0x129   :  { %930 = vst.msk [vmem:[#allocation2 + $0x50] sm:$0xff] %vm19_vm0, %v914_v33  ;;  %v912_v1 = vadd.f32 %v874_v48, %v44_v44  ;;  %v885_v2 = vadd.f32 %v1355_v34, %v788_v55  ;;  %v844_v4 = vpop.f32.mrf.mxu0  ;;  %v1253_v35 = vadd.f32 %v1913_v29, %v1912_v28  ;;  %v43_v48 = vld [vmem:[#allocation2 + $0x38] sm:$0xff]  ;;  %v764_v50 = vadd.f32 %v1293_v22, %v1766_v25 }
 0x12a   :  { %920 = vst.msk [vmem:[#allocation2] sm:$0xff] %vm19_vm0, %v904_v51  ;;  %v907_v0 = vadd.f32 %v853_v52, %v39_v53  ;;  %v845_v8 = vadd.f32 %v844_v4, %v748_v17  ;;  %v876_v10 = vpop.f32.mrf.mxu1  ;;  %v50_v17 = vld [vmem:[#allocation2 + $0x70] sm:$0xff] }
 0x12b   :  { %928 = vst.msk [vmem:[#allocation2 + $0x40] sm:$0xff] %vm19_vm0, %v912_v1  ;;  %v915_v15 = vadd.f32 %v885_v2, %v47_v58  ;;  %v877_v16 = vadd.f32 %v876_v10, %v780_v5  ;;  %v1350_v19 = vpop.f32.mrf.mxu0  ;;  %v796_v61 = vadd.f32 %v1317_v14, %v1253_v35 }
 0x12c   :  { %923 = vst.msk [vmem:[#allocation2 + $0x18] sm:$0xff] %vm19_vm0, %v907_v0  ;;  %v905_v23 = vadd.f32 %v845_v8, %v37_v3  ;;  %v866_v24 = vadd.f32 %v1350_v19, %v769_v56  ;;  %v1358_v26 = vpop.f32.mrf.mxu1 }
 0x12d   :  { %931 = vst.msk [vmem:[#allocation2 + $0x58] sm:$0xff] %vm19_vm0, %v915_v15  ;;  %v913_v32 = vadd.f32 %v877_v16, %v45_v9  ;;  %v898_v36 = vadd.f32 %v1358_v26, %v801_v11  ;;  %v857_v38 = vpop.f32.mrf.mxu0 }
 0x12e   :  { %921 = vst.msk [vmem:[#allocation2 + $0x8] sm:$0xff] %vm19_vm0, %v905_v23  ;;  %v910_v39 = vadd.f32 %v866_v24, %v42_v18  ;;  %v858_v40 = vadd.f32 %v857_v38, %v1768_v30  ;;  %v889_v46 = vpop.f32.mrf.mxu1  ;;  %v51_v30 = vld [vmem:[#allocation2 + $0x78] sm:$0xff] }
 0x12f   :  { %v941_v44 = vld [vmem:[#allocation2 + $0x10] sm:$0xff]  ;;  %929 = vst.msk [vmem:[#allocation2 + $0x48] sm:$0xff] %vm19_vm0, %v913_v32  ;;  %v918_v47 = vadd.f32 %v898_v36, %v50_v17  ;;  %v890_v33 = vadd.f32 %v889_v46, %v793_v27  ;;  %v1351_v53 = vpop.f32.mrf.mxu0 }
 0x130   :  { %v964_v55 = vadd.f32 %v1791_v31, %v941_v44  ;;  %v949_v56 = vld [vmem:[#allocation2 + $0x50] sm:$0xff]  ;;  %926 = vst.msk [vmem:[#allocation2 + $0x30] sm:$0xff] %vm19_vm0, %v910_v39  ;;  %v908_v41 = vadd.f32 %v858_v40, %v40_v37  ;;  %v869_v57 = vadd.f32 %v1351_v53, %v772_v42  ;;  %v1359_v49 = vpop.f32.mrf.mxu1 }
 0x131   :  { %v972_v51 = vadd.f32 %v1791_v31, %v949_v56  ;;  %v939_v52 = vld [vmem:[#allocation2] sm:$0xff]  ;;  %934 = vst.msk [vmem:[#allocation2 + $0x70] sm:$0xff] %vm19_vm0, %v918_v47  ;;  %v916_v58 = vadd.f32 %v890_v33, %v48_v45  ;;  %v901_v34 = vadd.f32 %v1359_v49, %v804_v54  ;;  %v860_v60 = vpop.f32.mrf.mxu0 }
 0x132   :  { %v980_v1 = vmax.f32 %v964_v55, 0.0  ;;  %v962_v2 = vadd.f32 %v1791_v31, %v939_v52  ;;  %v947_v3 = vld [vmem:[#allocation2 + $0x40] sm:$0xff]  ;;  %924 = vst.msk [vmem:[#allocation2 + $0x20] sm:$0xff] %vm19_vm0, %v908_v41  ;;  %v911_v4 = vadd.f32 %v869_v57, %v43_v48  ;;  %v861_v5 = vadd.f32 %v860_v60, %v764_v50  ;;  %v892_v25 = vpop.f32.mrf.mxu1 }
 0x133   :  { %v988_v63 = vmax.f32 %v972_v51, 0.0  ;;  %v970_v7 = vadd.f32 %v1791_v31, %v947_v3  ;;  %v942_v0 = vld [vmem:[#allocation2 + $0x18] sm:$0xff]  ;;  %932 = vst.msk [vmem:[#allocation2 + $0x60] sm:$0xff] %vm19_vm0, %v916_v58  ;;  %v919_v8 = vadd.f32 %v901_v34, %v51_v30  ;;  %v893_v9 = vadd.f32 %v892_v25, %v796_v61 }
 0x134   :  { %v1182_v10 = vpack.c.bf16 %v980_v1, %v980_v1  ;;  %v978_v11 = vmax.f32 %v962_v2, 0.0  ;;  %v965_v12 = vadd.f32 %v1791_v31, %v942_v0  ;;  %v950_v13 = vld [vmem:[#allocation2 + $0x58] sm:$0xff]  ;;  %927 = vst.msk [vmem:[#allocation2 + $0x38] sm:$0xff] %vm19_vm0, %v911_v4  ;;  %v909_v15 = vadd.f32 %v861_v5, %v41_v59 }
 0x135   :  { %v1190_v16 = vpack.c.bf16 %v988_v63, %v988_v63  ;;  %v986_v18 = vmax.f32 %v970_v7, 0.0  ;;  %v973_v19 = vadd.f32 %v1791_v31, %v950_v13  ;;  %v940_v20 = vld [vmem:[#allocation2 + $0x8] sm:$0xff]  ;;  %935 = vst.msk [vmem:[#allocation2 + $0x78] sm:$0xff] %vm19_vm0, %v919_v8  ;;  %v917_v21 = vadd.f32 %v893_v9, %v49_v6 }
 0x136   :  { %1061 = vst.msk [vmem:[%s1889_s3 + $0x8] sm:$0xf] %vm1058_vm1, %v1182_v10  ;;  %v1180_v22 = vpack.c.bf16 %v978_v11, %v978_v11  ;;  %v981_v23 = vmax.f32 %v965_v12, 0.0  ;;  %v963_v24 = vadd.f32 %v1791_v31, %v940_v20  ;;  %v948_v17 = vld [vmem:[#allocation2 + $0x48] sm:$0xff] }
 0x137   :  { %925 = vst.msk [vmem:[#allocation2 + $0x28] sm:$0xff] %vm19_vm0, %v909_v15  ;;  %v1188_v26 = vpack.c.bf16 %v986_v18, %v986_v18  ;;  %v989_v27 = vmax.f32 %v973_v19, 0.0  ;;  %v971_v28 = vadd.f32 %v1791_v31, %v948_v17  ;;  %v945_v29 = vld [vmem:[#allocation2 + $0x30] sm:$0xff]  ;;  %933 = vst.msk [vmem:[#allocation2 + $0x68] sm:$0xff] %vm19_vm0, %v917_v21 }
 0x138   :  { %1069 = vst.msk [vmem:[%s1889_s3 + $0x28] sm:$0xf] %vm1058_vm1, %v1190_v16  ;;  %1059 = vst.msk [vmem:[%s1889_s3] sm:$0xf] %vm1058_vm1, %v1180_v22  ;;  %v1183_v35 = vpack.c.bf16 %v981_v23, %v981_v23  ;;  %v979_v43 = vmax.f32 %v963_v24, 0.0  ;;  %v968_v62 = vadd.f32 %v1791_v31, %v945_v29  ;;  %v953_v14 = vld [vmem:[#allocation2 + $0x70] sm:$0xff] }
 0x139   :  { %1067 = vst.msk [vmem:[%s1889_s3 + $0x20] sm:$0xf] %vm1058_vm1, %v1188_v26  ;;  %v1191_v32 = vpack.c.bf16 %v989_v27, %v989_v27  ;;  %v987_v36 = vmax.f32 %v971_v28, 0.0  ;;  %v976_v37 = vadd.f32 %v1791_v31, %v953_v14  ;;  %v943_v38 = vld [vmem:[#allocation2 + $0x20] sm:$0xff] }
 0x13a   :  { %1062 = vst.msk [vmem:[%s1889_s3 + $0xc] sm:$0xf] %vm1058_vm1, %v1183_v35  ;;  %v1181_v39 = vpack.c.bf16 %v979_v43, %v979_v43  ;;  %v984_v40 = vmax.f32 %v968_v62, 0.0  ;;  %v966_v45 = vadd.f32 %v1791_v31, %v943_v38  ;;  %v951_v46 = vld [vmem:[#allocation2 + $0x60] sm:$0xff] }
 0x13b   :  { %1070 = vst.msk [vmem:[%s1889_s3 + $0x2c] sm:$0xf] %vm1058_vm1, %v1191_v32  ;;  %v1189_v42 = vpack.c.bf16 %v987_v36, %v987_v36  ;;  %v992_v44 = vmax.f32 %v976_v37, 0.0  ;;  %v974_v47 = vadd.f32 %v1791_v31, %v951_v46  ;;  %v946_v33 = vld [vmem:[#allocation2 + $0x38] sm:$0xff] }
 0x13c   :  { %1060 = vst.msk [vmem:[%s1889_s3 + $0x4] sm:$0xf] %vm1058_vm1, %v1181_v39  ;;  %v1186_v48 = vpack.c.bf16 %v984_v40, %v984_v40  ;;  %v982_v53 = vmax.f32 %v966_v45, 0.0  ;;  %v969_v54 = vadd.f32 %v1791_v31, %v946_v33  ;;  %v954_v55 = vld [vmem:[#allocation2 + $0x78] sm:$0xff] }
 0x13d   :  { %1068 = vst.msk [vmem:[%s1889_s3 + $0x24] sm:$0xf] %vm1058_vm1, %v1189_v42  ;;  %v1194_v56 = vpack.c.bf16 %v992_v44, %v992_v44  ;;  %v990_v41 = vmax.f32 %v974_v47, 0.0  ;;  %v977_v57 = vadd.f32 %v1791_v31, %v954_v55 }
 0x13e   :  { %v944_v30 = vld [vmem:[#allocation2 + $0x28] sm:$0xff]  ;;  %1065 = vst.msk [vmem:[%s1889_s3 + $0x18] sm:$0xf] %vm1058_vm1, %v1186_v48  ;;  %v1184_v49 = vpack.c.bf16 %v982_v53, %v982_v53  ;;  %v985_v50 = vmax.f32 %v969_v54, 0.0 }
 0x13f   :  { %v967_v51 = vadd.f32 %v1791_v31, %v944_v30  ;;  %v952_v52 = vld [vmem:[#allocation2 + $0x68] sm:$0xff]  ;;  %1073 = vst.msk [vmem:[%s1889_s3 + $0x38] sm:$0xf] %vm1058_vm1, %v1194_v56  ;;  %v1192_v58 = vpack.c.bf16 %v990_v41, %v990_v41  ;;  %v993_v34 = vmax.f32 %v977_v57, 0.0 }
 0x140   :  { %v975_v59 = vadd.f32 %v1791_v31, %v952_v52  ;;  %1063 = vst.msk [vmem:[%s1889_s3 + $0x10] sm:$0xf] %vm1058_vm1, %v1184_v49  ;;  %v1187_v60 = vpack.c.bf16 %v985_v50, %v985_v50 }
 0x141   :  { %v983_v61 = vmax.f32 %v967_v51, 0.0  ;;  %1071 = vst.msk [vmem:[%s1889_s3 + $0x30] sm:$0xf] %vm1058_vm1, %v1192_v58  ;;  %v1195_v1 = vpack.c.bf16 %v993_v34, %v993_v34 }
 0x142   :  { %v991_v2 = vmax.f32 %v975_v59, 0.0  ;;  %1066 = vst.msk [vmem:[%s1889_s3 + $0x1c] sm:$0xf] %vm1058_vm1, %v1187_v60 }
 0x143   :  { %v1185_v31 = vpack.c.bf16 %v983_v61, %v983_v61  ;;  %1074 = vst.msk [vmem:[%s1889_s3 + $0x3c] sm:$0xf] %vm1058_vm1, %v1195_v1 }
 0x144   :  { %v1193_v3 = vpack.c.bf16 %v991_v2, %v991_v2 }
 0x145   :  { %1064 = vst.msk [vmem:[%s1889_s3 + $0x14] sm:$0xf] %vm1058_vm1, %v1185_v31 }
 0x146   :  { %1072 = vst.msk [vmem:[%s1889_s3 + $0x34] sm:$0xf] %vm1058_vm1, %v1193_v3 }

// kernel: quantized_resnet18_forward.28
= control target key start
LH: loop header
LB: loop body
LE: loop exit
PB: predicated region body
PF: predicated region fallthrough
CT: control target
= control target key end

     0   :  { %vm22_vm0 = vcmask 523264   ;;  %vm1109_vm1 = vcmask 519168   ;;  %s2168_s1 = inlined_call_operand.vmem [shape: bf16[576,64], index: 1, kind: input, shape index: {}]   ;;  %s2169_s0 = inlined_call_operand.vmem [shape: bf16[128,576], index: 0, kind: input, shape index: {}]   ;;  %s2170_s3 = inlined_call_operand.vmem [shape: bf16[128,64], index: 3, kind: input, shape index: {}]   ;;  %s2171_s2 = inlined_call_operand.vmem [shape: f32[1,64], index: 2, kind: input, shape index: {}]   ;;  %s2172_s4 = inlined_call_operand.vmem [shape: bf16[128,64], index: 4, kind: output, shape index: {}]  }
   0x1   :  { %v1459_v0 = vld [vmem:[%s2168_s1 + $0x78] sm:$0xff]   ;;  %v1463_v4 = vld [vmem:[%s2168_s1 + $0x70] sm:$0xff]   ;;  %v1467_v8 = vld [vmem:[%s2168_s1 + $0x68] sm:$0xff]  }
   0x2   :  { %v1460_v1 = vld [vmem:[%s2168_s1 + $0xf8] sm:$0xff]   ;;  %1286 = vmatprep.subr.bf16.mxu0 %v1459_v0  ;;  %v1464_v5 = vld [vmem:[%s2168_s1 + $0xf0] sm:$0xff]   ;;  %v1468_v9 = vld [vmem:[%s2168_s1 + $0xe8] sm:$0xff]  }
   0x3   :  { %v1461_v2 = vld [vmem:[%s2168_s1 + $0x38] sm:$0xff]   ;;  %1350 = vmatprep.subr.bf16.mxu1 %v1460_v1  ;;  %v1465_v6 = vld [vmem:[%s2168_s1 + $0x30] sm:$0xff]   ;;  %v1469_v10 = vld [vmem:[%s2168_s1 + $0x28] sm:$0xff]  }
   0x4   :  { %v1462_v3 = vld [vmem:[%s2168_s1 + $0xb8] sm:$0xff]   ;;  %1287 = vmatpush3.bf16.msra.mxu0 %v1461_v2  ;;  %v1466_v7 = vld [vmem:[%s2168_s1 + $0xb0] sm:$0xff]   ;;  %v1470_v11 = vld [vmem:[%s2168_s1 + $0xa8] sm:$0xff]  }
   0x5   :  { %1351 = vmatpush3.bf16.msra.mxu1 %v1462_v3  ;;  %1288 = vmatprep.subr.bf16.mxu0 %v1463_v4  ;;  %v1471_v12 = vld [vmem:[%s2168_s1 + $0x60] sm:$0xff]   ;;  %v1475_v16 = vld [vmem:[%s2168_s1 + $0x58] sm:$0xff]   ;;  %v1479_v20 = vld [vmem:[%s2168_s1 + $0x50] sm:$0xff]  }
   0x6   :  { %1352 = vmatprep.subr.bf16.mxu1 %v1464_v5  ;;  %v1472_v13 = vld [vmem:[%s2168_s1 + $0xe0] sm:$0xff]   ;;  %v1476_v17 = vld [vmem:[%s2168_s1 + $0xd8] sm:$0xff]   ;;  %v1480_v21 = vld [vmem:[%s2168_s1 + $0xd0] sm:$0xff]  }
   0x7   :  { %v1473_v14 = vld [vmem:[%s2168_s1 + $0x20] sm:$0xff]   ;;  %v1477_v18 = vld [vmem:[%s2168_s1 + $0x18] sm:$0xff]   ;;  %v1481_v22 = vld [vmem:[%s2168_s1 + $0x10] sm:$0xff]  }
   0x8   :  { %1289 = vmatpush3.bf16.msra.mxu0 %v1465_v6  ;;  %v1474_v15 = vld [vmem:[%s2168_s1 + $0xa0] sm:$0xff]   ;;  %v1478_v19 = vld [vmem:[%s2168_s1 + $0x98] sm:$0xff]   ;;  %v1482_v23 = vld [vmem:[%s2168_s1 + $0x90] sm:$0xff]  }
   0x9   :  { %1353 = vmatpush3.bf16.msra.mxu1 %v1466_v7  ;;  %1290 = vmatprep.subr.bf16.mxu0 %v1467_v8  ;;  %v1483_v24 = vld [vmem:[%s2168_s1 + $0x48] sm:$0xff]   ;;  %v1487_v28 = vld [vmem:[%s2168_s1 + $0x40] sm:$0xff]   ;;  %v1497_v36 = vld [vmem:[%s2168_s1 + $0x118] sm:$0xff]  }
   0xa   :  { %1354 = vmatprep.subr.bf16.mxu1 %v1468_v9  ;;  %v1484_v25 = vld [vmem:[%s2168_s1 + $0xc8] sm:$0xff]   ;;  %v1488_v29 = vld [vmem:[%s2168_s1 + $0xc0] sm:$0xff]   ;;  %v1510_v42 = vld [vmem:[%s2168_s1 + $0x110] sm:$0xff]  }
   0xb   :  { %v1485_v26 = vld [vmem:[%s2168_s1 + $0x8] sm:$0xff]   ;;  %v1489_v30 = vld [vmem:[%s2168_s1] sm:$0xff]   ;;  %v1506_v43 = vld [vmem:[%s2169_s0 + $0x5c] ss:$20 sps:$4 sm:$0xff]  }
   0xc   :  { %1291 = vmatpush3.bf16.msra.mxu0 %v1469_v10  ;;  %v1486_v27 = vld [vmem:[%s2168_s1 + $0x88] sm:$0xff]   ;;  %v1490_v31 = vld [vmem:[%s2168_s1 + $0x80] sm:$0xff]   ;;  %v1511_v47 = vld [vmem:[%s2169_s0 + $0x7c] ss:$20 sps:$4 sm:$0xff]  }
   0xd   :  { %1355 = vmatpush3.bf16.msra.mxu1 %v1470_v11  ;;  %1292 = vmatprep.subr.bf16.mxu0 %v1471_v12  ;;  %v1491_v32 = vld [vmem:[%s2169_s0] ss:$20 sps:$4 sm:$0xff]   ;;  %v1493_v33 = vld [vmem:[%s2169_s0 + $0x4] ss:$20 sps:$4 sm:$0xff]   ;;  %v1494_v34 = vld [vmem:[%s2169_s0 + $0x8] ss:$20 sps:$4 sm:$0xff]  }
   0xe   :  { %1356 = vmatprep.subr.bf16.mxu1 %v1472_v13  ;;  %v1496_v35 = vld [vmem:[%s2169_s0 + $0xc] ss:$20 sps:$4 sm:$0xff]   ;;  %648 = vmatprep.mubr.bf16.mxu0 %v1493_v33  ;;  %v1500_v38 = vld [vmem:[%s2169_s0 + $0x34] ss:$20 sps:$4 sm:$0xff]   ;;  %v1503_v40 = vld [vmem:[%s2169_s0 + $0x30] ss:$20 sps:$4 sm:$0xff]  }
   0xf   :  { %745 = vmatprep.mubr.bf16.mxu1 %v1496_v35  ;;  %v1498_v37 = vld [vmem:[%s2169_s0 + $0x2c] ss:$20 sps:$4 sm:$0xff]   ;;  %v1502_v39 = vld [vmem:[%s2169_s0 + $0x28] ss:$20 sps:$4 sm:$0xff]   ;;  %v1508_v44 = vld [vmem:[%s2169_s0 + $0x50] ss:$20 sps:$4 sm:$0xff]  }
  0x10   :  { %1293 = vmatpush3.bf16.msra.mxu0 %v1473_v14  ;;  %v1504_v41 = vld [vmem:[%s2169_s0 + $0x54] ss:$20 sps:$4 sm:$0xff]   ;;  %v1509_v45 = vld [vmem:[%s2169_s0 + $0x58] ss:$20 sps:$4 sm:$0xff]   ;;  %v1536_v49 = vld [vmem:[%s2168_s1 + $0x100] sm:$0xff]   ;;  %v1551_v12 = vmov 0.0  }
  0x11   :  { %1357 = vmatpush3.bf16.msra.mxu1 %v1474_v15  ;;  %1294 = vmatprep.subr.bf16.mxu0 %v1475_v16  ;;  %v1523_v46 = vld [vmem:[%s2168_s1 + $0x108] sm:$0xff]   ;;  %v1513_v48 = vld [vmem:[%s2169_s0 + $0x84] ss:$20 sps:$4 sm:$0xff]   ;;  %v1516_v51 = vld [vmem:[%s2169_s0 + $0x80] ss:$20 sps:$4 sm:$0xff]   ;;  %25 = vst.msk [vmem:[#allocation2 + $0x10] sm:$0xff] %vm22_vm0, %v1551_v12 }
  0x12   :  { %1358 = vmatprep.subr.bf16.mxu1 %v1476_v17  ;;  %v1515_v50 = vld [vmem:[%s2169_s0 + $0x78] ss:$20 sps:$4 sm:$0xff]   ;;  %v1521_v54 = vld [vmem:[%s2169_s0 + $0xa0] ss:$20 sps:$4 sm:$0xff]   ;;  %v1522_v55 = vld [vmem:[%s2169_s0 + $0xa8] ss:$20 sps:$4 sm:$0xff]  }
  0x13   :  { %v1517_v52 = vld [vmem:[%s2169_s0 + $0xa4] ss:$20 sps:$4 sm:$0xff]   ;;  %v1519_v53 = vld [vmem:[%s2169_s0 + $0xac] ss:$20 sps:$4 sm:$0xff]   ;;  %v1526_v57 = vld [vmem:[%s2169_s0 + $0xd4] ss:$20 sps:$4 sm:$0xff]  }
  0x14   :  { %1295 = vmatpush3.bf16.msra.mxu0 %v1477_v18  ;;  %v1524_v56 = vld [vmem:[%s2169_s0 + $0xcc] ss:$20 sps:$4 sm:$0xff]   ;;  %v1528_v58 = vld [vmem:[%s2169_s0 + $0xc8] ss:$20 sps:$4 sm:$0xff]   ;;  %v1529_v59 = vld [vmem:[%s2169_s0 + $0xd0] ss:$20 sps:$4 sm:$0xff]  }
  0x15   :  { %1359 = vmatpush3.bf16.msra.mxu1 %v1478_v19  ;;  %1296 = vmatprep.subr.bf16.mxu0 %v1479_v20  ;;  %v1530_v60 = vld [vmem:[%s2169_s0 + $0xf4] ss:$20 sps:$4 sm:$0xff]   ;;  %v1532_v61 = vld [vmem:[%s2169_s0 + $0xfc] ss:$20 sps:$4 sm:$0xff]   ;;  %v1535_v63 = vld [vmem:[%s2169_s0 + $0xf8] ss:$20 sps:$4 sm:$0xff]  }
  0x16   :  { %1360 = vmatprep.subr.bf16.mxu1 %v1480_v21  ;;  %v1534_v62 = vld [vmem:[%s2169_s0 + $0xf0] ss:$20 sps:$4 sm:$0xff]   ;;  %v1541_v2 = vld [vmem:[%s2169_s0 + $0x118] ss:$20 sps:$4 sm:$0xff]   ;;  %v1542_v3 = vld [vmem:[%s2169_s0 + $0x120] ss:$20 sps:$4 sm:$0xff]  }
  0x17   :  { %v1537_v0 = vld [vmem:[%s2169_s0 + $0x11c] ss:$20 sps:$4 sm:$0xff]   ;;  %v1539_v1 = vld [vmem:[%s2169_s0 + $0x124] ss:$20 sps:$4 sm:$0xff]   ;;  %v1547_v8 = vld [vmem:[%s2169_s0 + $0x60] ss:$20 sps:$4 sm:$0xff]  }
  0x18   :  { %1297 = vmatpush3.bf16.msra.mxu0 %v1481_v22  ;;  %v1543_v4 = vld [vmem:[%s2169_s0 + $0x10] ss:$20 sps:$4 sm:$0xff]   ;;  %v1545_v6 = vld [vmem:[%s2169_s0 + $0x38] ss:$20 sps:$4 sm:$0xff]   ;;  %v1548_v9 = vld [vmem:[%s2169_s0 + $0x100] ss:$20 sps:$4 sm:$0xff]  }
  0x19   :  { %1361 = vmatpush3.bf16.msra.mxu1 %v1482_v23  ;;  %1298 = vmatprep.subr.bf16.mxu0 %v1483_v24  ;;  %v1544_v5 = vld [vmem:[%s2169_s0 + $0xb0] ss:$20 sps:$4 sm:$0xff]   ;;  %v1546_v7 = vld [vmem:[%s2169_s0 + $0xd8] ss:$20 sps:$4 sm:$0xff]   ;;  %v1549_v10 = vld [vmem:[%s2169_s0 + $0x88] ss:$20 sps:$4 sm:$0xff]  }
  0x1a   :  { %1362 = vmatprep.subr.bf16.mxu1 %v1484_v25  ;;  %v1550_v11 = vld [vmem:[%s2169_s0 + $0x128] ss:$20 sps:$4 sm:$0xff]   ;;  %23 = vst.msk [vmem:[#allocation2] sm:$0xff] %vm22_vm0, %v1551_v12  ;;  %24 = vst.msk [vmem:[#allocation2 + $0x8] sm:$0xff] %vm22_vm0, %v1551_v12 }
  0x1b   :  { %26 = vst.msk [vmem:[#allocation2 + $0x18] sm:$0xff] %vm22_vm0, %v1551_v12  ;;  %27 = vst.msk [vmem:[#allocation2 + $0x20] sm:$0xff] %vm22_vm0, %v1551_v12 }
  0x1c   :  { %1299 = vmatpush3.bf16.msra.mxu0 %v1485_v26  ;;  %28 = vst.msk [vmem:[#allocation2 + $0x28] sm:$0xff] %vm22_vm0, %v1551_v12  ;;  %29 = vst.msk [vmem:[#allocation2 + $0x30] sm:$0xff] %vm22_vm0, %v1551_v12 }
  0x1d   :  { %1363 = vmatpush3.bf16.msra.mxu1 %v1486_v27  ;;  %1300 = vmatprep.subr.bf16.mxu0 %v1487_v28  ;;  %30 = vst.msk [vmem:[#allocation2 + $0x38] sm:$0xff] %vm22_vm0, %v1551_v12  ;;  %31 = vst.msk [vmem:[#allocation2 + $0x40] sm:$0xff] %vm22_vm0, %v1551_v12 }
  0x1e   :  { %1364 = vmatprep.subr.bf16.mxu1 %v1488_v29  ;;  %32 = vst.msk [vmem:[#allocation2 + $0x48] sm:$0xff] %vm22_vm0, %v1551_v12  ;;  %33 = vst.msk [vmem:[#allocation2 + $0x50] sm:$0xff] %vm22_vm0, %v1551_v12 }
  0x1f   :  { %34 = vst.msk [vmem:[#allocation2 + $0x58] sm:$0xff] %vm22_vm0, %v1551_v12  ;;  %35 = vst.msk [vmem:[#allocation2 + $0x60] sm:$0xff] %vm22_vm0, %v1551_v12 }
  0x20   :  { %1301 = vmatpush3.bf16.msra.mxu0 %v1489_v30  ;;  %36 = vst.msk [vmem:[#allocation2 + $0x68] sm:$0xff] %vm22_vm0, %v1551_v12  ;;  %37 = vst.msk [vmem:[#allocation2 + $0x70] sm:$0xff] %vm22_vm0, %v1551_v12 }
  0x21   :  { %1365 = vmatpush3.bf16.msra.mxu1 %v1490_v31  ;;  %1426 = vmatprep.subr.bf16.mxu0 %v1497_v36  ;;  %38 = vst.msk [vmem:[#allocation2 + $0x78] sm:$0xff] %vm22_vm0, %v1551_v12 }
  0x22   :  { %1450 = vmatprep.subr.bf16.mxu1 %v1497_v36 }
  0x23   :  { %649 = vmatmul.mubr.bf16.vlgmr.msra.gmra.mxu0 %v1491_v32 }
  0x24   :  { %746 = vmatmul.mubr.bf16.vlgmr.msra.gmra.mxu1 %v1494_v34  ;;  %1427 = vmatpush3.bf16.msra.mxu0 %v1497_v36 }
  0x25   :  { %1454 = vmatpush3.bf16.msra.mxu1 %v1497_v36  ;;  %656 = vmatprep.mubr.bf16.mxu0 %v1498_v37 }
  0x26   :  { %753 = vmatprep.mubr.bf16.mxu1 %v1500_v38  ;;  %1428 = vmatprep.subr.bf16.mxu0 %v1510_v42 }
  0x27   :  { %1451 = vmatprep.subr.bf16.mxu1 %v1510_v42 }
  0x28   :  { %1429 = vmatpush3.bf16.msra.mxu0 %v1510_v42 }
  0x29   :  { %1455 = vmatpush3.bf16.msra.mxu1 %v1510_v42  ;;  %1430 = vmatprep.subr.bf16.mxu0 %v1523_v46 }
  0x2a   :  { %1452 = vmatprep.subr.bf16.mxu1 %v1523_v46 }
  0x2b   :  { %657 = vmatmul.mubr.bf16.gmra.mxu0 %v1502_v39 }
  0x2c   :  { %754 = vmatmul.mubr.bf16.gmra.mxu1 %v1503_v40  ;;  %664 = vmatprep.mubr.bf16.mxu0 %v1504_v41 }
  0x2d   :  { %761 = vmatprep.mubr.bf16.mxu1 %v1506_v43  ;;  %1431 = vmatpush3.bf16.msra.mxu0 %v1523_v46 }
  0x2e   :  { %1456 = vmatpush3.bf16.msra.mxu1 %v1523_v46  ;;  %1432 = vmatprep.subr.bf16.mxu0 %v1536_v49 }
  0x2f   :  { %1453 = vmatprep.subr.bf16.mxu1 %v1536_v49 }
  0x31   :  { %1433 = vmatpush3.bf16.msra.mxu0 %v1536_v49 }
  0x32   :  { %1457 = vmatpush3.bf16.msra.mxu1 %v1536_v49 }
  0x33   :  { %665 = vmatmul.mubr.bf16.gmra.mxu0 %v1508_v44 }
  0x34   :  { %762 = vmatmul.mubr.bf16.gmra.mxu1 %v1509_v45  ;;  %672 = vmatprep.mubr.bf16.mxu0 %v1511_v47 }
  0x35   :  { %769 = vmatprep.mubr.bf16.mxu1 %v1513_v48 }
  0x3b   :  { %673 = vmatmul.mubr.bf16.gmra.mxu0 %v1515_v50 }
  0x3c   :  { %770 = vmatmul.mubr.bf16.gmra.mxu1 %v1516_v51  ;;  %680 = vmatprep.mubr.bf16.mxu0 %v1517_v52 }
  0x3d   :  { %777 = vmatprep.mubr.bf16.mxu1 %v1519_v53 }
  0x43   :  { %681 = vmatmul.mubr.bf16.gmra.mxu0 %v1521_v54 }
  0x44   :  { %778 = vmatmul.mubr.bf16.gmra.mxu1 %v1522_v55  ;;  %688 = vmatprep.mubr.bf16.mxu0 %v1524_v56 }
  0x45   :  { %785 = vmatprep.mubr.bf16.mxu1 %v1526_v57 }
  0x4b   :  { %689 = vmatmul.mubr.bf16.gmra.mxu0 %v1528_v58 }
  0x4c   :  { %786 = vmatmul.mubr.bf16.gmra.mxu1 %v1529_v59  ;;  %696 = vmatprep.mubr.bf16.mxu0 %v1530_v60 }
  0x4d   :  { %793 = vmatprep.mubr.bf16.mxu1 %v1532_v61 }
  0x53   :  { %697 = vmatmul.mubr.bf16.gmra.mxu0 %v1534_v62 }
  0x54   :  { %794 = vmatmul.mubr.bf16.gmra.mxu1 %v1535_v63  ;;  %704 = vmatprep.mubr.bf16.mxu0 %v1537_v0 }
  0x55   :  { %801 = vmatprep.mubr.bf16.mxu1 %v1539_v1 }
  0x5b   :  { %705 = vmatmul.mubr.bf16.gmra.mxu0 %v1541_v2  ;;  %v1918_v2 = vld [vmem:[%s2170_s3 + $0x8] sm:$0xff]  }
  0x5c   :  { %802 = vmatmul.mubr.bf16.gmra.mxu1 %v1542_v3  ;;  %1434 = vmatprep.mubr.msk.bf16.mxu0 %vm22_vm0, %v1543_v4  ;;  %v1925_v4 = vld [vmem:[%s2170_s3 + $0x28] sm:$0xff]  }
  0x5d   :  { %1442 = vmatprep.mubr.msk.bf16.mxu1 %vm22_vm0, %v1544_v5  ;;  %v1930_v5 = vld [vmem:[%s2170_s3] sm:$0xff]  }
  0x5e   :  { %2184 = vst [vmem:[#allocation10_spill] sm:$0xff] %v1930_v5 }
  0x63   :  { %1435 = vmatmul.mubr.msk.bf16.vlgmr.msra.gmra.mxu0 %vm22_vm0, %v1545_v6  ;;  %v1935_v6 = vld [vmem:[%s2170_s3 + $0x20] sm:$0xff]  }
  0x64   :  { %1443 = vmatmul.mubr.msk.bf16.vlgmr.msra.gmra.mxu1 %vm22_vm0, %v1546_v7  ;;  %1438 = vmatprep.mubr.msk.bf16.mxu0 %vm22_vm0, %v1547_v8  ;;  %2185 = vst [vmem:[#allocation11_spill] sm:$0xff] %v1935_v6 }
  0x65   :  { %1446 = vmatprep.mubr.msk.bf16.mxu1 %vm22_vm0, %v1548_v9  ;;  %v1944_v9 = vld [vmem:[%s2170_s3 + $0x18] sm:$0xff]  }
  0x6b   :  { %1439 = vmatmul.mubr.msk.bf16.gmra.mxu0 %vm22_vm0, %v1549_v10  ;;  %v1949_v10 = vld [vmem:[%s2170_s3 + $0x38] sm:$0xff]  }
  0x6c   :  { %1447 = vmatmul.mubr.msk.bf16.gmra.mxu1 %vm22_vm0, %v1550_v11 }
  0xe3   :  { %v1829_v13 = vpop.f32.mrf.mxu0 }
  0xe4   :  { %v1831_v14 = vpop.f32.mrf.mxu1 }
  0xe5   :  { %v1833_v15 = vpop.f32.mrf.mxu0 }
  0xe6   :  { %v1835_v16 = vpop.f32.mrf.mxu1 }
  0xe7   :  { %v1837_v17 = vpop.f32.mrf.mxu0 }
  0xe8   :  { %v1839_v18 = vpop.f32.mrf.mxu1 }
  0xe9   :  { %v1841_v19 = vpop.f32.mrf.mxu0 }
  0xea   :  { %v1843_v20 = vpop.f32.mrf.mxu1 }
  0xeb   :  { %v1845_v21 = vpop.f32.mrf.mxu0  ;;  %v1371_v12 = vadd.f32 %v1843_v20, %v1839_v18 }
  0xec   :  { %v1847_v22 = vpop.f32.mrf.mxu1 }
  0xed   :  { %v1849_v23 = vpop.f32.mrf.mxu0 }
  0xee   :  { %v1851_v24 = vpop.f32.mrf.mxu1  ;;  %v1310_v6 = vadd.f32 %v1849_v23, %v1845_v21 }
  0xef   :  { %v1853_v25 = vpop.f32.mrf.mxu0 }
  0xf0   :  { %v1855_v26 = vpop.f32.mrf.mxu1 }
  0xf1   :  { %v1857_v27 = vpop.f32.mrf.mxu0 }
  0xf2   :  { %v1859_v28 = vpop.f32.mrf.mxu1 }
  0xf3   :  { %v1861_v29 = vpop.f32.mrf.mxu0  ;;  %v1377_v18 = vadd.f32 %v1859_v28, %v1855_v26 }
  0xf4   :  { %v1863_v30 = vpop.f32.mrf.mxu1 }
  0xf5   :  { %v1865_v31 = vpop.f32.mrf.mxu0 }
  0xf6   :  { %v1867_v32 = vpop.f32.mrf.mxu1 }
  0xf7   :  { %v1869_v33 = vpop.f32.mrf.mxu0  ;;  %v1380_v20 = vadd.f32 %v1867_v32, %v1863_v30 }
  0xf8   :  { %v1871_v34 = vpop.f32.mrf.mxu1 }
  0xf9   :  { %2177 = vst [vmem:[#allocation3_spill] sm:$0xff] %v1871_v34  ;;  %v1873_v35 = vpop.f32.mrf.mxu0  ;;  %v1368_v34 = vadd.f32 %v1835_v16, %v1831_v14 }
  0xfa   :  { %v1875_v36 = vpop.f32.mrf.mxu1 }
  0xfb   :  { %2178 = vst [vmem:[#allocation4_spill] sm:$0xff] %v1875_v36  ;;  %v1877_v37 = vpop.f32.mrf.mxu0 }
  0xfc   :  { %v1879_v38 = vpop.f32.mrf.mxu1 }
  0xfd   :  { %v1881_v39 = vpop.f32.mrf.mxu0 }
  0xfe   :  { %v1883_v40 = vpop.f32.mrf.mxu1  ;;  %v1322_v26 = vadd.f32 %v1881_v39, %v1877_v37 }
  0xff   :  { %v1885_v41 = vpop.f32.mrf.mxu0  ;;  %v1386_v30 = vadd.f32 %v1883_v40, %v1879_v38 }
 0x100   :  { %v1887_v42 = vpop.f32.mrf.mxu1 }
 0x101   :  { %2179 = vst [vmem:[#allocation5_spill] sm:$0xff] %v1887_v42  ;;  %v1889_v43 = vpop.f32.mrf.mxu0 }
 0x102   :  { %2180 = vst [vmem:[#allocation6_spill] sm:$0xff] %v1889_v43  ;;  %v1891_v44 = vpop.f32.mrf.mxu1  ;;  %v1962_v43 = vld [vmem:[%s2170_s3 + $0x10] sm:$0xff]  }
 0x103   :  { %2181 = vst [vmem:[#allocation7_spill] sm:$0xff] %v1891_v44  ;;  %v1893_v45 = vpop.f32.mrf.mxu0  ;;  %v1257_v44 = vunpack.c.l.bf16 %v1962_v43 }
 0x104   :  { %v1895_v46 = vpop.f32.mrf.mxu1 }
 0x105   :  { %v1327_v47 = vpop.f32.mrf.mxu0 }
 0x106   :  { %v1391_v48 = vpop.f32.mrf.mxu1 }
 0x107   :  { %v1897_v49 = vpop.f32.mrf.mxu0  ;;  %v1392_v23 = vadd.f32 %v1391_v48, %v1895_v46  ;;  %v2007_v48 = vadd.f32 %v1873_v35, %v1869_v33 }
 0x108   :  { %v1899_v50 = vpop.f32.mrf.mxu1 }
 0x109   :  { %v1901_v51 = vpop.f32.mrf.mxu0 }
 0x10a   :  { %v1903_v52 = vpop.f32.mrf.mxu1 }
 0x10b   :  { %v1332_v53 = vpop.f32.mrf.mxu0  ;;  %v1395_v38 = vadd.f32 %v1903_v52, %v1899_v50  ;;  %v50_v52 = vld [vmem:[#allocation2 + $0x58] sm:$0xff] }
 0x10c   :  { %v1396_v54 = vpop.f32.mrf.mxu1 }
 0x10d   :  { %v1333_v55 = vpop.f32.mrf.mxu0 }
 0x10e   :  { %v1397_v56 = vpop.f32.mrf.mxu1  ;;  %v1334_v5 = vadd.f32 %v1333_v55, %v1332_v53  ;;  %v1262_v53 = vunpack.c.h.bf16 %v1944_v9 }
 0x10f   :  { %v1335_v57 = vpop.f32.mrf.mxu0  ;;  %v1398_v14 = vadd.f32 %v1397_v56, %v1396_v54  ;;  %v49_v56 = vld [vmem:[#allocation2 + $0x50] sm:$0xff] }
 0x110   :  { %v1399_v58 = vpop.f32.mrf.mxu1 }
 0x111   :  { %v1336_v59 = vpop.f32.mrf.mxu0  ;;  %v788_v46 = vadd.f32 %v1398_v14, %v1334_v5  ;;  %v47_v5 = vld [vmem:[#allocation2 + $0x40] sm:$0xff] }
 0x112   :  { %v1400_v60 = vpop.f32.mrf.mxu1  ;;  %v1337_v32 = vadd.f32 %v1336_v59, %v1335_v57  ;;  %v39_v57 = vld [vmem:[#allocation2] sm:$0xff] }
 0x113   :  { %v1905_v61 = vpop.f32.mrf.mxu0  ;;  %v1401_v54 = vadd.f32 %v1400_v60, %v1399_v58 }
 0x114   :  { %v1907_v62 = vpop.f32.mrf.mxu1 }
 0x115   :  { %v1909_v63 = vpop.f32.mrf.mxu0 }
 0x116   :  { %v1911_v0 = vpop.f32.mrf.mxu1 }
 0x117   :  { %v1913_v1 = vpop.f32.mrf.mxu0  ;;  %v1404_v50 = vadd.f32 %v1911_v0, %v1907_v62 }
 0x118   :  { %2182 = vst [vmem:[#allocation8_spill] sm:$0xff] %v1913_v1  ;;  %v1920_v3 = vpop.f32.mrf.mxu1  ;;  %v1967_v1 = vld [vmem:[%s2170_s3 + $0x30] sm:$0xff]  }
 0x119   :  { %2183 = vst [vmem:[#allocation9_spill] sm:$0xff] %v1920_v3  ;;  %v1937_v7 = vpop.f32.mrf.mxu0  ;;  %v1307_v3 = vadd.f32 %v1841_v19, %v1837_v17  ;;  %v1273_v42 = vunpack.c.l.bf16 %v1967_v1  ;;  %v1313_v17 = vadd.f32 %v1857_v27, %v1853_v25  ;;  %v1316_v19 = vadd.f32 %v1865_v31, %v1861_v29 }
 0x11a   :  { %2186 = vst [vmem:[#allocation12_spill] sm:$0xff] %v1937_v7  ;;  %v1939_v8 = vpop.f32.mrf.mxu1  ;;  %v1304_v7 = vadd.f32 %v1833_v15, %v1829_v13  ;;  %v1374_v13 = vadd.f32 %v1851_v24, %v1847_v22  ;;  %v1328_v22 = vadd.f32 %v1327_v47, %v1893_v45  ;;  %v41_v45 = vld [vmem:[#allocation2 + $0x10] sm:$0xff] }
 0x11b   :  { %2187 = vst [vmem:[#allocation13_spill] sm:$0xff] %v1939_v8  ;;  %v1344_v11 = vpop.f32.mrf.mxu0  ;;  %v751_v31 = vadd.f32 %v1371_v12, %v1307_v3  ;;  %v759_v37 = vadd.f32 %v1377_v18, %v1313_v17  ;;  %v2009_v39 = vadd.f32 %v1380_v20, %v1316_v19  ;;  %v791_v17 = vadd.f32 %v1401_v54, %v1337_v32 }
 0x11c   :  { %v1408_v8 = vpop.f32.mrf.mxu1  ;;  %v756_v28 = vadd.f32 %v1374_v13, %v1310_v6  ;;  %v748_v29 = vadd.f32 %v1368_v34, %v1304_v7  ;;  %v1331_v34 = vadd.f32 %v1901_v51, %v1897_v49  ;;  %v780_v59 = vadd.f32 %v1392_v23, %v1328_v22  ;;  %v42_v13 = vld [vmem:[#allocation2 + $0x18] sm:$0xff]  ;;  %v40_v22 = vld [vmem:[#allocation2 + $0x8] sm:$0xff] }
 0x11d   :  { %v1345_v36 = vpop.f32.mrf.mxu0  ;;  %v772_v18 = vadd.f32 %v1386_v30, %v1322_v26  ;;  %v1340_v49 = vadd.f32 %v1909_v63, %v1905_v61  ;;  %v2189_v61 = vld [vmem:[#allocation5_spill] sm:$0xff]  ;;  %v2190_v63 = vld [vmem:[#allocation7_spill] sm:$0xff] }
 0x11e   :  { %v1409_v15 = vpop.f32.mrf.mxu1  ;;  %v1346_v60 = vadd.f32 %v1345_v36, %v1344_v11  ;;  %v2188_v11 = vld [vmem:[#allocation6_spill] sm:$0xff]  ;;  %v1389_v26 = vadd.f32 %v2190_v63, %v2189_v61 }
 0x11f   :  { %v1983_v16 = vpop.f32.mrf.mxu0  ;;  %v1410_v3 = vadd.f32 %v1409_v15, %v1408_v8  ;;  %v1325_v15 = vadd.f32 %v2188_v11, %v1885_v41 }
 0x120   :  { %v1995_v21 = vpop.f32.mrf.mxu1 }
 0x121   :  { %v1348_v24 = vpop.f32.mrf.mxu0  ;;  %v804_v30 = vadd.f32 %v1410_v3, %v1346_v60  ;;  %v2039_v60 = vld [vmem:[%s2171_s2] ss:$0 sm:$0xff] }
 0x122   :  { %v1412_v27 = vpop.f32.mrf.mxu1  ;;  %v1349_v32 = vadd.f32 %v1348_v24, %v1983_v16  ;;  %v2194_v16 = vld [vmem:[#allocation12_spill] sm:$0xff] }
 0x123   :  { %v1436_v47 = vpop.f32.mrf.mxu0  ;;  %v1413_v41 = vadd.f32 %v1412_v27, %v1995_v21  ;;  %v2195_v21 = vld [vmem:[#allocation9_spill] sm:$0xff] }
 0x124   :  { %v853_v55 = vadd.f32 %v1436_v47, %v756_v28  ;;  %v1444_v25 = vpop.f32.mrf.mxu1  ;;  %v48_v28 = vld [vmem:[#allocation2 + $0x48] sm:$0xff]  ;;  %v45_v47 = vld [vmem:[#allocation2 + $0x30] sm:$0xff] }
 0x125   :  { %v885_v40 = vadd.f32 %v1444_v25, %v788_v46  ;;  %v844_v58 = vpop.f32.mrf.mxu0  ;;  %v783_v25 = vadd.f32 %v1395_v38, %v1331_v34  ;;  %v53_v38 = vld [vmem:[#allocation2 + $0x70] sm:$0xff] }
 0x126   :  { %v909_v33 = vadd.f32 %v853_v55, %v41_v45  ;;  %v845_v35 = vadd.f32 %v844_v58, %v748_v29  ;;  %v876_v6 = vpop.f32.mrf.mxu1  ;;  %v2191_v55 = vld [vmem:[#allocation3_spill] sm:$0xff]  ;;  %v2193_v58 = vld [vmem:[#allocation8_spill] sm:$0xff]  ;;  %v2196_v27 = vld [vmem:[#allocation13_spill] sm:$0xff] }
 0x127   :  { %v917_v7 = vadd.f32 %v885_v40, %v49_v56  ;;  %v877_v12 = vadd.f32 %v876_v6, %v780_v59  ;;  %v1437_v14 = vpop.f32.mrf.mxu0  ;;  %v2192_v56 = vld [vmem:[#allocation4_spill] sm:$0xff]  ;;  %v1343_v24 = vadd.f32 %v2194_v16, %v2193_v58  ;;  %v1407_v59 = vadd.f32 %v2196_v27, %v2195_v21 }
 0x128   :  { %925 = vst.msk [vmem:[#allocation2 + $0x10] sm:$0xff] %vm22_vm0, %v909_v33  ;;  %v907_v36 = vadd.f32 %v845_v35, %v39_v57  ;;  %v856_v51 = vadd.f32 %v1437_v14, %v759_v37  ;;  %v1445_v8 = vpop.f32.mrf.mxu1  ;;  %v1383_v37 = vadd.f32 %v2192_v56, %v2191_v55  ;;  %v796_v57 = vadd.f32 %v1404_v50, %v1340_v49  ;;  %v43_v35 = vld [vmem:[#allocation2 + $0x20] sm:$0xff] }
 0x129   :  { %933 = vst.msk [vmem:[#allocation2 + $0x50] sm:$0xff] %vm22_vm0, %v917_v7  ;;  %v915_v19 = vadd.f32 %v877_v12, %v47_v5  ;;  %v888_v20 = vadd.f32 %v1445_v8, %v791_v17  ;;  %v847_v23 = vpop.f32.mrf.mxu0  ;;  %v51_v12 = vld [vmem:[#allocation2 + $0x60] sm:$0xff]  ;;  %v775_v14 = vadd.f32 %v1389_v26, %v1325_v15  ;;  %v1258_v17 = vunpack.c.h.bf16 %v1962_v43  ;;  %v54_v15 = vld [vmem:[#allocation2 + $0x78] sm:$0xff] }
 0x12a   :  { %923 = vst.msk [vmem:[#allocation2] sm:$0xff] %vm22_vm0, %v907_v36  ;;  %v910_v62 = vadd.f32 %v856_v51, %v42_v13  ;;  %v848_v0 = vadd.f32 %v847_v23, %v751_v31  ;;  %v879_v29 = vpop.f32.mrf.mxu1  ;;  %v46_v36 = vld [vmem:[#allocation2 + $0x38] sm:$0xff]  ;;  %v1274_v8 = vunpack.c.h.bf16 %v1967_v1  ;;  %v767_v23 = vadd.f32 %v1383_v37, %v2007_v48 }
 0x12b   :  { %931 = vst.msk [vmem:[#allocation2 + $0x40] sm:$0xff] %vm22_vm0, %v915_v19  ;;  %v918_v54 = vadd.f32 %v888_v20, %v50_v52  ;;  %v880_v45 = vadd.f32 %v879_v29, %v783_v25  ;;  %v1440_v46 = vpop.f32.mrf.mxu0  ;;  %v807_v52 = vadd.f32 %v1413_v41, %v1349_v32  ;;  %v2197_v29 = vunpack.c.l.bf16 %v1918_v2 }
 0x12c   :  { %926 = vst.msk [vmem:[#allocation2 + $0x18] sm:$0xff] %vm22_vm0, %v910_v62  ;;  %v908_v34 = vadd.f32 %v848_v0, %v40_v22  ;;  %v869_v31 = vadd.f32 %v1440_v46, %v772_v18  ;;  %v1448_v40 = vpop.f32.mrf.mxu1  ;;  %v44_v62 = vld [vmem:[#allocation2 + $0x28] sm:$0xff]  ;;  %v2198_v46 = vunpack.c.l.bf16 %v1925_v4 }
 0x12d   :  { %934 = vst.msk [vmem:[#allocation2 + $0x58] sm:$0xff] %vm22_vm0, %v918_v54  ;;  %v916_v3 = vadd.f32 %v880_v45, %v48_v28  ;;  %v901_v33 = vadd.f32 %v1448_v40, %v804_v30  ;;  %v860_v5 = vpop.f32.mrf.mxu0  ;;  %v799_v28 = vadd.f32 %v1407_v59, %v1343_v24  ;;  %v52_v45 = vld [vmem:[#allocation2 + $0x68] sm:$0xff]  ;;  %v2199_v40 = vld [vmem:[#allocation10_spill] sm:$0xff]  ;;  %v2201_v59 = vld [vmem:[#allocation11_spill] sm:$0xff] }
 0x12e   :  { %924 = vst.msk [vmem:[#allocation2 + $0x8] sm:$0xff] %vm22_vm0, %v908_v34  ;;  %v913_v6 = vadd.f32 %v869_v31, %v45_v47  ;;  %v861_v7 = vadd.f32 %v860_v5, %v2009_v39  ;;  %v892_v13 = vpop.f32.mrf.mxu1 }
 0x12f   :  { %v944_v18 = vld [vmem:[#allocation2 + $0x10] sm:$0xff]  ;;  %932 = vst.msk [vmem:[#allocation2 + $0x48] sm:$0xff] %vm22_vm0, %v916_v3  ;;  %v921_v49 = vadd.f32 %v901_v33, %v53_v38  ;;  %v893_v50 = vadd.f32 %v892_v13, %v796_v57  ;;  %v1441_v51 = vpop.f32.mrf.mxu0  ;;  %v2200_v57 = vunpack.c.l.bf16 %v2199_v40  ;;  %v2202_v3 = vunpack.c.l.bf16 %v2201_v59 }
 0x130   :  { %v967_v11 = vadd.f32 %v2039_v60, %v944_v18  ;;  %v952_v19 = vld [vmem:[#allocation2 + $0x50] sm:$0xff]  ;;  %929 = vst.msk [vmem:[#allocation2 + $0x30] sm:$0xff] %vm22_vm0, %v913_v6  ;;  %v911_v39 = vadd.f32 %v861_v7, %v43_v35  ;;  %v872_v20 = vadd.f32 %v1441_v51, %v775_v14  ;;  %v1449_v22 = vpop.f32.mrf.mxu1  ;;  %v2203_v13 = vunpack.c.h.bf16 %v1918_v2 }
 0x131   :  { %v975_v25 = vadd.f32 %v2039_v60, %v952_v19  ;;  %v942_v61 = vld [vmem:[#allocation2] sm:$0xff]  ;;  %937 = vst.msk [vmem:[#allocation2 + $0x70] sm:$0xff] %vm22_vm0, %v921_v49  ;;  %v919_v63 = vadd.f32 %v893_v50, %v51_v12  ;;  %v904_v26 = vadd.f32 %v1449_v22, %v807_v52  ;;  %v863_v0 = vpop.f32.mrf.mxu0  ;;  %v2204_v51 = vunpack.c.h.bf16 %v1925_v4 }
 0x132   :  { %v1015_v30 = vadd.f32 %v2197_v29, %v967_v11  ;;  %v965_v32 = vadd.f32 %v2039_v60, %v942_v61  ;;  %v950_v41 = vld [vmem:[#allocation2 + $0x40] sm:$0xff]  ;;  %927 = vst.msk [vmem:[#allocation2 + $0x20] sm:$0xff] %vm22_vm0, %v911_v39  ;;  %v914_v54 = vadd.f32 %v872_v20, %v46_v36  ;;  %v864_v48 = vadd.f32 %v863_v0, %v767_v23  ;;  %v895_v47 = vpop.f32.mrf.mxu1 }
 0x133   :  { %v1023_v55 = vadd.f32 %v2198_v46, %v975_v25  ;;  %v973_v56 = vadd.f32 %v2039_v60, %v950_v41  ;;  %v945_v37 = vld [vmem:[#allocation2 + $0x18] sm:$0xff]  ;;  %935 = vst.msk [vmem:[#allocation2 + $0x60] sm:$0xff] %vm22_vm0, %v919_v63  ;;  %v922_v34 = vadd.f32 %v904_v26, %v54_v15  ;;  %v896_v31 = vadd.f32 %v895_v47, %v799_v28 }
 0x134   :  { %v1031_v38 = vmax.f32 %v1015_v30, 0.0  ;;  %v1013_v58 = vadd.f32 %v2200_v57, %v965_v32  ;;  %v968_v16 = vadd.f32 %v2039_v60, %v945_v37  ;;  %v953_v24 = vld [vmem:[#allocation2 + $0x58] sm:$0xff]  ;;  %930 = vst.msk [vmem:[#allocation2 + $0x38] sm:$0xff] %vm22_vm0, %v914_v54  ;;  %v912_v21 = vadd.f32 %v864_v48, %v44_v62 }
 0x135   :  { %v1039_v27 = vmax.f32 %v1023_v55, 0.0  ;;  %v1021_v33 = vadd.f32 %v2202_v3, %v973_v56  ;;  %v976_v35 = vadd.f32 %v2039_v60, %v953_v24  ;;  %v943_v5 = vld [vmem:[#allocation2 + $0x8] sm:$0xff]  ;;  %938 = vst.msk [vmem:[#allocation2 + $0x78] sm:$0xff] %vm22_vm0, %v922_v34  ;;  %v920_v6 = vadd.f32 %v896_v31, %v52_v45 }
 0x136   :  { %v1233_v7 = vpack.c.bf16 %v1031_v38, %v1031_v38  ;;  %v1029_v12 = vmax.f32 %v1013_v58, 0.0  ;;  %v1016_v14 = vadd.f32 %v2203_v13, %v968_v16  ;;  %v966_v18 = vadd.f32 %v2039_v60, %v943_v5  ;;  %v951_v49 = vld [vmem:[#allocation2 + $0x48] sm:$0xff]  ;;  %928 = vst.msk [vmem:[#allocation2 + $0x28] sm:$0xff] %vm22_vm0, %v912_v21 }
 0x137   :  { %v1241_v50 = vpack.c.bf16 %v1039_v27, %v1039_v27  ;;  %v1037_v36 = vmax.f32 %v1021_v33, 0.0  ;;  %v1024_v52 = vadd.f32 %v2204_v51, %v976_v35  ;;  %v974_v11 = vadd.f32 %v2039_v60, %v951_v49  ;;  %v948_v19 = vld [vmem:[#allocation2 + $0x30] sm:$0xff]  ;;  %936 = vst.msk [vmem:[#allocation2 + $0x68] sm:$0xff] %vm22_vm0, %v920_v6 }
 0x138   :  { %1112 = vst.msk [vmem:[%s2172_s4 + $0x8] sm:$0xf] %vm1109_vm1, %v1233_v7  ;;  %v1231_v2 = vpack.c.bf16 %v1029_v12, %v1029_v12  ;;  %v1032_v39 = vmax.f32 %v1016_v14, 0.0  ;;  %v2205_v20 = vunpack.c.h.bf16 %v2199_v40  ;;  %v971_v22 = vadd.f32 %v2039_v60, %v948_v19  ;;  %v956_v23 = vld [vmem:[#allocation2 + $0x70] sm:$0xff] }
 0x139   :  { %1120 = vst.msk [vmem:[%s2172_s4 + $0x28] sm:$0xf] %vm1109_vm1, %v1241_v50  ;;  %v1239_v4 = vpack.c.bf16 %v1037_v36, %v1037_v36  ;;  %v1040_v25 = vmax.f32 %v1024_v52, 0.0  ;;  %v2206_v61 = vunpack.c.h.bf16 %v2201_v59  ;;  %v979_v26 = vadd.f32 %v2039_v60, %v956_v23  ;;  %v946_v62 = vld [vmem:[#allocation2 + $0x20] sm:$0xff] }
 0x13a   :  { %v1014_v15 = vadd.f32 %v2205_v20, %v966_v18  ;;  %1110 = vst.msk [vmem:[%s2172_s4] sm:$0xf] %vm1109_vm1, %v1231_v2  ;;  %v1234_v0 = vpack.c.bf16 %v1032_v39, %v1032_v39  ;;  %v2207_v29 = vunpack.c.l.bf16 %v1944_v9  ;;  %v969_v32 = vadd.f32 %v2039_v60, %v946_v62  ;;  %v954_v41 = vld [vmem:[#allocation2 + $0x60] sm:$0xff] }
 0x13b   :  { %v1022_v63 = vadd.f32 %v2206_v61, %v974_v11  ;;  %1118 = vst.msk [vmem:[%s2172_s4 + $0x20] sm:$0xf] %vm1109_vm1, %v1239_v4  ;;  %v1242_v54 = vpack.c.bf16 %v1040_v25, %v1040_v25  ;;  %v2208_v45 = vunpack.c.l.bf16 %v1949_v10  ;;  %v977_v46 = vadd.f32 %v2039_v60, %v954_v41  ;;  %v949_v55 = vld [vmem:[#allocation2 + $0x38] sm:$0xff] }
 0x13c   :  { %v1030_v28 = vmax.f32 %v1014_v15, 0.0  ;;  %v1019_v30 = vadd.f32 %v2207_v29, %v971_v22  ;;  %1113 = vst.msk [vmem:[%s2172_s4 + $0xc] sm:$0xf] %vm1109_vm1, %v1234_v0  ;;  %v1017_v34 = vadd.f32 %v1257_v44, %v969_v32  ;;  %v972_v31 = vadd.f32 %v2039_v60, %v949_v55  ;;  %v957_v38 = vld [vmem:[#allocation2 + $0x78] sm:$0xff] }
 0x13d   :  { %v1038_v48 = vmax.f32 %v1022_v63, 0.0  ;;  %v1027_v47 = vadd.f32 %v2208_v45, %v979_v26  ;;  %1121 = vst.msk [vmem:[%s2172_s4 + $0x2c] sm:$0xf] %vm1109_vm1, %v1242_v54  ;;  %v1025_v58 = vadd.f32 %v1273_v42, %v977_v46  ;;  %v980_v16 = vadd.f32 %v2039_v60, %v957_v38  ;;  %v947_v24 = vld [vmem:[#allocation2 + $0x28] sm:$0xff] }
 0x13e   :  { %v1232_v56 = vpack.c.bf16 %v1030_v28, %v1030_v28  ;;  %v1035_v37 = vmax.f32 %v1019_v30, 0.0  ;;  %v1033_v21 = vmax.f32 %v1017_v34, 0.0  ;;  %v1020_v27 = vadd.f32 %v1262_v53, %v972_v31  ;;  %v955_v3 = vld [vmem:[#allocation2 + $0x68] sm:$0xff] }
 0x13f   :  { %v1240_v40 = vpack.c.bf16 %v1038_v48, %v1038_v48  ;;  %v1043_v57 = vmax.f32 %v1027_v47, 0.0  ;;  %v970_v59 = vadd.f32 %v2039_v60, %v947_v24  ;;  %v1041_v33 = vmax.f32 %v1025_v58, 0.0 }
 0x140   :  { %1111 = vst.msk [vmem:[%s2172_s4 + $0x4] sm:$0xf] %vm1109_vm1, %v1232_v56  ;;  %v1237_v44 = vpack.c.bf16 %v1035_v37, %v1035_v37  ;;  %v2209_v35 = vunpack.c.h.bf16 %v1949_v10  ;;  %v978_v6 = vadd.f32 %v2039_v60, %v955_v3  ;;  %v1235_v9 = vpack.c.bf16 %v1033_v21, %v1033_v21 }
 0x141   :  { %1119 = vst.msk [vmem:[%s2172_s4 + $0x24] sm:$0xf] %vm1109_vm1, %v1240_v40  ;;  %v1245_v42 = vpack.c.bf16 %v1043_v57, %v1043_v57  ;;  %v1036_v53 = vmax.f32 %v1020_v27, 0.0  ;;  %v1018_v7 = vadd.f32 %v1258_v17, %v970_v59  ;;  %v1243_v12 = vpack.c.bf16 %v1041_v33, %v1041_v33 }
 0x142   :  { %v1028_v5 = vadd.f32 %v2209_v35, %v980_v16  ;;  %1116 = vst.msk [vmem:[%s2172_s4 + $0x18] sm:$0xf] %vm1109_vm1, %v1237_v44  ;;  %v1026_v60 = vadd.f32 %v1274_v8, %v978_v6  ;;  %1114 = vst.msk [vmem:[%s2172_s4 + $0x10] sm:$0xf] %vm1109_vm1, %v1235_v9 }
 0x143   :  { %1124 = vst.msk [vmem:[%s2172_s4 + $0x38] sm:$0xf] %vm1109_vm1, %v1245_v42  ;;  %v1238_v13 = vpack.c.bf16 %v1036_v53, %v1036_v53  ;;  %v1034_v14 = vmax.f32 %v1018_v7, 0.0  ;;  %1122 = vst.msk [vmem:[%s2172_s4 + $0x30] sm:$0xf] %vm1109_vm1, %v1243_v12 }
 0x144   :  { %v1044_v10 = vmax.f32 %v1028_v5, 0.0  ;;  %v1042_v17 = vmax.f32 %v1026_v60, 0.0 }
 0x145   :  { %1117 = vst.msk [vmem:[%s2172_s4 + $0x1c] sm:$0xf] %vm1109_vm1, %v1238_v13  ;;  %v1236_v1 = vpack.c.bf16 %v1034_v14, %v1034_v14 }
 0x146   :  { %v1246_v43 = vpack.c.bf16 %v1044_v10, %v1044_v10  ;;  %v1244_v8 = vpack.c.bf16 %v1042_v17, %v1042_v17 }
 0x147   :  { %1115 = vst.msk [vmem:[%s2172_s4 + $0x14] sm:$0xf] %vm1109_vm1, %v1236_v1 }
 0x148   :  { %1125 = vst.msk [vmem:[%s2172_s4 + $0x3c] sm:$0xf] %vm1109_vm1, %v1246_v43  ;;  %1123 = vst.msk [vmem:[%s2172_s4 + $0x34] sm:$0xf] %vm1109_vm1, %v1244_v8 }

// kernel: quantized_resnet18_forward.31
= control target key start
LH: loop header
LB: loop body
LE: loop exit
PB: predicated region body
PF: predicated region fallthrough
CT: control target
= control target key end

     0   :  { %vm377_vm0 = vcmask 523264   ;;  %s944_s1 = inlined_call_operand.vmem [shape: bf16[576,128], index: 1, kind: input, shape index: {}]   ;;  %s945_s0 = inlined_call_operand.vmem [shape: bf16[32,576], index: 0, kind: input, shape index: {}]   ;;  %s946_s2 = inlined_call_operand.vmem [shape: f32[1,128], index: 2, kind: input, shape index: {}]   ;;  %s947_s3 = inlined_call_operand.vmem [shape: bf16[32,128], index: 3, kind: output, shape index: {}]  }
   0x1   :  { %v727_v0 = vld [vmem:[%s944_s1 + $0x78] sm:$0xff]   ;;  %v731_v4 = vld [vmem:[%s944_s1 + $0x70] sm:$0xff]   ;;  %v735_v8 = vld [vmem:[%s944_s1 + $0x68] sm:$0xff]  }
   0x2   :  { %v728_v1 = vld [vmem:[%s944_s1 + $0xf8] sm:$0xff]   ;;  %653 = vmatprep.subr.bf16.mxu0 %v727_v0  ;;  %v732_v5 = vld [vmem:[%s944_s1 + $0xf0] sm:$0xff]   ;;  %v736_v9 = vld [vmem:[%s944_s1 + $0xe8] sm:$0xff]  }
   0x3   :  { %v729_v2 = vld [vmem:[%s944_s1 + $0x38] sm:$0xff]   ;;  %681 = vmatprep.subr.bf16.mxu1 %v728_v1  ;;  %v733_v6 = vld [vmem:[%s944_s1 + $0x30] sm:$0xff]   ;;  %v737_v10 = vld [vmem:[%s944_s1 + $0x28] sm:$0xff]  }
   0x4   :  { %v730_v3 = vld [vmem:[%s944_s1 + $0xb8] sm:$0xff]   ;;  %654 = vmatpush3.bf16.msra.mxu0 %v729_v2  ;;  %v734_v7 = vld [vmem:[%s944_s1 + $0xb0] sm:$0xff]   ;;  %v738_v11 = vld [vmem:[%s944_s1 + $0xa8] sm:$0xff]  }
   0x5   :  { %682 = vmatpush3.bf16.msra.mxu1 %v730_v3  ;;  %655 = vmatprep.subr.bf16.mxu0 %v731_v4  ;;  %v739_v12 = vld [vmem:[%s944_s1 + $0x60] sm:$0xff]   ;;  %v743_v16 = vld [vmem:[%s944_s1 + $0x58] sm:$0xff]   ;;  %v747_v20 = vld [vmem:[%s944_s1 + $0x50] sm:$0xff]  }
   0x6   :  { %683 = vmatprep.subr.bf16.mxu1 %v732_v5  ;;  %v740_v13 = vld [vmem:[%s944_s1 + $0xe0] sm:$0xff]   ;;  %v744_v17 = vld [vmem:[%s944_s1 + $0xd8] sm:$0xff]   ;;  %v748_v21 = vld [vmem:[%s944_s1 + $0xd0] sm:$0xff]  }
   0x7   :  { %v741_v14 = vld [vmem:[%s944_s1 + $0x20] sm:$0xff]   ;;  %v745_v18 = vld [vmem:[%s944_s1 + $0x18] sm:$0xff]   ;;  %v749_v22 = vld [vmem:[%s944_s1 + $0x10] sm:$0xff]  }
   0x8   :  { %656 = vmatpush3.bf16.msra.mxu0 %v733_v6  ;;  %v742_v15 = vld [vmem:[%s944_s1 + $0xa0] sm:$0xff]   ;;  %v746_v19 = vld [vmem:[%s944_s1 + $0x98] sm:$0xff]   ;;  %v750_v23 = vld [vmem:[%s944_s1 + $0x90] sm:$0xff]  }
   0x9   :  { %684 = vmatpush3.bf16.msra.mxu1 %v734_v7  ;;  %657 = vmatprep.subr.bf16.mxu0 %v735_v8  ;;  %v751_v24 = vld [vmem:[%s944_s1 + $0x48] sm:$0xff]   ;;  %v755_v28 = vld [vmem:[%s944_s1 + $0x40] sm:$0xff]   ;;  %v765_v36 = vld [vmem:[%s944_s1 + $0x118] sm:$0xff]  }
   0xa   :  { %685 = vmatprep.subr.bf16.mxu1 %v736_v9  ;;  %v752_v25 = vld [vmem:[%s944_s1 + $0xc8] sm:$0xff]   ;;  %v756_v29 = vld [vmem:[%s944_s1 + $0xc0] sm:$0xff]   ;;  %v766_v37 = vld [vmem:[%s944_s1 + $0x110] sm:$0xff]  }
   0xb   :  { %v753_v26 = vld [vmem:[%s944_s1 + $0x8] sm:$0xff]   ;;  %v757_v30 = vld [vmem:[%s944_s1] sm:$0xff]  }
   0xc   :  { %658 = vmatpush3.bf16.msra.mxu0 %v737_v10  ;;  %v754_v27 = vld [vmem:[%s944_s1 + $0x88] sm:$0xff]   ;;  %v758_v31 = vld [vmem:[%s944_s1 + $0x80] sm:$0xff]  }
   0xd   :  { %686 = vmatpush3.bf16.msra.mxu1 %v738_v11  ;;  %659 = vmatprep.subr.bf16.mxu0 %v739_v12  ;;  %v759_v32 = vld [vmem:[%s945_s0] ss:$20 sps:$4 sm:$0xff]   ;;  %v761_v33 = vld [vmem:[%s945_s0 + $0x4] ss:$20 sps:$4 sm:$0xff]   ;;  %v762_v34 = vld [vmem:[%s945_s0 + $0x8] ss:$20 sps:$4 sm:$0xff]  }
   0xe   :  { %687 = vmatprep.subr.bf16.mxu1 %v740_v13  ;;  %v764_v35 = vld [vmem:[%s945_s0 + $0xc] ss:$20 sps:$4 sm:$0xff]   ;;  %416 = vmatprep.mubr.bf16.mxu0 %v761_v33  ;;  %v769_v39 = vld [vmem:[%s945_s0 + $0x34] ss:$20 sps:$4 sm:$0xff]   ;;  %v772_v42 = vld [vmem:[%s945_s0 + $0x30] ss:$20 sps:$4 sm:$0xff]  }
   0xf   :  { %465 = vmatprep.mubr.bf16.mxu1 %v764_v35  ;;  %v767_v38 = vld [vmem:[%s945_s0 + $0x2c] ss:$20 sps:$4 sm:$0xff]   ;;  %v771_v40 = vld [vmem:[%s945_s0 + $0x28] ss:$20 sps:$4 sm:$0xff]   ;;  %v775_v43 = vld [vmem:[%s945_s0 + $0x10] ss:$20 sps:$4 sm:$0xff]  }
  0x10   :  { %660 = vmatpush3.bf16.msra.mxu0 %v741_v14  ;;  %v773_v41 = vld [vmem:[%s944_s1 + $0x108] sm:$0xff]   ;;  %v774_v44 = vld [vmem:[%s944_s1 + $0x100] sm:$0xff]  }
  0x11   :  { %688 = vmatpush3.bf16.msra.mxu1 %v742_v15  ;;  %661 = vmatprep.subr.bf16.mxu0 %v743_v16  ;;  %v776_v45 = vld [vmem:[%s945_s0 + $0x38] ss:$20 sps:$4 sm:$0xff]   ;;  %v633_v10 = vld [vmem:[%s946_s2] ss:$0 sm:$0xff] }
  0x12   :  { %689 = vmatprep.subr.bf16.mxu1 %v744_v17 }
  0x14   :  { %662 = vmatpush3.bf16.msra.mxu0 %v745_v18 }
  0x15   :  { %690 = vmatpush3.bf16.msra.mxu1 %v746_v19  ;;  %663 = vmatprep.subr.bf16.mxu0 %v747_v20 }
  0x16   :  { %691 = vmatprep.subr.bf16.mxu1 %v748_v21 }
  0x18   :  { %664 = vmatpush3.bf16.msra.mxu0 %v749_v22 }
  0x19   :  { %692 = vmatpush3.bf16.msra.mxu1 %v750_v23  ;;  %665 = vmatprep.subr.bf16.mxu0 %v751_v24 }
  0x1a   :  { %693 = vmatprep.subr.bf16.mxu1 %v752_v25 }
  0x1c   :  { %666 = vmatpush3.bf16.msra.mxu0 %v753_v26 }
  0x1d   :  { %694 = vmatpush3.bf16.msra.mxu1 %v754_v27  ;;  %667 = vmatprep.subr.bf16.mxu0 %v755_v28 }
  0x1e   :  { %695 = vmatprep.subr.bf16.mxu1 %v756_v29 }
  0x20   :  { %668 = vmatpush3.bf16.msra.mxu0 %v757_v30 }
  0x21   :  { %696 = vmatpush3.bf16.msra.mxu1 %v758_v31  ;;  %715 = vmatprep.subr.bf16.mxu0 %v765_v36 }
  0x23   :  { %417 = vmatmul.mubr.bf16.vlgmr.msra.gmra.mxu0 %v759_v32 }
  0x24   :  { %466 = vmatmul.mubr.bf16.vlgmr.msra.gmra.mxu1 %v762_v34  ;;  %716 = vmatpush3.bf16.msra.mxu0 %v765_v36 }
  0x25   :  { %717 = vmatprep.subr.bf16.mxu0 %v766_v37  ;;  %424 = vmatprep.mubr.bf16.mxu0 %v767_v38 }
  0x26   :  { %473 = vmatprep.mubr.bf16.mxu1 %v769_v39 }
  0x28   :  { %718 = vmatpush3.bf16.msra.mxu0 %v766_v37 }
  0x29   :  { %719 = vmatprep.subr.bf16.mxu0 %v773_v41 }
  0x2b   :  { %425 = vmatmul.mubr.bf16.gmra.mxu0 %v771_v40 }
  0x2c   :  { %474 = vmatmul.mubr.bf16.gmra.mxu1 %v772_v42  ;;  %723 = vmatprep.mubr.msk.bf16.mxu0 %vm377_vm0, %v775_v43 }
  0x2d   :  { %720 = vmatpush3.bf16.msra.mxu0 %v773_v41 }
  0x2e   :  { %721 = vmatprep.subr.bf16.mxu0 %v774_v44 }
  0x31   :  { %722 = vmatpush3.bf16.msra.mxu0 %v774_v44 }
  0x34   :  { %724 = vmatmul.mubr.msk.bf16.vlgmr.msra.gmra.mxu0 %vm377_vm0, %v776_v45 }
  0xe3   :  { %v669_v46 = vpop.f32.mrf.mxu0 }
  0xe4   :  { %v697_v47 = vpop.f32.mrf.mxu1 }
  0xe5   :  { %v670_v48 = vpop.f32.mrf.mxu0 }
  0xe6   :  { %v698_v49 = vpop.f32.mrf.mxu1  ;;  %v671_v62 = vadd.f32 %v670_v48, %v669_v46 }
  0xe7   :  { %v672_v50 = vpop.f32.mrf.mxu0  ;;  %v699_v63 = vadd.f32 %v698_v49, %v697_v47 }
  0xe8   :  { %v700_v51 = vpop.f32.mrf.mxu1 }
  0xe9   :  { %v673_v52 = vpop.f32.mrf.mxu0  ;;  %v468_v9 = vadd.f32 %v699_v63, %v671_v62 }
  0xea   :  { %v701_v53 = vpop.f32.mrf.mxu1  ;;  %v674_v6 = vadd.f32 %v673_v52, %v672_v50 }
  0xeb   :  { %v675_v54 = vpop.f32.mrf.mxu0  ;;  %v702_v7 = vadd.f32 %v701_v53, %v700_v51 }
  0xec   :  { %v703_v55 = vpop.f32.mrf.mxu1 }
  0xed   :  { %v676_v56 = vpop.f32.mrf.mxu0  ;;  %v471_v17 = vadd.f32 %v702_v7, %v674_v6 }
  0xee   :  { %v704_v57 = vpop.f32.mrf.mxu1  ;;  %v677_v58 = vadd.f32 %v676_v56, %v675_v54 }
  0xef   :  { %v705_v59 = vadd.f32 %v704_v57, %v703_v55  ;;  %v678_v60 = vpop.f32.mrf.mxu0 }
  0xf0   :  { %v706_v61 = vpop.f32.mrf.mxu1 }
  0xf1   :  { %v679_v0 = vpop.f32.mrf.mxu0  ;;  %v476_v4 = vadd.f32 %v705_v59, %v677_v58 }
  0xf2   :  { %v707_v1 = vpop.f32.mrf.mxu1  ;;  %v680_v2 = vadd.f32 %v679_v0, %v678_v60 }
  0xf3   :  { %v708_v3 = vadd.f32 %v707_v1, %v706_v61 }
  0xf4   :  { %v725_v5 = vpop.f32.mrf.mxu0 }
  0xf5   :  { %v525_v8 = vadd.f32 %v725_v5, %v476_v4  ;;  %v479_v13 = vadd.f32 %v708_v3, %v680_v2 }
  0xf6   :  { %v516_v11 = vpop.f32.mrf.mxu0 }
  0xf7   :  { %v517_v12 = vadd.f32 %v516_v11, %v468_v9  ;;  %v555_v15 = vadd.f32 %v633_v10, %v525_v8 }
  0xf8   :  { %v726_v14 = vpop.f32.mrf.mxu0 }
  0xf9   :  { %v528_v16 = vadd.f32 %v726_v14, %v479_v13  ;;  %v553_v19 = vadd.f32 %v633_v10, %v517_v12  ;;  %v559_v22 = vmax.f32 %v555_v15, 0.0 }
  0xfa   :  { %v519_v18 = vpop.f32.mrf.mxu0 }
  0xfb   :  { %v556_v20 = vadd.f32 %v633_v10, %v528_v16  ;;  %v520_v21 = vadd.f32 %v519_v18, %v471_v17  ;;  %v557_v25 = vmax.f32 %v553_v19, 0.0 }
  0xfd   :  { %v560_v23 = vmax.f32 %v556_v20, 0.0  ;;  %v554_v24 = vadd.f32 %v633_v10, %v520_v21 }
  0xff   :  { %v650_v26 = vpack.c.bf16 %v560_v23, %v559_v22  ;;  %v558_v27 = vmax.f32 %v554_v24, 0.0 }
 0x101   :  { %652 = vst [vmem:[%s947_s3 + $0x8] sm:$0xff] %v650_v26   ;;  %v645_v28 = vpack.c.bf16 %v558_v27, %v557_v25 }
 0x103   :  { %646 = vst [vmem:[%s947_s3] sm:$0xff] %v645_v28  }

// kernel: quantized_resnet18_forward.32
= control target key start
LH: loop header
LB: loop body
LE: loop exit
PB: predicated region body
PF: predicated region fallthrough
CT: control target
= control target key end

     0   :  { %vm73_vm0 = vcmask 523264   ;;  %s278_s1 = inlined_call_operand.vmem [shape: bf16[64,128], index: 1, kind: input, shape index: {}]   ;;  %s279_s0 = inlined_call_operand.vmem [shape: bf16[32,64], index: 0, kind: input, shape index: {}]   ;;  %s280_s2 = inlined_call_operand.vmem [shape: f32[1,128], index: 2, kind: input, shape index: {}]   ;;  %s281_s3 = inlined_call_operand.vmem [shape: bf16[32,128], index: 3, kind: output, shape index: {}]  }
   0x1   :  { %v225_v0 = vld [vmem:[%s278_s1 + $0x18] sm:$0xff]   ;;  %v226_v1 = vld [vmem:[%s278_s1 + $0x10] sm:$0xff]   ;;  %v227_v2 = vld [vmem:[%s278_s1 + $0x8] sm:$0xff]  }
   0x2   :  { %213 = vmatprep.subr.bf16.mxu0 %v225_v0  ;;  %v229_v3 = vld [vmem:[%s279_s0] sm:$0xff]   ;;  %v230_v5 = vld [vmem:[%s279_s0 + $0x8] sm:$0xff]  }
   0x3   :  { %214 = vmatpush3.bf16.msra.mxu0 %v225_v0  ;;  %221 = vmatprep.mubr.msk.bf16.mxu0 %vm73_vm0, %v229_v3  ;;  %v228_v4 = vld [vmem:[%s278_s1] sm:$0xff]  }
   0x4   :  { %215 = vmatprep.subr.bf16.mxu0 %v226_v1  ;;  %v187_v7 = vld [vmem:[%s280_s2] ss:$0 sm:$0xff] }
   0x7   :  { %216 = vmatpush3.bf16.msra.mxu0 %v226_v1 }
   0x8   :  { %217 = vmatprep.subr.bf16.mxu0 %v227_v2 }
   0xb   :  { %218 = vmatpush3.bf16.msra.mxu0 %v227_v2 }
   0xc   :  { %219 = vmatprep.subr.bf16.mxu0 %v228_v4 }
   0xf   :  { %220 = vmatpush3.bf16.msra.mxu0 %v228_v4 }
  0x12   :  { %222 = vmatmul.mubr.msk.bf16.vlgmr.msra.gmra.mxu0 %vm73_vm0, %v230_v5 }
  0xd2   :  { %v223_v6 = vpop.f32.mrf.mxu0 }
  0xd3   :  { %v153_v10 = vadd.f32 %v223_v6, %v187_v7 }
  0xd4   :  { %v114_v8 = vpop.f32.mrf.mxu0 }
  0xd5   :  { %v151_v13 = vadd.f32 %v187_v7, %v114_v8 }
  0xd6   :  { %v224_v9 = vpop.f32.mrf.mxu0 }
  0xd7   :  { %v154_v11 = vadd.f32 %v224_v9, %v187_v7 }
  0xd8   :  { %v117_v12 = vpop.f32.mrf.mxu0 }
  0xd9   :  { %v204_v14 = vpack.c.bf16 %v154_v11, %v153_v10  ;;  %v152_v15 = vadd.f32 %v187_v7, %v117_v12 }
  0xdb   :  { %206 = vst [vmem:[%s281_s3 + $0x8] sm:$0xff] %v204_v14   ;;  %v199_v16 = vpack.c.bf16 %v152_v15, %v151_v13 }
  0xdd   :  { %200 = vst [vmem:[%s281_s3] sm:$0xff] %v199_v16  }

// kernel: quantized_resnet18_forward.34
= control target key start
LH: loop header
LB: loop body
LE: loop exit
PB: predicated region body
PF: predicated region fallthrough
CT: control target
= control target key end

     0   :  { %s1072_s12 = smov 0   ;;  %s1074_s13 = smov 0   ;;  %s1182_s0 = inlined_call_operand.vmem [shape: bf16[32,1152], index: 0, kind: input, shape index: {}]   ;;  %s1183_s1 = inlined_call_operand.vmem [shape: bf16[1152,128], index: 1, kind: input, shape index: {}]   ;;  %s1184_s2 = inlined_call_operand.vmem [shape: f32[1,128], index: 2, kind: input, shape index: {}]   ;;  %s1185_s3 = inlined_call_operand.vmem [shape: bf16[32,128], index: 3, kind: output, shape index: {}]  }
   0x1   :  { %s1076_s14 = smov 0   ;;  %s1078_s15 = smov 0  }
   0x2   :  { %s1080_s16 = smov 0  }
   0x3 LB: > { %s25_s17 = sadd.s32 1, %s1045_s15  ;;  %p48_p1 = scmp.ne.s32.totalorder %s1037_s13, %s1033_s12  ;;  %s1049_s16 = sphi %s1080_s16, %s13_s16   ;;  %s1045_s15 = sphi %s1078_s15, %s1189_s15   ;;  %s1041_s14 = sphi %s1076_s14, %s1188_s14   ;;  %s1037_s13 = sphi %s1074_s13, %s1187_s13   ;;  %s1033_s12 = sphi %s1072_s12, %s1186_s12  }
   0x4   : > { %p26_p0 = scmp.ge.s32.totalorder %s25_s17, 3  ;;  %p49_p2 = scmp.eq.s32.totalorder %s1049_s16, 0 }
   0x5   : > { %s41_s19 = sadd.s32 1, %s1037_s13  ;;  %p809_p5 = scmp.ge.s32.totalorder %s1049_s16, 3 }
   0x6   : > { %s1191_s17 = smov (%p26_p0, %s25_s17), 0  ;;  %p50_p3 = por %p49_p2, %p48_p1 }
   0x7   : > { %s37_s18 = ssub.s32 %s1045_s15, %s1191_s17  ;;  %162 = sbr.rel (%p809_p5) target bundleno = 21 (0x15), region = 20 }
   0x8   : > { %p39_p4 = scmp.eq.s32.totalorder %s37_s18, 0 }
   0xa   : > { %s1107_s20 = scalar_select %p39_p4, %s1037_s13, %s41_s19  }
   0xc   : > { %165 = sbr.rel (!%p50_p3) target bundleno = 21 (0x15), region = 24  ;;  %s167_s21 = sand.u32 (%p50_p3), 1, %s1037_s13  }
   0xd   : > { %s862_s22 = smul.u32 (%p50_p3), 12, %s1045_s15 }
   0xe   : > { %s936_s23 = smul.u32 (%p50_p3), 48, %s167_s21 }
   0xf   : > { %s175_s26 = scalar_lea.vmem (%p50_p3), %s1182_s0, %s862_s22 }
  0x10   : > { %v190_v0 = vld [vmem:[%s175_s26] sm:$0xff] (%p50_p3)  ;;  %v194_v2 = vld [vmem:[%s175_s26 + $0x48] sm:$0xff] (%p50_p3)  ;;  %s169_s27 = scalar_lea.vmem (%p50_p3), [#allocation3], %s936_s23  ;;  %v815_v6 = vld [vmem:[%s175_s26 + $0x50] sm:$0xf] (%p50_p3) }
  0x11   : > { %v192_v1 = vld [vmem:[%s175_s26 + $0x24] sm:$0xff]  ;;  %191 = vst [vmem:[%s169_s27] sm:$0xff] %v190_v0  ;;  %195 = vst [vmem:[%s169_s27 + $0x18] sm:$0xff] %v194_v2  ;;  %v196_v3 = vld [vmem:[%s175_s26 + $0x6c] sm:$0xff] }
  0x12   : > { %193 = vst [vmem:[%s169_s27 + $0xc] sm:$0xff] %v192_v1  ;;  %v811_v4 = vld [vmem:[%s175_s26 + $0x8] sm:$0xf]  ;;  %v813_v5 = vld [vmem:[%s175_s26 + $0x2c] sm:$0xf]  ;;  %197 = vst [vmem:[%s169_s27 + $0x24] sm:$0xff] %v196_v3 }
  0x13   : > { %812 = vst [vmem:[%s169_s27 + $0x8] sm:$0xf] %v811_v4  ;;  %814 = vst [vmem:[%s169_s27 + $0x14] sm:$0xf] %v813_v5  ;;  %v817_v7 = vld [vmem:[%s175_s26 + $0x74] sm:$0xf] }
  0x14   : > { %816 = vst [vmem:[%s169_s27 + $0x20] sm:$0xf] %v815_v6  ;;  %818 = vst [vmem:[%s169_s27 + $0x2c] sm:$0xf] %v817_v7 }
  0x15 PF: > { %p819_p6 = scmp.ge.s32.totalorder %s1049_s16, 1  ;;  %p230_p7 = scmp.lt.s32.totalorder %s1049_s16, 4 }
  0x17   : > { %p231_p8 = pnand %p819_p6, %p230_p7 }
  0x18   : > { %s237_s28 = sand.u32 (!%p231_p8), 1, %s1033_s12   ;;  %s276_s29 = smul.u32 (!%p231_p8), 48, %s1041_s14 }
  0x19   : > { %234 = sbr.rel (%p231_p8) target bundleno = 299 (0x12b), region = 54  ;;  %p821_p10 = scmp.ne.s32.totalorder (!%p231_p8), %s1041_s14, 0 }
  0x1a   : > { %s937_s30 = smul.u32 (!%p231_p8), 48, %s237_s28  ;;  %p277_p9 = scmp.lt.s32.totalorder (!%p231_p8), %s276_s29, 143 }
  0x1c   : > { %s1124_s8 = scalar_lea.vmem (!%p231_p8), [#allocation3], %s937_s30 }
  0x1e   : > { %s1193_s29 = smov (!%p277_p9, %s276_s29), 143  ;;  %301 = sbr.rel (%p821_p10) target bundleno = 38 (0x26), region = 62 }
  0x1f   : > { %s820_s4 = sshll.u32 %s1193_s29, 2 }
  0x20   : > { %s1122_s7 = scalar_lea.vmem %s1183_s1, %s820_s4 }
  0x23   : > { %v1051_v8 = vmov 0.0  }
  0x24   : > { %302 = vst [vmem:[#allocation2 + $0x10] sm:$0xff] %v1051_v8  ;;  %303 = vst [vmem:[#allocation2] sm:$0xff] %v1051_v8 }
  0x25   : > { %304 = vst [vmem:[#allocation2 + $0x18] sm:$0xff] %v1051_v8  ;;  %305 = vst [vmem:[#allocation2 + $0x8] sm:$0xff] %v1051_v8 }
  0x26 PF: > { %v979_v9 = vld [vmem:[%s1122_s7 + $0x78] sm:$0xff]   ;;  %v982_v12 = vld [vmem:[%s1122_s7 + $0x70] sm:$0xff]   ;;  %v985_v15 = vld [vmem:[%s1122_s7 + $0x68] sm:$0xff]   ;;  %p852_p11 = scmp.ne.s32.totalorder %s1041_s14, 2 }
  0x27   : > { %v980_v10 = vld [vmem:[%s1122_s7 + $0x38] sm:$0xff]   ;;  %878 = vmatprep.subr.bf16.mxu0 %v979_v9  ;;  %v983_v13 = vld [vmem:[%s1122_s7 + $0x30] sm:$0xff]   ;;  %v986_v16 = vld [vmem:[%s1122_s7 + $0x28] sm:$0xff]  }
  0x28   : > { %v981_v11 = vld [vmem:[%s1122_s7 + $0xb8] sm:$0xff]   ;;  %879 = vmatpush3.bf16.msra.mxu0 %v980_v10  ;;  %v984_v14 = vld [vmem:[%s1122_s7 + $0xb0] sm:$0xff]   ;;  %v987_v17 = vld [vmem:[%s1122_s7 + $0xa8] sm:$0xff]  }
  0x29   : > { %916 = vmatprep.subr.bf16.mxu1 %v981_v11  ;;  %880 = vmatprep.subr.bf16.mxu0 %v982_v12  ;;  %v988_v18 = vld [vmem:[%s1122_s7 + $0x60] sm:$0xff]   ;;  %v991_v21 = vld [vmem:[%s1122_s7 + $0x58] sm:$0xff]   ;;  %v994_v24 = vld [vmem:[%s1122_s7 + $0x50] sm:$0xff]  }
  0x2a   : > { %917 = vmatpush3.bf16.msra.mxu1 %v981_v11  ;;  %v989_v19 = vld [vmem:[%s1122_s7 + $0x20] sm:$0xff]   ;;  %v993_v22 = vld [vmem:[%s1122_s7 + $0x98] sm:$0xff]   ;;  %v996_v25 = vld [vmem:[%s1122_s7 + $0x90] sm:$0xff]  }
  0x2b   : > { %918 = vmatprep.subr.bf16.mxu1 %v984_v14  ;;  %v990_v20 = vld [vmem:[%s1122_s7 + $0xa0] sm:$0xff]   ;;  %v992_v23 = vld [vmem:[%s1122_s7 + $0x18] sm:$0xff]   ;;  %v995_v26 = vld [vmem:[%s1122_s7 + $0x10] sm:$0xff]  }
  0x2c   : > { %881 = vmatpush3.bf16.msra.mxu0 %v983_v13  ;;  %v997_v27 = vld [vmem:[%s1122_s7 + $0x48] sm:$0xff]   ;;  %v1000_v30 = vld [vmem:[%s1122_s7 + $0x40] sm:$0xff]   ;;  %v306_v44 = vld [vmem:[#allocation2 + $0x10] sm:$0xff] }
  0x2d   : > { %882 = vmatprep.subr.bf16.mxu0 %v985_v15  ;;  %v998_v28 = vld [vmem:[%s1122_s7 + $0x8] sm:$0xff]   ;;  %v1002_v31 = vld [vmem:[%s1122_s7 + $0x80] sm:$0xff]   ;;  %v308_v58 = vld [vmem:[#allocation2 + $0x18] sm:$0xff] }
  0x2e   : > { %919 = vmatpush3.bf16.msra.mxu1 %v984_v14  ;;  %v999_v29 = vld [vmem:[%s1122_s7 + $0x88] sm:$0xff]   ;;  %v1005_v32 = vld [vmem:[%s1124_s8 + $0x4] ss:$12 sps:$4 sm:$0xff]  }
  0x2f   : > { %920 = vmatprep.subr.bf16.mxu1 %v987_v17  ;;  %v1006_v33 = vld [vmem:[%s1124_s8 + $0x8] ss:$12 sps:$4 sm:$0xff]   ;;  %574 = vmatprep.mubr.bf16.mxu0 %v1005_v32  ;;  %v1003_v35 = vld [vmem:[%s1124_s8] ss:$12 sps:$4 sm:$0xff]   ;;  %v1010_v38 = vld [vmem:[%s1124_s8 + $0x18] ss:$12 sps:$4 sm:$0xff]  }
  0x30   : > { %883 = vmatpush3.bf16.msra.mxu0 %v986_v16  ;;  %v1001_v34 = vld [vmem:[%s1122_s7] sm:$0xff]   ;;  %932 = vmatprep.mubr.bf16.mxu1 %v1006_v33  ;;  %v1008_v36 = vld [vmem:[%s1124_s8 + $0x1c] ss:$12 sps:$4 sm:$0xff]  }
  0x31   : > { %884 = vmatprep.subr.bf16.mxu0 %v988_v18  ;;  %v1007_v37 = vld [vmem:[%s1124_s8 + $0x20] ss:$12 sps:$4 sm:$0xff]  }
  0x32   : > { %921 = vmatpush3.bf16.msra.mxu1 %v987_v17  ;;  %v307_v52 = vld [vmem:[#allocation2] sm:$0xff]  ;;  %v309_v0 = vld [vmem:[#allocation2 + $0x8] sm:$0xff] }
  0x33   : > { %922 = vmatprep.subr.bf16.mxu1 %v990_v20 }
  0x34   : > { %885 = vmatpush3.bf16.msra.mxu0 %v989_v19 }
  0x35   : > { %886 = vmatprep.subr.bf16.mxu0 %v991_v21 }
  0x36   : > { %923 = vmatpush3.bf16.msra.mxu1 %v990_v20 }
  0x37   : > { %924 = vmatprep.subr.bf16.mxu1 %v993_v22 }
  0x38   : > { %887 = vmatpush3.bf16.msra.mxu0 %v992_v23 }
  0x39   : > { %888 = vmatprep.subr.bf16.mxu0 %v994_v24 }
  0x3a   : > { %925 = vmatpush3.bf16.msra.mxu1 %v993_v22 }
  0x3b   : > { %926 = vmatprep.subr.bf16.mxu1 %v996_v25 }
  0x3c   : > { %889 = vmatpush3.bf16.msra.mxu0 %v995_v26 }
  0x3d   : > { %890 = vmatprep.subr.bf16.mxu0 %v997_v27 }
  0x3e   : > { %927 = vmatpush3.bf16.msra.mxu1 %v996_v25 }
  0x3f   : > { %928 = vmatprep.subr.bf16.mxu1 %v999_v29 }
  0x40   : > { %891 = vmatpush3.bf16.msra.mxu0 %v998_v28 }
  0x41   : > { %892 = vmatprep.subr.bf16.mxu0 %v1000_v30 }
  0x42   : > { %929 = vmatpush3.bf16.msra.mxu1 %v999_v29 }
  0x43   : > { %930 = vmatprep.subr.bf16.mxu1 %v1002_v31 }
  0x44   : > { %893 = vmatpush3.bf16.msra.mxu0 %v1001_v34 }
  0x46   : > { %931 = vmatpush3.bf16.msra.mxu1 %v1002_v31 }
  0x47   : > { %575 = vmatmul.mubr.bf16.vlgmr.msra.gmra.mxu0 %v1003_v35 }
  0x48   : > { %582 = vmatprep.mubr.bf16.mxu0 %v1008_v36 }
  0x49   : > { %933 = vmatmul.mubr.bf16.vlgmr.msra.gmra.mxu1 %v1007_v37 }
  0x4f   : > { %583 = vmatmul.mubr.bf16.gmra.mxu0 %v1010_v38 }
 0x107   : > { %v894_v39 = vpop.f32.mrf.mxu0 }
 0x109   : > { %v895_v40 = vpop.f32.mrf.mxu0  ;;  %v934_v41 = vpop.f32.mrf.mxu1 }
 0x10a   : > { %v896_v42 = vadd.f32 %v895_v40, %v894_v39 }
 0x10b   : > { %v897_v43 = vpop.f32.mrf.mxu0  ;;  %v625_v45 = vpop.f32.mrf.mxu1 }
 0x10c   : > { %v626_v46 = vadd.f32 %v896_v42, %v625_v45 }
 0x10d   : > { %v898_v47 = vpop.f32.mrf.mxu0  ;;  %v935_v48 = vpop.f32.mrf.mxu1 }
 0x10e   : > { %v640_v49 = vadd.f32 %v626_v46, %v306_v44  ;;  %v899_v50 = vadd.f32 %v898_v47, %v897_v43 }
 0x10f   : > { %v900_v51 = vpop.f32.mrf.mxu0  ;;  %v628_v53 = vpop.f32.mrf.mxu1 }
 0x110   : > { %644 = vst [vmem:[#allocation2 + $0x10] sm:$0xff] %v640_v49  ;;  %v629_v54 = vadd.f32 %v899_v50, %v628_v53 }
 0x111   : > { %v901_v55 = vpop.f32.mrf.mxu0 }
 0x112   : > { %v641_v56 = vadd.f32 %v629_v54, %v307_v52  ;;  %v902_v57 = vadd.f32 %v901_v55, %v900_v51 }
 0x113   : > { %v903_v59 = vpop.f32.mrf.mxu0 }
 0x114   : > { %645 = vst [vmem:[#allocation2] sm:$0xff] %v641_v56  ;;  %v634_v60 = vadd.f32 %v934_v41, %v902_v57 }
 0x115   : > { %v904_v61 = vpop.f32.mrf.mxu0 }
 0x116   : > { %v642_v62 = vadd.f32 %v634_v60, %v308_v58  ;;  %v905_v63 = vadd.f32 %v904_v61, %v903_v59 }
 0x118   : > { %646 = vst [vmem:[#allocation2 + $0x18] sm:$0xff] %v642_v62  ;;  %v637_v1 = vadd.f32 %v935_v48, %v905_v63  ;;  %651 = sbr.rel (%p852_p11) target bundleno = 299 (0x12b), region = 66 }
 0x11a   : > { %v643_v2 = vadd.f32 %v637_v1, %v309_v0 }
 0x11c   : > { %647 = vst [vmem:[#allocation2 + $0x8] sm:$0xff] %v643_v2 }
 0x11d   : > { %v652_v3 = vld [vmem:[#allocation2 + $0x10] sm:$0xff]  ;;  %v653_v4 = vld [vmem:[#allocation2] sm:$0xff] }
 0x11e   : > { %v853_v5 = vld [vmem:[%s1184_s2] ss:$0 sm:$0xff] }
 0x11f   : > { %v663_v6 = vadd.f32 %v853_v5, %v652_v3  ;;  %v664_v7 = vadd.f32 %v853_v5, %v653_v4  ;;  %v654_v8 = vld [vmem:[#allocation2 + $0x18] sm:$0xff] }
 0x120   : > { %v665_v10 = vadd.f32 %v853_v5, %v654_v8 }
 0x121   : > { %v667_v12 = vmax.f32 %v663_v6, 0.0  ;;  %v668_v13 = vmax.f32 %v664_v7, 0.0 }
 0x122   : > { %v669_v14 = vmax.f32 %v665_v10, 0.0 }
 0x123   : > { %v655_v9 = vld [vmem:[#allocation2 + $0x8] sm:$0xff]  ;;  %v870_v16 = vpack.c.bf16 %v668_v13, %v667_v12 }
 0x124   : > { %v666_v11 = vadd.f32 %v853_v5, %v655_v9 }
 0x125   : > { %871 = vst [vmem:[%s1185_s3] sm:$0xff] %v870_v16  }
 0x126   : > { %v670_v15 = vmax.f32 %v666_v11, 0.0 }
 0x128   : > { %v875_v17 = vpack.c.bf16 %v670_v15, %v669_v14 }
 0x12a   : > { %877 = vst [vmem:[%s1185_s3 + $0x8] sm:$0xff] %v875_v17  }
 0x12b PF: > { %s13_s16 = sadd.s32 1, %s1049_s16   ;;  %s1186_s12 = smov %s1037_s13 }
 0x12c   : > { %p10_p12 = scmp.ge.s32.totalorder %s13_s16, 5   ;;  %s1187_s13 = smov %s1107_s20 }
 0x12d   : > { %s1188_s14 = smov %s1045_s15  ;;  %s1189_s15 = smov %s1191_s17 }
 0x12e   :  { %12 = sbr.rel (!%p10_p12) target bundleno = 3 (0x3), region = 113 }

// kernel: quantized_resnet18_forward.33
= control target key start
LH: loop header
LB: loop body
LE: loop exit
PB: predicated region body
PF: predicated region fallthrough
CT: control target
= control target key end

     0   :  { %s1177_s15 = smov 0   ;;  %s1179_s16 = smov 0   ;;  %s1293_s0 = inlined_call_operand.vmem [shape: bf16[32,1152], index: 0, kind: input, shape index: {}]   ;;  %s1294_s1 = inlined_call_operand.vmem [shape: bf16[1152,128], index: 1, kind: input, shape index: {}]   ;;  %s1295_s2 = inlined_call_operand.vmem [shape: f32[1,128], index: 2, kind: input, shape index: {}]   ;;  %s1296_s3 = inlined_call_operand.vmem [shape: bf16[32,128], index: 3, kind: input, shape index: {}]   ;;  %s1297_s4 = inlined_call_operand.vmem [shape: bf16[32,128], index: 4, kind: output, shape index: {}]  }
   0x1   :  { %s1181_s17 = smov 0   ;;  %s1183_s18 = smov 0  }
   0x2   :  { %s1185_s19 = smov 0  }
   0x3 LB: > { %s26_s20 = sadd.s32 1, %s1145_s18  ;;  %p49_p1 = scmp.ne.s32.totalorder %s1137_s16, %s1133_s15  ;;  %s1149_s19 = sphi %s1185_s19, %s14_s19   ;;  %s1145_s18 = sphi %s1183_s18, %s1301_s18   ;;  %s1141_s17 = sphi %s1181_s17, %s1300_s17   ;;  %s1137_s16 = sphi %s1179_s16, %s1299_s16   ;;  %s1133_s15 = sphi %s1177_s15, %s1298_s15  }
   0x4   : > { %p27_p0 = scmp.ge.s32.totalorder %s26_s20, 3  ;;  %p50_p2 = scmp.eq.s32.totalorder %s1149_s19, 0 }
   0x5   : > { %s42_s22 = sadd.s32 1, %s1137_s16  ;;  %p900_p5 = scmp.ge.s32.totalorder %s1149_s19, 3 }
   0x6   : > { %s1303_s20 = smov (%p27_p0, %s26_s20), 0  ;;  %p51_p3 = por %p50_p2, %p49_p1 }
   0x7   : > { %s38_s21 = ssub.s32 %s1145_s18, %s1303_s20  ;;  %203 = sbr.rel (%p900_p5) target bundleno = 21 (0x15), region = 24 }
   0x8   : > { %p40_p4 = scmp.eq.s32.totalorder %s38_s21, 0 }
   0xa   : > { %s1212_s23 = scalar_select %p40_p4, %s1137_s16, %s42_s22  }
   0xc   : > { %206 = sbr.rel (!%p51_p3) target bundleno = 21 (0x15), region = 28  ;;  %s208_s24 = sand.u32 (%p51_p3), 1, %s1137_s16  }
   0xd   : > { %s953_s25 = smul.u32 (%p51_p3), 12, %s1145_s18 }
   0xe   : > { %s1036_s26 = smul.u32 (%p51_p3), 48, %s208_s24 }
   0xf   : > { %s216_s29 = scalar_lea.vmem (%p51_p3), %s1293_s0, %s953_s25 }
  0x10   : > { %v231_v0 = vld [vmem:[%s216_s29] sm:$0xff] (%p51_p3)  ;;  %v235_v2 = vld [vmem:[%s216_s29 + $0x48] sm:$0xff] (%p51_p3)  ;;  %s210_s30 = scalar_lea.vmem (%p51_p3), [#allocation3], %s1036_s26  ;;  %v906_v6 = vld [vmem:[%s216_s29 + $0x50] sm:$0xf] (%p51_p3) }
  0x11   : > { %v233_v1 = vld [vmem:[%s216_s29 + $0x24] sm:$0xff]  ;;  %232 = vst [vmem:[%s210_s30] sm:$0xff] %v231_v0  ;;  %236 = vst [vmem:[%s210_s30 + $0x18] sm:$0xff] %v235_v2  ;;  %v237_v3 = vld [vmem:[%s216_s29 + $0x6c] sm:$0xff] }
  0x12   : > { %234 = vst [vmem:[%s210_s30 + $0xc] sm:$0xff] %v233_v1  ;;  %v902_v4 = vld [vmem:[%s216_s29 + $0x8] sm:$0xf]  ;;  %v904_v5 = vld [vmem:[%s216_s29 + $0x2c] sm:$0xf]  ;;  %238 = vst [vmem:[%s210_s30 + $0x24] sm:$0xff] %v237_v3 }
  0x13   : > { %903 = vst [vmem:[%s210_s30 + $0x8] sm:$0xf] %v902_v4  ;;  %905 = vst [vmem:[%s210_s30 + $0x14] sm:$0xf] %v904_v5  ;;  %v908_v7 = vld [vmem:[%s216_s29 + $0x74] sm:$0xf] }
  0x14   : > { %907 = vst [vmem:[%s210_s30 + $0x20] sm:$0xf] %v906_v6  ;;  %909 = vst [vmem:[%s210_s30 + $0x2c] sm:$0xf] %v908_v7 }
  0x15 PF: > { %p910_p6 = scmp.ge.s32.totalorder %s1149_s19, 1  ;;  %p271_p7 = scmp.lt.s32.totalorder %s1149_s19, 4 }
  0x17   : > { %p272_p8 = pnand %p910_p6, %p271_p7 }
  0x18   : > { %s278_s5 = sand.u32 (!%p272_p8), 1, %s1133_s15   ;;  %s327_s6 = smul.u32 (!%p272_p8), 48, %s1141_s17 }
  0x19   : > { %275 = sbr.rel (%p272_p8) target bundleno = 301 (0x12d), region = 58  ;;  %p912_p10 = scmp.ne.s32.totalorder (!%p272_p8), %s1141_s17, 0 }
  0x1a   : > { %s1037_s7 = smul.u32 (!%p272_p8), 48, %s278_s5  ;;  %p328_p9 = scmp.lt.s32.totalorder (!%p272_p8), %s327_s6, 143 }
  0x1c   : > { %s1229_s12 = scalar_lea.vmem (!%p272_p8), [#allocation3], %s1037_s7 }
  0x1e   : > { %s1305_s6 = smov (!%p328_p9, %s327_s6), 143  ;;  %361 = sbr.rel (%p912_p10) target bundleno = 38 (0x26), region = 66 }
  0x1f   : > { %s911_s8 = sshll.u32 %s1305_s6, 2 }
  0x20   : > { %s1227_s11 = scalar_lea.vmem %s1294_s1, %s911_s8 }
  0x23   : > { %v1151_v8 = vmov 0.0  }
  0x24   : > { %362 = vst [vmem:[#allocation2 + $0x10] sm:$0xff] %v1151_v8  ;;  %363 = vst [vmem:[#allocation2] sm:$0xff] %v1151_v8 }
  0x25   : > { %364 = vst [vmem:[#allocation2 + $0x18] sm:$0xff] %v1151_v8  ;;  %365 = vst [vmem:[#allocation2 + $0x8] sm:$0xff] %v1151_v8 }
  0x26 PF: > { %v1079_v9 = vld [vmem:[%s1227_s11 + $0x78] sm:$0xff]   ;;  %v1082_v12 = vld [vmem:[%s1227_s11 + $0x70] sm:$0xff]   ;;  %v1085_v15 = vld [vmem:[%s1227_s11 + $0x68] sm:$0xff]   ;;  %p943_p11 = scmp.ne.s32.totalorder %s1141_s17, 2 }
  0x27   : > { %v1080_v10 = vld [vmem:[%s1227_s11 + $0x38] sm:$0xff]   ;;  %978 = vmatprep.subr.bf16.mxu0 %v1079_v9  ;;  %v1083_v13 = vld [vmem:[%s1227_s11 + $0x30] sm:$0xff]   ;;  %v1086_v16 = vld [vmem:[%s1227_s11 + $0x28] sm:$0xff]  }
  0x28   : > { %v1081_v11 = vld [vmem:[%s1227_s11 + $0xb8] sm:$0xff]   ;;  %979 = vmatpush3.bf16.msra.mxu0 %v1080_v10  ;;  %v1084_v14 = vld [vmem:[%s1227_s11 + $0xb0] sm:$0xff]   ;;  %v1087_v17 = vld [vmem:[%s1227_s11 + $0xa8] sm:$0xff]  }
  0x29   : > { %1016 = vmatprep.subr.bf16.mxu1 %v1081_v11  ;;  %980 = vmatprep.subr.bf16.mxu0 %v1082_v12  ;;  %v1088_v18 = vld [vmem:[%s1227_s11 + $0x60] sm:$0xff]   ;;  %v1091_v21 = vld [vmem:[%s1227_s11 + $0x58] sm:$0xff]   ;;  %v1094_v24 = vld [vmem:[%s1227_s11 + $0x50] sm:$0xff]  }
  0x2a   : > { %1017 = vmatpush3.bf16.msra.mxu1 %v1081_v11  ;;  %v1089_v19 = vld [vmem:[%s1227_s11 + $0x20] sm:$0xff]   ;;  %v1093_v22 = vld [vmem:[%s1227_s11 + $0x98] sm:$0xff]   ;;  %v1096_v25 = vld [vmem:[%s1227_s11 + $0x90] sm:$0xff]  }
  0x2b   : > { %1018 = vmatprep.subr.bf16.mxu1 %v1084_v14  ;;  %v1090_v20 = vld [vmem:[%s1227_s11 + $0xa0] sm:$0xff]   ;;  %v1092_v23 = vld [vmem:[%s1227_s11 + $0x18] sm:$0xff]   ;;  %v1095_v26 = vld [vmem:[%s1227_s11 + $0x10] sm:$0xff]  }
  0x2c   : > { %981 = vmatpush3.bf16.msra.mxu0 %v1083_v13  ;;  %v1097_v27 = vld [vmem:[%s1227_s11 + $0x48] sm:$0xff]   ;;  %v1100_v30 = vld [vmem:[%s1227_s11 + $0x40] sm:$0xff]   ;;  %v366_v44 = vld [vmem:[#allocation2 + $0x10] sm:$0xff] }
  0x2d   : > { %982 = vmatprep.subr.bf16.mxu0 %v1085_v15  ;;  %v1098_v28 = vld [vmem:[%s1227_s11 + $0x8] sm:$0xff]   ;;  %v1102_v31 = vld [vmem:[%s1227_s11 + $0x80] sm:$0xff]   ;;  %v368_v58 = vld [vmem:[#allocation2 + $0x18] sm:$0xff] }
  0x2e   : > { %1019 = vmatpush3.bf16.msra.mxu1 %v1084_v14  ;;  %v1099_v29 = vld [vmem:[%s1227_s11 + $0x88] sm:$0xff]   ;;  %v1105_v32 = vld [vmem:[%s1229_s12 + $0x4] ss:$12 sps:$4 sm:$0xff]  }
  0x2f   : > { %1020 = vmatprep.subr.bf16.mxu1 %v1087_v17  ;;  %v1106_v33 = vld [vmem:[%s1229_s12 + $0x8] ss:$12 sps:$4 sm:$0xff]   ;;  %634 = vmatprep.mubr.bf16.mxu0 %v1105_v32  ;;  %v1103_v35 = vld [vmem:[%s1229_s12] ss:$12 sps:$4 sm:$0xff]   ;;  %v1110_v38 = vld [vmem:[%s1229_s12 + $0x18] ss:$12 sps:$4 sm:$0xff]  }
  0x30   : > { %983 = vmatpush3.bf16.msra.mxu0 %v1086_v16  ;;  %v1101_v34 = vld [vmem:[%s1227_s11] sm:$0xff]   ;;  %1032 = vmatprep.mubr.bf16.mxu1 %v1106_v33  ;;  %v1108_v36 = vld [vmem:[%s1229_s12 + $0x1c] ss:$12 sps:$4 sm:$0xff]  }
  0x31   : > { %984 = vmatprep.subr.bf16.mxu0 %v1088_v18  ;;  %v1107_v37 = vld [vmem:[%s1229_s12 + $0x20] ss:$12 sps:$4 sm:$0xff]  }
  0x32   : > { %1021 = vmatpush3.bf16.msra.mxu1 %v1087_v17  ;;  %v367_v52 = vld [vmem:[#allocation2] sm:$0xff]  ;;  %v369_v0 = vld [vmem:[#allocation2 + $0x8] sm:$0xff] }
  0x33   : > { %1022 = vmatprep.subr.bf16.mxu1 %v1090_v20 }
  0x34   : > { %985 = vmatpush3.bf16.msra.mxu0 %v1089_v19 }
  0x35   : > { %986 = vmatprep.subr.bf16.mxu0 %v1091_v21 }
  0x36   : > { %1023 = vmatpush3.bf16.msra.mxu1 %v1090_v20 }
  0x37   : > { %1024 = vmatprep.subr.bf16.mxu1 %v1093_v22 }
  0x38   : > { %987 = vmatpush3.bf16.msra.mxu0 %v1092_v23 }
  0x39   : > { %988 = vmatprep.subr.bf16.mxu0 %v1094_v24 }
  0x3a   : > { %1025 = vmatpush3.bf16.msra.mxu1 %v1093_v22 }
  0x3b   : > { %1026 = vmatprep.subr.bf16.mxu1 %v1096_v25 }
  0x3c   : > { %989 = vmatpush3.bf16.msra.mxu0 %v1095_v26 }
  0x3d   : > { %990 = vmatprep.subr.bf16.mxu0 %v1097_v27 }
  0x3e   : > { %1027 = vmatpush3.bf16.msra.mxu1 %v1096_v25 }
  0x3f   : > { %1028 = vmatprep.subr.bf16.mxu1 %v1099_v29 }
  0x40   : > { %991 = vmatpush3.bf16.msra.mxu0 %v1098_v28 }
  0x41   : > { %992 = vmatprep.subr.bf16.mxu0 %v1100_v30 }
  0x42   : > { %1029 = vmatpush3.bf16.msra.mxu1 %v1099_v29 }
  0x43   : > { %1030 = vmatprep.subr.bf16.mxu1 %v1102_v31 }
  0x44   : > { %993 = vmatpush3.bf16.msra.mxu0 %v1101_v34 }
  0x46   : > { %1031 = vmatpush3.bf16.msra.mxu1 %v1102_v31 }
  0x47   : > { %635 = vmatmul.mubr.bf16.vlgmr.msra.gmra.mxu0 %v1103_v35 }
  0x48   : > { %642 = vmatprep.mubr.bf16.mxu0 %v1108_v36 }
  0x49   : > { %1033 = vmatmul.mubr.bf16.vlgmr.msra.gmra.mxu1 %v1107_v37 }
  0x4f   : > { %643 = vmatmul.mubr.bf16.gmra.mxu0 %v1110_v38 }
 0x107   : > { %v994_v39 = vpop.f32.mrf.mxu0 }
 0x109   : > { %v995_v40 = vpop.f32.mrf.mxu0  ;;  %v1034_v41 = vpop.f32.mrf.mxu1 }
 0x10a   : > { %v996_v42 = vadd.f32 %v995_v40, %v994_v39 }
 0x10b   : > { %v997_v43 = vpop.f32.mrf.mxu0  ;;  %v685_v45 = vpop.f32.mrf.mxu1 }
 0x10c   : > { %v686_v46 = vadd.f32 %v996_v42, %v685_v45 }
 0x10d   : > { %v998_v47 = vpop.f32.mrf.mxu0  ;;  %v1035_v48 = vpop.f32.mrf.mxu1 }
 0x10e   : > { %v700_v49 = vadd.f32 %v686_v46, %v366_v44  ;;  %v999_v50 = vadd.f32 %v998_v47, %v997_v43 }
 0x10f   : > { %v1000_v51 = vpop.f32.mrf.mxu0  ;;  %v688_v53 = vpop.f32.mrf.mxu1 }
 0x110   : > { %704 = vst [vmem:[#allocation2 + $0x10] sm:$0xff] %v700_v49  ;;  %v689_v54 = vadd.f32 %v999_v50, %v688_v53 }
 0x111   : > { %v1001_v55 = vpop.f32.mrf.mxu0 }
 0x112   : > { %v701_v56 = vadd.f32 %v689_v54, %v367_v52  ;;  %v1002_v57 = vadd.f32 %v1001_v55, %v1000_v51 }
 0x113   : > { %v1003_v59 = vpop.f32.mrf.mxu0 }
 0x114   : > { %705 = vst [vmem:[#allocation2] sm:$0xff] %v701_v56  ;;  %v694_v60 = vadd.f32 %v1034_v41, %v1002_v57 }
 0x115   : > { %v1004_v61 = vpop.f32.mrf.mxu0 }
 0x116   : > { %v702_v62 = vadd.f32 %v694_v60, %v368_v58  ;;  %v1005_v63 = vadd.f32 %v1004_v61, %v1003_v59 }
 0x118   : > { %706 = vst [vmem:[#allocation2 + $0x18] sm:$0xff] %v702_v62  ;;  %v697_v1 = vadd.f32 %v1035_v48, %v1005_v63  ;;  %711 = sbr.rel (%p943_p11) target bundleno = 301 (0x12d), region = 70 }
 0x11a   : > { %v703_v2 = vadd.f32 %v697_v1, %v369_v0 }
 0x11c   : > { %707 = vst [vmem:[#allocation2 + $0x8] sm:$0xff] %v703_v2 }
 0x11d   : > { %v712_v3 = vld [vmem:[#allocation2 + $0x10] sm:$0xff]  ;;  %v713_v4 = vld [vmem:[#allocation2] sm:$0xff]  ;;  %v976_v15 = vld [vmem:[%s1296_s3 + $0x8] sm:$0xff]  }
 0x11e   : > { %v944_v5 = vld [vmem:[%s1295_s2] ss:$0 sm:$0xff]  ;;  %v964_v16 = vunpack.c.l.bf16 %v976_v15  ;;  %v965_v17 = vunpack.c.h.bf16 %v976_v15 }
 0x11f   : > { %v723_v6 = vadd.f32 %v944_v5, %v712_v3  ;;  %v724_v7 = vadd.f32 %v944_v5, %v713_v4  ;;  %v959_v8 = vld [vmem:[%s1296_s3] sm:$0xff]   ;;  %v714_v9 = vld [vmem:[#allocation2 + $0x18] sm:$0xff] }
 0x120   : > { %v960_v11 = vunpack.c.l.bf16 %v959_v8  ;;  %v961_v12 = vunpack.c.h.bf16 %v959_v8  ;;  %v725_v13 = vadd.f32 %v944_v5, %v714_v9 }
 0x122   : > { %v735_v18 = vadd.f32 %v960_v11, %v723_v6  ;;  %v736_v19 = vadd.f32 %v961_v12, %v724_v7  ;;  %v737_v20 = vadd.f32 %v964_v16, %v725_v13 }
 0x123   : > { %v715_v10 = vld [vmem:[#allocation2 + $0x8] sm:$0xff] }
 0x124   : > { %v726_v14 = vadd.f32 %v944_v5, %v715_v10  ;;  %v739_v22 = vmax.f32 %v735_v18, 0.0  ;;  %v740_v23 = vmax.f32 %v736_v19, 0.0  ;;  %v741_v24 = vmax.f32 %v737_v20, 0.0 }
 0x126   : > { %v738_v21 = vadd.f32 %v965_v17, %v726_v14  ;;  %v969_v26 = vpack.c.bf16 %v740_v23, %v739_v22 }
 0x128   : > { %v742_v25 = vmax.f32 %v738_v21, 0.0  ;;  %970 = vst [vmem:[%s1297_s4] sm:$0xff] %v969_v26  }
 0x12a   : > { %v974_v27 = vpack.c.bf16 %v742_v25, %v741_v24 }
 0x12c   : > { %977 = vst [vmem:[%s1297_s4 + $0x8] sm:$0xff] %v974_v27  }
 0x12d PF: > { %s14_s19 = sadd.s32 1, %s1149_s19   ;;  %s1298_s15 = smov %s1137_s16 }
 0x12e   : > { %p11_p12 = scmp.ge.s32.totalorder %s14_s19, 5   ;;  %s1299_s16 = smov %s1212_s23 }
 0x12f   : > { %s1300_s17 = smov %s1145_s18  ;;  %s1301_s18 = smov %s1303_s20 }
 0x130   :  { %13 = sbr.rel (!%p11_p12) target bundleno = 3 (0x3), region = 120 }

// kernel: quantized_resnet18_forward.36
= control target key start
LH: loop header
LB: loop body
LE: loop exit
PB: predicated region body
PF: predicated region fallthrough
CT: control target
= control target key end

     0   :  { %s1148_s12 = smov 0   ;;  %s1150_s13 = smov 0   ;;  %s1279_s0 = inlined_call_operand.vmem [shape: bf16[16,1152], index: 0, kind: input, shape index: {}]   ;;  %s1280_s1 = inlined_call_operand.vmem [shape: bf16[1152,256], index: 1, kind: input, shape index: {}]   ;;  %s1281_s2 = inlined_call_operand.vmem [shape: f32[1,256], index: 2, kind: input, shape index: {}]   ;;  %s1282_s3 = inlined_call_operand.vmem [shape: bf16[16,256], index: 3, kind: output, shape index: {}]  }
   0x1   :  { %s1152_s14 = smov 0   ;;  %s1154_s15 = smov 0  }
   0x2   :  { %s1156_s16 = smov 0  }
   0x3 LB: > { %s25_s17 = sadd.s32 1, %s1120_s15  ;;  %p48_p1 = scmp.ne.s32.totalorder %s1112_s13, %s1108_s12  ;;  %s1124_s16 = sphi %s1156_s16, %s13_s16   ;;  %s1120_s15 = sphi %s1154_s15, %s1286_s15   ;;  %s1116_s14 = sphi %s1152_s14, %s1285_s14   ;;  %s1112_s13 = sphi %s1150_s13, %s1284_s13   ;;  %s1108_s12 = sphi %s1148_s12, %s1283_s12  }
   0x4   : > { %p26_p0 = scmp.ge.s32.totalorder %s25_s17, 3  ;;  %p49_p2 = scmp.eq.s32.totalorder %s1124_s16, 0 }
   0x5   : > { %s41_s19 = sadd.s32 1, %s1112_s13  ;;  %p894_p5 = scmp.ge.s32.totalorder %s1124_s16, 3 }
   0x6   : > { %s1288_s17 = smov (%p26_p0, %s25_s17), 0  ;;  %p50_p3 = por %p49_p2, %p48_p1 }
   0x7   : > { %s37_s18 = ssub.s32 %s1120_s15, %s1288_s17  ;;  %164 = sbr.rel (%p894_p5) target bundleno = 19 (0x13), region = 20 }
   0x8   : > { %p39_p4 = scmp.eq.s32.totalorder %s37_s18, 0 }
   0xa   : > { %s1183_s20 = scalar_select %p39_p4, %s1112_s13, %s41_s19  }
   0xc   : > { %167 = sbr.rel (!%p50_p3) target bundleno = 19 (0x13), region = 24  ;;  %s169_s21 = sand.u32 (%p50_p3), 1, %s1112_s13  }
   0xd   : > { %s962_s22 = smul.u32 (%p50_p3), 12, %s1120_s15 }
   0xe   : > { %s966_s23 = smul.u32 (%p50_p3), 24, %s169_s21 }
   0xf   : > { %s177_s26 = scalar_lea.vmem (%p50_p3), %s1279_s0, %s962_s22 }
  0x10   : > { %v192_v0 = vld [vmem:[%s177_s26] sm:$0xff] (%p50_p3)  ;;  %v896_v2 = vld [vmem:[%s177_s26 + $0x8] sm:$0xf] (%p50_p3)  ;;  %s171_s27 = scalar_lea.vmem (%p50_p3), [#allocation3], %s966_s23  ;;  %v898_v3 = vld [vmem:[%s177_s26 + $0x2c] sm:$0xf] (%p50_p3) }
  0x11   : > { %v194_v1 = vld [vmem:[%s177_s26 + $0x24] sm:$0xff]  ;;  %193 = vst [vmem:[%s171_s27] sm:$0xff] %v192_v0  ;;  %897 = vst [vmem:[%s171_s27 + $0x8] sm:$0xf] %v896_v2 }
  0x12   : > { %195 = vst [vmem:[%s171_s27 + $0xc] sm:$0xff] %v194_v1  ;;  %899 = vst [vmem:[%s171_s27 + $0x14] sm:$0xf] %v898_v3 }
  0x13 PF: > { %p900_p6 = scmp.ge.s32.totalorder %s1124_s16, 1  ;;  %p227_p7 = scmp.lt.s32.totalorder %s1124_s16, 4 }
  0x15   : > { %p228_p8 = pnand %p900_p6, %p227_p7 }
  0x16   : > { %s234_s28 = sand.u32 (!%p228_p8), 1, %s1108_s12   ;;  %s278_s29 = smul.u32 (!%p228_p8), 48, %s1116_s14 }
  0x17   : > { %231 = sbr.rel (%p228_p8) target bundleno = 320 (0x140), region = 54  ;;  %p903_p10 = scmp.ne.s32.totalorder (!%p228_p8), %s1116_s14, 0 }
  0x18   : > { %s967_s30 = smul.u32 (!%p228_p8), 24, %s234_s28  ;;  %p280_p9 = scmp.lt.s32.totalorder (!%p228_p8), %s278_s29, 143 }
  0x1a   : > { %s1200_s8 = scalar_lea.vmem (!%p228_p8), [#allocation3], %s967_s30 }
  0x1c   : > { %s1290_s29 = smov (!%p280_p9, %s278_s29), 143  ;;  %311 = sbr.rel (%p903_p10) target bundleno = 36 (0x24), region = 62 }
  0x1d   : > { %s963_s4 = sshll.u32 %s1290_s29, 3 }
  0x1e   : > { %s1198_s7 = scalar_lea.vmem %s1280_s1, %s963_s4 }
  0x21   : > { %v1126_v4 = vmov 0.0  }
  0x22   : > { %312 = vst [vmem:[#allocation2 + $0x10] sm:$0xff] %v1126_v4  ;;  %313 = vst [vmem:[#allocation2] sm:$0xff] %v1126_v4 }
  0x23   : > { %314 = vst [vmem:[#allocation2 + $0x18] sm:$0xff] %v1126_v4  ;;  %315 = vst [vmem:[#allocation2 + $0x8] sm:$0xff] %v1126_v4 }
  0x24 PF: > { %v1010_v5 = vld [vmem:[%s1198_s7 + $0x74] ss:$8 sps:$4 sm:$0xff]   ;;  %v1012_v6 = vld [vmem:[%s1198_s7 + $0x70] ss:$8 sps:$4 sm:$0xff]   ;;  %v1127_v7 = vmov 0   ;;  %p955_p11 = scmp.ne.s32.totalorder %s1116_s14, 2 }
  0x25   : > { %703 = vmatprep.mubr.bf16.mxu1 %v1127_v7  ;;  %628 = vmatprep.subr.bf16.mxu0 %v1010_v5  ;;  %v1013_v8 = vld [vmem:[%s1198_s7 + $0x64] ss:$8 sps:$4 sm:$0xff]   ;;  %v1015_v9 = vld [vmem:[%s1198_s7 + $0x60] ss:$8 sps:$4 sm:$0xff]   ;;  %v1016_v10 = vld [vmem:[%s1198_s7 + $0x54] ss:$8 sps:$4 sm:$0xff]  }
  0x26   : > { %629 = vmatpush1.bf16.msra.mxu0 %v1012_v6  ;;  %v1018_v11 = vld [vmem:[%s1198_s7 + $0x50] ss:$8 sps:$4 sm:$0xff]   ;;  %v1019_v12 = vld [vmem:[%s1198_s7 + $0x44] ss:$8 sps:$4 sm:$0xff]   ;;  %v1031_v13 = vld [vmem:[%s1198_s7 + $0x174] ss:$8 sps:$4 sm:$0xff]  }
  0x27   : > { %630 = vmatprep.subr.bf16.mxu0 %v1013_v8  ;;  %v1033_v14 = vld [vmem:[%s1198_s7 + $0x170] ss:$8 sps:$4 sm:$0xff]   ;;  %v1021_v15 = vld [vmem:[%s1198_s7 + $0x40] ss:$8 sps:$4 sm:$0xff]   ;;  %v1022_v16 = vld [vmem:[%s1198_s7 + $0x34] ss:$8 sps:$4 sm:$0xff]   ;;  %671 = vmatprep.subr.bf16.mxu1 %v1031_v13 }
  0x28   : > { %v1037_v17 = vld [vmem:[%s1198_s7 + $0x164] ss:$8 sps:$4 sm:$0xff]   ;;  %672 = vmatpush1.bf16.msra.mxu1 %v1033_v14  ;;  %v1039_v18 = vld [vmem:[%s1198_s7 + $0x160] ss:$8 sps:$4 sm:$0xff]   ;;  %v1024_v19 = vld [vmem:[%s1198_s7 + $0x30] ss:$8 sps:$4 sm:$0xff]  }
  0x29   : > { %673 = vmatprep.subr.bf16.mxu1 %v1037_v17  ;;  %v1043_v20 = vld [vmem:[%s1198_s7 + $0x154] ss:$8 sps:$4 sm:$0xff]   ;;  %v1025_v21 = vld [vmem:[%s1198_s7 + $0x24] ss:$8 sps:$4 sm:$0xff]   ;;  %v1045_v22 = vld [vmem:[%s1198_s7 + $0x150] ss:$8 sps:$4 sm:$0xff]  }
  0x2a   : > { %631 = vmatpush1.bf16.msra.mxu0 %v1015_v9  ;;  %v1049_v23 = vld [vmem:[%s1198_s7 + $0x144] ss:$8 sps:$4 sm:$0xff]   ;;  %v1027_v24 = vld [vmem:[%s1198_s7 + $0x20] ss:$8 sps:$4 sm:$0xff]   ;;  %v1028_v25 = vld [vmem:[%s1198_s7 + $0x14] ss:$8 sps:$4 sm:$0xff]  }
  0x2b   : > { %632 = vmatprep.subr.bf16.mxu0 %v1016_v10  ;;  %v1051_v26 = vld [vmem:[%s1198_s7 + $0x140] ss:$8 sps:$4 sm:$0xff]   ;;  %v1055_v27 = vld [vmem:[%s1198_s7 + $0x134] ss:$8 sps:$4 sm:$0xff]   ;;  %v1030_v28 = vld [vmem:[%s1198_s7 + $0x10] ss:$8 sps:$4 sm:$0xff]  }
  0x2c   : > { %674 = vmatpush1.bf16.msra.mxu1 %v1039_v18  ;;  %v1034_v29 = vld [vmem:[%s1198_s7 + $0x4] ss:$8 sps:$4 sm:$0xff]   ;;  %v1057_v30 = vld [vmem:[%s1198_s7 + $0x130] ss:$8 sps:$4 sm:$0xff]   ;;  %v1036_v32 = vld [vmem:[%s1198_s7] ss:$8 sps:$4 sm:$0xff]  }
  0x2d   : > { %675 = vmatprep.subr.bf16.mxu1 %v1043_v20  ;;  %v1061_v31 = vld [vmem:[%s1198_s7 + $0x124] ss:$8 sps:$4 sm:$0xff]   ;;  %v1040_v33 = vld [vmem:[%s1198_s7 + $0xf4] ss:$8 sps:$4 sm:$0xff]   ;;  %v1063_v34 = vld [vmem:[%s1198_s7 + $0x120] ss:$8 sps:$4 sm:$0xff]  }
  0x2e   : > { %633 = vmatpush1.bf16.msra.mxu0 %v1018_v11  ;;  %v1067_v35 = vld [vmem:[%s1198_s7 + $0x114] ss:$8 sps:$4 sm:$0xff]   ;;  %v1042_v36 = vld [vmem:[%s1198_s7 + $0xf0] ss:$8 sps:$4 sm:$0xff]   ;;  %v1046_v37 = vld [vmem:[%s1198_s7 + $0xe4] ss:$8 sps:$4 sm:$0xff]  }
  0x2f   : > { %634 = vmatprep.subr.bf16.mxu0 %v1019_v12  ;;  %v1069_v38 = vld [vmem:[%s1198_s7 + $0x110] ss:$8 sps:$4 sm:$0xff]   ;;  %v1073_v39 = vld [vmem:[%s1198_s7 + $0x104] ss:$8 sps:$4 sm:$0xff]   ;;  %v1048_v41 = vld [vmem:[%s1198_s7 + $0xe0] ss:$8 sps:$4 sm:$0xff]  }
  0x30   : > { %676 = vmatpush1.bf16.msra.mxu1 %v1045_v22  ;;  %v1085_v40 = vld [vmem:[%s1200_s8 + $0x4] ss:$12 sps:$4 sm:$0xff]   ;;  %v1079_v46 = vld [vmem:[%s1200_s8 + $0x8] ss:$12 sps:$4 sm:$0xff]   ;;  %v1083_v56 = vld [vmem:[%s1200_s8] ss:$12 sps:$4 sm:$0xff]  }
  0x31   : > { %677 = vmatprep.subr.bf16.mxu1 %v1049_v23  ;;  %v1052_v42 = vld [vmem:[%s1198_s7 + $0xd4] ss:$8 sps:$4 sm:$0xff]   ;;  %660 = vmatprep.mubr.bf16.mxu0 %v1085_v40  ;;  %v1075_v43 = vld [vmem:[%s1198_s7 + $0x100] ss:$8 sps:$4 sm:$0xff]   ;;  %v1054_v44 = vld [vmem:[%s1198_s7 + $0xd0] ss:$8 sps:$4 sm:$0xff]  }
  0x32   : > { %635 = vmatpush1.bf16.msra.mxu0 %v1021_v15  ;;  %v1058_v45 = vld [vmem:[%s1198_s7 + $0xc4] ss:$8 sps:$4 sm:$0xff]   ;;  %v1060_v47 = vld [vmem:[%s1198_s7 + $0xc0] ss:$8 sps:$4 sm:$0xff]   ;;  %v1064_v48 = vld [vmem:[%s1198_s7 + $0xb4] ss:$8 sps:$4 sm:$0xff]  }
  0x33   : > { %636 = vmatprep.subr.bf16.mxu0 %v1022_v16  ;;  %v1066_v49 = vld [vmem:[%s1198_s7 + $0xb0] ss:$8 sps:$4 sm:$0xff]   ;;  %v1070_v50 = vld [vmem:[%s1198_s7 + $0xa4] ss:$8 sps:$4 sm:$0xff]   ;;  %v1072_v51 = vld [vmem:[%s1198_s7 + $0xa0] ss:$8 sps:$4 sm:$0xff]  }
  0x34   : > { %678 = vmatpush1.bf16.msra.mxu1 %v1051_v26  ;;  %v1076_v52 = vld [vmem:[%s1198_s7 + $0x94] ss:$8 sps:$4 sm:$0xff]   ;;  %v1078_v53 = vld [vmem:[%s1198_s7 + $0x90] ss:$8 sps:$4 sm:$0xff]   ;;  %v1080_v54 = vld [vmem:[%s1198_s7 + $0x84] ss:$8 sps:$4 sm:$0xff]  }
  0x35   : > { %679 = vmatprep.subr.bf16.mxu1 %v1055_v27  ;;  %v1082_v55 = vld [vmem:[%s1198_s7 + $0x80] ss:$8 sps:$4 sm:$0xff]   ;;  %v316_v59 = vld [vmem:[#allocation2 + $0x10] sm:$0xff]  ;;  %v318_v3 = vld [vmem:[#allocation2 + $0x18] sm:$0xff] }
  0x36   : > { %637 = vmatpush1.bf16.msra.mxu0 %v1024_v19  ;;  %v317_v63 = vld [vmem:[#allocation2] sm:$0xff]  ;;  %v319_v8 = vld [vmem:[#allocation2 + $0x8] sm:$0xff] }
  0x37   : > { %638 = vmatprep.subr.bf16.mxu0 %v1025_v21 }
  0x38   : > { %680 = vmatpush1.bf16.msra.mxu1 %v1057_v30 }
  0x39   : > { %681 = vmatprep.subr.bf16.mxu1 %v1061_v31 }
  0x3a   : > { %639 = vmatpush1.bf16.msra.mxu0 %v1027_v24 }
  0x3b   : > { %640 = vmatprep.subr.bf16.mxu0 %v1028_v25 }
  0x3c   : > { %682 = vmatpush1.bf16.msra.mxu1 %v1063_v34 }
  0x3d   : > { %683 = vmatprep.subr.bf16.mxu1 %v1067_v35 }
  0x3e   : > { %641 = vmatpush1.bf16.msra.mxu0 %v1030_v28 }
  0x3f   : > { %642 = vmatprep.subr.bf16.mxu0 %v1034_v29 }
  0x40   : > { %684 = vmatpush1.bf16.msra.mxu1 %v1069_v38 }
  0x41   : > { %685 = vmatprep.subr.bf16.mxu1 %v1073_v39 }
  0x42   : > { %643 = vmatpush1.bf16.msra.mxu0 %v1036_v32 }
  0x43   : > { %644 = vmatprep.subr.bf16.mxu0 %v1040_v33 }
  0x44   : > { %686 = vmatpush1.bf16.msra.mxu1 %v1075_v43 }
  0x46   : > { %645 = vmatpush2.bf16.msra.mxu0 %v1042_v36 }
  0x47   : > { %646 = vmatprep.subr.bf16.mxu0 %v1046_v37  ;;  %704 = vmatmul.mubr.bf16.vlgmr.msra.gmra.mxu1 %v1079_v46 }
  0x4a   : > { %647 = vmatpush2.bf16.msra.mxu0 %v1048_v41 }
  0x4b   : > { %648 = vmatprep.subr.bf16.mxu0 %v1052_v42 }
  0x4e   : > { %649 = vmatpush2.bf16.msra.mxu0 %v1054_v44 }
  0x4f   : > { %650 = vmatprep.subr.bf16.mxu0 %v1058_v45 }
  0x52   : > { %651 = vmatpush2.bf16.msra.mxu0 %v1060_v47 }
  0x53   : > { %652 = vmatprep.subr.bf16.mxu0 %v1064_v48 }
  0x56   : > { %653 = vmatpush2.bf16.msra.mxu0 %v1066_v49 }
  0x57   : > { %654 = vmatprep.subr.bf16.mxu0 %v1070_v50 }
  0x5a   : > { %655 = vmatpush2.bf16.msra.mxu0 %v1072_v51 }
  0x5b   : > { %656 = vmatprep.subr.bf16.mxu0 %v1076_v52 }
  0x5e   : > { %657 = vmatpush2.bf16.msra.mxu0 %v1078_v53 }
  0x5f   : > { %658 = vmatprep.subr.bf16.mxu0 %v1080_v54 }
  0x62   : > { %659 = vmatpush2.bf16.msra.mxu0 %v1082_v55 }
  0x65   : > { %661 = vmatmul.mubr.bf16.vlgmr.msra.gmra.mxu0 %v1083_v56 }
 0x107   : > { %v705_v57 = vpop.f32.mrf.mxu1 }
 0x109   : > { %v707_v58 = vpop.f32.mrf.mxu1 }
 0x10b   : > { %v709_v62 = vpop.f32.mrf.mxu1 }
 0x10d   : > { %v711_v7 = vpop.f32.mrf.mxu1 }
 0x125   : > { %v662_v60 = vpop.f32.mrf.mxu0 }
 0x126   : > { %v706_v61 = vadd.f32 %v705_v57, %v662_v60 }
 0x127   : > { %v664_v0 = vpop.f32.mrf.mxu0 }
 0x128   : > { %v714_v1 = vadd.f32 %v706_v61, %v316_v59  ;;  %v708_v2 = vadd.f32 %v707_v58, %v664_v0 }
 0x129   : > { %v666_v4 = vpop.f32.mrf.mxu0 }
 0x12a   : > { %718 = vst [vmem:[#allocation2 + $0x10] sm:$0xff] %v714_v1  ;;  %v715_v5 = vadd.f32 %v708_v2, %v317_v63  ;;  %v710_v6 = vadd.f32 %v709_v62, %v666_v4 }
 0x12b   : > { %v668_v9 = vpop.f32.mrf.mxu0 }
 0x12c   : > { %719 = vst [vmem:[#allocation2] sm:$0xff] %v715_v5  ;;  %v716_v10 = vadd.f32 %v710_v6, %v318_v3  ;;  %v712_v11 = vadd.f32 %v711_v7, %v668_v9  ;;  %725 = sbr.rel (%p955_p11) target bundleno = 320 (0x140), region = 66 }
 0x12e   : > { %720 = vst [vmem:[#allocation2 + $0x18] sm:$0xff] %v716_v10  ;;  %v717_v12 = vadd.f32 %v712_v11, %v319_v8 }
 0x130   : > { %721 = vst [vmem:[#allocation2 + $0x8] sm:$0xff] %v717_v12 }
 0x131   : > { %v732_v13 = vlaneseq  ;;  %v730_v15 = vld [vmem:[%s1281_s2] sm:$0x3]  ;;  %v726_v16 = vld [vmem:[#allocation2 + $0x10] sm:$0xff] }
 0x133   : > { %v733_v14 = vshrl.u32 %v732_v13, 7  ;;  %v727_v19 = vld [vmem:[#allocation2] sm:$0xff] }
 0x135   : > { %v734_v17 = vsub.s32 0, %v733_v14  ;;  %v738_v18 = vsub.s32 1, %v733_v14  ;;  %v728_v20 = vld [vmem:[#allocation2 + $0x18] sm:$0xff] }
 0x137   : > { %v729_v21 = vld [vmem:[#allocation2 + $0x8] sm:$0xff]  ;;  %v735_v22 = vrot.slane %v730_v15, %v734_v17  ;;  %v739_v23 = vrot.slane %v730_v15, %v738_v18 }
 0x139   : > { %v742_v24 = vadd.f32 %v735_v22, %v726_v16  ;;  %v743_v25 = vadd.f32 %v739_v23, %v727_v19  ;;  %v744_v26 = vadd.f32 %v735_v22, %v728_v20  ;;  %v745_v27 = vadd.f32 %v739_v23, %v729_v21 }
 0x13b   : > { %v746_v28 = vmax.f32 %v742_v24, 0.0  ;;  %v747_v29 = vmax.f32 %v743_v25, 0.0  ;;  %v748_v30 = vmax.f32 %v744_v26, 0.0  ;;  %v749_v31 = vmax.f32 %v745_v27, 0.0 }
 0x13d   : > { %v964_v32 = vpack.c.bf16 %v747_v29, %v746_v28  ;;  %v965_v33 = vpack.c.bf16 %v749_v31, %v748_v30 }
 0x13f   : > { %762 = vst [vmem:[%s1282_s3] sm:$0xff] %v964_v32  ;;  %763 = vst [vmem:[%s1282_s3 + $0x8] sm:$0xff] %v965_v33 }
 0x140 PF: > { %s13_s16 = sadd.s32 1, %s1124_s16   ;;  %s1283_s12 = smov %s1112_s13 }
 0x141   : > { %p10_p12 = scmp.ge.s32.totalorder %s13_s16, 5   ;;  %s1284_s13 = smov %s1183_s20 }
 0x142   : > { %s1285_s14 = smov %s1120_s15  ;;  %s1286_s15 = smov %s1288_s17 }
 0x143   :  { %12 = sbr.rel (!%p10_p12) target bundleno = 3 (0x3), region = 113 }

// kernel: quantized_resnet18_forward.37
= control target key start
LH: loop header
LB: loop body
LE: loop exit
PB: predicated region body
PF: predicated region fallthrough
CT: control target
= control target key end

     0   :  { %v270_v1 = vmov 0   ;;  %v191_v18 = vlaneseq  ;;  %s351_s1 = inlined_call_operand.vmem [shape: bf16[128,256], index: 1, kind: input, shape index: {}]   ;;  %s352_s0 = inlined_call_operand.vmem [shape: bf16[16,128], index: 0, kind: input, shape index: {}]   ;;  %s353_s2 = inlined_call_operand.vmem [shape: f32[1,256], index: 2, kind: input, shape index: {}]   ;;  %s354_s3 = inlined_call_operand.vmem [shape: bf16[16,256], index: 3, kind: output, shape index: {}]  }
   0x1   :  { %v245_v0 = vld [vmem:[%s351_s1 + $0x74] ss:$8 sps:$4 sm:$0xff]   ;;  %163 = vmatprep.mubr.bf16.mxu0 %v270_v1  ;;  %v247_v2 = vld [vmem:[%s351_s1 + $0x70] ss:$8 sps:$4 sm:$0xff]   ;;  %v248_v3 = vld [vmem:[%s351_s1 + $0x64] ss:$8 sps:$4 sm:$0xff]  }
   0x2   :  { %131 = vmatprep.subr.bf16.mxu0 %v245_v0  ;;  %v250_v4 = vld [vmem:[%s351_s1 + $0x60] ss:$8 sps:$4 sm:$0xff]   ;;  %v251_v5 = vld [vmem:[%s351_s1 + $0x54] ss:$8 sps:$4 sm:$0xff]   ;;  %v253_v6 = vld [vmem:[%s351_s1 + $0x50] ss:$8 sps:$4 sm:$0xff]  }
   0x3   :  { %132 = vmatpush1.bf16.msra.mxu0 %v247_v2  ;;  %v254_v7 = vld [vmem:[%s351_s1 + $0x44] ss:$8 sps:$4 sm:$0xff]   ;;  %v256_v8 = vld [vmem:[%s351_s1 + $0x40] ss:$8 sps:$4 sm:$0xff]   ;;  %v257_v9 = vld [vmem:[%s351_s1 + $0x34] ss:$8 sps:$4 sm:$0xff]  }
   0x4   :  { %133 = vmatprep.subr.bf16.mxu0 %v248_v3  ;;  %v259_v10 = vld [vmem:[%s351_s1 + $0x30] ss:$8 sps:$4 sm:$0xff]   ;;  %v260_v11 = vld [vmem:[%s351_s1 + $0x24] ss:$8 sps:$4 sm:$0xff]   ;;  %v262_v12 = vld [vmem:[%s351_s1 + $0x20] ss:$8 sps:$4 sm:$0xff]  }
   0x5   :  { %v263_v13 = vld [vmem:[%s351_s1 + $0x14] ss:$8 sps:$4 sm:$0xff]   ;;  %v265_v14 = vld [vmem:[%s351_s1 + $0x10] ss:$8 sps:$4 sm:$0xff]   ;;  %v266_v15 = vld [vmem:[%s351_s1 + $0x4] ss:$8 sps:$4 sm:$0xff]  }
   0x6   :  { %v268_v16 = vld [vmem:[%s351_s1] ss:$8 sps:$4 sm:$0xff]   ;;  %v192_v19 = vshrl.u32 %v191_v18, 7 }
   0x7   :  { %134 = vmatpush1.bf16.msra.mxu0 %v250_v4  ;;  %v269_v17 = vld [vmem:[%s352_s0] sm:$0xff]  }
   0x8   :  { %135 = vmatprep.subr.bf16.mxu0 %v251_v5  ;;  %v193_v20 = vsub.s32 0, %v192_v19  ;;  %v197_v21 = vsub.s32 1, %v192_v19  ;;  %v189_v22 = vld [vmem:[%s353_s2] sm:$0x3] }
   0xa   :  { %v194_v23 = vrot.slane %v189_v22, %v193_v20  ;;  %v198_v24 = vrot.slane %v189_v22, %v197_v21 }
   0xb   :  { %136 = vmatpush1.bf16.msra.mxu0 %v253_v6 }
   0xc   :  { %137 = vmatprep.subr.bf16.mxu0 %v254_v7 }
   0xf   :  { %138 = vmatpush1.bf16.msra.mxu0 %v256_v8 }
  0x10   :  { %139 = vmatprep.subr.bf16.mxu0 %v257_v9 }
  0x13   :  { %140 = vmatpush1.bf16.msra.mxu0 %v259_v10 }
  0x14   :  { %141 = vmatprep.subr.bf16.mxu0 %v260_v11 }
  0x17   :  { %142 = vmatpush1.bf16.msra.mxu0 %v262_v12 }
  0x18   :  { %143 = vmatprep.subr.bf16.mxu0 %v263_v13 }
  0x1b   :  { %144 = vmatpush1.bf16.msra.mxu0 %v265_v14 }
  0x1c   :  { %145 = vmatprep.subr.bf16.mxu0 %v266_v15 }
  0x1f   :  { %146 = vmatpush1.bf16.msra.mxu0 %v268_v16 }
  0x22   :  { %164 = vmatmul.mubr.bf16.vlgmr.msra.gmra.mxu0 %v269_v17 }
  0xe2   :  { %v165_v25 = vpop.f32.mrf.mxu0 }
  0xe3   :  { %v201_v27 = vadd.f32 %v194_v23, %v165_v25 }
  0xe4   :  { %v167_v26 = vpop.f32.mrf.mxu0 }
  0xe5   :  { %v202_v28 = vadd.f32 %v198_v24, %v167_v26 }
  0xe6   :  { %v169_v29 = vpop.f32.mrf.mxu0 }
  0xe7   :  { %v242_v30 = vpack.c.bf16 %v202_v28, %v201_v27  ;;  %v203_v32 = vadd.f32 %v194_v23, %v169_v29 }
  0xe8   :  { %v171_v31 = vpop.f32.mrf.mxu0 }
  0xe9   :  { %217 = vst [vmem:[%s354_s3] sm:$0xff] %v242_v30  ;;  %v204_v33 = vadd.f32 %v198_v24, %v171_v31 }
  0xeb   :  { %v243_v34 = vpack.c.bf16 %v204_v33, %v203_v32 }
  0xed   :  { %218 = vst [vmem:[%s354_s3 + $0x8] sm:$0xff] %v243_v34 }

// kernel: quantized_resnet18_forward.39
= control target key start
LH: loop header
LB: loop body
LE: loop exit
PB: predicated region body
PF: predicated region fallthrough
CT: control target
= control target key end

     0   :  { %s1148_s12 = smov 0   ;;  %s1150_s13 = smov 0   ;;  %s1279_s0 = inlined_call_operand.vmem [shape: bf16[16,2304], index: 0, kind: input, shape index: {}]   ;;  %s1280_s1 = inlined_call_operand.vmem [shape: bf16[2304,256], index: 1, kind: input, shape index: {}]   ;;  %s1281_s2 = inlined_call_operand.vmem [shape: f32[1,256], index: 2, kind: input, shape index: {}]   ;;  %s1282_s3 = inlined_call_operand.vmem [shape: bf16[16,256], index: 3, kind: output, shape index: {}]  }
   0x1   :  { %s1152_s14 = smov 0   ;;  %s1154_s15 = smov 0  }
   0x2   :  { %s1156_s16 = smov 0  }
   0x3 LB: > { %s25_s17 = sadd.s32 1, %s1120_s15  ;;  %p48_p1 = scmp.ne.s32.totalorder %s1112_s13, %s1108_s12  ;;  %s1124_s16 = sphi %s1156_s16, %s13_s16   ;;  %s1120_s15 = sphi %s1154_s15, %s1286_s15   ;;  %s1116_s14 = sphi %s1152_s14, %s1285_s14   ;;  %s1112_s13 = sphi %s1150_s13, %s1284_s13   ;;  %s1108_s12 = sphi %s1148_s12, %s1283_s12  }
   0x4   : > { %p26_p0 = scmp.ge.s32.totalorder %s25_s17, 6  ;;  %p49_p2 = scmp.eq.s32.totalorder %s1124_s16, 0 }
   0x5   : > { %s41_s19 = sadd.s32 1, %s1112_s13  ;;  %p894_p5 = scmp.ge.s32.totalorder %s1124_s16, 6 }
   0x6   : > { %s1288_s17 = smov (%p26_p0, %s25_s17), 0  ;;  %p50_p3 = por %p49_p2, %p48_p1 }
   0x7   : > { %s37_s18 = ssub.s32 %s1120_s15, %s1288_s17  ;;  %164 = sbr.rel (%p894_p5) target bundleno = 19 (0x13), region = 20 }
   0x8   : > { %p39_p4 = scmp.eq.s32.totalorder %s37_s18, 0 }
   0xa   : > { %s1183_s20 = scalar_select %p39_p4, %s1112_s13, %s41_s19  }
   0xc   : > { %167 = sbr.rel (!%p50_p3) target bundleno = 19 (0x13), region = 24  ;;  %s169_s21 = sand.u32 (%p50_p3), 1, %s1112_s13  }
   0xd   : > { %s962_s22 = smul.u32 (%p50_p3), 12, %s1120_s15 }
   0xe   : > { %s966_s23 = smul.u32 (%p50_p3), 24, %s169_s21 }
   0xf   : > { %s177_s26 = scalar_lea.vmem (%p50_p3), %s1279_s0, %s962_s22 }
  0x10   : > { %v192_v0 = vld [vmem:[%s177_s26] sm:$0xff] (%p50_p3)  ;;  %v194_v1 = vld [vmem:[%s177_s26 + $0x48] sm:$0xff] (%p50_p3)  ;;  %s171_s27 = scalar_lea.vmem (%p50_p3), [#allocation3], %s966_s23  ;;  %v898_v3 = vld [vmem:[%s177_s26 + $0x50] sm:$0xf] (%p50_p3) }
  0x11   : > { %v896_v2 = vld [vmem:[%s177_s26 + $0x8] sm:$0xf]  ;;  %193 = vst [vmem:[%s171_s27] sm:$0xff] %v192_v0  ;;  %195 = vst [vmem:[%s171_s27 + $0xc] sm:$0xff] %v194_v1 }
  0x12   : > { %897 = vst [vmem:[%s171_s27 + $0x8] sm:$0xf] %v896_v2  ;;  %899 = vst [vmem:[%s171_s27 + $0x14] sm:$0xf] %v898_v3 }
  0x13 PF: > { %p900_p6 = scmp.ge.s32.totalorder %s1124_s16, 1  ;;  %p227_p7 = scmp.lt.s32.totalorder %s1124_s16, 7 }
  0x15   : > { %p228_p8 = pnand %p900_p6, %p227_p7 }
  0x16   : > { %s234_s28 = sand.u32 (!%p228_p8), 1, %s1108_s12   ;;  %s278_s29 = smul.u32 (!%p228_p8), 48, %s1116_s14 }
  0x17   : > { %231 = sbr.rel (%p228_p8) target bundleno = 320 (0x140), region = 54  ;;  %p903_p10 = scmp.ne.s32.totalorder (!%p228_p8), %s1116_s14, 0 }
  0x18   : > { %s967_s30 = smul.u32 (!%p228_p8), 24, %s234_s28  ;;  %p280_p9 = scmp.lt.s32.totalorder (!%p228_p8), %s278_s29, 287 }
  0x1a   : > { %s1200_s8 = scalar_lea.vmem (!%p228_p8), [#allocation3], %s967_s30 }
  0x1c   : > { %s1290_s29 = smov (!%p280_p9, %s278_s29), 287  ;;  %311 = sbr.rel (%p903_p10) target bundleno = 36 (0x24), region = 62 }
  0x1d   : > { %s963_s4 = sshll.u32 %s1290_s29, 3 }
  0x1e   : > { %s1198_s7 = scalar_lea.vmem %s1280_s1, %s963_s4 }
  0x21   : > { %v1126_v4 = vmov 0.0  }
  0x22   : > { %312 = vst [vmem:[#allocation2 + $0x10] sm:$0xff] %v1126_v4  ;;  %313 = vst [vmem:[#allocation2] sm:$0xff] %v1126_v4 }
  0x23   : > { %314 = vst [vmem:[#allocation2 + $0x18] sm:$0xff] %v1126_v4  ;;  %315 = vst [vmem:[#allocation2 + $0x8] sm:$0xff] %v1126_v4 }
  0x24 PF: > { %v1010_v5 = vld [vmem:[%s1198_s7 + $0x74] ss:$8 sps:$4 sm:$0xff]   ;;  %v1012_v6 = vld [vmem:[%s1198_s7 + $0x70] ss:$8 sps:$4 sm:$0xff]   ;;  %v1127_v7 = vmov 0   ;;  %p955_p11 = scmp.ne.s32.totalorder %s1116_s14, 5 }
  0x25   : > { %703 = vmatprep.mubr.bf16.mxu1 %v1127_v7  ;;  %628 = vmatprep.subr.bf16.mxu0 %v1010_v5  ;;  %v1013_v8 = vld [vmem:[%s1198_s7 + $0x64] ss:$8 sps:$4 sm:$0xff]   ;;  %v1015_v9 = vld [vmem:[%s1198_s7 + $0x60] ss:$8 sps:$4 sm:$0xff]   ;;  %v1016_v10 = vld [vmem:[%s1198_s7 + $0x54] ss:$8 sps:$4 sm:$0xff]  }
  0x26   : > { %629 = vmatpush1.bf16.msra.mxu0 %v1012_v6  ;;  %v1018_v11 = vld [vmem:[%s1198_s7 + $0x50] ss:$8 sps:$4 sm:$0xff]   ;;  %v1019_v12 = vld [vmem:[%s1198_s7 + $0x44] ss:$8 sps:$4 sm:$0xff]   ;;  %v1031_v13 = vld [vmem:[%s1198_s7 + $0x174] ss:$8 sps:$4 sm:$0xff]  }
  0x27   : > { %630 = vmatprep.subr.bf16.mxu0 %v1013_v8  ;;  %v1033_v14 = vld [vmem:[%s1198_s7 + $0x170] ss:$8 sps:$4 sm:$0xff]   ;;  %v1021_v15 = vld [vmem:[%s1198_s7 + $0x40] ss:$8 sps:$4 sm:$0xff]   ;;  %v1022_v16 = vld [vmem:[%s1198_s7 + $0x34] ss:$8 sps:$4 sm:$0xff]   ;;  %671 = vmatprep.subr.bf16.mxu1 %v1031_v13 }
  0x28   : > { %v1037_v17 = vld [vmem:[%s1198_s7 + $0x164] ss:$8 sps:$4 sm:$0xff]   ;;  %672 = vmatpush1.bf16.msra.mxu1 %v1033_v14  ;;  %v1039_v18 = vld [vmem:[%s1198_s7 + $0x160] ss:$8 sps:$4 sm:$0xff]   ;;  %v1024_v19 = vld [vmem:[%s1198_s7 + $0x30] ss:$8 sps:$4 sm:$0xff]  }
  0x29   : > { %673 = vmatprep.subr.bf16.mxu1 %v1037_v17  ;;  %v1043_v20 = vld [vmem:[%s1198_s7 + $0x154] ss:$8 sps:$4 sm:$0xff]   ;;  %v1025_v21 = vld [vmem:[%s1198_s7 + $0x24] ss:$8 sps:$4 sm:$0xff]   ;;  %v1045_v22 = vld [vmem:[%s1198_s7 + $0x150] ss:$8 sps:$4 sm:$0xff]  }
  0x2a   : > { %631 = vmatpush1.bf16.msra.mxu0 %v1015_v9  ;;  %v1049_v23 = vld [vmem:[%s1198_s7 + $0x144] ss:$8 sps:$4 sm:$0xff]   ;;  %v1027_v24 = vld [vmem:[%s1198_s7 + $0x20] ss:$8 sps:$4 sm:$0xff]   ;;  %v1028_v25 = vld [vmem:[%s1198_s7 + $0x14] ss:$8 sps:$4 sm:$0xff]  }
  0x2b   : > { %632 = vmatprep.subr.bf16.mxu0 %v1016_v10  ;;  %v1051_v26 = vld [vmem:[%s1198_s7 + $0x140] ss:$8 sps:$4 sm:$0xff]   ;;  %v1055_v27 = vld [vmem:[%s1198_s7 + $0x134] ss:$8 sps:$4 sm:$0xff]   ;;  %v1030_v28 = vld [vmem:[%s1198_s7 + $0x10] ss:$8 sps:$4 sm:$0xff]  }
  0x2c   : > { %674 = vmatpush1.bf16.msra.mxu1 %v1039_v18  ;;  %v1034_v29 = vld [vmem:[%s1198_s7 + $0x4] ss:$8 sps:$4 sm:$0xff]   ;;  %v1057_v30 = vld [vmem:[%s1198_s7 + $0x130] ss:$8 sps:$4 sm:$0xff]   ;;  %v1036_v32 = vld [vmem:[%s1198_s7] ss:$8 sps:$4 sm:$0xff]  }
  0x2d   : > { %675 = vmatprep.subr.bf16.mxu1 %v1043_v20  ;;  %v1061_v31 = vld [vmem:[%s1198_s7 + $0x124] ss:$8 sps:$4 sm:$0xff]   ;;  %v1040_v33 = vld [vmem:[%s1198_s7 + $0xf4] ss:$8 sps:$4 sm:$0xff]   ;;  %v1063_v34 = vld [vmem:[%s1198_s7 + $0x120] ss:$8 sps:$4 sm:$0xff]  }
  0x2e   : > { %633 = vmatpush1.bf16.msra.mxu0 %v1018_v11  ;;  %v1067_v35 = vld [vmem:[%s1198_s7 + $0x114] ss:$8 sps:$4 sm:$0xff]   ;;  %v1042_v36 = vld [vmem:[%s1198_s7 + $0xf0] ss:$8 sps:$4 sm:$0xff]   ;;  %v1046_v37 = vld [vmem:[%s1198_s7 + $0xe4] ss:$8 sps:$4 sm:$0xff]  }
  0x2f   : > { %634 = vmatprep.subr.bf16.mxu0 %v1019_v12  ;;  %v1069_v38 = vld [vmem:[%s1198_s7 + $0x110] ss:$8 sps:$4 sm:$0xff]   ;;  %v1073_v39 = vld [vmem:[%s1198_s7 + $0x104] ss:$8 sps:$4 sm:$0xff]   ;;  %v1048_v41 = vld [vmem:[%s1198_s7 + $0xe0] ss:$8 sps:$4 sm:$0xff]  }
  0x30   : > { %676 = vmatpush1.bf16.msra.mxu1 %v1045_v22  ;;  %v1085_v40 = vld [vmem:[%s1200_s8 + $0x4] ss:$12 sps:$4 sm:$0xff]   ;;  %v1079_v46 = vld [vmem:[%s1200_s8 + $0x8] ss:$12 sps:$4 sm:$0xff]   ;;  %v1083_v56 = vld [vmem:[%s1200_s8] ss:$12 sps:$4 sm:$0xff]  }
  0x31   : > { %677 = vmatprep.subr.bf16.mxu1 %v1049_v23  ;;  %v1052_v42 = vld [vmem:[%s1198_s7 + $0xd4] ss:$8 sps:$4 sm:$0xff]   ;;  %660 = vmatprep.mubr.bf16.mxu0 %v1085_v40  ;;  %v1075_v43 = vld [vmem:[%s1198_s7 + $0x100] ss:$8 sps:$4 sm:$0xff]   ;;  %v1054_v44 = vld [vmem:[%s1198_s7 + $0xd0] ss:$8 sps:$4 sm:$0xff]  }
  0x32   : > { %635 = vmatpush1.bf16.msra.mxu0 %v1021_v15  ;;  %v1058_v45 = vld [vmem:[%s1198_s7 + $0xc4] ss:$8 sps:$4 sm:$0xff]   ;;  %v1060_v47 = vld [vmem:[%s1198_s7 + $0xc0] ss:$8 sps:$4 sm:$0xff]   ;;  %v1064_v48 = vld [vmem:[%s1198_s7 + $0xb4] ss:$8 sps:$4 sm:$0xff]  }
  0x33   : > { %636 = vmatprep.subr.bf16.mxu0 %v1022_v16  ;;  %v1066_v49 = vld [vmem:[%s1198_s7 + $0xb0] ss:$8 sps:$4 sm:$0xff]   ;;  %v1070_v50 = vld [vmem:[%s1198_s7 + $0xa4] ss:$8 sps:$4 sm:$0xff]   ;;  %v1072_v51 = vld [vmem:[%s1198_s7 + $0xa0] ss:$8 sps:$4 sm:$0xff]  }
  0x34   : > { %678 = vmatpush1.bf16.msra.mxu1 %v1051_v26  ;;  %v1076_v52 = vld [vmem:[%s1198_s7 + $0x94] ss:$8 sps:$4 sm:$0xff]   ;;  %v1078_v53 = vld [vmem:[%s1198_s7 + $0x90] ss:$8 sps:$4 sm:$0xff]   ;;  %v1080_v54 = vld [vmem:[%s1198_s7 + $0x84] ss:$8 sps:$4 sm:$0xff]  }
  0x35   : > { %679 = vmatprep.subr.bf16.mxu1 %v1055_v27  ;;  %v1082_v55 = vld [vmem:[%s1198_s7 + $0x80] ss:$8 sps:$4 sm:$0xff]   ;;  %v316_v59 = vld [vmem:[#allocation2 + $0x10] sm:$0xff]  ;;  %v318_v3 = vld [vmem:[#allocation2 + $0x18] sm:$0xff] }
  0x36   : > { %637 = vmatpush1.bf16.msra.mxu0 %v1024_v19  ;;  %v317_v63 = vld [vmem:[#allocation2] sm:$0xff]  ;;  %v319_v8 = vld [vmem:[#allocation2 + $0x8] sm:$0xff] }
  0x37   : > { %638 = vmatprep.subr.bf16.mxu0 %v1025_v21 }
  0x38   : > { %680 = vmatpush1.bf16.msra.mxu1 %v1057_v30 }
  0x39   : > { %681 = vmatprep.subr.bf16.mxu1 %v1061_v31 }
  0x3a   : > { %639 = vmatpush1.bf16.msra.mxu0 %v1027_v24 }
  0x3b   : > { %640 = vmatprep.subr.bf16.mxu0 %v1028_v25 }
  0x3c   : > { %682 = vmatpush1.bf16.msra.mxu1 %v1063_v34 }
  0x3d   : > { %683 = vmatprep.subr.bf16.mxu1 %v1067_v35 }
  0x3e   : > { %641 = vmatpush1.bf16.msra.mxu0 %v1030_v28 }
  0x3f   : > { %642 = vmatprep.subr.bf16.mxu0 %v1034_v29 }
  0x40   : > { %684 = vmatpush1.bf16.msra.mxu1 %v1069_v38 }
  0x41   : > { %685 = vmatprep.subr.bf16.mxu1 %v1073_v39 }
  0x42   : > { %643 = vmatpush1.bf16.msra.mxu0 %v1036_v32 }
  0x43   : > { %644 = vmatprep.subr.bf16.mxu0 %v1040_v33 }
  0x44   : > { %686 = vmatpush1.bf16.msra.mxu1 %v1075_v43 }
  0x46   : > { %645 = vmatpush2.bf16.msra.mxu0 %v1042_v36 }
  0x47   : > { %646 = vmatprep.subr.bf16.mxu0 %v1046_v37  ;;  %704 = vmatmul.mubr.bf16.vlgmr.msra.gmra.mxu1 %v1079_v46 }
  0x4a   : > { %647 = vmatpush2.bf16.msra.mxu0 %v1048_v41 }
  0x4b   : > { %648 = vmatprep.subr.bf16.mxu0 %v1052_v42 }
  0x4e   : > { %649 = vmatpush2.bf16.msra.mxu0 %v1054_v44 }
  0x4f   : > { %650 = vmatprep.subr.bf16.mxu0 %v1058_v45 }
  0x52   : > { %651 = vmatpush2.bf16.msra.mxu0 %v1060_v47 }
  0x53   : > { %652 = vmatprep.subr.bf16.mxu0 %v1064_v48 }
  0x56   : > { %653 = vmatpush2.bf16.msra.mxu0 %v1066_v49 }
  0x57   : > { %654 = vmatprep.subr.bf16.mxu0 %v1070_v50 }
  0x5a   : > { %655 = vmatpush2.bf16.msra.mxu0 %v1072_v51 }
  0x5b   : > { %656 = vmatprep.subr.bf16.mxu0 %v1076_v52 }
  0x5e   : > { %657 = vmatpush2.bf16.msra.mxu0 %v1078_v53 }
  0x5f   : > { %658 = vmatprep.subr.bf16.mxu0 %v1080_v54 }
  0x62   : > { %659 = vmatpush2.bf16.msra.mxu0 %v1082_v55 }
  0x65   : > { %661 = vmatmul.mubr.bf16.vlgmr.msra.gmra.mxu0 %v1083_v56 }
 0x107   : > { %v705_v57 = vpop.f32.mrf.mxu1 }
 0x109   : > { %v707_v58 = vpop.f32.mrf.mxu1 }
 0x10b   : > { %v709_v62 = vpop.f32.mrf.mxu1 }
 0x10d   : > { %v711_v7 = vpop.f32.mrf.mxu1 }
 0x125   : > { %v662_v60 = vpop.f32.mrf.mxu0 }
 0x126   : > { %v706_v61 = vadd.f32 %v705_v57, %v662_v60 }
 0x127   : > { %v664_v0 = vpop.f32.mrf.mxu0 }
 0x128   : > { %v714_v1 = vadd.f32 %v706_v61, %v316_v59  ;;  %v708_v2 = vadd.f32 %v707_v58, %v664_v0 }
 0x129   : > { %v666_v4 = vpop.f32.mrf.mxu0 }
 0x12a   : > { %718 = vst [vmem:[#allocation2 + $0x10] sm:$0xff] %v714_v1  ;;  %v715_v5 = vadd.f32 %v708_v2, %v317_v63  ;;  %v710_v6 = vadd.f32 %v709_v62, %v666_v4 }
 0x12b   : > { %v668_v9 = vpop.f32.mrf.mxu0 }
 0x12c   : > { %719 = vst [vmem:[#allocation2] sm:$0xff] %v715_v5  ;;  %v716_v10 = vadd.f32 %v710_v6, %v318_v3  ;;  %v712_v11 = vadd.f32 %v711_v7, %v668_v9  ;;  %725 = sbr.rel (%p955_p11) target bundleno = 320 (0x140), region = 66 }
 0x12e   : > { %720 = vst [vmem:[#allocation2 + $0x18] sm:$0xff] %v716_v10  ;;  %v717_v12 = vadd.f32 %v712_v11, %v319_v8 }
 0x130   : > { %721 = vst [vmem:[#allocation2 + $0x8] sm:$0xff] %v717_v12 }
 0x131   : > { %v732_v13 = vlaneseq  ;;  %v730_v15 = vld [vmem:[%s1281_s2] sm:$0x3]  ;;  %v726_v16 = vld [vmem:[#allocation2 + $0x10] sm:$0xff] }
 0x133   : > { %v733_v14 = vshrl.u32 %v732_v13, 7  ;;  %v727_v19 = vld [vmem:[#allocation2] sm:$0xff] }
 0x135   : > { %v734_v17 = vsub.s32 0, %v733_v14  ;;  %v738_v18 = vsub.s32 1, %v733_v14  ;;  %v728_v20 = vld [vmem:[#allocation2 + $0x18] sm:$0xff] }
 0x137   : > { %v729_v21 = vld [vmem:[#allocation2 + $0x8] sm:$0xff]  ;;  %v735_v22 = vrot.slane %v730_v15, %v734_v17  ;;  %v739_v23 = vrot.slane %v730_v15, %v738_v18 }
 0x139   : > { %v742_v24 = vadd.f32 %v735_v22, %v726_v16  ;;  %v743_v25 = vadd.f32 %v739_v23, %v727_v19  ;;  %v744_v26 = vadd.f32 %v735_v22, %v728_v20  ;;  %v745_v27 = vadd.f32 %v739_v23, %v729_v21 }
 0x13b   : > { %v746_v28 = vmax.f32 %v742_v24, 0.0  ;;  %v747_v29 = vmax.f32 %v743_v25, 0.0  ;;  %v748_v30 = vmax.f32 %v744_v26, 0.0  ;;  %v749_v31 = vmax.f32 %v745_v27, 0.0 }
 0x13d   : > { %v964_v32 = vpack.c.bf16 %v747_v29, %v746_v28  ;;  %v965_v33 = vpack.c.bf16 %v749_v31, %v748_v30 }
 0x13f   : > { %762 = vst [vmem:[%s1282_s3] sm:$0xff] %v964_v32  ;;  %763 = vst [vmem:[%s1282_s3 + $0x8] sm:$0xff] %v965_v33 }
 0x140 PF: > { %s13_s16 = sadd.s32 1, %s1124_s16   ;;  %s1283_s12 = smov %s1112_s13 }
 0x141   : > { %p10_p12 = scmp.ge.s32.totalorder %s13_s16, 8   ;;  %s1284_s13 = smov %s1183_s20 }
 0x142   : > { %s1285_s14 = smov %s1120_s15  ;;  %s1286_s15 = smov %s1288_s17 }
 0x143   :  { %12 = sbr.rel (!%p10_p12) target bundleno = 3 (0x3), region = 113 }

// kernel: quantized_resnet18_forward.38
= control target key start
LH: loop header
LB: loop body
LE: loop exit
PB: predicated region body
PF: predicated region fallthrough
CT: control target
= control target key end

     0   :  { %s1253_s15 = smov 0   ;;  %s1255_s16 = smov 0   ;;  %s1390_s0 = inlined_call_operand.vmem [shape: bf16[16,2304], index: 0, kind: input, shape index: {}]   ;;  %s1391_s1 = inlined_call_operand.vmem [shape: bf16[2304,256], index: 1, kind: input, shape index: {}]   ;;  %s1392_s2 = inlined_call_operand.vmem [shape: f32[1,256], index: 2, kind: input, shape index: {}]   ;;  %s1393_s3 = inlined_call_operand.vmem [shape: bf16[16,256], index: 3, kind: input, shape index: {}]   ;;  %s1394_s4 = inlined_call_operand.vmem [shape: bf16[16,256], index: 4, kind: output, shape index: {}]  }
   0x1   :  { %s1257_s17 = smov 0   ;;  %s1259_s18 = smov 0  }
   0x2   :  { %s1261_s19 = smov 0  }
   0x3 LB: > { %s26_s20 = sadd.s32 1, %s1220_s18  ;;  %p49_p1 = scmp.ne.s32.totalorder %s1212_s16, %s1208_s15  ;;  %s1224_s19 = sphi %s1261_s19, %s14_s19   ;;  %s1220_s18 = sphi %s1259_s18, %s1398_s18   ;;  %s1216_s17 = sphi %s1257_s17, %s1397_s17   ;;  %s1212_s16 = sphi %s1255_s16, %s1396_s16   ;;  %s1208_s15 = sphi %s1253_s15, %s1395_s15  }
   0x4   : > { %p27_p0 = scmp.ge.s32.totalorder %s26_s20, 6  ;;  %p50_p2 = scmp.eq.s32.totalorder %s1224_s19, 0 }
   0x5   : > { %s42_s22 = sadd.s32 1, %s1212_s16  ;;  %p994_p5 = scmp.ge.s32.totalorder %s1224_s19, 6 }
   0x6   : > { %s1400_s20 = smov (%p27_p0, %s26_s20), 0  ;;  %p51_p3 = por %p50_p2, %p49_p1 }
   0x7   : > { %s38_s21 = ssub.s32 %s1220_s18, %s1400_s20  ;;  %208 = sbr.rel (%p994_p5) target bundleno = 19 (0x13), region = 24 }
   0x8   : > { %p40_p4 = scmp.eq.s32.totalorder %s38_s21, 0 }
   0xa   : > { %s1288_s23 = scalar_select %p40_p4, %s1212_s16, %s42_s22  }
   0xc   : > { %211 = sbr.rel (!%p51_p3) target bundleno = 19 (0x13), region = 28  ;;  %s213_s24 = sand.u32 (%p51_p3), 1, %s1212_s16  }
   0xd   : > { %s1062_s25 = smul.u32 (%p51_p3), 12, %s1220_s18 }
   0xe   : > { %s1066_s26 = smul.u32 (%p51_p3), 24, %s213_s24 }
   0xf   : > { %s221_s29 = scalar_lea.vmem (%p51_p3), %s1390_s0, %s1062_s25 }
  0x10   : > { %v236_v0 = vld [vmem:[%s221_s29] sm:$0xff] (%p51_p3)  ;;  %v238_v1 = vld [vmem:[%s221_s29 + $0x48] sm:$0xff] (%p51_p3)  ;;  %s215_s30 = scalar_lea.vmem (%p51_p3), [#allocation3], %s1066_s26  ;;  %v998_v3 = vld [vmem:[%s221_s29 + $0x50] sm:$0xf] (%p51_p3) }
  0x11   : > { %v996_v2 = vld [vmem:[%s221_s29 + $0x8] sm:$0xf]  ;;  %237 = vst [vmem:[%s215_s30] sm:$0xff] %v236_v0  ;;  %239 = vst [vmem:[%s215_s30 + $0xc] sm:$0xff] %v238_v1 }
  0x12   : > { %997 = vst [vmem:[%s215_s30 + $0x8] sm:$0xf] %v996_v2  ;;  %999 = vst [vmem:[%s215_s30 + $0x14] sm:$0xf] %v998_v3 }
  0x13 PF: > { %p1000_p6 = scmp.ge.s32.totalorder %s1224_s19, 1  ;;  %p271_p7 = scmp.lt.s32.totalorder %s1224_s19, 7 }
  0x15   : > { %p272_p8 = pnand %p1000_p6, %p271_p7 }
  0x16   : > { %s278_s5 = sand.u32 (!%p272_p8), 1, %s1208_s15   ;;  %s334_s6 = smul.u32 (!%p272_p8), 48, %s1216_s17 }
  0x17   : > { %275 = sbr.rel (%p272_p8) target bundleno = 322 (0x142), region = 58  ;;  %p1003_p10 = scmp.ne.s32.totalorder (!%p272_p8), %s1216_s17, 0 }
  0x18   : > { %s1067_s7 = smul.u32 (!%p272_p8), 24, %s278_s5  ;;  %p336_p9 = scmp.lt.s32.totalorder (!%p272_p8), %s334_s6, 287 }
  0x1a   : > { %s1305_s12 = scalar_lea.vmem (!%p272_p8), [#allocation3], %s1067_s7 }
  0x1c   : > { %s1402_s6 = smov (!%p336_p9, %s334_s6), 287  ;;  %379 = sbr.rel (%p1003_p10) target bundleno = 36 (0x24), region = 66 }
  0x1d   : > { %s1063_s8 = sshll.u32 %s1402_s6, 3 }
  0x1e   : > { %s1303_s11 = scalar_lea.vmem %s1391_s1, %s1063_s8 }
  0x21   : > { %v1226_v4 = vmov 0.0  }
  0x22   : > { %380 = vst [vmem:[#allocation2 + $0x10] sm:$0xff] %v1226_v4  ;;  %381 = vst [vmem:[#allocation2] sm:$0xff] %v1226_v4 }
  0x23   : > { %382 = vst [vmem:[#allocation2 + $0x18] sm:$0xff] %v1226_v4  ;;  %383 = vst [vmem:[#allocation2 + $0x8] sm:$0xff] %v1226_v4 }
  0x24 PF: > { %v1110_v5 = vld [vmem:[%s1303_s11 + $0x74] ss:$8 sps:$4 sm:$0xff]   ;;  %v1112_v6 = vld [vmem:[%s1303_s11 + $0x70] ss:$8 sps:$4 sm:$0xff]   ;;  %v1227_v7 = vmov 0   ;;  %p1055_p11 = scmp.ne.s32.totalorder %s1216_s17, 5 }
  0x25   : > { %771 = vmatprep.mubr.bf16.mxu1 %v1227_v7  ;;  %696 = vmatprep.subr.bf16.mxu0 %v1110_v5  ;;  %v1113_v8 = vld [vmem:[%s1303_s11 + $0x64] ss:$8 sps:$4 sm:$0xff]   ;;  %v1115_v9 = vld [vmem:[%s1303_s11 + $0x60] ss:$8 sps:$4 sm:$0xff]   ;;  %v1116_v10 = vld [vmem:[%s1303_s11 + $0x54] ss:$8 sps:$4 sm:$0xff]  }
  0x26   : > { %697 = vmatpush1.bf16.msra.mxu0 %v1112_v6  ;;  %v1118_v11 = vld [vmem:[%s1303_s11 + $0x50] ss:$8 sps:$4 sm:$0xff]   ;;  %v1119_v12 = vld [vmem:[%s1303_s11 + $0x44] ss:$8 sps:$4 sm:$0xff]   ;;  %v1131_v13 = vld [vmem:[%s1303_s11 + $0x174] ss:$8 sps:$4 sm:$0xff]  }
  0x27   : > { %698 = vmatprep.subr.bf16.mxu0 %v1113_v8  ;;  %v1133_v14 = vld [vmem:[%s1303_s11 + $0x170] ss:$8 sps:$4 sm:$0xff]   ;;  %v1121_v15 = vld [vmem:[%s1303_s11 + $0x40] ss:$8 sps:$4 sm:$0xff]   ;;  %v1122_v16 = vld [vmem:[%s1303_s11 + $0x34] ss:$8 sps:$4 sm:$0xff]   ;;  %739 = vmatprep.subr.bf16.mxu1 %v1131_v13 }
  0x28   : > { %v1137_v17 = vld [vmem:[%s1303_s11 + $0x164] ss:$8 sps:$4 sm:$0xff]   ;;  %740 = vmatpush1.bf16.msra.mxu1 %v1133_v14  ;;  %v1139_v18 = vld [vmem:[%s1303_s11 + $0x160] ss:$8 sps:$4 sm:$0xff]   ;;  %v1124_v19 = vld [vmem:[%s1303_s11 + $0x30] ss:$8 sps:$4 sm:$0xff]  }
  0x29   : > { %741 = vmatprep.subr.bf16.mxu1 %v1137_v17  ;;  %v1143_v20 = vld [vmem:[%s1303_s11 + $0x154] ss:$8 sps:$4 sm:$0xff]   ;;  %v1125_v21 = vld [vmem:[%s1303_s11 + $0x24] ss:$8 sps:$4 sm:$0xff]   ;;  %v1145_v22 = vld [vmem:[%s1303_s11 + $0x150] ss:$8 sps:$4 sm:$0xff]  }
  0x2a   : > { %699 = vmatpush1.bf16.msra.mxu0 %v1115_v9  ;;  %v1149_v23 = vld [vmem:[%s1303_s11 + $0x144] ss:$8 sps:$4 sm:$0xff]   ;;  %v1127_v24 = vld [vmem:[%s1303_s11 + $0x20] ss:$8 sps:$4 sm:$0xff]   ;;  %v1128_v25 = vld [vmem:[%s1303_s11 + $0x14] ss:$8 sps:$4 sm:$0xff]  }
  0x2b   : > { %700 = vmatprep.subr.bf16.mxu0 %v1116_v10  ;;  %v1151_v26 = vld [vmem:[%s1303_s11 + $0x140] ss:$8 sps:$4 sm:$0xff]   ;;  %v1155_v27 = vld [vmem:[%s1303_s11 + $0x134] ss:$8 sps:$4 sm:$0xff]   ;;  %v1130_v28 = vld [vmem:[%s1303_s11 + $0x10] ss:$8 sps:$4 sm:$0xff]  }
  0x2c   : > { %742 = vmatpush1.bf16.msra.mxu1 %v1139_v18  ;;  %v1134_v29 = vld [vmem:[%s1303_s11 + $0x4] ss:$8 sps:$4 sm:$0xff]   ;;  %v1157_v30 = vld [vmem:[%s1303_s11 + $0x130] ss:$8 sps:$4 sm:$0xff]   ;;  %v1136_v32 = vld [vmem:[%s1303_s11] ss:$8 sps:$4 sm:$0xff]  }
  0x2d   : > { %743 = vmatprep.subr.bf16.mxu1 %v1143_v20  ;;  %v1161_v31 = vld [vmem:[%s1303_s11 + $0x124] ss:$8 sps:$4 sm:$0xff]   ;;  %v1140_v33 = vld [vmem:[%s1303_s11 + $0xf4] ss:$8 sps:$4 sm:$0xff]   ;;  %v1163_v34 = vld [vmem:[%s1303_s11 + $0x120] ss:$8 sps:$4 sm:$0xff]  }
  0x2e   : > { %701 = vmatpush1.bf16.msra.mxu0 %v1118_v11  ;;  %v1167_v35 = vld [vmem:[%s1303_s11 + $0x114] ss:$8 sps:$4 sm:$0xff]   ;;  %v1142_v36 = vld [vmem:[%s1303_s11 + $0xf0] ss:$8 sps:$4 sm:$0xff]   ;;  %v1146_v37 = vld [vmem:[%s1303_s11 + $0xe4] ss:$8 sps:$4 sm:$0xff]  }
  0x2f   : > { %702 = vmatprep.subr.bf16.mxu0 %v1119_v12  ;;  %v1169_v38 = vld [vmem:[%s1303_s11 + $0x110] ss:$8 sps:$4 sm:$0xff]   ;;  %v1173_v39 = vld [vmem:[%s1303_s11 + $0x104] ss:$8 sps:$4 sm:$0xff]   ;;  %v1148_v41 = vld [vmem:[%s1303_s11 + $0xe0] ss:$8 sps:$4 sm:$0xff]  }
  0x30   : > { %744 = vmatpush1.bf16.msra.mxu1 %v1145_v22  ;;  %v1185_v40 = vld [vmem:[%s1305_s12 + $0x4] ss:$12 sps:$4 sm:$0xff]   ;;  %v1179_v46 = vld [vmem:[%s1305_s12 + $0x8] ss:$12 sps:$4 sm:$0xff]   ;;  %v1183_v56 = vld [vmem:[%s1305_s12] ss:$12 sps:$4 sm:$0xff]  }
  0x31   : > { %745 = vmatprep.subr.bf16.mxu1 %v1149_v23  ;;  %v1152_v42 = vld [vmem:[%s1303_s11 + $0xd4] ss:$8 sps:$4 sm:$0xff]   ;;  %728 = vmatprep.mubr.bf16.mxu0 %v1185_v40  ;;  %v1175_v43 = vld [vmem:[%s1303_s11 + $0x100] ss:$8 sps:$4 sm:$0xff]   ;;  %v1154_v44 = vld [vmem:[%s1303_s11 + $0xd0] ss:$8 sps:$4 sm:$0xff]  }
  0x32   : > { %703 = vmatpush1.bf16.msra.mxu0 %v1121_v15  ;;  %v1158_v45 = vld [vmem:[%s1303_s11 + $0xc4] ss:$8 sps:$4 sm:$0xff]   ;;  %v1160_v47 = vld [vmem:[%s1303_s11 + $0xc0] ss:$8 sps:$4 sm:$0xff]   ;;  %v1164_v48 = vld [vmem:[%s1303_s11 + $0xb4] ss:$8 sps:$4 sm:$0xff]  }
  0x33   : > { %704 = vmatprep.subr.bf16.mxu0 %v1122_v16  ;;  %v1166_v49 = vld [vmem:[%s1303_s11 + $0xb0] ss:$8 sps:$4 sm:$0xff]   ;;  %v1170_v50 = vld [vmem:[%s1303_s11 + $0xa4] ss:$8 sps:$4 sm:$0xff]   ;;  %v1172_v51 = vld [vmem:[%s1303_s11 + $0xa0] ss:$8 sps:$4 sm:$0xff]  }
  0x34   : > { %746 = vmatpush1.bf16.msra.mxu1 %v1151_v26  ;;  %v1176_v52 = vld [vmem:[%s1303_s11 + $0x94] ss:$8 sps:$4 sm:$0xff]   ;;  %v1178_v53 = vld [vmem:[%s1303_s11 + $0x90] ss:$8 sps:$4 sm:$0xff]   ;;  %v1180_v54 = vld [vmem:[%s1303_s11 + $0x84] ss:$8 sps:$4 sm:$0xff]  }
  0x35   : > { %747 = vmatprep.subr.bf16.mxu1 %v1155_v27  ;;  %v1182_v55 = vld [vmem:[%s1303_s11 + $0x80] ss:$8 sps:$4 sm:$0xff]   ;;  %v384_v59 = vld [vmem:[#allocation2 + $0x10] sm:$0xff]  ;;  %v386_v3 = vld [vmem:[#allocation2 + $0x18] sm:$0xff] }
  0x36   : > { %705 = vmatpush1.bf16.msra.mxu0 %v1124_v19  ;;  %v385_v63 = vld [vmem:[#allocation2] sm:$0xff]  ;;  %v387_v8 = vld [vmem:[#allocation2 + $0x8] sm:$0xff] }
  0x37   : > { %706 = vmatprep.subr.bf16.mxu0 %v1125_v21 }
  0x38   : > { %748 = vmatpush1.bf16.msra.mxu1 %v1157_v30 }
  0x39   : > { %749 = vmatprep.subr.bf16.mxu1 %v1161_v31 }
  0x3a   : > { %707 = vmatpush1.bf16.msra.mxu0 %v1127_v24 }
  0x3b   : > { %708 = vmatprep.subr.bf16.mxu0 %v1128_v25 }
  0x3c   : > { %750 = vmatpush1.bf16.msra.mxu1 %v1163_v34 }
  0x3d   : > { %751 = vmatprep.subr.bf16.mxu1 %v1167_v35 }
  0x3e   : > { %709 = vmatpush1.bf16.msra.mxu0 %v1130_v28 }
  0x3f   : > { %710 = vmatprep.subr.bf16.mxu0 %v1134_v29 }
  0x40   : > { %752 = vmatpush1.bf16.msra.mxu1 %v1169_v38 }
  0x41   : > { %753 = vmatprep.subr.bf16.mxu1 %v1173_v39 }
  0x42   : > { %711 = vmatpush1.bf16.msra.mxu0 %v1136_v32 }
  0x43   : > { %712 = vmatprep.subr.bf16.mxu0 %v1140_v33 }
  0x44   : > { %754 = vmatpush1.bf16.msra.mxu1 %v1175_v43 }
  0x46   : > { %713 = vmatpush2.bf16.msra.mxu0 %v1142_v36 }
  0x47   : > { %714 = vmatprep.subr.bf16.mxu0 %v1146_v37  ;;  %772 = vmatmul.mubr.bf16.vlgmr.msra.gmra.mxu1 %v1179_v46 }
  0x4a   : > { %715 = vmatpush2.bf16.msra.mxu0 %v1148_v41 }
  0x4b   : > { %716 = vmatprep.subr.bf16.mxu0 %v1152_v42 }
  0x4e   : > { %717 = vmatpush2.bf16.msra.mxu0 %v1154_v44 }
  0x4f   : > { %718 = vmatprep.subr.bf16.mxu0 %v1158_v45 }
  0x52   : > { %719 = vmatpush2.bf16.msra.mxu0 %v1160_v47 }
  0x53   : > { %720 = vmatprep.subr.bf16.mxu0 %v1164_v48 }
  0x56   : > { %721 = vmatpush2.bf16.msra.mxu0 %v1166_v49 }
  0x57   : > { %722 = vmatprep.subr.bf16.mxu0 %v1170_v50 }
  0x5a   : > { %723 = vmatpush2.bf16.msra.mxu0 %v1172_v51 }
  0x5b   : > { %724 = vmatprep.subr.bf16.mxu0 %v1176_v52 }
  0x5e   : > { %725 = vmatpush2.bf16.msra.mxu0 %v1178_v53 }
  0x5f   : > { %726 = vmatprep.subr.bf16.mxu0 %v1180_v54 }
  0x62   : > { %727 = vmatpush2.bf16.msra.mxu0 %v1182_v55 }
  0x65   : > { %729 = vmatmul.mubr.bf16.vlgmr.msra.gmra.mxu0 %v1183_v56 }
 0x107   : > { %v773_v57 = vpop.f32.mrf.mxu1 }
 0x109   : > { %v775_v58 = vpop.f32.mrf.mxu1 }
 0x10b   : > { %v777_v62 = vpop.f32.mrf.mxu1 }
 0x10d   : > { %v779_v7 = vpop.f32.mrf.mxu1 }
 0x125   : > { %v730_v60 = vpop.f32.mrf.mxu0 }
 0x126   : > { %v774_v61 = vadd.f32 %v773_v57, %v730_v60 }
 0x127   : > { %v732_v0 = vpop.f32.mrf.mxu0 }
 0x128   : > { %v782_v1 = vadd.f32 %v774_v61, %v384_v59  ;;  %v776_v2 = vadd.f32 %v775_v58, %v732_v0 }
 0x129   : > { %v734_v4 = vpop.f32.mrf.mxu0 }
 0x12a   : > { %786 = vst [vmem:[#allocation2 + $0x10] sm:$0xff] %v782_v1  ;;  %v783_v5 = vadd.f32 %v776_v2, %v385_v63  ;;  %v778_v6 = vadd.f32 %v777_v62, %v734_v4 }
 0x12b   : > { %v736_v9 = vpop.f32.mrf.mxu0 }
 0x12c   : > { %787 = vst [vmem:[#allocation2] sm:$0xff] %v783_v5  ;;  %v784_v10 = vadd.f32 %v778_v6, %v386_v3  ;;  %v780_v11 = vadd.f32 %v779_v7, %v736_v9  ;;  %793 = sbr.rel (%p1055_p11) target bundleno = 322 (0x142), region = 70 }
 0x12e   : > { %788 = vst [vmem:[#allocation2 + $0x18] sm:$0xff] %v784_v10  ;;  %v785_v12 = vadd.f32 %v780_v11, %v387_v8 }
 0x130   : > { %789 = vst [vmem:[#allocation2 + $0x8] sm:$0xff] %v785_v12 }
 0x131   : > { %v800_v13 = vlaneseq  ;;  %v814_v15 = vld [vmem:[%s1393_s3] sm:$0xff]  ;;  %v815_v17 = vld [vmem:[%s1393_s3 + $0x8] sm:$0xff]  ;;  %v794_v18 = vld [vmem:[#allocation2 + $0x10] sm:$0xff] }
 0x132   : > { %v798_v16 = vld [vmem:[%s1392_s2] sm:$0x3]  ;;  %v816_v22 = vunpack.c.l.bf16 %v814_v15  ;;  %v817_v23 = vunpack.c.h.bf16 %v814_v15  ;;  %v818_v28 = vunpack.c.l.bf16 %v815_v17  ;;  %v819_v29 = vunpack.c.h.bf16 %v815_v17 }
 0x133   : > { %v801_v14 = vshrl.u32 %v800_v13, 7  ;;  %v795_v21 = vld [vmem:[#allocation2] sm:$0xff] }
 0x135   : > { %v802_v19 = vsub.s32 0, %v801_v14  ;;  %v806_v20 = vsub.s32 1, %v801_v14  ;;  %v796_v24 = vld [vmem:[#allocation2 + $0x18] sm:$0xff] }
 0x137   : > { %v797_v25 = vld [vmem:[#allocation2 + $0x8] sm:$0xff]  ;;  %v803_v26 = vrot.slane %v798_v16, %v802_v19  ;;  %v807_v27 = vrot.slane %v798_v16, %v806_v20 }
 0x139   : > { %v810_v30 = vadd.f32 %v803_v26, %v794_v18  ;;  %v811_v31 = vadd.f32 %v807_v27, %v795_v21  ;;  %v812_v32 = vadd.f32 %v803_v26, %v796_v24  ;;  %v813_v33 = vadd.f32 %v807_v27, %v797_v25 }
 0x13b   : > { %v820_v34 = vadd.f32 %v816_v22, %v810_v30  ;;  %v821_v35 = vadd.f32 %v817_v23, %v811_v31  ;;  %v822_v36 = vadd.f32 %v818_v28, %v812_v32  ;;  %v823_v37 = vadd.f32 %v819_v29, %v813_v33 }
 0x13d   : > { %v824_v38 = vmax.f32 %v820_v34, 0.0  ;;  %v825_v39 = vmax.f32 %v821_v35, 0.0  ;;  %v826_v40 = vmax.f32 %v822_v36, 0.0  ;;  %v827_v41 = vmax.f32 %v823_v37, 0.0 }
 0x13f   : > { %v1064_v42 = vpack.c.bf16 %v825_v39, %v824_v38  ;;  %v1065_v43 = vpack.c.bf16 %v827_v41, %v826_v40 }
 0x141   : > { %840 = vst [vmem:[%s1394_s4] sm:$0xff] %v1064_v42  ;;  %841 = vst [vmem:[%s1394_s4 + $0x8] sm:$0xff] %v1065_v43 }
 0x142 PF: > { %s14_s19 = sadd.s32 1, %s1224_s19   ;;  %s1395_s15 = smov %s1212_s16 }
 0x143   : > { %p11_p12 = scmp.ge.s32.totalorder %s14_s19, 8   ;;  %s1396_s16 = smov %s1288_s23 }
 0x144   : > { %s1397_s17 = smov %s1220_s18  ;;  %s1398_s18 = smov %s1400_s20 }
 0x145   :  { %13 = sbr.rel (!%p11_p12) target bundleno = 3 (0x3), region = 120 }

// kernel: quantized_resnet18_forward.41
= control target key start
LH: loop header
LB: loop body
LE: loop exit
PB: predicated region body
PF: predicated region fallthrough
CT: control target
= control target key end

     0   :  { %s1812_s0 = inlined_call_operand.vmem [shape: bf16[16,2304], index: 0, kind: input, shape index: {}]   ;;  %s1813_s1 = inlined_call_operand.vmem [shape: bf16[2304,512], index: 1, kind: input, shape index: {}]   ;;  %s1814_s2 = inlined_call_operand.vmem [shape: f32[1,512], index: 2, kind: input, shape index: {}]   ;;  %s1815_s3 = inlined_call_operand.vmem [shape: bf16[16,512], index: 3, kind: output, shape index: {}]  }
   0x1   :  { %1817 = sst [smem:[#allocation7_spill]] %s1812_s0 }
   0x2   :  { %1818 = sst [smem:[#allocation8_spill]] %s1813_s1 }
   0x3   :  { %s1479_s12 = smov 0   ;;  %s1481_s13 = smov 0  }
   0x4   :  { %s1483_s14 = smov 0   ;;  %s1485_s15 = smov 0  }
   0x5   :  { %s1487_s16 = smov 0   ;;  %s1489_s17 = smov 0  }
   0x6   :  { %s1491_s18 = smov 0   ;;  %s1493_s19 = smov 0  }
   0x7   :  { %s1495_s20 = smov 0   ;;  %s1497_s21 = smov 0  }
   0x8   :  { %s1499_s22 = smov 0  }
   0x9 LB: > { %s1119_s23 = sadd.s32 4294967295, %s1455_s22   ;;  %s25_s24 = sadd.s32 1, %s1447_s20  ;;  %s1455_s22 = sphi %s1499_s22, %s13_s22   ;;  %s1451_s21 = sphi %s1497_s21, %s1835_s21   ;;  %s1447_s20 = sphi %s1495_s20, %s1834_s20   ;;  %s1443_s19 = sphi %s1493_s19, %s1833_s19   ;;  %s1439_s18 = sphi %s1491_s18, %s1832_s18   ;;  %s1435_s17 = sphi %s1489_s17, %s1831_s17   ;;  %s1431_s16 = sphi %s1487_s16, %s1830_s16   ;;  %s1427_s15 = sphi %s1485_s15, %s1829_s15   ;;  %s1423_s14 = sphi %s1483_s14, %s1828_s14   ;;  %s1419_s13 = sphi %s1481_s13, %s1827_s13   ;;  %s1415_s12 = sphi %s1479_s12, %s1826_s12  }
   0xa   : > { %p26_p0 = scmp.ge.s32.totalorder %s25_s24, 6  ;;  %s28_s25 = sadd.s32 1, %s1451_s21 }
   0xb   : > { %s41_s26 = sadd.s32 1, %s1435_s17  ;;  %p48_p1 = scmp.ne.s32.totalorder %s1435_s17, %s1431_s16 }
   0xc   : > { %s1837_s24 = smov (%p26_p0, %s25_s24), 0  ;;  %s1839_s25 = smov (!%p26_p0, %s28_s25), %s1451_s21 }
   0xd   : > { %s37_s27 = ssub.s32 %s1447_s20, %s1837_s24  ;;  %p49_p2 = scmp.eq.s32.totalorder %s1455_s22, 0 }
   0xe   : > { %p30_p3 = scmp.ge.s32.totalorder %s1839_s25, 2  ;;  %p39_p4 = scmp.eq.s32.totalorder %s37_s27, 0 }
   0xf   : > { %p1546_p5 = por %p49_p2, %p48_p1  ;;  %s69_s29 = sadd.s32 1, %s1427_s15 }
  0x10   : > { %s1841_s25 = smov (%p30_p3, %s1839_s25), 0  ;;  %p76_p6 = scmp.ne.s32.totalorder %s1427_s15, %s1423_s14 }
  0x11   : > { %1820 = sst [smem:[#allocation6_spill]] %s1841_s25  ;;  %s65_s4 = ssub.s32 %s1451_s21, %s1841_s25 }
  0x12   : > { %s1554_s30 = scalar_select %p39_p4, %s1435_s17, %s41_s26  }
  0x13   : > { %s66_s5 = sor.u32 %s65_s4, %s37_s27  ;;  %p121_p7 = scmp.eq.s32.totalorder %s65_s4, 0 }
  0x14   : > { %p67_p8 = scmp.eq.s32.totalorder %s66_s5, 0  ;;  %p1560_p9 = por %p76_p6, %p49_p2 }
  0x15   : > { %s123_s7 = sadd.s32 1, %s1419_s13  ;;  %p133_p10 = scmp.ne.s32.totalorder %s1419_s13, %s1415_s12 }
  0x16   : > { %s1568_s8 = scalar_select %p67_p8, %s1427_s15, %s69_s29  }
  0x17   : > { %s1571_s9 = scalar_select %p121_p7, %s1419_s13, %s123_s7  }
  0x18   : > { %p134_p11 = scmp.eq.s32.totalorder %s1119_s23, 11  ;;  %p1122_p13 = scmp.ge.s32.totalorder %s1455_s22, 12 }
  0x1a   : > { %p1573_p12 = por %p134_p11, %p133_p10  ;;  %156 = sbr.rel (%p1122_p13) target bundleno = 76 (0x4c), region = 16 }
  0x1f   : > { %159 = sbr.rel (!%p1546_p5) target bundleno = 42 (0x2a), region = 20  ;;  %s161_s11 = sand.u32 (%p1546_p5), 1, %s1435_s17  }
  0x20   : > { %s1194_s26 = smul.u32 (%p1546_p5), 12, %s1447_s20  ;;  %s1823_s0 = sld [smem:[#allocation7_spill]] (%p1546_p5) }
  0x21   : > { %s1199_s27 = smul.u32 (%p1546_p5), 24, %s161_s11 }
  0x23   : > { %s163_s23 = scalar_lea.vmem (%p1546_p5), [#allocation3], %s1199_s27 }
  0x26   : > { %s169_s5 = scalar_lea.vmem %s1823_s0, %s1194_s26 }
  0x27   : > { %v184_v0 = vld [vmem:[%s169_s5] sm:$0xff]  ;;  %v186_v1 = vld [vmem:[%s169_s5 + $0x48] sm:$0xff]  ;;  %v1126_v3 = vld [vmem:[%s169_s5 + $0x50] sm:$0xf] }
  0x28   : > { %v1124_v2 = vld [vmem:[%s169_s5 + $0x8] sm:$0xf]  ;;  %185 = vst [vmem:[%s163_s23] sm:$0xff] %v184_v0  ;;  %187 = vst [vmem:[%s163_s23 + $0xc] sm:$0xff] %v186_v1 }
  0x29   : > { %1125 = vst [vmem:[%s163_s23 + $0x8] sm:$0xf] %v1124_v2  ;;  %1127 = vst [vmem:[%s163_s23 + $0x14] sm:$0xf] %v1126_v3 }
  0x2a PF: > { %205 = sbr.rel (!%p1560_p9) target bundleno = 76 (0x4c), region = 46  ;;  %s207_s28 = sand.u32 (%p1560_p9), 1, %s1427_s15  }
  0x2b   : > { %s1200_s7 = smul.u32 (%p1560_p9), 384, %s207_s28  ;;  %s1128_s11 = sshll.u32 (%p1560_p9), %s1451_s21, 1 }
  0x2c   : > { %s1195_s26 = smul.u32 (%p1560_p9), 192, %s1447_s20  ;;  %s1824_s1 = sld [smem:[#allocation8_spill]] (%p1560_p9) }
  0x2d   : > { %s1598_s6 = scalar_lea.vmem (%p1560_p9), [#allocation4], %s1200_s7 }
  0x2e   : > { %s213_s29 = sadd.s32 (%p1560_p9), %s1195_s26, %s1128_s11 }
  0x2f   : > { %s1130_s4 = sshll.u32 %s213_s29, 2 }
  0x32   : > { %s1593_s25 = scalar_lea.vmem %s1824_s1, %s1130_s4 }
  0x33   : > { %v338_v4 = vld [vmem:[%s1593_s25] sm:$0xff]  ;;  %v340_v5 = vld [vmem:[%s1593_s25 + $0x10] sm:$0xff] }
  0x34   : > { %v342_v6 = vld [vmem:[%s1593_s25 + $0x20] sm:$0xff]  ;;  %339 = vst [vmem:[%s1598_s6] sm:$0xff] %v338_v4  ;;  %341 = vst [vmem:[%s1598_s6 + $0x8] sm:$0xff] %v340_v5  ;;  %v344_v7 = vld [vmem:[%s1593_s25 + $0x30] sm:$0xff] }
  0x35   : > { %343 = vst [vmem:[%s1598_s6 + $0x10] sm:$0xff] %v342_v6  ;;  %v346_v8 = vld [vmem:[%s1593_s25 + $0x40] sm:$0xff]  ;;  %v348_v9 = vld [vmem:[%s1593_s25 + $0x50] sm:$0xff]  ;;  %345 = vst [vmem:[%s1598_s6 + $0x18] sm:$0xff] %v344_v7 }
  0x36   : > { %347 = vst [vmem:[%s1598_s6 + $0x20] sm:$0xff] %v346_v8  ;;  %349 = vst [vmem:[%s1598_s6 + $0x28] sm:$0xff] %v348_v9  ;;  %v350_v10 = vld [vmem:[%s1593_s25 + $0x60] sm:$0xff]  ;;  %v352_v11 = vld [vmem:[%s1593_s25 + $0x70] sm:$0xff] }
  0x37   : > { %v354_v12 = vld [vmem:[%s1593_s25 + $0x80] sm:$0xff]  ;;  %351 = vst [vmem:[%s1598_s6 + $0x30] sm:$0xff] %v350_v10  ;;  %353 = vst [vmem:[%s1598_s6 + $0x38] sm:$0xff] %v352_v11  ;;  %v356_v13 = vld [vmem:[%s1593_s25 + $0x90] sm:$0xff] }
  0x38   : > { %355 = vst [vmem:[%s1598_s6 + $0x40] sm:$0xff] %v354_v12  ;;  %v358_v14 = vld [vmem:[%s1593_s25 + $0xa0] sm:$0xff]  ;;  %v360_v15 = vld [vmem:[%s1593_s25 + $0xb0] sm:$0xff]  ;;  %357 = vst [vmem:[%s1598_s6 + $0x48] sm:$0xff] %v356_v13 }
  0x39   : > { %359 = vst [vmem:[%s1598_s6 + $0x50] sm:$0xff] %v358_v14  ;;  %361 = vst [vmem:[%s1598_s6 + $0x58] sm:$0xff] %v360_v15  ;;  %v362_v16 = vld [vmem:[%s1593_s25 + $0xc0] sm:$0xff]  ;;  %v364_v17 = vld [vmem:[%s1593_s25 + $0xd0] sm:$0xff] }
  0x3a   : > { %v366_v18 = vld [vmem:[%s1593_s25 + $0xe0] sm:$0xff]  ;;  %363 = vst [vmem:[%s1598_s6 + $0x60] sm:$0xff] %v362_v16  ;;  %365 = vst [vmem:[%s1598_s6 + $0x68] sm:$0xff] %v364_v17  ;;  %v368_v19 = vld [vmem:[%s1593_s25 + $0xf0] sm:$0xff] }
  0x3b   : > { %367 = vst [vmem:[%s1598_s6 + $0x70] sm:$0xff] %v366_v18  ;;  %v370_v20 = vld [vmem:[%s1593_s25 + $0x100] sm:$0xff]  ;;  %v372_v21 = vld [vmem:[%s1593_s25 + $0x110] sm:$0xff]  ;;  %369 = vst [vmem:[%s1598_s6 + $0x78] sm:$0xff] %v368_v19 }
  0x3c   : > { %371 = vst [vmem:[%s1598_s6 + $0x80] sm:$0xff] %v370_v20  ;;  %373 = vst [vmem:[%s1598_s6 + $0x88] sm:$0xff] %v372_v21  ;;  %v374_v22 = vld [vmem:[%s1593_s25 + $0x120] sm:$0xff]  ;;  %v376_v23 = vld [vmem:[%s1593_s25 + $0x130] sm:$0xff] }
  0x3d   : > { %v378_v24 = vld [vmem:[%s1593_s25 + $0x140] sm:$0xff]  ;;  %375 = vst [vmem:[%s1598_s6 + $0x90] sm:$0xff] %v374_v22  ;;  %377 = vst [vmem:[%s1598_s6 + $0x98] sm:$0xff] %v376_v23  ;;  %v380_v25 = vld [vmem:[%s1593_s25 + $0x150] sm:$0xff] }
  0x3e   : > { %379 = vst [vmem:[%s1598_s6 + $0xa0] sm:$0xff] %v378_v24  ;;  %v382_v26 = vld [vmem:[%s1593_s25 + $0x160] sm:$0xff]  ;;  %v384_v27 = vld [vmem:[%s1593_s25 + $0x170] sm:$0xff]  ;;  %381 = vst [vmem:[%s1598_s6 + $0xa8] sm:$0xff] %v380_v25 }
  0x3f   : > { %383 = vst [vmem:[%s1598_s6 + $0xb0] sm:$0xff] %v382_v26  ;;  %385 = vst [vmem:[%s1598_s6 + $0xb8] sm:$0xff] %v384_v27  ;;  %v386_v28 = vld [vmem:[%s1593_s25 + $0x180] sm:$0xff]  ;;  %v388_v29 = vld [vmem:[%s1593_s25 + $0x190] sm:$0xff] }
  0x40   : > { %v390_v30 = vld [vmem:[%s1593_s25 + $0x1a0] sm:$0xff]  ;;  %387 = vst [vmem:[%s1598_s6 + $0xc0] sm:$0xff] %v386_v28  ;;  %389 = vst [vmem:[%s1598_s6 + $0xc8] sm:$0xff] %v388_v29  ;;  %v392_v31 = vld [vmem:[%s1593_s25 + $0x1b0] sm:$0xff] }
  0x41   : > { %391 = vst [vmem:[%s1598_s6 + $0xd0] sm:$0xff] %v390_v30  ;;  %v394_v32 = vld [vmem:[%s1593_s25 + $0x1c0] sm:$0xff]  ;;  %v396_v33 = vld [vmem:[%s1593_s25 + $0x1d0] sm:$0xff]  ;;  %393 = vst [vmem:[%s1598_s6 + $0xd8] sm:$0xff] %v392_v31 }
  0x42   : > { %395 = vst [vmem:[%s1598_s6 + $0xe0] sm:$0xff] %v394_v32  ;;  %397 = vst [vmem:[%s1598_s6 + $0xe8] sm:$0xff] %v396_v33  ;;  %v398_v34 = vld [vmem:[%s1593_s25 + $0x1e0] sm:$0xff]  ;;  %v400_v35 = vld [vmem:[%s1593_s25 + $0x1f0] sm:$0xff] }
  0x43   : > { %v402_v36 = vld [vmem:[%s1593_s25 + $0x200] sm:$0xff]  ;;  %399 = vst [vmem:[%s1598_s6 + $0xf0] sm:$0xff] %v398_v34  ;;  %401 = vst [vmem:[%s1598_s6 + $0xf8] sm:$0xff] %v400_v35  ;;  %v404_v37 = vld [vmem:[%s1593_s25 + $0x210] sm:$0xff] }
  0x44   : > { %403 = vst [vmem:[%s1598_s6 + $0x100] sm:$0xff] %v402_v36  ;;  %v406_v38 = vld [vmem:[%s1593_s25 + $0x220] sm:$0xff]  ;;  %v408_v39 = vld [vmem:[%s1593_s25 + $0x230] sm:$0xff]  ;;  %405 = vst [vmem:[%s1598_s6 + $0x108] sm:$0xff] %v404_v37 }
  0x45   : > { %407 = vst [vmem:[%s1598_s6 + $0x110] sm:$0xff] %v406_v38  ;;  %409 = vst [vmem:[%s1598_s6 + $0x118] sm:$0xff] %v408_v39  ;;  %v410_v40 = vld [vmem:[%s1593_s25 + $0x240] sm:$0xff]  ;;  %v412_v41 = vld [vmem:[%s1593_s25 + $0x250] sm:$0xff] }
  0x46   : > { %v414_v42 = vld [vmem:[%s1593_s25 + $0x260] sm:$0xff]  ;;  %411 = vst [vmem:[%s1598_s6 + $0x120] sm:$0xff] %v410_v40  ;;  %413 = vst [vmem:[%s1598_s6 + $0x128] sm:$0xff] %v412_v41  ;;  %v416_v43 = vld [vmem:[%s1593_s25 + $0x270] sm:$0xff] }
  0x47   : > { %415 = vst [vmem:[%s1598_s6 + $0x130] sm:$0xff] %v414_v42  ;;  %v418_v44 = vld [vmem:[%s1593_s25 + $0x280] sm:$0xff]  ;;  %v420_v45 = vld [vmem:[%s1593_s25 + $0x290] sm:$0xff]  ;;  %417 = vst [vmem:[%s1598_s6 + $0x138] sm:$0xff] %v416_v43 }
  0x48   : > { %419 = vst [vmem:[%s1598_s6 + $0x140] sm:$0xff] %v418_v44  ;;  %421 = vst [vmem:[%s1598_s6 + $0x148] sm:$0xff] %v420_v45  ;;  %v422_v46 = vld [vmem:[%s1593_s25 + $0x2a0] sm:$0xff]  ;;  %v424_v47 = vld [vmem:[%s1593_s25 + $0x2b0] sm:$0xff] }
  0x49   : > { %v426_v48 = vld [vmem:[%s1593_s25 + $0x2c0] sm:$0xff]  ;;  %423 = vst [vmem:[%s1598_s6 + $0x150] sm:$0xff] %v422_v46  ;;  %425 = vst [vmem:[%s1598_s6 + $0x158] sm:$0xff] %v424_v47  ;;  %v428_v49 = vld [vmem:[%s1593_s25 + $0x2d0] sm:$0xff] }
  0x4a   : > { %427 = vst [vmem:[%s1598_s6 + $0x160] sm:$0xff] %v426_v48  ;;  %v430_v50 = vld [vmem:[%s1593_s25 + $0x2e0] sm:$0xff]  ;;  %v432_v51 = vld [vmem:[%s1593_s25 + $0x2f0] sm:$0xff]  ;;  %429 = vst [vmem:[%s1598_s6 + $0x168] sm:$0xff] %v428_v49 }
  0x4b   : > { %431 = vst [vmem:[%s1598_s6 + $0x170] sm:$0xff] %v430_v50  ;;  %433 = vst [vmem:[%s1598_s6 + $0x178] sm:$0xff] %v432_v51 }
  0x4c PF: > { %p1131_p0 = scmp.ge.s32.totalorder %s1455_s22, 1  ;;  %p446_p1 = scmp.lt.s32.totalorder %s1455_s22, 13 }
  0x4e   : > { %p447_p2 = pnand %p1131_p0, %p446_p1 }
  0x4f   : > { %s453_s0 = sand.u32 (!%p447_p2), 1, %s1431_s16   ;;  %s460_s5 = sand.u32 (!%p447_p2), 1, %s1423_s14  }
  0x50   : > { %450 = sbr.rel (%p447_p2) target bundleno = 387 (0x183), region = 88  ;;  %s487_s28 = sand.u32 (!%p447_p2), 1, %s1415_s12  }
  0x51   : > { %s1201_s23 = smul.u32 (!%p447_p2), 24, %s453_s0  ;;  %s1132_s7 = sshll.u32 (!%p447_p2), %s487_s28, 4 }
  0x52   : > { %s1202_s25 = smul.u32 (!%p447_p2), 384, %s460_s5  ;;  %s1133_s11 = sshll.u32 (!%p447_p2), %s1443_s19, 1 }
  0x53   : > { %p495_p3 = scmp.lt.s32.totalorder (!%p447_p2), %s1133_s11, 3  ;;  %s1705_s27 = scalar_lea.vmem (!%p447_p2), [#allocation3], %s1201_s23 }
  0x54   : > { %s1707_s6 = scalar_lea.vmem (!%p447_p2), [#allocation4], %s1202_s25  ;;  %s1709_s1 = scalar_lea.vmem (!%p447_p2), [#allocation5], %s1132_s7 }
  0x55   : > { %s1843_s11 = smov (!%p495_p3, %s1133_s11), 3  ;;  %p1134_p4 = scmp.ne.s32.totalorder %s1439_s18, 0 }
  0x56   : > { %s497_s4 = scalar_lea.vmem %s1814_s2, %s1843_s11 }
  0x57   : > { %505 = sbr.rel (%p1134_p4) target bundleno = 95 (0x5f), region = 100 }
  0x5c   : > { %v1457_v52 = vmov 0.0  }
  0x5d   : > { %506 = vst [vmem:[#allocation2 + $0x10] sm:$0xff] %v1457_v52  ;;  %507 = vst [vmem:[#allocation2] sm:$0xff] %v1457_v52 }
  0x5e   : > { %508 = vst [vmem:[#allocation2 + $0x18] sm:$0xff] %v1457_v52  ;;  %509 = vst [vmem:[#allocation2 + $0x8] sm:$0xff] %v1457_v52 }
  0x5f PF: > { %v1293_v53 = vld [vmem:[%s1707_s6 + $0x74] ss:$8 sps:$4 sm:$0xff]   ;;  %v1295_v54 = vld [vmem:[%s1707_s6 + $0x70] ss:$8 sps:$4 sm:$0xff]   ;;  %v1458_v55 = vmov 0   ;;  %p1186_p5 = scmp.ne.s32.totalorder %s1439_s18, 5 }
  0x60   : > { %897 = vmatprep.mubr.bf16.mxu1 %v1458_v55  ;;  %822 = vmatprep.subr.bf16.mxu0 %v1293_v53  ;;  %v1296_v56 = vld [vmem:[%s1707_s6 + $0x64] ss:$8 sps:$4 sm:$0xff]   ;;  %v1298_v57 = vld [vmem:[%s1707_s6 + $0x60] ss:$8 sps:$4 sm:$0xff]   ;;  %v1299_v58 = vld [vmem:[%s1707_s6 + $0x54] ss:$8 sps:$4 sm:$0xff]  }
  0x61   : > { %823 = vmatpush1.bf16.msra.mxu0 %v1295_v54  ;;  %v1301_v59 = vld [vmem:[%s1707_s6 + $0x50] ss:$8 sps:$4 sm:$0xff]   ;;  %v1302_v60 = vld [vmem:[%s1707_s6 + $0x44] ss:$8 sps:$4 sm:$0xff]   ;;  %v1314_v61 = vld [vmem:[%s1707_s6 + $0x174] ss:$8 sps:$4 sm:$0xff]  }
  0x62   : > { %824 = vmatprep.subr.bf16.mxu0 %v1296_v56  ;;  %v1316_v62 = vld [vmem:[%s1707_s6 + $0x170] ss:$8 sps:$4 sm:$0xff]   ;;  %v1304_v63 = vld [vmem:[%s1707_s6 + $0x40] ss:$8 sps:$4 sm:$0xff]   ;;  %v1305_v0 = vld [vmem:[%s1707_s6 + $0x34] ss:$8 sps:$4 sm:$0xff]   ;;  %865 = vmatprep.subr.bf16.mxu1 %v1314_v61 }
  0x63   : > { %v1320_v1 = vld [vmem:[%s1707_s6 + $0x164] ss:$8 sps:$4 sm:$0xff]   ;;  %866 = vmatpush1.bf16.msra.mxu1 %v1316_v62  ;;  %v1322_v2 = vld [vmem:[%s1707_s6 + $0x160] ss:$8 sps:$4 sm:$0xff]   ;;  %v1307_v3 = vld [vmem:[%s1707_s6 + $0x30] ss:$8 sps:$4 sm:$0xff]  }
  0x64   : > { %867 = vmatprep.subr.bf16.mxu1 %v1320_v1  ;;  %v1326_v4 = vld [vmem:[%s1707_s6 + $0x154] ss:$8 sps:$4 sm:$0xff]   ;;  %v1308_v5 = vld [vmem:[%s1707_s6 + $0x24] ss:$8 sps:$4 sm:$0xff]   ;;  %v1328_v6 = vld [vmem:[%s1707_s6 + $0x150] ss:$8 sps:$4 sm:$0xff]  }
  0x65   : > { %825 = vmatpush1.bf16.msra.mxu0 %v1298_v57  ;;  %v1332_v7 = vld [vmem:[%s1707_s6 + $0x144] ss:$8 sps:$4 sm:$0xff]   ;;  %v1310_v8 = vld [vmem:[%s1707_s6 + $0x20] ss:$8 sps:$4 sm:$0xff]   ;;  %v1311_v9 = vld [vmem:[%s1707_s6 + $0x14] ss:$8 sps:$4 sm:$0xff]  }
  0x66   : > { %826 = vmatprep.subr.bf16.mxu0 %v1299_v58  ;;  %v1334_v10 = vld [vmem:[%s1707_s6 + $0x140] ss:$8 sps:$4 sm:$0xff]   ;;  %v1338_v11 = vld [vmem:[%s1707_s6 + $0x134] ss:$8 sps:$4 sm:$0xff]   ;;  %v1313_v12 = vld [vmem:[%s1707_s6 + $0x10] ss:$8 sps:$4 sm:$0xff]  }
  0x67   : > { %868 = vmatpush1.bf16.msra.mxu1 %v1322_v2  ;;  %v1317_v13 = vld [vmem:[%s1707_s6 + $0x4] ss:$8 sps:$4 sm:$0xff]   ;;  %v1340_v14 = vld [vmem:[%s1707_s6 + $0x130] ss:$8 sps:$4 sm:$0xff]   ;;  %v1319_v16 = vld [vmem:[%s1707_s6] ss:$8 sps:$4 sm:$0xff]  }
  0x68   : > { %869 = vmatprep.subr.bf16.mxu1 %v1326_v4  ;;  %v1344_v15 = vld [vmem:[%s1707_s6 + $0x124] ss:$8 sps:$4 sm:$0xff]   ;;  %v1323_v17 = vld [vmem:[%s1707_s6 + $0xf4] ss:$8 sps:$4 sm:$0xff]   ;;  %v1346_v18 = vld [vmem:[%s1707_s6 + $0x120] ss:$8 sps:$4 sm:$0xff]  }
  0x69   : > { %827 = vmatpush1.bf16.msra.mxu0 %v1301_v59  ;;  %v1350_v19 = vld [vmem:[%s1707_s6 + $0x114] ss:$8 sps:$4 sm:$0xff]   ;;  %v1325_v20 = vld [vmem:[%s1707_s6 + $0xf0] ss:$8 sps:$4 sm:$0xff]   ;;  %v1329_v21 = vld [vmem:[%s1707_s6 + $0xe4] ss:$8 sps:$4 sm:$0xff]  }
  0x6a   : > { %828 = vmatprep.subr.bf16.mxu0 %v1302_v60  ;;  %v1352_v22 = vld [vmem:[%s1707_s6 + $0x110] ss:$8 sps:$4 sm:$0xff]   ;;  %v1356_v23 = vld [vmem:[%s1707_s6 + $0x104] ss:$8 sps:$4 sm:$0xff]   ;;  %v1331_v25 = vld [vmem:[%s1707_s6 + $0xe0] ss:$8 sps:$4 sm:$0xff]  }
  0x6b   : > { %870 = vmatpush1.bf16.msra.mxu1 %v1328_v6  ;;  %v1368_v24 = vld [vmem:[%s1705_s27 + $0x4] ss:$12 sps:$4 sm:$0xff]   ;;  %v1362_v30 = vld [vmem:[%s1705_s27 + $0x8] ss:$12 sps:$4 sm:$0xff]   ;;  %v1366_v40 = vld [vmem:[%s1705_s27] ss:$12 sps:$4 sm:$0xff]  }
  0x6c   : > { %871 = vmatprep.subr.bf16.mxu1 %v1332_v7  ;;  %v1335_v26 = vld [vmem:[%s1707_s6 + $0xd4] ss:$8 sps:$4 sm:$0xff]   ;;  %854 = vmatprep.mubr.bf16.mxu0 %v1368_v24  ;;  %v1358_v27 = vld [vmem:[%s1707_s6 + $0x100] ss:$8 sps:$4 sm:$0xff]   ;;  %v1337_v28 = vld [vmem:[%s1707_s6 + $0xd0] ss:$8 sps:$4 sm:$0xff]  }
  0x6d   : > { %829 = vmatpush1.bf16.msra.mxu0 %v1304_v63  ;;  %v1341_v29 = vld [vmem:[%s1707_s6 + $0xc4] ss:$8 sps:$4 sm:$0xff]   ;;  %v1343_v31 = vld [vmem:[%s1707_s6 + $0xc0] ss:$8 sps:$4 sm:$0xff]   ;;  %v1347_v32 = vld [vmem:[%s1707_s6 + $0xb4] ss:$8 sps:$4 sm:$0xff]  }
  0x6e   : > { %830 = vmatprep.subr.bf16.mxu0 %v1305_v0  ;;  %v1349_v33 = vld [vmem:[%s1707_s6 + $0xb0] ss:$8 sps:$4 sm:$0xff]   ;;  %v1353_v34 = vld [vmem:[%s1707_s6 + $0xa4] ss:$8 sps:$4 sm:$0xff]   ;;  %v1355_v35 = vld [vmem:[%s1707_s6 + $0xa0] ss:$8 sps:$4 sm:$0xff]  }
  0x6f   : > { %872 = vmatpush1.bf16.msra.mxu1 %v1334_v10  ;;  %v1359_v36 = vld [vmem:[%s1707_s6 + $0x94] ss:$8 sps:$4 sm:$0xff]   ;;  %v1361_v37 = vld [vmem:[%s1707_s6 + $0x90] ss:$8 sps:$4 sm:$0xff]   ;;  %v1363_v38 = vld [vmem:[%s1707_s6 + $0x84] ss:$8 sps:$4 sm:$0xff]  }
  0x70   : > { %873 = vmatprep.subr.bf16.mxu1 %v1338_v11  ;;  %v1365_v39 = vld [vmem:[%s1707_s6 + $0x80] ss:$8 sps:$4 sm:$0xff]   ;;  %v511_v47 = vld [vmem:[#allocation2] sm:$0xff]  ;;  %v513_v56 = vld [vmem:[#allocation2 + $0x8] sm:$0xff] }
  0x71   : > { %831 = vmatpush1.bf16.msra.mxu0 %v1307_v3  ;;  %v510_v43 = vld [vmem:[#allocation2 + $0x10] sm:$0xff]  ;;  %v512_v51 = vld [vmem:[#allocation2 + $0x18] sm:$0xff] }
  0x72   : > { %832 = vmatprep.subr.bf16.mxu0 %v1308_v5 }
  0x73   : > { %874 = vmatpush1.bf16.msra.mxu1 %v1340_v14 }
  0x74   : > { %875 = vmatprep.subr.bf16.mxu1 %v1344_v15 }
  0x75   : > { %833 = vmatpush1.bf16.msra.mxu0 %v1310_v8 }
  0x76   : > { %834 = vmatprep.subr.bf16.mxu0 %v1311_v9 }
  0x77   : > { %876 = vmatpush1.bf16.msra.mxu1 %v1346_v18 }
  0x78   : > { %877 = vmatprep.subr.bf16.mxu1 %v1350_v19 }
  0x79   : > { %835 = vmatpush1.bf16.msra.mxu0 %v1313_v12 }
  0x7a   : > { %836 = vmatprep.subr.bf16.mxu0 %v1317_v13 }
  0x7b   : > { %878 = vmatpush1.bf16.msra.mxu1 %v1352_v22 }
  0x7c   : > { %879 = vmatprep.subr.bf16.mxu1 %v1356_v23 }
  0x7d   : > { %837 = vmatpush1.bf16.msra.mxu0 %v1319_v16 }
  0x7e   : > { %838 = vmatprep.subr.bf16.mxu0 %v1323_v17 }
  0x7f   : > { %880 = vmatpush1.bf16.msra.mxu1 %v1358_v27 }
  0x81   : > { %839 = vmatpush2.bf16.msra.mxu0 %v1325_v20 }
  0x82   : > { %840 = vmatprep.subr.bf16.mxu0 %v1329_v21  ;;  %898 = vmatmul.mubr.bf16.vlgmr.msra.gmra.mxu1 %v1362_v30 }
  0x85   : > { %841 = vmatpush2.bf16.msra.mxu0 %v1331_v25 }
  0x86   : > { %842 = vmatprep.subr.bf16.mxu0 %v1335_v26 }
  0x89   : > { %843 = vmatpush2.bf16.msra.mxu0 %v1337_v28 }
  0x8a   : > { %844 = vmatprep.subr.bf16.mxu0 %v1341_v29 }
  0x8d   : > { %845 = vmatpush2.bf16.msra.mxu0 %v1343_v31 }
  0x8e   : > { %846 = vmatprep.subr.bf16.mxu0 %v1347_v32 }
  0x91   : > { %847 = vmatpush2.bf16.msra.mxu0 %v1349_v33 }
  0x92   : > { %848 = vmatprep.subr.bf16.mxu0 %v1353_v34 }
  0x95   : > { %849 = vmatpush2.bf16.msra.mxu0 %v1355_v35 }
  0x96   : > { %850 = vmatprep.subr.bf16.mxu0 %v1359_v36 }
  0x99   : > { %851 = vmatpush2.bf16.msra.mxu0 %v1361_v37 }
  0x9a   : > { %852 = vmatprep.subr.bf16.mxu0 %v1363_v38 }
  0x9d   : > { %853 = vmatpush2.bf16.msra.mxu0 %v1365_v39 }
  0xa0   : > { %855 = vmatmul.mubr.bf16.vlgmr.msra.gmra.mxu0 %v1366_v40 }
 0x142   : > { %v899_v41 = vpop.f32.mrf.mxu1 }
 0x144   : > { %v901_v42 = vpop.f32.mrf.mxu1 }
 0x146   : > { %v903_v46 = vpop.f32.mrf.mxu1 }
 0x148   : > { %v905_v55 = vpop.f32.mrf.mxu1 }
 0x160   : > { %v856_v44 = vpop.f32.mrf.mxu0 }
 0x161   : > { %v900_v45 = vadd.f32 %v899_v41, %v856_v44 }
 0x162   : > { %v858_v48 = vpop.f32.mrf.mxu0 }
 0x163   : > { %v908_v49 = vadd.f32 %v900_v45, %v510_v43  ;;  %v902_v50 = vadd.f32 %v901_v42, %v858_v48 }
 0x164   : > { %v860_v52 = vpop.f32.mrf.mxu0 }
 0x165   : > { %912 = vst [vmem:[#allocation2 + $0x10] sm:$0xff] %v908_v49  ;;  %v909_v53 = vadd.f32 %v902_v50, %v511_v47  ;;  %v904_v54 = vadd.f32 %v903_v46, %v860_v52 }
 0x166   : > { %v862_v57 = vpop.f32.mrf.mxu0 }
 0x167   : > { %913 = vst [vmem:[#allocation2] sm:$0xff] %v909_v53  ;;  %v910_v58 = vadd.f32 %v904_v54, %v512_v51  ;;  %v906_v59 = vadd.f32 %v905_v55, %v862_v57  ;;  %919 = sbr.rel (%p1186_p5) target bundleno = 379 (0x17b), region = 104 }
 0x169   : > { %914 = vst [vmem:[#allocation2 + $0x18] sm:$0xff] %v910_v58  ;;  %v911_v60 = vadd.f32 %v906_v59, %v513_v56 }
 0x16b   : > { %915 = vst [vmem:[#allocation2 + $0x8] sm:$0xff] %v911_v60 }
 0x16c   : > { %v926_v61 = vlaneseq  ;;  %v924_v63 = vld [vmem:[%s497_s4] sm:$0x3]  ;;  %v920_v0 = vld [vmem:[#allocation2 + $0x10] sm:$0xff] }
 0x16e   : > { %v927_v62 = vshrl.u32 %v926_v61, 7  ;;  %v921_v3 = vld [vmem:[#allocation2] sm:$0xff] }
 0x170   : > { %v928_v1 = vsub.s32 0, %v927_v62  ;;  %v932_v2 = vsub.s32 1, %v927_v62  ;;  %v922_v4 = vld [vmem:[#allocation2 + $0x18] sm:$0xff] }
 0x172   : > { %v923_v5 = vld [vmem:[#allocation2 + $0x8] sm:$0xff]  ;;  %v929_v6 = vrot.slane %v924_v63, %v928_v1  ;;  %v933_v7 = vrot.slane %v924_v63, %v932_v2 }
 0x174   : > { %v936_v8 = vadd.f32 %v929_v6, %v920_v0  ;;  %v937_v9 = vadd.f32 %v933_v7, %v921_v3  ;;  %v938_v10 = vadd.f32 %v929_v6, %v922_v4  ;;  %v939_v11 = vadd.f32 %v933_v7, %v923_v5 }
 0x176   : > { %v940_v12 = vmax.f32 %v936_v8, 0.0  ;;  %v941_v13 = vmax.f32 %v937_v9, 0.0  ;;  %v942_v14 = vmax.f32 %v938_v10, 0.0  ;;  %v943_v15 = vmax.f32 %v939_v11, 0.0 }
 0x178   : > { %v1196_v16 = vpack.c.bf16 %v941_v13, %v940_v12  ;;  %v1197_v17 = vpack.c.bf16 %v943_v15, %v942_v14 }
 0x17a   : > { %956 = vst [vmem:[%s1709_s1] sm:$0xff] %v1196_v16  ;;  %957 = vst [vmem:[%s1709_s1 + $0x8] sm:$0xff] %v1197_v17 }
 0x17b PF: > { %964 = sbr.rel (!%p1573_p12) target bundleno = 387 (0x183), region = 108  ;;  %s1198_s16 = sshll.u32 (%p1573_p12), %s1443_s19, 3 }
 0x17c   : > { %s970_s5 = scalar_lea.vmem (%p1573_p12), %s1815_s3, %s1198_s16 }
 0x181   : > { %v1001_v18 = vld [vmem:[%s1709_s1] sm:$0xff]  ;;  %v1003_v19 = vld [vmem:[%s1709_s1 + $0x8] sm:$0xff] }
 0x182   : > { %1002 = vst [vmem:[%s970_s5] sm:$0xff] %v1001_v18  ;;  %1004 = vst [vmem:[%s970_s5 + $0x10] sm:$0xff] %v1003_v19 }
 0x183 PF: > { %s13_s22 = sadd.s32 1, %s1455_s22   ;;  %s1825_s1 = sld [smem:[#allocation6_spill]] }
 0x184   : > { %p10_p6 = scmp.ge.s32.totalorder %s13_s22, 14   ;;  %s1826_s12 = smov %s1419_s13 }
 0x185   : > { %s1827_s13 = smov %s1571_s9  ;;  %s1828_s14 = smov %s1427_s15 }
 0x186   : > { %s1829_s15 = smov %s1568_s8  ;;  %s1830_s16 = smov %s1435_s17 }
 0x187   : > { %s1831_s17 = smov %s1554_s30  ;;  %s1832_s18 = smov %s1447_s20 }
 0x188   : > { %s1833_s19 = smov %s1451_s21  ;;  %s1834_s20 = smov %s1837_s24 }
 0x189   : > { %s1835_s21 = smov %s1825_s1  ;;  %12 = sbr.rel (!%p10_p6) target bundleno = 9 (0x9), region = 194 }

// kernel: quantized_resnet18_forward.42
= control target key start
LH: loop header
LB: loop body
LE: loop exit
PB: predicated region body
PF: predicated region fallthrough
CT: control target
= control target key end

     0   :  { %s1081_s12 = smov 0   ;;  %s1083_s13 = smov 0   ;;  %s1269_s0 = inlined_call_operand.vmem [shape: bf16[16,256], index: 0, kind: input, shape index: {}]   ;;  %s1270_s1 = inlined_call_operand.vmem [shape: bf16[256,512], index: 1, kind: input, shape index: {}]   ;;  %s1271_s2 = inlined_call_operand.vmem [shape: f32[1,512], index: 2, kind: input, shape index: {}]   ;;  %s1272_s3 = inlined_call_operand.vmem [shape: bf16[16,512], index: 3, kind: output, shape index: {}]  }
   0x1   :  { %s1085_s14 = smov 0   ;;  %s1087_s15 = smov 0  }
   0x2   :  { %s1089_s16 = smov 0  }
   0x3 LB: > { %s28_s17 = sadd.s32 1, %s1055_s15  ;;  %s873_s18 = sadd.s32 4294967295, %s1059_s16   ;;  %s1059_s16 = sphi %s1089_s16, %s13_s16   ;;  %s1055_s15 = sphi %s1087_s15, %s1277_s15   ;;  %s1051_s14 = sphi %s1085_s14, %s1276_s14   ;;  %s1047_s13 = sphi %s1083_s13, %s1275_s13   ;;  %s1043_s12 = sphi %s1081_s12, %s1274_s12  }
   0x4   : > { %p30_p0 = scmp.ge.s32.totalorder %s28_s17, 2  ;;  %p76_p1 = scmp.ne.s32.totalorder %s1047_s13, %s1043_s12 }
   0x5   : > { %p77_p2 = scmp.eq.s32.totalorder %s1059_s16, 0  ;;  %p134_p4 = scmp.eq.s32.totalorder %s873_s18, 1 }
   0x6   : > { %s1279_s17 = smov (%p30_p0, %s28_s17), 0  ;;  %s69_s20 = sadd.s32 1, %s1047_s13 }
   0x7   : > { %p78_p3 = por %p77_p2, %p76_p1  ;;  %s65_s19 = ssub.s32 %s1055_s15, %s1279_s17 }
   0x8   : > { %p67_p5 = scmp.eq.s32.totalorder %s65_s19, 0  ;;  %p1116_p6 = por %p134_p4, %p76_p1 }
   0x9   : > { %p877_p7 = scmp.ge.s32.totalorder %s1059_s16, 2 }
   0xa   : > { %s1121_s22 = scalar_select %p67_p5, %s1047_s13, %s69_s20  }
   0xb   : > { %171 = sbr.rel (%p877_p7) target bundleno = 36 (0x24), region = 20 }
  0x10   : > { %174 = sbr.rel (!%p78_p3) target bundleno = 36 (0x24), region = 24  ;;  %s176_s23 = sand.u32 (%p78_p3), 1, %s1047_s13  }
  0x11   : > { %s926_s24 = sshll.u32 (%p78_p3), %s1055_s15, 3  ;;  %s878_s25 = sshll.u32 (%p78_p3), %s176_s23, 8 }
  0x12   : > { %s1129_s28 = scalar_lea.vmem (%p78_p3), %s1270_s1, %s926_s24  ;;  %s1134_s29 = scalar_lea.vmem (%p78_p3), [#allocation3], %s878_s25 }
  0x13   : > { %v275_v0 = vld [vmem:[%s1129_s28] sm:$0xff] (%p78_p3)  ;;  %v277_v1 = vld [vmem:[%s1129_s28 + $0x10] sm:$0xff] (%p78_p3) }
  0x14   : > { %v279_v2 = vld [vmem:[%s1129_s28 + $0x20] sm:$0xff] (%p78_p3)  ;;  %276 = vst [vmem:[%s1134_s29] sm:$0xff] (%p78_p3), %v275_v0  ;;  %278 = vst [vmem:[%s1134_s29 + $0x8] sm:$0xff] (%p78_p3), %v277_v1  ;;  %v281_v3 = vld [vmem:[%s1129_s28 + $0x30] sm:$0xff] (%p78_p3) }
  0x15   : > { %280 = vst [vmem:[%s1134_s29 + $0x10] sm:$0xff] %v279_v2  ;;  %v283_v4 = vld [vmem:[%s1129_s28 + $0x40] sm:$0xff]  ;;  %v285_v5 = vld [vmem:[%s1129_s28 + $0x50] sm:$0xff]  ;;  %282 = vst [vmem:[%s1134_s29 + $0x18] sm:$0xff] %v281_v3 }
  0x16   : > { %284 = vst [vmem:[%s1134_s29 + $0x20] sm:$0xff] %v283_v4  ;;  %286 = vst [vmem:[%s1134_s29 + $0x28] sm:$0xff] %v285_v5  ;;  %v287_v6 = vld [vmem:[%s1129_s28 + $0x60] sm:$0xff]  ;;  %v289_v7 = vld [vmem:[%s1129_s28 + $0x70] sm:$0xff] }
  0x17   : > { %v291_v8 = vld [vmem:[%s1129_s28 + $0x80] sm:$0xff]  ;;  %288 = vst [vmem:[%s1134_s29 + $0x30] sm:$0xff] %v287_v6  ;;  %290 = vst [vmem:[%s1134_s29 + $0x38] sm:$0xff] %v289_v7  ;;  %v293_v9 = vld [vmem:[%s1129_s28 + $0x90] sm:$0xff] }
  0x18   : > { %292 = vst [vmem:[%s1134_s29 + $0x40] sm:$0xff] %v291_v8  ;;  %v295_v10 = vld [vmem:[%s1129_s28 + $0xa0] sm:$0xff]  ;;  %v297_v11 = vld [vmem:[%s1129_s28 + $0xb0] sm:$0xff]  ;;  %294 = vst [vmem:[%s1134_s29 + $0x48] sm:$0xff] %v293_v9 }
  0x19   : > { %296 = vst [vmem:[%s1134_s29 + $0x50] sm:$0xff] %v295_v10  ;;  %298 = vst [vmem:[%s1134_s29 + $0x58] sm:$0xff] %v297_v11  ;;  %v299_v12 = vld [vmem:[%s1129_s28 + $0xc0] sm:$0xff]  ;;  %v301_v13 = vld [vmem:[%s1129_s28 + $0xd0] sm:$0xff] }
  0x1a   : > { %v303_v14 = vld [vmem:[%s1129_s28 + $0xe0] sm:$0xff]  ;;  %300 = vst [vmem:[%s1134_s29 + $0x60] sm:$0xff] %v299_v12  ;;  %302 = vst [vmem:[%s1134_s29 + $0x68] sm:$0xff] %v301_v13  ;;  %v305_v15 = vld [vmem:[%s1129_s28 + $0xf0] sm:$0xff] }
  0x1b   : > { %304 = vst [vmem:[%s1134_s29 + $0x70] sm:$0xff] %v303_v14  ;;  %v307_v16 = vld [vmem:[%s1129_s28 + $0x100] sm:$0xff]  ;;  %v309_v17 = vld [vmem:[%s1129_s28 + $0x110] sm:$0xff]  ;;  %306 = vst [vmem:[%s1134_s29 + $0x78] sm:$0xff] %v305_v15 }
  0x1c   : > { %308 = vst [vmem:[%s1134_s29 + $0x80] sm:$0xff] %v307_v16  ;;  %310 = vst [vmem:[%s1134_s29 + $0x88] sm:$0xff] %v309_v17  ;;  %v311_v18 = vld [vmem:[%s1129_s28 + $0x120] sm:$0xff]  ;;  %v313_v19 = vld [vmem:[%s1129_s28 + $0x130] sm:$0xff] }
  0x1d   : > { %v315_v20 = vld [vmem:[%s1129_s28 + $0x140] sm:$0xff]  ;;  %312 = vst [vmem:[%s1134_s29 + $0x90] sm:$0xff] %v311_v18  ;;  %314 = vst [vmem:[%s1134_s29 + $0x98] sm:$0xff] %v313_v19  ;;  %v317_v21 = vld [vmem:[%s1129_s28 + $0x150] sm:$0xff] }
  0x1e   : > { %316 = vst [vmem:[%s1134_s29 + $0xa0] sm:$0xff] %v315_v20  ;;  %v319_v22 = vld [vmem:[%s1129_s28 + $0x160] sm:$0xff]  ;;  %v321_v23 = vld [vmem:[%s1129_s28 + $0x170] sm:$0xff]  ;;  %318 = vst [vmem:[%s1134_s29 + $0xa8] sm:$0xff] %v317_v21 }
  0x1f   : > { %320 = vst [vmem:[%s1134_s29 + $0xb0] sm:$0xff] %v319_v22  ;;  %322 = vst [vmem:[%s1134_s29 + $0xb8] sm:$0xff] %v321_v23  ;;  %v323_v24 = vld [vmem:[%s1129_s28 + $0x180] sm:$0xff]  ;;  %v325_v25 = vld [vmem:[%s1129_s28 + $0x190] sm:$0xff] }
  0x20   : > { %v327_v26 = vld [vmem:[%s1129_s28 + $0x1a0] sm:$0xff]  ;;  %324 = vst [vmem:[%s1134_s29 + $0xc0] sm:$0xff] %v323_v24  ;;  %326 = vst [vmem:[%s1134_s29 + $0xc8] sm:$0xff] %v325_v25  ;;  %v329_v27 = vld [vmem:[%s1129_s28 + $0x1b0] sm:$0xff] }
  0x21   : > { %328 = vst [vmem:[%s1134_s29 + $0xd0] sm:$0xff] %v327_v26  ;;  %v331_v28 = vld [vmem:[%s1129_s28 + $0x1c0] sm:$0xff]  ;;  %v333_v29 = vld [vmem:[%s1129_s28 + $0x1d0] sm:$0xff]  ;;  %330 = vst [vmem:[%s1134_s29 + $0xd8] sm:$0xff] %v329_v27 }
  0x22   : > { %332 = vst [vmem:[%s1134_s29 + $0xe0] sm:$0xff] %v331_v28  ;;  %334 = vst [vmem:[%s1134_s29 + $0xe8] sm:$0xff] %v333_v29  ;;  %v335_v30 = vld [vmem:[%s1129_s28 + $0x1e0] sm:$0xff]  ;;  %v337_v31 = vld [vmem:[%s1129_s28 + $0x1f0] sm:$0xff] }
  0x23   : > { %336 = vst [vmem:[%s1134_s29 + $0xf0] sm:$0xff] %v335_v30  ;;  %338 = vst [vmem:[%s1134_s29 + $0xf8] sm:$0xff] %v337_v31 }
  0x24 PF: > { %p881_p8 = scmp.ge.s32.totalorder %s1059_s16, 1  ;;  %p351_p9 = scmp.lt.s32.totalorder %s1059_s16, 3 }
  0x26   : > { %p352_p10 = pnand %p881_p8, %p351_p9 }
  0x27   : > { %s358_s30 = sand.u32 (!%p352_p10), 1, %s1043_s12   ;;  %s884_s10 = sshll.u32 (!%p352_p10), %s1051_s14, 1 }
  0x28   : > { %355 = sbr.rel (%p352_p10) target bundleno = 322 (0x142), region = 66  ;;  %s882_s4 = sshll.u32 (!%p352_p10), %s358_s30, 8 }
  0x29   : > { %s1205_s7 = scalar_lea.vmem (!%p352_p10), [#allocation3], %s882_s4  ;;  %p409_p11 = scmp.lt.s32.totalorder (!%p352_p10), %s884_s10, 3 }
  0x2a   : > { %s883_s20 = sshll.u32 (!%p352_p10), %s358_s30, 4 }
  0x2b   : > { %s393_s23 = scalar_lea.vmem (!%p352_p10), [#allocation4], %s883_s20 }
  0x2d   : > { %v1020_v32 = vld [vmem:[%s1269_s0 + $0x4] ss:$8 sps:$4 sm:$0xff]   ;;  %v970_v33 = vld [vmem:[%s1205_s7 + $0x74] ss:$8 sps:$4 sm:$0xff]   ;;  %v972_v34 = vld [vmem:[%s1205_s7 + $0x70] ss:$8 sps:$4 sm:$0xff]   ;;  %v691_v2 = vlaneseq }
  0x2e   : > { %663 = vmatprep.mubr.bf16.mxu0 %v1020_v32  ;;  %631 = vmatprep.subr.bf16.mxu0 %v970_v33  ;;  %v973_v35 = vld [vmem:[%s1205_s7 + $0x64] ss:$8 sps:$4 sm:$0xff]   ;;  %v975_v36 = vld [vmem:[%s1205_s7 + $0x60] ss:$8 sps:$4 sm:$0xff]   ;;  %v976_v37 = vld [vmem:[%s1205_s7 + $0x54] ss:$8 sps:$4 sm:$0xff]  }
  0x2f   : > { %632 = vmatpush1.bf16.msra.mxu0 %v972_v34  ;;  %v978_v38 = vld [vmem:[%s1205_s7 + $0x50] ss:$8 sps:$4 sm:$0xff]   ;;  %v979_v39 = vld [vmem:[%s1205_s7 + $0x44] ss:$8 sps:$4 sm:$0xff]   ;;  %v981_v40 = vld [vmem:[%s1205_s7 + $0x40] ss:$8 sps:$4 sm:$0xff]  }
  0x30   : > { %633 = vmatprep.subr.bf16.mxu0 %v973_v35  ;;  %v982_v41 = vld [vmem:[%s1205_s7 + $0x34] ss:$8 sps:$4 sm:$0xff]   ;;  %v984_v42 = vld [vmem:[%s1205_s7 + $0x30] ss:$8 sps:$4 sm:$0xff]   ;;  %v985_v43 = vld [vmem:[%s1205_s7 + $0x24] ss:$8 sps:$4 sm:$0xff]  }
  0x31   : > { %v987_v44 = vld [vmem:[%s1205_s7 + $0x20] ss:$8 sps:$4 sm:$0xff]   ;;  %v988_v45 = vld [vmem:[%s1205_s7 + $0x14] ss:$8 sps:$4 sm:$0xff]   ;;  %v990_v46 = vld [vmem:[%s1205_s7 + $0x10] ss:$8 sps:$4 sm:$0xff]  }
  0x32   : > { %v991_v47 = vld [vmem:[%s1205_s7 + $0x4] ss:$8 sps:$4 sm:$0xff]   ;;  %v993_v48 = vld [vmem:[%s1205_s7] ss:$8 sps:$4 sm:$0xff]   ;;  %v994_v49 = vld [vmem:[%s1205_s7 + $0xf4] ss:$8 sps:$4 sm:$0xff]  }
  0x33   : > { %634 = vmatpush1.bf16.msra.mxu0 %v975_v36  ;;  %v996_v50 = vld [vmem:[%s1205_s7 + $0xf0] ss:$8 sps:$4 sm:$0xff]   ;;  %v997_v51 = vld [vmem:[%s1205_s7 + $0xe4] ss:$8 sps:$4 sm:$0xff]   ;;  %v999_v52 = vld [vmem:[%s1205_s7 + $0xe0] ss:$8 sps:$4 sm:$0xff]  }
  0x34   : > { %635 = vmatprep.subr.bf16.mxu0 %v976_v37  ;;  %v1000_v53 = vld [vmem:[%s1205_s7 + $0xd4] ss:$8 sps:$4 sm:$0xff]   ;;  %v1002_v54 = vld [vmem:[%s1205_s7 + $0xd0] ss:$8 sps:$4 sm:$0xff]   ;;  %v1003_v55 = vld [vmem:[%s1205_s7 + $0xc4] ss:$8 sps:$4 sm:$0xff]  }
  0x35   : > { %v1005_v56 = vld [vmem:[%s1205_s7 + $0xc0] ss:$8 sps:$4 sm:$0xff]   ;;  %v1006_v57 = vld [vmem:[%s1205_s7 + $0xb4] ss:$8 sps:$4 sm:$0xff]   ;;  %v1008_v58 = vld [vmem:[%s1205_s7 + $0xb0] ss:$8 sps:$4 sm:$0xff]  }
  0x36   : > { %v1009_v59 = vld [vmem:[%s1205_s7 + $0xa4] ss:$8 sps:$4 sm:$0xff]   ;;  %v1011_v60 = vld [vmem:[%s1205_s7 + $0xa0] ss:$8 sps:$4 sm:$0xff]   ;;  %v1012_v61 = vld [vmem:[%s1205_s7 + $0x94] ss:$8 sps:$4 sm:$0xff]  }
  0x37   : > { %636 = vmatpush1.bf16.msra.mxu0 %v978_v38  ;;  %v1014_v62 = vld [vmem:[%s1205_s7 + $0x90] ss:$8 sps:$4 sm:$0xff]   ;;  %v1015_v63 = vld [vmem:[%s1205_s7 + $0x84] ss:$8 sps:$4 sm:$0xff]   ;;  %v1017_v0 = vld [vmem:[%s1205_s7 + $0x80] ss:$8 sps:$4 sm:$0xff]  }
  0x38   : > { %637 = vmatprep.subr.bf16.mxu0 %v979_v39  ;;  %v1018_v1 = vld [vmem:[%s1269_s0] ss:$8 sps:$4 sm:$0xff]   ;;  %s1281_s10 = smov (!%p409_p11, %s884_s10), 3  ;;  %v692_v3 = vshrl.u32 %v691_v2, 7  ;;  %s929_s24 = sshll.u32 (%p1116_p6), %s1051_s14, 3 }
  0x39   : > { %s411_s19 = scalar_lea.vmem %s1271_s2, %s1281_s10  ;;  %s731_s26 = scalar_lea.vmem (%p1116_p6), %s1272_s3, %s929_s24 }
  0x3a   : > { %v693_v4 = vsub.s32 0, %v692_v3  ;;  %v697_v5 = vsub.s32 1, %v692_v3  ;;  %v689_v6 = vld [vmem:[%s411_s19] sm:$0x3] }
  0x3b   : > { %638 = vmatpush1.bf16.msra.mxu0 %v981_v40 }
  0x3c   : > { %639 = vmatprep.subr.bf16.mxu0 %v982_v41  ;;  %v694_v7 = vrot.slane %v689_v6, %v693_v4  ;;  %v698_v8 = vrot.slane %v689_v6, %v697_v5 }
  0x3f   : > { %640 = vmatpush1.bf16.msra.mxu0 %v984_v42 }
  0x40   : > { %641 = vmatprep.subr.bf16.mxu0 %v985_v43 }
  0x43   : > { %642 = vmatpush1.bf16.msra.mxu0 %v987_v44 }
  0x44   : > { %643 = vmatprep.subr.bf16.mxu0 %v988_v45 }
  0x47   : > { %644 = vmatpush1.bf16.msra.mxu0 %v990_v46 }
  0x48   : > { %645 = vmatprep.subr.bf16.mxu0 %v991_v47 }
  0x4b   : > { %646 = vmatpush1.bf16.msra.mxu0 %v993_v48 }
  0x4c   : > { %647 = vmatprep.subr.bf16.mxu0 %v994_v49 }
  0x4f   : > { %648 = vmatpush2.bf16.msra.mxu0 %v996_v50 }
  0x50   : > { %649 = vmatprep.subr.bf16.mxu0 %v997_v51 }
  0x53   : > { %650 = vmatpush2.bf16.msra.mxu0 %v999_v52 }
  0x54   : > { %651 = vmatprep.subr.bf16.mxu0 %v1000_v53 }
  0x57   : > { %652 = vmatpush2.bf16.msra.mxu0 %v1002_v54 }
  0x58   : > { %653 = vmatprep.subr.bf16.mxu0 %v1003_v55 }
  0x5b   : > { %654 = vmatpush2.bf16.msra.mxu0 %v1005_v56 }
  0x5c   : > { %655 = vmatprep.subr.bf16.mxu0 %v1006_v57 }
  0x5f   : > { %656 = vmatpush2.bf16.msra.mxu0 %v1008_v58 }
  0x60   : > { %657 = vmatprep.subr.bf16.mxu0 %v1009_v59 }
  0x63   : > { %658 = vmatpush2.bf16.msra.mxu0 %v1011_v60 }
  0x64   : > { %659 = vmatprep.subr.bf16.mxu0 %v1012_v61 }
  0x67   : > { %660 = vmatpush2.bf16.msra.mxu0 %v1014_v62 }
  0x68   : > { %661 = vmatprep.subr.bf16.mxu0 %v1015_v63 }
  0x6b   : > { %662 = vmatpush2.bf16.msra.mxu0 %v1017_v0 }
  0x6e   : > { %664 = vmatmul.mubr.bf16.vlgmr.msra.gmra.mxu0 %v1018_v1 }
 0x12e   : > { %v665_v9 = vpop.f32.mrf.mxu0 }
 0x12f   : > { %v701_v11 = vadd.f32 %v694_v7, %v665_v9 }
 0x130   : > { %v667_v10 = vpop.f32.mrf.mxu0 }
 0x131   : > { %v702_v12 = vadd.f32 %v698_v8, %v667_v10 }
 0x132   : > { %v669_v13 = vpop.f32.mrf.mxu0 }
 0x133   : > { %v927_v14 = vpack.c.bf16 %v702_v12, %v701_v11  ;;  %v703_v16 = vadd.f32 %v694_v7, %v669_v13 }
 0x134   : > { %v671_v15 = vpop.f32.mrf.mxu0 }
 0x135   : > { %717 = vst [vmem:[%s393_s23] sm:$0xff] %v927_v14  ;;  %v704_v17 = vadd.f32 %v698_v8, %v671_v15  ;;  %725 = sbr.rel (!%p1116_p6) target bundleno = 322 (0x142), region = 82 }
 0x137   : > { %v928_v18 = vpack.c.bf16 %v704_v17, %v703_v16 }
 0x139   : > { %718 = vst [vmem:[%s393_s23 + $0x8] sm:$0xff] %v928_v18 }
 0x13c   : > { %v762_v19 = vld [vmem:[%s393_s23] sm:$0xff] }
 0x13d   : > { %763 = vst [vmem:[%s731_s26] sm:$0xff] %v762_v19 }
 0x140   : > { %v764_v20 = vld [vmem:[%s393_s23 + $0x8] sm:$0xff] }
 0x141   : > { %765 = vst [vmem:[%s731_s26 + $0x10] sm:$0xff] %v764_v20 }
 0x142 PF: > { %s13_s16 = sadd.s32 1, %s1059_s16   ;;  %s1274_s12 = smov %s1047_s13 }
 0x143   : > { %p10_p12 = scmp.ge.s32.totalorder %s13_s16, 4   ;;  %s1275_s13 = smov %s1121_s22 }
 0x144   : > { %s1276_s14 = smov %s1055_s15  ;;  %s1277_s15 = smov %s1279_s17 }
 0x145   :  { %12 = sbr.rel (!%p10_p12) target bundleno = 3 (0x3), region = 157 }

// kernel: quantized_resnet18_forward.44
= control target key start
LH: loop header
LB: loop body
LE: loop exit
PB: predicated region body
PF: predicated region fallthrough
CT: control target
= control target key end

     0   :  { %s2049_s0 = inlined_call_operand.vmem [shape: bf16[16,4608], index: 0, kind: input, shape index: {}]   ;;  %s2050_s1 = inlined_call_operand.vmem [shape: bf16[4608,512], index: 1, kind: input, shape index: {}]   ;;  %s2051_s2 = inlined_call_operand.vmem [shape: f32[1,512], index: 2, kind: input, shape index: {}]   ;;  %s2052_s3 = inlined_call_operand.vmem [shape: bf16[16,512], index: 3, kind: output, shape index: {}]  }
   0x1   :  { %2054 = sst [smem:[#allocation7_spill]] %s2049_s0 }
   0x2   :  { %2055 = sst [smem:[#allocation8_spill]] %s2050_s1 }
   0x3   :  { %s1667_s12 = smov 0   ;;  %s1669_s13 = smov 0  }
   0x4   :  { %s1671_s14 = smov 0   ;;  %s1673_s15 = smov 0  }
   0x5   :  { %s1675_s16 = smov 0   ;;  %s1677_s17 = smov 0  }
   0x6   :  { %s1679_s18 = smov 0   ;;  %s1681_s19 = smov 0  }
   0x7   :  { %s1683_s20 = smov 0   ;;  %s1685_s21 = smov 0  }
   0x8   :  { %s1687_s22 = smov 0  }
   0x9 LB: > { %s1268_s23 = sadd.s32 4294967295, %s1644_s22   ;;  %s25_s24 = sadd.s32 1, %s1636_s20  ;;  %s1644_s22 = sphi %s1687_s22, %s13_s22   ;;  %s1640_s21 = sphi %s1685_s21, %s2072_s21   ;;  %s1636_s20 = sphi %s1683_s20, %s2071_s20   ;;  %s1632_s19 = sphi %s1681_s19, %s2070_s19   ;;  %s1628_s18 = sphi %s1679_s18, %s2069_s18   ;;  %s1624_s17 = sphi %s1677_s17, %s2068_s17   ;;  %s1620_s16 = sphi %s1675_s16, %s2067_s16   ;;  %s1616_s15 = sphi %s1673_s15, %s2066_s15   ;;  %s1612_s14 = sphi %s1671_s14, %s2065_s14   ;;  %s1608_s13 = sphi %s1669_s13, %s2064_s13   ;;  %s1604_s12 = sphi %s1667_s12, %s2063_s12  }
   0xa   : > { %p26_p0 = scmp.ge.s32.totalorder %s25_s24, 9  ;;  %s28_s25 = sadd.s32 1, %s1640_s21 }
   0xb   : > { %s41_s26 = sadd.s32 1, %s1624_s17  ;;  %p48_p1 = scmp.ne.s32.totalorder %s1624_s17, %s1620_s16 }
   0xc   : > { %s2074_s24 = smov (%p26_p0, %s25_s24), 0  ;;  %s2076_s25 = smov (!%p26_p0, %s28_s25), %s1640_s21 }
   0xd   : > { %s37_s27 = ssub.s32 %s1636_s20, %s2074_s24  ;;  %p49_p2 = scmp.eq.s32.totalorder %s1644_s22, 0 }
   0xe   : > { %p30_p3 = scmp.ge.s32.totalorder %s2076_s25, 2  ;;  %p39_p4 = scmp.eq.s32.totalorder %s37_s27, 0 }
   0xf   : > { %p1734_p5 = por %p49_p2, %p48_p1  ;;  %s69_s29 = sadd.s32 1, %s1616_s15 }
  0x10   : > { %s2078_s25 = smov (%p30_p3, %s2076_s25), 0  ;;  %p76_p6 = scmp.ne.s32.totalorder %s1616_s15, %s1612_s14 }
  0x11   : > { %2057 = sst [smem:[#allocation6_spill]] %s2078_s25  ;;  %s65_s4 = ssub.s32 %s1640_s21, %s2078_s25 }
  0x12   : > { %s1742_s30 = scalar_select %p39_p4, %s1624_s17, %s41_s26  }
  0x13   : > { %s66_s5 = sor.u32 %s65_s4, %s37_s27  ;;  %p121_p7 = scmp.eq.s32.totalorder %s65_s4, 0 }
  0x14   : > { %p67_p8 = scmp.eq.s32.totalorder %s66_s5, 0  ;;  %p1748_p9 = por %p76_p6, %p49_p2 }
  0x15   : > { %s123_s7 = sadd.s32 1, %s1608_s13  ;;  %p133_p10 = scmp.ne.s32.totalorder %s1608_s13, %s1604_s12 }
  0x16   : > { %s1756_s8 = scalar_select %p67_p8, %s1616_s15, %s69_s29  }
  0x17   : > { %s1759_s9 = scalar_select %p121_p7, %s1608_s13, %s123_s7  }
  0x18   : > { %p134_p11 = scmp.eq.s32.totalorder %s1268_s23, 17  ;;  %p1271_p13 = scmp.ge.s32.totalorder %s1644_s22, 18 }
  0x1a   : > { %p1761_p12 = por %p134_p11, %p133_p10  ;;  %156 = sbr.rel (%p1271_p13) target bundleno = 85 (0x55), region = 16 }
  0x1f   : > { %159 = sbr.rel (!%p1734_p5) target bundleno = 43 (0x2b), region = 20  ;;  %s161_s11 = sand.u32 (%p1734_p5), 1, %s1624_s17  }
  0x20   : > { %s1362_s26 = sshll.u32 (%p1734_p5), %s1636_s20, 4  ;;  %s1272_s27 = sshll.u32 (%p1734_p5), %s161_s11, 5 }
  0x21   : > { %s2060_s0 = sld [smem:[#allocation7_spill]] (%p1734_p5)  ;;  %s163_s23 = scalar_lea.vmem (%p1734_p5), [#allocation3], %s1272_s27 }
  0x27   : > { %s169_s5 = scalar_lea.vmem %s2060_s0, %s1362_s26 }
  0x28   : > { %v182_v0 = vld [vmem:[%s169_s5] sm:$0xff]  ;;  %v184_v1 = vld [vmem:[%s169_s5 + $0x8] sm:$0xff]  ;;  %v186_v2 = vld [vmem:[%s169_s5 + $0x90] sm:$0xff] }
  0x29   : > { %183 = vst [vmem:[%s163_s23] sm:$0xff] %v182_v0  ;;  %185 = vst [vmem:[%s163_s23 + $0x8] sm:$0xff] %v184_v1  ;;  %v188_v3 = vld [vmem:[%s169_s5 + $0x98] sm:$0xff] }
  0x2a   : > { %187 = vst [vmem:[%s163_s23 + $0x10] sm:$0xff] %v186_v2  ;;  %189 = vst [vmem:[%s163_s23 + $0x18] sm:$0xff] %v188_v3 }
  0x2b PF: > { %195 = sbr.rel (!%p1748_p9) target bundleno = 85 (0x55), region = 43  ;;  %s197_s28 = sand.u32 (%p1748_p9), 1, %s1616_s15  }
  0x2c   : > { %s1277_s7 = sshll.u32 (%p1748_p9), %s1640_s21, 1  ;;  %s1275_s11 = sshll.u32 (%p1748_p9), %s197_s28, 9 }
  0x2d   : > { %s1363_s26 = sshll.u32 (%p1748_p9), %s1636_s20, 8  ;;  %s2061_s1 = sld [smem:[#allocation8_spill]] (%p1748_p9) }
  0x2e   : > { %s203_s29 = sadd.s32 (%p1748_p9), %s1363_s26, %s1277_s7  ;;  %s1786_s6 = scalar_lea.vmem (%p1748_p9), [#allocation4], %s1275_s11 }
  0x2f   : > { %s1279_s4 = sshll.u32 (%p1748_p9), %s203_s29, 2 }
  0x33   : > { %s1781_s25 = scalar_lea.vmem %s2061_s1, %s1279_s4 }
  0x34   : > { %v360_v4 = vld [vmem:[%s1781_s25] sm:$0xff]  ;;  %v362_v5 = vld [vmem:[%s1781_s25 + $0x10] sm:$0xff] }
  0x35   : > { %v364_v6 = vld [vmem:[%s1781_s25 + $0x20] sm:$0xff]  ;;  %361 = vst [vmem:[%s1786_s6] sm:$0xff] %v360_v4  ;;  %363 = vst [vmem:[%s1786_s6 + $0x8] sm:$0xff] %v362_v5  ;;  %v366_v7 = vld [vmem:[%s1781_s25 + $0x30] sm:$0xff] }
  0x36   : > { %365 = vst [vmem:[%s1786_s6 + $0x10] sm:$0xff] %v364_v6  ;;  %v368_v8 = vld [vmem:[%s1781_s25 + $0x40] sm:$0xff]  ;;  %v370_v9 = vld [vmem:[%s1781_s25 + $0x50] sm:$0xff]  ;;  %367 = vst [vmem:[%s1786_s6 + $0x18] sm:$0xff] %v366_v7 }
  0x37   : > { %369 = vst [vmem:[%s1786_s6 + $0x20] sm:$0xff] %v368_v8  ;;  %371 = vst [vmem:[%s1786_s6 + $0x28] sm:$0xff] %v370_v9  ;;  %v372_v10 = vld [vmem:[%s1781_s25 + $0x60] sm:$0xff]  ;;  %v374_v11 = vld [vmem:[%s1781_s25 + $0x70] sm:$0xff] }
  0x38   : > { %v376_v12 = vld [vmem:[%s1781_s25 + $0x80] sm:$0xff]  ;;  %373 = vst [vmem:[%s1786_s6 + $0x30] sm:$0xff] %v372_v10  ;;  %375 = vst [vmem:[%s1786_s6 + $0x38] sm:$0xff] %v374_v11  ;;  %v378_v13 = vld [vmem:[%s1781_s25 + $0x90] sm:$0xff] }
  0x39   : > { %377 = vst [vmem:[%s1786_s6 + $0x40] sm:$0xff] %v376_v12  ;;  %v380_v14 = vld [vmem:[%s1781_s25 + $0xa0] sm:$0xff]  ;;  %v382_v15 = vld [vmem:[%s1781_s25 + $0xb0] sm:$0xff]  ;;  %379 = vst [vmem:[%s1786_s6 + $0x48] sm:$0xff] %v378_v13 }
  0x3a   : > { %381 = vst [vmem:[%s1786_s6 + $0x50] sm:$0xff] %v380_v14  ;;  %383 = vst [vmem:[%s1786_s6 + $0x58] sm:$0xff] %v382_v15  ;;  %v384_v16 = vld [vmem:[%s1781_s25 + $0xc0] sm:$0xff]  ;;  %v386_v17 = vld [vmem:[%s1781_s25 + $0xd0] sm:$0xff] }
  0x3b   : > { %v388_v18 = vld [vmem:[%s1781_s25 + $0xe0] sm:$0xff]  ;;  %385 = vst [vmem:[%s1786_s6 + $0x60] sm:$0xff] %v384_v16  ;;  %387 = vst [vmem:[%s1786_s6 + $0x68] sm:$0xff] %v386_v17  ;;  %v390_v19 = vld [vmem:[%s1781_s25 + $0xf0] sm:$0xff] }
  0x3c   : > { %389 = vst [vmem:[%s1786_s6 + $0x70] sm:$0xff] %v388_v18  ;;  %v392_v20 = vld [vmem:[%s1781_s25 + $0x100] sm:$0xff]  ;;  %v394_v21 = vld [vmem:[%s1781_s25 + $0x110] sm:$0xff]  ;;  %391 = vst [vmem:[%s1786_s6 + $0x78] sm:$0xff] %v390_v19 }
  0x3d   : > { %393 = vst [vmem:[%s1786_s6 + $0x80] sm:$0xff] %v392_v20  ;;  %395 = vst [vmem:[%s1786_s6 + $0x88] sm:$0xff] %v394_v21  ;;  %v396_v22 = vld [vmem:[%s1781_s25 + $0x120] sm:$0xff]  ;;  %v398_v23 = vld [vmem:[%s1781_s25 + $0x130] sm:$0xff] }
  0x3e   : > { %v400_v24 = vld [vmem:[%s1781_s25 + $0x140] sm:$0xff]  ;;  %397 = vst [vmem:[%s1786_s6 + $0x90] sm:$0xff] %v396_v22  ;;  %399 = vst [vmem:[%s1786_s6 + $0x98] sm:$0xff] %v398_v23  ;;  %v402_v25 = vld [vmem:[%s1781_s25 + $0x150] sm:$0xff] }
  0x3f   : > { %401 = vst [vmem:[%s1786_s6 + $0xa0] sm:$0xff] %v400_v24  ;;  %v404_v26 = vld [vmem:[%s1781_s25 + $0x160] sm:$0xff]  ;;  %v406_v27 = vld [vmem:[%s1781_s25 + $0x170] sm:$0xff]  ;;  %403 = vst [vmem:[%s1786_s6 + $0xa8] sm:$0xff] %v402_v25 }
  0x40   : > { %405 = vst [vmem:[%s1786_s6 + $0xb0] sm:$0xff] %v404_v26  ;;  %407 = vst [vmem:[%s1786_s6 + $0xb8] sm:$0xff] %v406_v27  ;;  %v408_v28 = vld [vmem:[%s1781_s25 + $0x180] sm:$0xff]  ;;  %v410_v29 = vld [vmem:[%s1781_s25 + $0x190] sm:$0xff] }
  0x41   : > { %v412_v30 = vld [vmem:[%s1781_s25 + $0x1a0] sm:$0xff]  ;;  %409 = vst [vmem:[%s1786_s6 + $0xc0] sm:$0xff] %v408_v28  ;;  %411 = vst [vmem:[%s1786_s6 + $0xc8] sm:$0xff] %v410_v29  ;;  %v414_v31 = vld [vmem:[%s1781_s25 + $0x1b0] sm:$0xff] }
  0x42   : > { %413 = vst [vmem:[%s1786_s6 + $0xd0] sm:$0xff] %v412_v30  ;;  %v416_v32 = vld [vmem:[%s1781_s25 + $0x1c0] sm:$0xff]  ;;  %v418_v33 = vld [vmem:[%s1781_s25 + $0x1d0] sm:$0xff]  ;;  %415 = vst [vmem:[%s1786_s6 + $0xd8] sm:$0xff] %v414_v31 }
  0x43   : > { %417 = vst [vmem:[%s1786_s6 + $0xe0] sm:$0xff] %v416_v32  ;;  %419 = vst [vmem:[%s1786_s6 + $0xe8] sm:$0xff] %v418_v33  ;;  %v420_v34 = vld [vmem:[%s1781_s25 + $0x1e0] sm:$0xff]  ;;  %v422_v35 = vld [vmem:[%s1781_s25 + $0x1f0] sm:$0xff] }
  0x44   : > { %v424_v36 = vld [vmem:[%s1781_s25 + $0x200] sm:$0xff]  ;;  %421 = vst [vmem:[%s1786_s6 + $0xf0] sm:$0xff] %v420_v34  ;;  %423 = vst [vmem:[%s1786_s6 + $0xf8] sm:$0xff] %v422_v35  ;;  %v426_v37 = vld [vmem:[%s1781_s25 + $0x210] sm:$0xff] }
  0x45   : > { %425 = vst [vmem:[%s1786_s6 + $0x100] sm:$0xff] %v424_v36  ;;  %v428_v38 = vld [vmem:[%s1781_s25 + $0x220] sm:$0xff]  ;;  %v430_v39 = vld [vmem:[%s1781_s25 + $0x230] sm:$0xff]  ;;  %427 = vst [vmem:[%s1786_s6 + $0x108] sm:$0xff] %v426_v37 }
  0x46   : > { %429 = vst [vmem:[%s1786_s6 + $0x110] sm:$0xff] %v428_v38  ;;  %431 = vst [vmem:[%s1786_s6 + $0x118] sm:$0xff] %v430_v39  ;;  %v432_v40 = vld [vmem:[%s1781_s25 + $0x240] sm:$0xff]  ;;  %v434_v41 = vld [vmem:[%s1781_s25 + $0x250] sm:$0xff] }
  0x47   : > { %v436_v42 = vld [vmem:[%s1781_s25 + $0x260] sm:$0xff]  ;;  %433 = vst [vmem:[%s1786_s6 + $0x120] sm:$0xff] %v432_v40  ;;  %435 = vst [vmem:[%s1786_s6 + $0x128] sm:$0xff] %v434_v41  ;;  %v438_v43 = vld [vmem:[%s1781_s25 + $0x270] sm:$0xff] }
  0x48   : > { %437 = vst [vmem:[%s1786_s6 + $0x130] sm:$0xff] %v436_v42  ;;  %v440_v44 = vld [vmem:[%s1781_s25 + $0x280] sm:$0xff]  ;;  %v442_v45 = vld [vmem:[%s1781_s25 + $0x290] sm:$0xff]  ;;  %439 = vst [vmem:[%s1786_s6 + $0x138] sm:$0xff] %v438_v43 }
  0x49   : > { %441 = vst [vmem:[%s1786_s6 + $0x140] sm:$0xff] %v440_v44  ;;  %443 = vst [vmem:[%s1786_s6 + $0x148] sm:$0xff] %v442_v45  ;;  %v444_v46 = vld [vmem:[%s1781_s25 + $0x2a0] sm:$0xff]  ;;  %v446_v47 = vld [vmem:[%s1781_s25 + $0x2b0] sm:$0xff] }
  0x4a   : > { %v448_v48 = vld [vmem:[%s1781_s25 + $0x2c0] sm:$0xff]  ;;  %445 = vst [vmem:[%s1786_s6 + $0x150] sm:$0xff] %v444_v46  ;;  %447 = vst [vmem:[%s1786_s6 + $0x158] sm:$0xff] %v446_v47  ;;  %v450_v49 = vld [vmem:[%s1781_s25 + $0x2d0] sm:$0xff] }
  0x4b   : > { %449 = vst [vmem:[%s1786_s6 + $0x160] sm:$0xff] %v448_v48  ;;  %v452_v50 = vld [vmem:[%s1781_s25 + $0x2e0] sm:$0xff]  ;;  %v454_v51 = vld [vmem:[%s1781_s25 + $0x2f0] sm:$0xff]  ;;  %451 = vst [vmem:[%s1786_s6 + $0x168] sm:$0xff] %v450_v49 }
  0x4c   : > { %453 = vst [vmem:[%s1786_s6 + $0x170] sm:$0xff] %v452_v50  ;;  %455 = vst [vmem:[%s1786_s6 + $0x178] sm:$0xff] %v454_v51  ;;  %v456_v52 = vld [vmem:[%s1781_s25 + $0x300] sm:$0xff]  ;;  %v458_v53 = vld [vmem:[%s1781_s25 + $0x310] sm:$0xff] }
  0x4d   : > { %v460_v54 = vld [vmem:[%s1781_s25 + $0x320] sm:$0xff]  ;;  %457 = vst [vmem:[%s1786_s6 + $0x180] sm:$0xff] %v456_v52  ;;  %459 = vst [vmem:[%s1786_s6 + $0x188] sm:$0xff] %v458_v53  ;;  %v462_v55 = vld [vmem:[%s1781_s25 + $0x330] sm:$0xff] }
  0x4e   : > { %461 = vst [vmem:[%s1786_s6 + $0x190] sm:$0xff] %v460_v54  ;;  %v464_v56 = vld [vmem:[%s1781_s25 + $0x340] sm:$0xff]  ;;  %v466_v57 = vld [vmem:[%s1781_s25 + $0x350] sm:$0xff]  ;;  %463 = vst [vmem:[%s1786_s6 + $0x198] sm:$0xff] %v462_v55 }
  0x4f   : > { %465 = vst [vmem:[%s1786_s6 + $0x1a0] sm:$0xff] %v464_v56  ;;  %467 = vst [vmem:[%s1786_s6 + $0x1a8] sm:$0xff] %v466_v57  ;;  %v468_v58 = vld [vmem:[%s1781_s25 + $0x360] sm:$0xff]  ;;  %v470_v59 = vld [vmem:[%s1781_s25 + $0x370] sm:$0xff] }
  0x50   : > { %v472_v60 = vld [vmem:[%s1781_s25 + $0x380] sm:$0xff]  ;;  %469 = vst [vmem:[%s1786_s6 + $0x1b0] sm:$0xff] %v468_v58  ;;  %471 = vst [vmem:[%s1786_s6 + $0x1b8] sm:$0xff] %v470_v59  ;;  %v474_v61 = vld [vmem:[%s1781_s25 + $0x390] sm:$0xff] }
  0x51   : > { %473 = vst [vmem:[%s1786_s6 + $0x1c0] sm:$0xff] %v472_v60  ;;  %v476_v62 = vld [vmem:[%s1781_s25 + $0x3a0] sm:$0xff]  ;;  %v478_v63 = vld [vmem:[%s1781_s25 + $0x3b0] sm:$0xff]  ;;  %475 = vst [vmem:[%s1786_s6 + $0x1c8] sm:$0xff] %v474_v61 }
  0x52   : > { %477 = vst [vmem:[%s1786_s6 + $0x1d0] sm:$0xff] %v476_v62  ;;  %479 = vst [vmem:[%s1786_s6 + $0x1d8] sm:$0xff] %v478_v63  ;;  %v480_v0 = vld [vmem:[%s1781_s25 + $0x3c0] sm:$0xff]  ;;  %v482_v1 = vld [vmem:[%s1781_s25 + $0x3d0] sm:$0xff] }
  0x53   : > { %v484_v2 = vld [vmem:[%s1781_s25 + $0x3e0] sm:$0xff]  ;;  %481 = vst [vmem:[%s1786_s6 + $0x1e0] sm:$0xff] %v480_v0  ;;  %483 = vst [vmem:[%s1786_s6 + $0x1e8] sm:$0xff] %v482_v1  ;;  %v486_v3 = vld [vmem:[%s1781_s25 + $0x3f0] sm:$0xff] }
  0x54   : > { %485 = vst [vmem:[%s1786_s6 + $0x1f0] sm:$0xff] %v484_v2  ;;  %487 = vst [vmem:[%s1786_s6 + $0x1f8] sm:$0xff] %v486_v3 }
  0x55 PF: > { %p1280_p0 = scmp.ge.s32.totalorder %s1644_s22, 1  ;;  %p500_p1 = scmp.lt.s32.totalorder %s1644_s22, 19 }
  0x57   : > { %p501_p2 = pnand %p1280_p0, %p500_p1 }
  0x58   : > { %s507_s0 = sand.u32 (!%p501_p2), 1, %s1620_s16   ;;  %s514_s5 = sand.u32 (!%p501_p2), 1, %s1612_s14  }
  0x59   : > { %504 = sbr.rel (%p501_p2) target bundleno = 397 (0x18d), region = 85  ;;  %s1281_s23 = sshll.u32 (!%p501_p2), %s507_s0, 5 }
  0x5a   : > { %s1282_s28 = sshll.u32 (!%p501_p2), %s514_s5, 9  ;;  %s541_s7 = sand.u32 (!%p501_p2), 1, %s1604_s12  }
  0x5b   : > { %s1284_s11 = sshll.u32 (!%p501_p2), %s1632_s19, 1  ;;  %s1283_s25 = sshll.u32 (!%p501_p2), %s541_s7, 4 }
  0x5c   : > { %p549_p3 = scmp.lt.s32.totalorder (!%p501_p2), %s1284_s11, 3  ;;  %s1925_s27 = scalar_lea.vmem (!%p501_p2), [#allocation3], %s1281_s23 }
  0x5d   : > { %s1927_s6 = scalar_lea.vmem (!%p501_p2), [#allocation4], %s1282_s28  ;;  %s1929_s1 = scalar_lea.vmem (!%p501_p2), [#allocation5], %s1283_s25 }
  0x5e   : > { %s2080_s11 = smov (!%p549_p3, %s1284_s11), 3  ;;  %p1285_p4 = scmp.ne.s32.totalorder %s1628_s18, 0 }
  0x5f   : > { %s551_s4 = scalar_lea.vmem %s2051_s2, %s2080_s11 }
  0x60   : > { %558 = sbr.rel (%p1285_p4) target bundleno = 104 (0x68), region = 97 }
  0x65   : > { %v1646_v4 = vmov 0.0  }
  0x66   : > { %559 = vst [vmem:[#allocation2 + $0x10] sm:$0xff] %v1646_v4  ;;  %560 = vst [vmem:[#allocation2] sm:$0xff] %v1646_v4 }
  0x67   : > { %561 = vst [vmem:[#allocation2 + $0x18] sm:$0xff] %v1646_v4  ;;  %562 = vst [vmem:[#allocation2 + $0x8] sm:$0xff] %v1646_v4 }
  0x68 PF: > { %v1456_v5 = vld [vmem:[%s1927_s6 + $0x74] ss:$8 sps:$4 sm:$0xff]   ;;  %v1460_v7 = vld [vmem:[%s1927_s6 + $0x70] ss:$8 sps:$4 sm:$0xff]   ;;  %v1462_v9 = vld [vmem:[%s1927_s6 + $0x64] ss:$8 sps:$4 sm:$0xff]  }
  0x69   : > { %v1458_v6 = vld [vmem:[%s1927_s6 + $0x174] ss:$8 sps:$4 sm:$0xff]   ;;  %975 = vmatprep.subr.bf16.mxu0 %v1456_v5  ;;  %v1461_v8 = vld [vmem:[%s1927_s6 + $0x170] ss:$8 sps:$4 sm:$0xff]   ;;  %v1464_v10 = vld [vmem:[%s1927_s6 + $0x164] ss:$8 sps:$4 sm:$0xff]  }
  0x6a   : > { %1018 = vmatprep.subr.bf16.mxu1 %v1458_v6  ;;  %976 = vmatpush1.bf16.msra.mxu0 %v1460_v7  ;;  %v1466_v11 = vld [vmem:[%s1927_s6 + $0x60] ss:$8 sps:$4 sm:$0xff]   ;;  %v1468_v13 = vld [vmem:[%s1927_s6 + $0x54] ss:$8 sps:$4 sm:$0xff]   ;;  %v1472_v15 = vld [vmem:[%s1927_s6 + $0x50] ss:$8 sps:$4 sm:$0xff]  }
  0x6b   : > { %1019 = vmatpush1.bf16.msra.mxu1 %v1461_v8  ;;  %977 = vmatprep.subr.bf16.mxu0 %v1462_v9  ;;  %v1467_v12 = vld [vmem:[%s1927_s6 + $0x160] ss:$8 sps:$4 sm:$0xff]   ;;  %v1470_v14 = vld [vmem:[%s1927_s6 + $0x154] ss:$8 sps:$4 sm:$0xff]   ;;  %v1473_v16 = vld [vmem:[%s1927_s6 + $0x150] ss:$8 sps:$4 sm:$0xff]  }
  0x6c   : > { %1020 = vmatprep.subr.bf16.mxu1 %v1464_v10  ;;  %v1474_v17 = vld [vmem:[%s1927_s6 + $0x44] ss:$8 sps:$4 sm:$0xff]   ;;  %v1478_v19 = vld [vmem:[%s1927_s6 + $0x40] ss:$8 sps:$4 sm:$0xff]   ;;  %v1480_v21 = vld [vmem:[%s1927_s6 + $0x34] ss:$8 sps:$4 sm:$0xff]  }
  0x6d   : > { %v1476_v18 = vld [vmem:[%s1927_s6 + $0x144] ss:$8 sps:$4 sm:$0xff]   ;;  %v1479_v20 = vld [vmem:[%s1927_s6 + $0x140] ss:$8 sps:$4 sm:$0xff]   ;;  %v1482_v22 = vld [vmem:[%s1927_s6 + $0x134] ss:$8 sps:$4 sm:$0xff]  }
  0x6e   : > { %978 = vmatpush1.bf16.msra.mxu0 %v1466_v11  ;;  %v1484_v23 = vld [vmem:[%s1927_s6 + $0x30] ss:$8 sps:$4 sm:$0xff]   ;;  %v1486_v25 = vld [vmem:[%s1927_s6 + $0x24] ss:$8 sps:$4 sm:$0xff]   ;;  %v1490_v27 = vld [vmem:[%s1927_s6 + $0x20] ss:$8 sps:$4 sm:$0xff]  }
  0x6f   : > { %1021 = vmatpush1.bf16.msra.mxu1 %v1467_v12  ;;  %979 = vmatprep.subr.bf16.mxu0 %v1468_v13  ;;  %v1485_v24 = vld [vmem:[%s1927_s6 + $0x130] ss:$8 sps:$4 sm:$0xff]   ;;  %v1488_v26 = vld [vmem:[%s1927_s6 + $0x124] ss:$8 sps:$4 sm:$0xff]   ;;  %v1491_v28 = vld [vmem:[%s1927_s6 + $0x120] ss:$8 sps:$4 sm:$0xff]  }
  0x70   : > { %1022 = vmatprep.subr.bf16.mxu1 %v1470_v14  ;;  %v1492_v29 = vld [vmem:[%s1927_s6 + $0x14] ss:$8 sps:$4 sm:$0xff]   ;;  %v1496_v31 = vld [vmem:[%s1927_s6 + $0x10] ss:$8 sps:$4 sm:$0xff]   ;;  %v1498_v33 = vld [vmem:[%s1927_s6 + $0x4] ss:$8 sps:$4 sm:$0xff]  }
  0x71   : > { %v1494_v30 = vld [vmem:[%s1927_s6 + $0x114] ss:$8 sps:$4 sm:$0xff]   ;;  %v1497_v32 = vld [vmem:[%s1927_s6 + $0x110] ss:$8 sps:$4 sm:$0xff]   ;;  %v1500_v34 = vld [vmem:[%s1927_s6 + $0x104] ss:$8 sps:$4 sm:$0xff]  }
  0x72   : > { %980 = vmatpush1.bf16.msra.mxu0 %v1472_v15  ;;  %v1502_v35 = vld [vmem:[%s1927_s6] ss:$8 sps:$4 sm:$0xff]   ;;  %v1504_v37 = vld [vmem:[%s1927_s6 + $0xf4] ss:$8 sps:$4 sm:$0xff]   ;;  %v1508_v39 = vld [vmem:[%s1927_s6 + $0xf0] ss:$8 sps:$4 sm:$0xff]  }
  0x73   : > { %1023 = vmatpush1.bf16.msra.mxu1 %v1473_v16  ;;  %981 = vmatprep.subr.bf16.mxu0 %v1474_v17  ;;  %v1503_v36 = vld [vmem:[%s1927_s6 + $0x100] ss:$8 sps:$4 sm:$0xff]   ;;  %v1506_v38 = vld [vmem:[%s1927_s6 + $0x1f4] ss:$8 sps:$4 sm:$0xff]   ;;  %v1509_v40 = vld [vmem:[%s1927_s6 + $0x1f0] ss:$8 sps:$4 sm:$0xff]  }
  0x74   : > { %1024 = vmatprep.subr.bf16.mxu1 %v1476_v18  ;;  %v1510_v41 = vld [vmem:[%s1927_s6 + $0xe4] ss:$8 sps:$4 sm:$0xff]   ;;  %v1514_v43 = vld [vmem:[%s1927_s6 + $0xe0] ss:$8 sps:$4 sm:$0xff]   ;;  %v1516_v45 = vld [vmem:[%s1927_s6 + $0xd4] ss:$8 sps:$4 sm:$0xff]  }
  0x75   : > { %v1512_v42 = vld [vmem:[%s1927_s6 + $0x1e4] ss:$8 sps:$4 sm:$0xff]   ;;  %v1515_v44 = vld [vmem:[%s1927_s6 + $0x1e0] ss:$8 sps:$4 sm:$0xff]   ;;  %v1518_v46 = vld [vmem:[%s1927_s6 + $0x1d4] ss:$8 sps:$4 sm:$0xff]  }
  0x76   : > { %982 = vmatpush1.bf16.msra.mxu0 %v1478_v19  ;;  %v1520_v47 = vld [vmem:[%s1927_s6 + $0xd0] ss:$8 sps:$4 sm:$0xff]   ;;  %v1522_v49 = vld [vmem:[%s1927_s6 + $0xc4] ss:$8 sps:$4 sm:$0xff]   ;;  %v1526_v51 = vld [vmem:[%s1927_s6 + $0xc0] ss:$8 sps:$4 sm:$0xff]  }
  0x77   : > { %1025 = vmatpush1.bf16.msra.mxu1 %v1479_v20  ;;  %983 = vmatprep.subr.bf16.mxu0 %v1480_v21  ;;  %v1521_v48 = vld [vmem:[%s1927_s6 + $0x1d0] ss:$8 sps:$4 sm:$0xff]   ;;  %v1524_v50 = vld [vmem:[%s1927_s6 + $0x1c4] ss:$8 sps:$4 sm:$0xff]   ;;  %v1527_v53 = vld [vmem:[%s1927_s6 + $0x1c0] ss:$8 sps:$4 sm:$0xff]  }
  0x78   : > { %1026 = vmatprep.subr.bf16.mxu1 %v1482_v22  ;;  %v1554_v52 = vld [vmem:[%s1925_s27 + $0x4] ss:$16 sps:$4 sm:$0xff]   ;;  %v1557_v56 = vld [vmem:[%s1925_s27 + $0xc] ss:$16 sps:$4 sm:$0xff]   ;;  %v1532_v57 = vld [vmem:[%s1927_s6 + $0xb0] ss:$8 sps:$4 sm:$0xff]  }
  0x79   : > { %v1528_v54 = vld [vmem:[%s1927_s6 + $0xb4] ss:$8 sps:$4 sm:$0xff]   ;;  %1007 = vmatprep.mubr.bf16.mxu0 %v1554_v52  ;;  %1050 = vmatprep.mubr.bf16.mxu1 %v1557_v56  ;;  %v1533_v58 = vld [vmem:[%s1927_s6 + $0x1b0] ss:$8 sps:$4 sm:$0xff]   ;;  %v1534_v59 = vld [vmem:[%s1927_s6 + $0xa4] ss:$8 sps:$4 sm:$0xff]  }
  0x7a   : > { %984 = vmatpush1.bf16.msra.mxu0 %v1484_v23  ;;  %v1530_v55 = vld [vmem:[%s1927_s6 + $0x1b4] ss:$8 sps:$4 sm:$0xff]   ;;  %v1536_v60 = vld [vmem:[%s1927_s6 + $0x1a4] ss:$8 sps:$4 sm:$0xff]   ;;  %v1538_v61 = vld [vmem:[%s1927_s6 + $0xa0] ss:$8 sps:$4 sm:$0xff]  }
  0x7b   : > { %1027 = vmatpush1.bf16.msra.mxu1 %v1485_v24  ;;  %985 = vmatprep.subr.bf16.mxu0 %v1486_v25  ;;  %v1539_v62 = vld [vmem:[%s1927_s6 + $0x1a0] ss:$8 sps:$4 sm:$0xff]   ;;  %v1540_v63 = vld [vmem:[%s1927_s6 + $0x94] ss:$8 sps:$4 sm:$0xff]   ;;  %v1544_v1 = vld [vmem:[%s1927_s6 + $0x90] ss:$8 sps:$4 sm:$0xff]  }
  0x7c   : > { %1028 = vmatprep.subr.bf16.mxu1 %v1488_v26  ;;  %v1542_v0 = vld [vmem:[%s1927_s6 + $0x194] ss:$8 sps:$4 sm:$0xff]   ;;  %v1545_v2 = vld [vmem:[%s1927_s6 + $0x190] ss:$8 sps:$4 sm:$0xff]   ;;  %v1546_v3 = vld [vmem:[%s1927_s6 + $0x84] ss:$8 sps:$4 sm:$0xff]  }
  0x7d   : > { %v1548_v4 = vld [vmem:[%s1927_s6 + $0x184] ss:$8 sps:$4 sm:$0xff]   ;;  %v1550_v5 = vld [vmem:[%s1927_s6 + $0x80] ss:$8 sps:$4 sm:$0xff]   ;;  %v563_v10 = vld [vmem:[#allocation2 + $0x10] sm:$0xff]  ;;  %p1354_p5 = scmp.ne.s32.totalorder %s1628_s18, 8 }
  0x7e   : > { %986 = vmatpush1.bf16.msra.mxu0 %v1490_v27  ;;  %v1551_v6 = vld [vmem:[%s1927_s6 + $0x180] ss:$8 sps:$4 sm:$0xff]   ;;  %v565_v19 = vld [vmem:[#allocation2 + $0x18] sm:$0xff] }
  0x7f   : > { %1029 = vmatpush1.bf16.msra.mxu1 %v1491_v28  ;;  %987 = vmatprep.subr.bf16.mxu0 %v1492_v29  ;;  %v1552_v7 = vld [vmem:[%s1925_s27] ss:$16 sps:$4 sm:$0xff]   ;;  %v1555_v8 = vld [vmem:[%s1925_s27 + $0x8] ss:$16 sps:$4 sm:$0xff]  }
  0x80   : > { %1030 = vmatprep.subr.bf16.mxu1 %v1494_v30  ;;  %v564_v14 = vld [vmem:[#allocation2] sm:$0xff]  ;;  %v566_v24 = vld [vmem:[#allocation2 + $0x8] sm:$0xff] }
  0x82   : > { %988 = vmatpush1.bf16.msra.mxu0 %v1496_v31 }
  0x83   : > { %1031 = vmatpush1.bf16.msra.mxu1 %v1497_v32  ;;  %989 = vmatprep.subr.bf16.mxu0 %v1498_v33 }
  0x84   : > { %1032 = vmatprep.subr.bf16.mxu1 %v1500_v34 }
  0x86   : > { %990 = vmatpush1.bf16.msra.mxu0 %v1502_v35 }
  0x87   : > { %1033 = vmatpush1.bf16.msra.mxu1 %v1503_v36  ;;  %991 = vmatprep.subr.bf16.mxu0 %v1504_v37 }
  0x88   : > { %1034 = vmatprep.subr.bf16.mxu1 %v1506_v38 }
  0x8a   : > { %992 = vmatpush2.bf16.msra.mxu0 %v1508_v39 }
  0x8b   : > { %1035 = vmatpush2.bf16.msra.mxu1 %v1509_v40  ;;  %993 = vmatprep.subr.bf16.mxu0 %v1510_v41 }
  0x8c   : > { %1036 = vmatprep.subr.bf16.mxu1 %v1512_v42 }
  0x8e   : > { %994 = vmatpush2.bf16.msra.mxu0 %v1514_v43 }
  0x8f   : > { %1037 = vmatpush2.bf16.msra.mxu1 %v1515_v44  ;;  %995 = vmatprep.subr.bf16.mxu0 %v1516_v45 }
  0x90   : > { %1038 = vmatprep.subr.bf16.mxu1 %v1518_v46 }
  0x92   : > { %996 = vmatpush2.bf16.msra.mxu0 %v1520_v47 }
  0x93   : > { %1039 = vmatpush2.bf16.msra.mxu1 %v1521_v48  ;;  %997 = vmatprep.subr.bf16.mxu0 %v1522_v49 }
  0x94   : > { %1040 = vmatprep.subr.bf16.mxu1 %v1524_v50 }
  0x96   : > { %998 = vmatpush2.bf16.msra.mxu0 %v1526_v51 }
  0x97   : > { %1041 = vmatpush2.bf16.msra.mxu1 %v1527_v53  ;;  %999 = vmatprep.subr.bf16.mxu0 %v1528_v54 }
  0x98   : > { %1042 = vmatprep.subr.bf16.mxu1 %v1530_v55 }
  0x9a   : > { %1000 = vmatpush2.bf16.msra.mxu0 %v1532_v57 }
  0x9b   : > { %1043 = vmatpush2.bf16.msra.mxu1 %v1533_v58  ;;  %1001 = vmatprep.subr.bf16.mxu0 %v1534_v59 }
  0x9c   : > { %1044 = vmatprep.subr.bf16.mxu1 %v1536_v60 }
  0x9e   : > { %1002 = vmatpush2.bf16.msra.mxu0 %v1538_v61 }
  0x9f   : > { %1045 = vmatpush2.bf16.msra.mxu1 %v1539_v62  ;;  %1003 = vmatprep.subr.bf16.mxu0 %v1540_v63 }
  0xa0   : > { %1046 = vmatprep.subr.bf16.mxu1 %v1542_v0 }
  0xa2   : > { %1004 = vmatpush2.bf16.msra.mxu0 %v1544_v1 }
  0xa3   : > { %1047 = vmatpush2.bf16.msra.mxu1 %v1545_v2  ;;  %1005 = vmatprep.subr.bf16.mxu0 %v1546_v3 }
  0xa4   : > { %1048 = vmatprep.subr.bf16.mxu1 %v1548_v4 }
  0xa6   : > { %1006 = vmatpush2.bf16.msra.mxu0 %v1550_v5 }
  0xa7   : > { %1049 = vmatpush2.bf16.msra.mxu1 %v1551_v6 }
  0xa9   : > { %1008 = vmatmul.mubr.bf16.vlgmr.msra.gmra.mxu0 %v1552_v7 }
  0xaa   : > { %1051 = vmatmul.mubr.bf16.vlgmr.msra.gmra.mxu1 %v1555_v8 }
 0x169   : > { %v1009_v9 = vpop.f32.mrf.mxu0 }
 0x16a   : > { %v1052_v11 = vpop.f32.mrf.mxu1 }
 0x16b   : > { %v1053_v12 = vadd.f32 %v1052_v11, %v1009_v9  ;;  %v1011_v13 = vpop.f32.mrf.mxu0 }
 0x16c   : > { %v1054_v15 = vpop.f32.mrf.mxu1 }
 0x16d   : > { %v1061_v16 = vadd.f32 %v1053_v12, %v563_v10  ;;  %v1055_v17 = vadd.f32 %v1054_v15, %v1011_v13  ;;  %v1013_v18 = vpop.f32.mrf.mxu0 }
 0x16e   : > { %v1056_v20 = vpop.f32.mrf.mxu1 }
 0x16f   : > { %1065 = vst [vmem:[#allocation2 + $0x10] sm:$0xff] %v1061_v16  ;;  %v1062_v21 = vadd.f32 %v1055_v17, %v564_v14  ;;  %v1057_v22 = vadd.f32 %v1056_v20, %v1013_v18  ;;  %v1015_v23 = vpop.f32.mrf.mxu0 }
 0x170   : > { %v1058_v25 = vpop.f32.mrf.mxu1 }
 0x171   : > { %1066 = vst [vmem:[#allocation2] sm:$0xff] %v1062_v21  ;;  %v1063_v26 = vadd.f32 %v1057_v22, %v565_v19  ;;  %v1059_v27 = vadd.f32 %v1058_v25, %v1015_v23  ;;  %1072 = sbr.rel (%p1354_p5) target bundleno = 389 (0x185), region = 101 }
 0x173   : > { %1067 = vst [vmem:[#allocation2 + $0x18] sm:$0xff] %v1063_v26  ;;  %v1064_v28 = vadd.f32 %v1059_v27, %v566_v24 }
 0x175   : > { %1068 = vst [vmem:[#allocation2 + $0x8] sm:$0xff] %v1064_v28 }
 0x176   : > { %v1079_v29 = vlaneseq  ;;  %v1077_v31 = vld [vmem:[%s551_s4] sm:$0x3]  ;;  %v1073_v32 = vld [vmem:[#allocation2 + $0x10] sm:$0xff] }
 0x178   : > { %v1080_v30 = vshrl.u32 %v1079_v29, 7  ;;  %v1074_v35 = vld [vmem:[#allocation2] sm:$0xff] }
 0x17a   : > { %v1081_v33 = vsub.s32 0, %v1080_v30  ;;  %v1085_v34 = vsub.s32 1, %v1080_v30  ;;  %v1075_v36 = vld [vmem:[#allocation2 + $0x18] sm:$0xff] }
 0x17c   : > { %v1076_v37 = vld [vmem:[#allocation2 + $0x8] sm:$0xff]  ;;  %v1082_v38 = vrot.slane %v1077_v31, %v1081_v33  ;;  %v1086_v39 = vrot.slane %v1077_v31, %v1085_v34 }
 0x17e   : > { %v1089_v40 = vadd.f32 %v1082_v38, %v1073_v32  ;;  %v1090_v41 = vadd.f32 %v1086_v39, %v1074_v35  ;;  %v1091_v42 = vadd.f32 %v1082_v38, %v1075_v36  ;;  %v1092_v43 = vadd.f32 %v1086_v39, %v1076_v37 }
 0x180   : > { %v1093_v44 = vmax.f32 %v1089_v40, 0.0  ;;  %v1094_v45 = vmax.f32 %v1090_v41, 0.0  ;;  %v1095_v46 = vmax.f32 %v1091_v42, 0.0  ;;  %v1096_v47 = vmax.f32 %v1092_v43, 0.0 }
 0x182   : > { %v1364_v48 = vpack.c.bf16 %v1094_v45, %v1093_v44  ;;  %v1365_v49 = vpack.c.bf16 %v1096_v47, %v1095_v46 }
 0x184   : > { %1109 = vst [vmem:[%s1929_s1] sm:$0xff] %v1364_v48  ;;  %1110 = vst [vmem:[%s1929_s1 + $0x8] sm:$0xff] %v1365_v49 }
 0x185 PF: > { %1117 = sbr.rel (!%p1761_p12) target bundleno = 397 (0x18d), region = 105  ;;  %s1366_s16 = sshll.u32 (%p1761_p12), %s1632_s19, 3 }
 0x186   : > { %s1123_s5 = scalar_lea.vmem (%p1761_p12), %s2052_s3, %s1366_s16 }
 0x18b   : > { %v1154_v50 = vld [vmem:[%s1929_s1] sm:$0xff]  ;;  %v1156_v51 = vld [vmem:[%s1929_s1 + $0x8] sm:$0xff] }
 0x18c   : > { %1155 = vst [vmem:[%s1123_s5] sm:$0xff] %v1154_v50  ;;  %1157 = vst [vmem:[%s1123_s5 + $0x10] sm:$0xff] %v1156_v51 }
 0x18d PF: > { %s13_s22 = sadd.s32 1, %s1644_s22   ;;  %s2062_s1 = sld [smem:[#allocation6_spill]] }
 0x18e   : > { %p10_p6 = scmp.ge.s32.totalorder %s13_s22, 20   ;;  %s2063_s12 = smov %s1608_s13 }
 0x18f   : > { %s2064_s13 = smov %s1759_s9  ;;  %s2065_s14 = smov %s1616_s15 }
 0x190   : > { %s2066_s15 = smov %s1756_s8  ;;  %s2067_s16 = smov %s1624_s17 }
 0x191   : > { %s2068_s17 = smov %s1742_s30  ;;  %s2069_s18 = smov %s1636_s20 }
 0x192   : > { %s2070_s19 = smov %s1640_s21  ;;  %s2071_s20 = smov %s2074_s24 }
 0x193   : > { %s2072_s21 = smov %s2062_s1  ;;  %12 = sbr.rel (!%p10_p6) target bundleno = 9 (0x9), region = 185 }

// kernel: quantized_resnet18_forward.43
= control target key start
LH: loop header
LB: loop body
LE: loop exit
PB: predicated region body
PF: predicated region fallthrough
CT: control target
= control target key end

     0   :  { %s2209_s0 = inlined_call_operand.vmem [shape: bf16[16,4608], index: 0, kind: input, shape index: {}]   ;;  %s2210_s1 = inlined_call_operand.vmem [shape: bf16[4608,512], index: 1, kind: input, shape index: {}]   ;;  %s2211_s2 = inlined_call_operand.vmem [shape: f32[1,512], index: 2, kind: input, shape index: {}]   ;;  %s2212_s3 = inlined_call_operand.vmem [shape: bf16[16,512], index: 3, kind: input, shape index: {}]   ;;  %s2213_s4 = inlined_call_operand.vmem [shape: bf16[16,512], index: 4, kind: output, shape index: {}]  }
   0x1   :  { %2216 = sst [smem:[#allocation10_spill]] %s2209_s0 }
   0x2   :  { %s1802_s15 = smov 0   ;;  %s1804_s16 = smov 0  }
   0x3   :  { %s1806_s17 = smov 0   ;;  %s1808_s18 = smov 0  }
   0x4   :  { %s1810_s19 = smov 0   ;;  %s1812_s20 = smov 0  }
   0x5   :  { %s1814_s21 = smov 0   ;;  %s1816_s22 = smov 0  }
   0x6   :  { %s1818_s23 = smov 0   ;;  %s1820_s24 = smov 0  }
   0x7   :  { %s1822_s25 = smov 0  }
   0x8 LB: > { %s1393_s26 = sadd.s32 4294967295, %s1774_s25   ;;  %s26_s27 = sadd.s32 1, %s1766_s23  ;;  %s1774_s25 = sphi %s1822_s25, %s14_s25   ;;  %s1770_s24 = sphi %s1820_s24, %s2237_s24   ;;  %s1766_s23 = sphi %s1818_s23, %s2236_s23   ;;  %s1762_s22 = sphi %s1816_s22, %s2235_s22   ;;  %s1758_s21 = sphi %s1814_s21, %s2234_s21   ;;  %s1754_s20 = sphi %s1812_s20, %s2233_s20   ;;  %s1750_s19 = sphi %s1810_s19, %s2232_s19   ;;  %s1746_s18 = sphi %s1808_s18, %s2231_s18   ;;  %s1742_s17 = sphi %s1806_s17, %s2230_s17   ;;  %s1738_s16 = sphi %s1804_s16, %s2229_s16   ;;  %s1734_s15 = sphi %s1802_s15, %s2228_s15  }
   0x9   : > { %p27_p0 = scmp.ge.s32.totalorder %s26_s27, 9  ;;  %s29_s28 = sadd.s32 1, %s1770_s24 }
   0xa   : > { %s42_s29 = sadd.s32 1, %s1754_s20  ;;  %p49_p1 = scmp.ne.s32.totalorder %s1754_s20, %s1750_s19 }
   0xb   : > { %s2239_s27 = smov (%p27_p0, %s26_s27), 0  ;;  %s2241_s28 = smov (!%p27_p0, %s29_s28), %s1770_s24 }
   0xc   : > { %2217 = sst [smem:[#allocation7_spill]] %s2239_s27  ;;  %s38_s30 = ssub.s32 %s1766_s23, %s2239_s27 }
   0xd   : > { %p50_p2 = scmp.eq.s32.totalorder %s1774_s25, 0  ;;  %p31_p3 = scmp.ge.s32.totalorder %s2241_s28, 2 }
   0xe   : > { %p40_p4 = scmp.eq.s32.totalorder %s38_s30, 0  ;;  %s70_s6 = sadd.s32 1, %s1746_s18 }
   0xf   : > { %p1871_p5 = por %p50_p2, %p49_p1  ;;  %s2243_s28 = smov (%p31_p3, %s2241_s28), 0 }
  0x10   : > { %2219 = sst [smem:[#allocation8_spill]] %s2243_s28  ;;  %s66_s8 = ssub.s32 %s1770_s24, %s2243_s28 }
  0x11   : > { %s1879_s7 = scalar_select %p40_p4, %s1754_s20, %s42_s29  }
  0x12   : > { %p77_p6 = scmp.ne.s32.totalorder %s1746_s18, %s1742_s17  ;;  %s67_s9 = sor.u32 %s66_s8, %s38_s30 }
  0x13   : > { %2220 = sst [smem:[#allocation9_spill]] %s1879_s7  ;;  %p122_p7 = scmp.eq.s32.totalorder %s66_s8, 0 }
  0x14   : > { %p68_p8 = scmp.eq.s32.totalorder %s67_s9, 0  ;;  %p1887_p9 = por %p77_p6, %p50_p2 }
  0x15   : > { %s124_s11 = sadd.s32 1, %s1738_s16  ;;  %p131_p10 = scmp.ne.s32.totalorder %s1738_s16, %s1734_s15 }
  0x16   : > { %s1895_s12 = scalar_select %p68_p8, %s1746_s18, %s70_s6  }
  0x17   : > { %s1898_s13 = scalar_select %p122_p7, %s1738_s16, %s124_s11  }
  0x18   : > { %p1902_p11 = por %p131_p10, %p50_p2  ;;  %p163_p12 = scmp.eq.s32.totalorder %s1393_s26, 17 }
  0x19   : > { %p1396_p0 = scmp.ge.s32.totalorder %s1774_s25, 18 }
  0x1a   : > { %p1906_p13 = por %p163_p12, %p131_p10 }
  0x1b   : > { %185 = sbr.rel (%p1396_p0) target bundleno = 88 (0x58), region = 16 }
  0x20   : > { %188 = sbr.rel (!%p1871_p5) target bundleno = 44 (0x2c), region = 20  ;;  %s190_s30 = sand.u32 (%p1871_p5), 1, %s1754_s20  }
  0x21   : > { %s1491_s6 = sshll.u32 (%p1871_p5), %s1766_s23, 4  ;;  %s1397_s8 = sshll.u32 (%p1871_p5), %s190_s30, 5 }
  0x22   : > { %s2224_s0 = sld [smem:[#allocation10_spill]] (%p1871_p5)  ;;  %s192_s26 = scalar_lea.vmem (%p1871_p5), [#allocation3], %s1397_s8 }
  0x28   : > { %s198_s28 = scalar_lea.vmem %s2224_s0, %s1491_s6 }
  0x29   : > { %v211_v0 = vld [vmem:[%s198_s28] sm:$0xff]  ;;  %v213_v1 = vld [vmem:[%s198_s28 + $0x8] sm:$0xff]  ;;  %v215_v2 = vld [vmem:[%s198_s28 + $0x90] sm:$0xff] }
  0x2a   : > { %212 = vst [vmem:[%s192_s26] sm:$0xff] %v211_v0  ;;  %214 = vst [vmem:[%s192_s26 + $0x8] sm:$0xff] %v213_v1  ;;  %v217_v3 = vld [vmem:[%s198_s28 + $0x98] sm:$0xff] }
  0x2b   : > { %216 = vst [vmem:[%s192_s26 + $0x10] sm:$0xff] %v215_v2  ;;  %218 = vst [vmem:[%s192_s26 + $0x18] sm:$0xff] %v217_v3 }
  0x2c PF: > { %224 = sbr.rel (!%p1887_p9) target bundleno = 83 (0x53), region = 43  ;;  %s226_s5 = sand.u32 (%p1887_p9), 1, %s1746_s18  }
  0x2d   : > { %s1402_s30 = sshll.u32 (%p1887_p9), %s1770_s24, 1  ;;  %s1400_s9 = sshll.u32 (%p1887_p9), %s226_s5, 9 }
  0x2e   : > { %s1492_s6 = sshll.u32 (%p1887_p9), %s1766_s23, 8  ;;  %s1931_s28 = scalar_lea.vmem (%p1887_p9), [#allocation4], %s1400_s9 }
  0x2f   : > { %s232_s11 = sadd.s32 (%p1887_p9), %s1492_s6, %s1402_s30 }
  0x30   : > { %s1404_s0 = sshll.u32 (%p1887_p9), %s232_s11, 2 }
  0x31   : > { %s1926_s7 = scalar_lea.vmem %s2210_s1, %s1404_s0 }
  0x32   : > { %v389_v4 = vld [vmem:[%s1926_s7] sm:$0xff]  ;;  %v391_v5 = vld [vmem:[%s1926_s7 + $0x10] sm:$0xff] }
  0x33   : > { %v393_v6 = vld [vmem:[%s1926_s7 + $0x20] sm:$0xff]  ;;  %390 = vst [vmem:[%s1931_s28] sm:$0xff] %v389_v4  ;;  %392 = vst [vmem:[%s1931_s28 + $0x8] sm:$0xff] %v391_v5  ;;  %v395_v7 = vld [vmem:[%s1926_s7 + $0x30] sm:$0xff] }
  0x34   : > { %394 = vst [vmem:[%s1931_s28 + $0x10] sm:$0xff] %v393_v6  ;;  %v397_v8 = vld [vmem:[%s1926_s7 + $0x40] sm:$0xff]  ;;  %v399_v9 = vld [vmem:[%s1926_s7 + $0x50] sm:$0xff]  ;;  %396 = vst [vmem:[%s1931_s28 + $0x18] sm:$0xff] %v395_v7 }
  0x35   : > { %398 = vst [vmem:[%s1931_s28 + $0x20] sm:$0xff] %v397_v8  ;;  %400 = vst [vmem:[%s1931_s28 + $0x28] sm:$0xff] %v399_v9  ;;  %v401_v10 = vld [vmem:[%s1926_s7 + $0x60] sm:$0xff]  ;;  %v403_v11 = vld [vmem:[%s1926_s7 + $0x70] sm:$0xff] }
  0x36   : > { %v405_v12 = vld [vmem:[%s1926_s7 + $0x80] sm:$0xff]  ;;  %402 = vst [vmem:[%s1931_s28 + $0x30] sm:$0xff] %v401_v10  ;;  %404 = vst [vmem:[%s1931_s28 + $0x38] sm:$0xff] %v403_v11  ;;  %v407_v13 = vld [vmem:[%s1926_s7 + $0x90] sm:$0xff] }
  0x37   : > { %406 = vst [vmem:[%s1931_s28 + $0x40] sm:$0xff] %v405_v12  ;;  %v409_v14 = vld [vmem:[%s1926_s7 + $0xa0] sm:$0xff]  ;;  %v411_v15 = vld [vmem:[%s1926_s7 + $0xb0] sm:$0xff]  ;;  %408 = vst [vmem:[%s1931_s28 + $0x48] sm:$0xff] %v407_v13 }
  0x38   : > { %410 = vst [vmem:[%s1931_s28 + $0x50] sm:$0xff] %v409_v14  ;;  %412 = vst [vmem:[%s1931_s28 + $0x58] sm:$0xff] %v411_v15  ;;  %v413_v16 = vld [vmem:[%s1926_s7 + $0xc0] sm:$0xff]  ;;  %v415_v17 = vld [vmem:[%s1926_s7 + $0xd0] sm:$0xff] }
  0x39   : > { %v417_v18 = vld [vmem:[%s1926_s7 + $0xe0] sm:$0xff]  ;;  %414 = vst [vmem:[%s1931_s28 + $0x60] sm:$0xff] %v413_v16  ;;  %416 = vst [vmem:[%s1931_s28 + $0x68] sm:$0xff] %v415_v17  ;;  %v419_v19 = vld [vmem:[%s1926_s7 + $0xf0] sm:$0xff] }
  0x3a   : > { %418 = vst [vmem:[%s1931_s28 + $0x70] sm:$0xff] %v417_v18  ;;  %v421_v20 = vld [vmem:[%s1926_s7 + $0x100] sm:$0xff]  ;;  %v423_v21 = vld [vmem:[%s1926_s7 + $0x110] sm:$0xff]  ;;  %420 = vst [vmem:[%s1931_s28 + $0x78] sm:$0xff] %v419_v19 }
  0x3b   : > { %422 = vst [vmem:[%s1931_s28 + $0x80] sm:$0xff] %v421_v20  ;;  %424 = vst [vmem:[%s1931_s28 + $0x88] sm:$0xff] %v423_v21  ;;  %v425_v22 = vld [vmem:[%s1926_s7 + $0x120] sm:$0xff]  ;;  %v427_v23 = vld [vmem:[%s1926_s7 + $0x130] sm:$0xff] }
  0x3c   : > { %v429_v24 = vld [vmem:[%s1926_s7 + $0x140] sm:$0xff]  ;;  %426 = vst [vmem:[%s1931_s28 + $0x90] sm:$0xff] %v425_v22  ;;  %428 = vst [vmem:[%s1931_s28 + $0x98] sm:$0xff] %v427_v23  ;;  %v431_v25 = vld [vmem:[%s1926_s7 + $0x150] sm:$0xff] }
  0x3d   : > { %430 = vst [vmem:[%s1931_s28 + $0xa0] sm:$0xff] %v429_v24  ;;  %v433_v26 = vld [vmem:[%s1926_s7 + $0x160] sm:$0xff]  ;;  %v435_v27 = vld [vmem:[%s1926_s7 + $0x170] sm:$0xff]  ;;  %432 = vst [vmem:[%s1931_s28 + $0xa8] sm:$0xff] %v431_v25 }
  0x3e   : > { %434 = vst [vmem:[%s1931_s28 + $0xb0] sm:$0xff] %v433_v26  ;;  %436 = vst [vmem:[%s1931_s28 + $0xb8] sm:$0xff] %v435_v27  ;;  %v437_v28 = vld [vmem:[%s1926_s7 + $0x180] sm:$0xff]  ;;  %v439_v29 = vld [vmem:[%s1926_s7 + $0x190] sm:$0xff] }
  0x3f   : > { %v441_v30 = vld [vmem:[%s1926_s7 + $0x1a0] sm:$0xff]  ;;  %438 = vst [vmem:[%s1931_s28 + $0xc0] sm:$0xff] %v437_v28  ;;  %440 = vst [vmem:[%s1931_s28 + $0xc8] sm:$0xff] %v439_v29  ;;  %v443_v31 = vld [vmem:[%s1926_s7 + $0x1b0] sm:$0xff] }
  0x40   : > { %442 = vst [vmem:[%s1931_s28 + $0xd0] sm:$0xff] %v441_v30  ;;  %v445_v32 = vld [vmem:[%s1926_s7 + $0x1c0] sm:$0xff]  ;;  %v447_v33 = vld [vmem:[%s1926_s7 + $0x1d0] sm:$0xff]  ;;  %444 = vst [vmem:[%s1931_s28 + $0xd8] sm:$0xff] %v443_v31 }
  0x41   : > { %446 = vst [vmem:[%s1931_s28 + $0xe0] sm:$0xff] %v445_v32  ;;  %448 = vst [vmem:[%s1931_s28 + $0xe8] sm:$0xff] %v447_v33  ;;  %v449_v34 = vld [vmem:[%s1926_s7 + $0x1e0] sm:$0xff]  ;;  %v451_v35 = vld [vmem:[%s1926_s7 + $0x1f0] sm:$0xff] }
  0x42   : > { %v453_v36 = vld [vmem:[%s1926_s7 + $0x200] sm:$0xff]  ;;  %450 = vst [vmem:[%s1931_s28 + $0xf0] sm:$0xff] %v449_v34  ;;  %452 = vst [vmem:[%s1931_s28 + $0xf8] sm:$0xff] %v451_v35  ;;  %v455_v37 = vld [vmem:[%s1926_s7 + $0x210] sm:$0xff] }
  0x43   : > { %454 = vst [vmem:[%s1931_s28 + $0x100] sm:$0xff] %v453_v36  ;;  %v457_v38 = vld [vmem:[%s1926_s7 + $0x220] sm:$0xff]  ;;  %v459_v39 = vld [vmem:[%s1926_s7 + $0x230] sm:$0xff]  ;;  %456 = vst [vmem:[%s1931_s28 + $0x108] sm:$0xff] %v455_v37 }
  0x44   : > { %458 = vst [vmem:[%s1931_s28 + $0x110] sm:$0xff] %v457_v38  ;;  %460 = vst [vmem:[%s1931_s28 + $0x118] sm:$0xff] %v459_v39  ;;  %v461_v40 = vld [vmem:[%s1926_s7 + $0x240] sm:$0xff]  ;;  %v463_v41 = vld [vmem:[%s1926_s7 + $0x250] sm:$0xff] }
  0x45   : > { %v465_v42 = vld [vmem:[%s1926_s7 + $0x260] sm:$0xff]  ;;  %462 = vst [vmem:[%s1931_s28 + $0x120] sm:$0xff] %v461_v40  ;;  %464 = vst [vmem:[%s1931_s28 + $0x128] sm:$0xff] %v463_v41  ;;  %v467_v43 = vld [vmem:[%s1926_s7 + $0x270] sm:$0xff] }
  0x46   : > { %466 = vst [vmem:[%s1931_s28 + $0x130] sm:$0xff] %v465_v42  ;;  %v469_v44 = vld [vmem:[%s1926_s7 + $0x280] sm:$0xff]  ;;  %v471_v45 = vld [vmem:[%s1926_s7 + $0x290] sm:$0xff]  ;;  %468 = vst [vmem:[%s1931_s28 + $0x138] sm:$0xff] %v467_v43 }
  0x47   : > { %470 = vst [vmem:[%s1931_s28 + $0x140] sm:$0xff] %v469_v44  ;;  %472 = vst [vmem:[%s1931_s28 + $0x148] sm:$0xff] %v471_v45  ;;  %v473_v46 = vld [vmem:[%s1926_s7 + $0x2a0] sm:$0xff]  ;;  %v475_v47 = vld [vmem:[%s1926_s7 + $0x2b0] sm:$0xff] }
  0x48   : > { %v477_v48 = vld [vmem:[%s1926_s7 + $0x2c0] sm:$0xff]  ;;  %474 = vst [vmem:[%s1931_s28 + $0x150] sm:$0xff] %v473_v46  ;;  %476 = vst [vmem:[%s1931_s28 + $0x158] sm:$0xff] %v475_v47  ;;  %v479_v49 = vld [vmem:[%s1926_s7 + $0x2d0] sm:$0xff] }
  0x49   : > { %478 = vst [vmem:[%s1931_s28 + $0x160] sm:$0xff] %v477_v48  ;;  %v481_v50 = vld [vmem:[%s1926_s7 + $0x2e0] sm:$0xff]  ;;  %v483_v51 = vld [vmem:[%s1926_s7 + $0x2f0] sm:$0xff]  ;;  %480 = vst [vmem:[%s1931_s28 + $0x168] sm:$0xff] %v479_v49 }
  0x4a   : > { %482 = vst [vmem:[%s1931_s28 + $0x170] sm:$0xff] %v481_v50  ;;  %484 = vst [vmem:[%s1931_s28 + $0x178] sm:$0xff] %v483_v51  ;;  %v485_v52 = vld [vmem:[%s1926_s7 + $0x300] sm:$0xff]  ;;  %v487_v53 = vld [vmem:[%s1926_s7 + $0x310] sm:$0xff] }
  0x4b   : > { %v489_v54 = vld [vmem:[%s1926_s7 + $0x320] sm:$0xff]  ;;  %486 = vst [vmem:[%s1931_s28 + $0x180] sm:$0xff] %v485_v52  ;;  %488 = vst [vmem:[%s1931_s28 + $0x188] sm:$0xff] %v487_v53  ;;  %v491_v55 = vld [vmem:[%s1926_s7 + $0x330] sm:$0xff] }
  0x4c   : > { %490 = vst [vmem:[%s1931_s28 + $0x190] sm:$0xff] %v489_v54  ;;  %v493_v56 = vld [vmem:[%s1926_s7 + $0x340] sm:$0xff]  ;;  %v495_v57 = vld [vmem:[%s1926_s7 + $0x350] sm:$0xff]  ;;  %492 = vst [vmem:[%s1931_s28 + $0x198] sm:$0xff] %v491_v55 }
  0x4d   : > { %494 = vst [vmem:[%s1931_s28 + $0x1a0] sm:$0xff] %v493_v56  ;;  %496 = vst [vmem:[%s1931_s28 + $0x1a8] sm:$0xff] %v495_v57  ;;  %v497_v58 = vld [vmem:[%s1926_s7 + $0x360] sm:$0xff]  ;;  %v499_v59 = vld [vmem:[%s1926_s7 + $0x370] sm:$0xff] }
  0x4e   : > { %v501_v60 = vld [vmem:[%s1926_s7 + $0x380] sm:$0xff]  ;;  %498 = vst [vmem:[%s1931_s28 + $0x1b0] sm:$0xff] %v497_v58  ;;  %500 = vst [vmem:[%s1931_s28 + $0x1b8] sm:$0xff] %v499_v59  ;;  %v503_v61 = vld [vmem:[%s1926_s7 + $0x390] sm:$0xff] }
  0x4f   : > { %502 = vst [vmem:[%s1931_s28 + $0x1c0] sm:$0xff] %v501_v60  ;;  %v505_v62 = vld [vmem:[%s1926_s7 + $0x3a0] sm:$0xff]  ;;  %v507_v63 = vld [vmem:[%s1926_s7 + $0x3b0] sm:$0xff]  ;;  %504 = vst [vmem:[%s1931_s28 + $0x1c8] sm:$0xff] %v503_v61 }
  0x50   : > { %506 = vst [vmem:[%s1931_s28 + $0x1d0] sm:$0xff] %v505_v62  ;;  %508 = vst [vmem:[%s1931_s28 + $0x1d8] sm:$0xff] %v507_v63  ;;  %v509_v0 = vld [vmem:[%s1926_s7 + $0x3c0] sm:$0xff]  ;;  %v511_v1 = vld [vmem:[%s1926_s7 + $0x3d0] sm:$0xff] }
  0x51   : > { %v513_v2 = vld [vmem:[%s1926_s7 + $0x3e0] sm:$0xff]  ;;  %510 = vst [vmem:[%s1931_s28 + $0x1e0] sm:$0xff] %v509_v0  ;;  %512 = vst [vmem:[%s1931_s28 + $0x1e8] sm:$0xff] %v511_v1  ;;  %v515_v3 = vld [vmem:[%s1926_s7 + $0x3f0] sm:$0xff] }
  0x52   : > { %514 = vst [vmem:[%s1931_s28 + $0x1f0] sm:$0xff] %v513_v2  ;;  %516 = vst [vmem:[%s1931_s28 + $0x1f8] sm:$0xff] %v515_v3 }
  0x53 PF: > { %530 = sbr.rel (!%p1902_p11) target bundleno = 88 (0x58), region = 85  ;;  %s532_s0 = sand.u32 (%p1902_p11), 1, %s1738_s16  }
  0x54   : > { %s1493_s27 = sshll.u32 (%p1902_p11), %s1770_s24, 3  ;;  %s1405_s10 = sshll.u32 (%p1902_p11), %s532_s0, 4 }
  0x55   : > { %s540_s30 = scalar_lea.vmem (%p1902_p11), %s2212_s3, %s1493_s27  ;;  %s534_s9 = scalar_lea.vmem (%p1902_p11), [#allocation5], %s1405_s10 }
  0x56   : > { %v571_v4 = vld [vmem:[%s540_s30] sm:$0xff] (%p1902_p11)  ;;  %v573_v5 = vld [vmem:[%s540_s30 + $0x10] sm:$0xff] (%p1902_p11) }
  0x57   : > { %572 = vst [vmem:[%s534_s9] sm:$0xff] (%p1902_p11), %v571_v4  ;;  %574 = vst [vmem:[%s534_s9 + $0x8] sm:$0xff] (%p1902_p11), %v573_v5 }
  0x58 PF: > { %p1408_p1 = scmp.ge.s32.totalorder %s1774_s25, 1  ;;  %p579_p2 = scmp.lt.s32.totalorder %s1774_s25, 19 }
  0x5a   : > { %p580_p3 = pnand %p1408_p1, %p579_p2 }
  0x5b   : > { %s586_s7 = sand.u32 (!%p580_p3), 1, %s1750_s19   ;;  %s593_s14 = sand.u32 (!%p580_p3), 1, %s1742_s17  }
  0x5c   : > { %583 = sbr.rel (%p580_p3) target bundleno = 403 (0x193), region = 123  ;;  %s1409_s6 = sshll.u32 (!%p580_p3), %s586_s7, 5 }
  0x5d   : > { %s1410_s11 = sshll.u32 (!%p580_p3), %s593_s14, 9  ;;  %s600_s8 = sand.u32 (!%p580_p3), 1, %s1734_s15  }
  0x5e   : > { %s1413_s28 = sshll.u32 (!%p580_p3), %s1762_s22, 1  ;;  %s2071_s0 = sshll.u32 (!%p580_p3), %s600_s8, 4 }
  0x5f   : > { %p641_p4 = scmp.lt.s32.totalorder (!%p580_p3), %s1413_s28, 3  ;;  %s2079_s5 = scalar_lea.vmem (!%p580_p3), [#allocation3], %s1409_s6 }
  0x60   : > { %s2081_s19 = scalar_lea.vmem (!%p580_p3), [#allocation4], %s1410_s11  ;;  %s602_s17 = scalar_lea.vmem (!%p580_p3), [#allocation5], %s2071_s0 }
  0x61   : > { %s2245_s28 = smov (!%p641_p4, %s1413_s28), 3  ;;  %s2085_s30 = scalar_lea.vmem [#allocation6], %s2071_s0 }
  0x62   : > { %s643_s26 = scalar_lea.vmem %s2211_s2, %s2245_s28  ;;  %p1414_p5 = scmp.ne.s32.totalorder %s1758_s21, 0 }
  0x64   : > { %652 = sbr.rel (%p1414_p5) target bundleno = 108 (0x6c), region = 139 }
  0x69   : > { %v1776_v6 = vmov 0.0  }
  0x6a   : > { %653 = vst [vmem:[#allocation2 + $0x10] sm:$0xff] %v1776_v6  ;;  %654 = vst [vmem:[#allocation2] sm:$0xff] %v1776_v6 }
  0x6b   : > { %655 = vst [vmem:[#allocation2 + $0x18] sm:$0xff] %v1776_v6  ;;  %656 = vst [vmem:[#allocation2 + $0x8] sm:$0xff] %v1776_v6 }
  0x6c PF: > { %v1586_v7 = vld [vmem:[%s2081_s19 + $0x74] ss:$8 sps:$4 sm:$0xff]   ;;  %v1590_v9 = vld [vmem:[%s2081_s19 + $0x70] ss:$8 sps:$4 sm:$0xff]   ;;  %v1592_v11 = vld [vmem:[%s2081_s19 + $0x64] ss:$8 sps:$4 sm:$0xff]  }
  0x6d   : > { %v1588_v8 = vld [vmem:[%s2081_s19 + $0x174] ss:$8 sps:$4 sm:$0xff]   ;;  %1069 = vmatprep.subr.bf16.mxu0 %v1586_v7  ;;  %v1591_v10 = vld [vmem:[%s2081_s19 + $0x170] ss:$8 sps:$4 sm:$0xff]   ;;  %v1594_v12 = vld [vmem:[%s2081_s19 + $0x164] ss:$8 sps:$4 sm:$0xff]  }
  0x6e   : > { %1112 = vmatprep.subr.bf16.mxu1 %v1588_v8  ;;  %1070 = vmatpush1.bf16.msra.mxu0 %v1590_v9  ;;  %v1596_v13 = vld [vmem:[%s2081_s19 + $0x60] ss:$8 sps:$4 sm:$0xff]   ;;  %v1598_v15 = vld [vmem:[%s2081_s19 + $0x54] ss:$8 sps:$4 sm:$0xff]   ;;  %v1602_v17 = vld [vmem:[%s2081_s19 + $0x50] ss:$8 sps:$4 sm:$0xff]  }
  0x6f   : > { %1113 = vmatpush1.bf16.msra.mxu1 %v1591_v10  ;;  %1071 = vmatprep.subr.bf16.mxu0 %v1592_v11  ;;  %v1597_v14 = vld [vmem:[%s2081_s19 + $0x160] ss:$8 sps:$4 sm:$0xff]   ;;  %v1600_v16 = vld [vmem:[%s2081_s19 + $0x154] ss:$8 sps:$4 sm:$0xff]   ;;  %v1603_v18 = vld [vmem:[%s2081_s19 + $0x150] ss:$8 sps:$4 sm:$0xff]  }
  0x70   : > { %1114 = vmatprep.subr.bf16.mxu1 %v1594_v12  ;;  %v1604_v19 = vld [vmem:[%s2081_s19 + $0x44] ss:$8 sps:$4 sm:$0xff]   ;;  %v1608_v21 = vld [vmem:[%s2081_s19 + $0x40] ss:$8 sps:$4 sm:$0xff]   ;;  %v1610_v23 = vld [vmem:[%s2081_s19 + $0x34] ss:$8 sps:$4 sm:$0xff]  }
  0x71   : > { %v1606_v20 = vld [vmem:[%s2081_s19 + $0x144] ss:$8 sps:$4 sm:$0xff]   ;;  %v1609_v22 = vld [vmem:[%s2081_s19 + $0x140] ss:$8 sps:$4 sm:$0xff]   ;;  %v1612_v24 = vld [vmem:[%s2081_s19 + $0x134] ss:$8 sps:$4 sm:$0xff]  }
  0x72   : > { %1072 = vmatpush1.bf16.msra.mxu0 %v1596_v13  ;;  %v1614_v25 = vld [vmem:[%s2081_s19 + $0x30] ss:$8 sps:$4 sm:$0xff]   ;;  %v1616_v27 = vld [vmem:[%s2081_s19 + $0x24] ss:$8 sps:$4 sm:$0xff]   ;;  %v1620_v29 = vld [vmem:[%s2081_s19 + $0x20] ss:$8 sps:$4 sm:$0xff]  }
  0x73   : > { %1115 = vmatpush1.bf16.msra.mxu1 %v1597_v14  ;;  %1073 = vmatprep.subr.bf16.mxu0 %v1598_v15  ;;  %v1615_v26 = vld [vmem:[%s2081_s19 + $0x130] ss:$8 sps:$4 sm:$0xff]   ;;  %v1618_v28 = vld [vmem:[%s2081_s19 + $0x124] ss:$8 sps:$4 sm:$0xff]   ;;  %v1621_v30 = vld [vmem:[%s2081_s19 + $0x120] ss:$8 sps:$4 sm:$0xff]  }
  0x74   : > { %1116 = vmatprep.subr.bf16.mxu1 %v1600_v16  ;;  %v1622_v31 = vld [vmem:[%s2081_s19 + $0x14] ss:$8 sps:$4 sm:$0xff]   ;;  %v1626_v33 = vld [vmem:[%s2081_s19 + $0x10] ss:$8 sps:$4 sm:$0xff]   ;;  %v1628_v35 = vld [vmem:[%s2081_s19 + $0x4] ss:$8 sps:$4 sm:$0xff]  }
  0x75   : > { %v1624_v32 = vld [vmem:[%s2081_s19 + $0x114] ss:$8 sps:$4 sm:$0xff]   ;;  %v1627_v34 = vld [vmem:[%s2081_s19 + $0x110] ss:$8 sps:$4 sm:$0xff]   ;;  %v1630_v36 = vld [vmem:[%s2081_s19 + $0x104] ss:$8 sps:$4 sm:$0xff]  }
  0x76   : > { %1074 = vmatpush1.bf16.msra.mxu0 %v1602_v17  ;;  %v1632_v37 = vld [vmem:[%s2081_s19] ss:$8 sps:$4 sm:$0xff]   ;;  %v1634_v39 = vld [vmem:[%s2081_s19 + $0xf4] ss:$8 sps:$4 sm:$0xff]   ;;  %v1638_v41 = vld [vmem:[%s2081_s19 + $0xf0] ss:$8 sps:$4 sm:$0xff]  }
  0x77   : > { %1117 = vmatpush1.bf16.msra.mxu1 %v1603_v18  ;;  %1075 = vmatprep.subr.bf16.mxu0 %v1604_v19  ;;  %v1633_v38 = vld [vmem:[%s2081_s19 + $0x100] ss:$8 sps:$4 sm:$0xff]   ;;  %v1636_v40 = vld [vmem:[%s2081_s19 + $0x1f4] ss:$8 sps:$4 sm:$0xff]   ;;  %v1639_v42 = vld [vmem:[%s2081_s19 + $0x1f0] ss:$8 sps:$4 sm:$0xff]  }
  0x78   : > { %1118 = vmatprep.subr.bf16.mxu1 %v1606_v20  ;;  %v1640_v43 = vld [vmem:[%s2081_s19 + $0xe4] ss:$8 sps:$4 sm:$0xff]   ;;  %v1644_v45 = vld [vmem:[%s2081_s19 + $0xe0] ss:$8 sps:$4 sm:$0xff]   ;;  %v1646_v47 = vld [vmem:[%s2081_s19 + $0xd4] ss:$8 sps:$4 sm:$0xff]  }
  0x79   : > { %v1642_v44 = vld [vmem:[%s2081_s19 + $0x1e4] ss:$8 sps:$4 sm:$0xff]   ;;  %v1645_v46 = vld [vmem:[%s2081_s19 + $0x1e0] ss:$8 sps:$4 sm:$0xff]   ;;  %v1648_v48 = vld [vmem:[%s2081_s19 + $0x1d4] ss:$8 sps:$4 sm:$0xff]  }
  0x7a   : > { %1076 = vmatpush1.bf16.msra.mxu0 %v1608_v21  ;;  %v1650_v49 = vld [vmem:[%s2081_s19 + $0xd0] ss:$8 sps:$4 sm:$0xff]   ;;  %v1652_v51 = vld [vmem:[%s2081_s19 + $0xc4] ss:$8 sps:$4 sm:$0xff]   ;;  %v1656_v53 = vld [vmem:[%s2081_s19 + $0xc0] ss:$8 sps:$4 sm:$0xff]  }
  0x7b   : > { %1119 = vmatpush1.bf16.msra.mxu1 %v1609_v22  ;;  %1077 = vmatprep.subr.bf16.mxu0 %v1610_v23  ;;  %v1651_v50 = vld [vmem:[%s2081_s19 + $0x1d0] ss:$8 sps:$4 sm:$0xff]   ;;  %v1654_v52 = vld [vmem:[%s2081_s19 + $0x1c4] ss:$8 sps:$4 sm:$0xff]   ;;  %v1657_v55 = vld [vmem:[%s2081_s19 + $0x1c0] ss:$8 sps:$4 sm:$0xff]  }
  0x7c   : > { %1120 = vmatprep.subr.bf16.mxu1 %v1612_v24  ;;  %v1684_v54 = vld [vmem:[%s2079_s5 + $0x4] ss:$16 sps:$4 sm:$0xff]   ;;  %v1687_v58 = vld [vmem:[%s2079_s5 + $0xc] ss:$16 sps:$4 sm:$0xff]   ;;  %v1662_v59 = vld [vmem:[%s2081_s19 + $0xb0] ss:$8 sps:$4 sm:$0xff]  }
  0x7d   : > { %v1658_v56 = vld [vmem:[%s2081_s19 + $0xb4] ss:$8 sps:$4 sm:$0xff]   ;;  %1101 = vmatprep.mubr.bf16.mxu0 %v1684_v54  ;;  %1144 = vmatprep.mubr.bf16.mxu1 %v1687_v58  ;;  %v1663_v60 = vld [vmem:[%s2081_s19 + $0x1b0] ss:$8 sps:$4 sm:$0xff]   ;;  %v1664_v61 = vld [vmem:[%s2081_s19 + $0xa4] ss:$8 sps:$4 sm:$0xff]  }
  0x7e   : > { %1078 = vmatpush1.bf16.msra.mxu0 %v1614_v25  ;;  %v1660_v57 = vld [vmem:[%s2081_s19 + $0x1b4] ss:$8 sps:$4 sm:$0xff]   ;;  %v1666_v62 = vld [vmem:[%s2081_s19 + $0x1a4] ss:$8 sps:$4 sm:$0xff]   ;;  %v1668_v63 = vld [vmem:[%s2081_s19 + $0xa0] ss:$8 sps:$4 sm:$0xff]  }
  0x7f   : > { %1121 = vmatpush1.bf16.msra.mxu1 %v1615_v26  ;;  %1079 = vmatprep.subr.bf16.mxu0 %v1616_v27  ;;  %v1669_v0 = vld [vmem:[%s2081_s19 + $0x1a0] ss:$8 sps:$4 sm:$0xff]   ;;  %v1670_v1 = vld [vmem:[%s2081_s19 + $0x94] ss:$8 sps:$4 sm:$0xff]   ;;  %v1674_v3 = vld [vmem:[%s2081_s19 + $0x90] ss:$8 sps:$4 sm:$0xff]  }
  0x80   : > { %1122 = vmatprep.subr.bf16.mxu1 %v1618_v28  ;;  %v1672_v2 = vld [vmem:[%s2081_s19 + $0x194] ss:$8 sps:$4 sm:$0xff]   ;;  %v1675_v4 = vld [vmem:[%s2081_s19 + $0x190] ss:$8 sps:$4 sm:$0xff]   ;;  %v1676_v5 = vld [vmem:[%s2081_s19 + $0x84] ss:$8 sps:$4 sm:$0xff]  }
  0x81   : > { %v1678_v6 = vld [vmem:[%s2081_s19 + $0x184] ss:$8 sps:$4 sm:$0xff]   ;;  %v1680_v7 = vld [vmem:[%s2081_s19 + $0x80] ss:$8 sps:$4 sm:$0xff]   ;;  %v657_v12 = vld [vmem:[#allocation2 + $0x10] sm:$0xff]  ;;  %p1483_p6 = scmp.ne.s32.totalorder %s1758_s21, 8 }
  0x82   : > { %1080 = vmatpush1.bf16.msra.mxu0 %v1620_v29  ;;  %v1681_v8 = vld [vmem:[%s2081_s19 + $0x180] ss:$8 sps:$4 sm:$0xff]   ;;  %v659_v21 = vld [vmem:[#allocation2 + $0x18] sm:$0xff] }
  0x83   : > { %1123 = vmatpush1.bf16.msra.mxu1 %v1621_v30  ;;  %1081 = vmatprep.subr.bf16.mxu0 %v1622_v31  ;;  %v1682_v9 = vld [vmem:[%s2079_s5] ss:$16 sps:$4 sm:$0xff]   ;;  %v1685_v10 = vld [vmem:[%s2079_s5 + $0x8] ss:$16 sps:$4 sm:$0xff]  }
  0x84   : > { %1124 = vmatprep.subr.bf16.mxu1 %v1624_v32  ;;  %v658_v16 = vld [vmem:[#allocation2] sm:$0xff]  ;;  %v660_v26 = vld [vmem:[#allocation2 + $0x8] sm:$0xff] }
  0x86   : > { %1082 = vmatpush1.bf16.msra.mxu0 %v1626_v33 }
  0x87   : > { %1125 = vmatpush1.bf16.msra.mxu1 %v1627_v34  ;;  %1083 = vmatprep.subr.bf16.mxu0 %v1628_v35 }
  0x88   : > { %1126 = vmatprep.subr.bf16.mxu1 %v1630_v36 }
  0x8a   : > { %1084 = vmatpush1.bf16.msra.mxu0 %v1632_v37 }
  0x8b   : > { %1127 = vmatpush1.bf16.msra.mxu1 %v1633_v38  ;;  %1085 = vmatprep.subr.bf16.mxu0 %v1634_v39 }
  0x8c   : > { %1128 = vmatprep.subr.bf16.mxu1 %v1636_v40 }
  0x8e   : > { %1086 = vmatpush2.bf16.msra.mxu0 %v1638_v41 }
  0x8f   : > { %1129 = vmatpush2.bf16.msra.mxu1 %v1639_v42  ;;  %1087 = vmatprep.subr.bf16.mxu0 %v1640_v43 }
  0x90   : > { %1130 = vmatprep.subr.bf16.mxu1 %v1642_v44 }
  0x92   : > { %1088 = vmatpush2.bf16.msra.mxu0 %v1644_v45 }
  0x93   : > { %1131 = vmatpush2.bf16.msra.mxu1 %v1645_v46  ;;  %1089 = vmatprep.subr.bf16.mxu0 %v1646_v47 }
  0x94   : > { %1132 = vmatprep.subr.bf16.mxu1 %v1648_v48 }
  0x96   : > { %1090 = vmatpush2.bf16.msra.mxu0 %v1650_v49 }
  0x97   : > { %1133 = vmatpush2.bf16.msra.mxu1 %v1651_v50  ;;  %1091 = vmatprep.subr.bf16.mxu0 %v1652_v51 }
  0x98   : > { %1134 = vmatprep.subr.bf16.mxu1 %v1654_v52 }
  0x9a   : > { %1092 = vmatpush2.bf16.msra.mxu0 %v1656_v53 }
  0x9b   : > { %1135 = vmatpush2.bf16.msra.mxu1 %v1657_v55  ;;  %1093 = vmatprep.subr.bf16.mxu0 %v1658_v56 }
  0x9c   : > { %1136 = vmatprep.subr.bf16.mxu1 %v1660_v57 }
  0x9e   : > { %1094 = vmatpush2.bf16.msra.mxu0 %v1662_v59 }
  0x9f   : > { %1137 = vmatpush2.bf16.msra.mxu1 %v1663_v60  ;;  %1095 = vmatprep.subr.bf16.mxu0 %v1664_v61 }
  0xa0   : > { %1138 = vmatprep.subr.bf16.mxu1 %v1666_v62 }
  0xa2   : > { %1096 = vmatpush2.bf16.msra.mxu0 %v1668_v63 }
  0xa3   : > { %1139 = vmatpush2.bf16.msra.mxu1 %v1669_v0  ;;  %1097 = vmatprep.subr.bf16.mxu0 %v1670_v1 }
  0xa4   : > { %1140 = vmatprep.subr.bf16.mxu1 %v1672_v2 }
  0xa6   : > { %1098 = vmatpush2.bf16.msra.mxu0 %v1674_v3 }
  0xa7   : > { %1141 = vmatpush2.bf16.msra.mxu1 %v1675_v4  ;;  %1099 = vmatprep.subr.bf16.mxu0 %v1676_v5 }
  0xa8   : > { %1142 = vmatprep.subr.bf16.mxu1 %v1678_v6 }
  0xaa   : > { %1100 = vmatpush2.bf16.msra.mxu0 %v1680_v7 }
  0xab   : > { %1143 = vmatpush2.bf16.msra.mxu1 %v1681_v8 }
  0xad   : > { %1102 = vmatmul.mubr.bf16.vlgmr.msra.gmra.mxu0 %v1682_v9 }
  0xae   : > { %1145 = vmatmul.mubr.bf16.vlgmr.msra.gmra.mxu1 %v1685_v10 }
 0x16d   : > { %v1103_v11 = vpop.f32.mrf.mxu0 }
 0x16e   : > { %v1146_v13 = vpop.f32.mrf.mxu1 }
 0x16f   : > { %v1147_v14 = vadd.f32 %v1146_v13, %v1103_v11  ;;  %v1105_v15 = vpop.f32.mrf.mxu0 }
 0x170   : > { %v1148_v17 = vpop.f32.mrf.mxu1 }
 0x171   : > { %v1155_v18 = vadd.f32 %v1147_v14, %v657_v12  ;;  %v1149_v19 = vadd.f32 %v1148_v17, %v1105_v15  ;;  %v1107_v20 = vpop.f32.mrf.mxu0 }
 0x172   : > { %v1150_v22 = vpop.f32.mrf.mxu1 }
 0x173   : > { %1159 = vst [vmem:[#allocation2 + $0x10] sm:$0xff] %v1155_v18  ;;  %v1156_v23 = vadd.f32 %v1149_v19, %v658_v16  ;;  %v1151_v24 = vadd.f32 %v1150_v22, %v1107_v20  ;;  %v1109_v25 = vpop.f32.mrf.mxu0 }
 0x174   : > { %v1152_v27 = vpop.f32.mrf.mxu1 }
 0x175   : > { %1160 = vst [vmem:[#allocation2] sm:$0xff] %v1156_v23  ;;  %v1157_v28 = vadd.f32 %v1151_v24, %v659_v21  ;;  %v1153_v29 = vadd.f32 %v1152_v27, %v1109_v25  ;;  %1166 = sbr.rel (%p1483_p6) target bundleno = 395 (0x18b), region = 143 }
 0x177   : > { %1161 = vst [vmem:[#allocation2 + $0x18] sm:$0xff] %v1157_v28  ;;  %v1158_v30 = vadd.f32 %v1153_v29, %v660_v26 }
 0x179   : > { %1162 = vst [vmem:[#allocation2 + $0x8] sm:$0xff] %v1158_v30 }
 0x17a   : > { %v1173_v31 = vlaneseq  ;;  %v1187_v33 = vld [vmem:[%s602_s17] sm:$0xff]  ;;  %v1188_v35 = vld [vmem:[%s602_s17 + $0x8] sm:$0xff] }
 0x17b   : > { %v1171_v34 = vld [vmem:[%s643_s26] sm:$0x3]  ;;  %v1167_v36 = vld [vmem:[#allocation2 + $0x10] sm:$0xff]  ;;  %v1189_v40 = vunpack.c.l.bf16 %v1187_v33  ;;  %v1190_v41 = vunpack.c.h.bf16 %v1187_v33  ;;  %v1191_v46 = vunpack.c.l.bf16 %v1188_v35  ;;  %v1192_v47 = vunpack.c.h.bf16 %v1188_v35 }
 0x17c   : > { %v1174_v32 = vshrl.u32 %v1173_v31, 7  ;;  %v1168_v39 = vld [vmem:[#allocation2] sm:$0xff] }
 0x17e   : > { %v1175_v37 = vsub.s32 0, %v1174_v32  ;;  %v1179_v38 = vsub.s32 1, %v1174_v32  ;;  %v1169_v42 = vld [vmem:[#allocation2 + $0x18] sm:$0xff] }
 0x180   : > { %v1170_v43 = vld [vmem:[#allocation2 + $0x8] sm:$0xff]  ;;  %v1176_v44 = vrot.slane %v1171_v34, %v1175_v37  ;;  %v1180_v45 = vrot.slane %v1171_v34, %v1179_v38 }
 0x182   : > { %v1183_v48 = vadd.f32 %v1176_v44, %v1167_v36  ;;  %v1184_v49 = vadd.f32 %v1180_v45, %v1168_v39  ;;  %v1185_v50 = vadd.f32 %v1176_v44, %v1169_v42  ;;  %v1186_v51 = vadd.f32 %v1180_v45, %v1170_v43 }
 0x184   : > { %v1193_v52 = vadd.f32 %v1189_v40, %v1183_v48  ;;  %v1194_v53 = vadd.f32 %v1190_v41, %v1184_v49  ;;  %v1195_v54 = vadd.f32 %v1191_v46, %v1185_v50  ;;  %v1196_v55 = vadd.f32 %v1192_v47, %v1186_v51 }
 0x186   : > { %v1197_v56 = vmax.f32 %v1193_v52, 0.0  ;;  %v1198_v57 = vmax.f32 %v1194_v53, 0.0  ;;  %v1199_v58 = vmax.f32 %v1195_v54, 0.0  ;;  %v1200_v59 = vmax.f32 %v1196_v55, 0.0 }
 0x188   : > { %v1494_v60 = vpack.c.bf16 %v1198_v57, %v1197_v56  ;;  %v1495_v61 = vpack.c.bf16 %v1200_v59, %v1199_v58 }
 0x18a   : > { %1213 = vst [vmem:[%s2085_s30] sm:$0xff] %v1494_v60  ;;  %1214 = vst [vmem:[%s2085_s30 + $0x8] sm:$0xff] %v1495_v61 }
 0x18b PF: > { %1221 = sbr.rel (!%p1906_p13) target bundleno = 403 (0x193), region = 147  ;;  %s1496_s21 = sshll.u32 (%p1906_p13), %s1762_s22, 3 }
 0x18c   : > { %s1227_s6 = scalar_lea.vmem (%p1906_p13), %s2213_s4, %s1496_s21 }
 0x191   : > { %v1258_v62 = vld [vmem:[%s2085_s30] sm:$0xff]  ;;  %v1260_v63 = vld [vmem:[%s2085_s30 + $0x8] sm:$0xff] }
 0x192   : > { %1259 = vst [vmem:[%s1227_s6] sm:$0xff] %v1258_v62  ;;  %1261 = vst [vmem:[%s1227_s6 + $0x10] sm:$0xff] %v1260_v63 }
 0x193 PF: > { %s14_s25 = sadd.s32 1, %s1774_s25   ;;  %s2225_s29 = sld [smem:[#allocation9_spill]] }
 0x194   : > { %p11_p7 = scmp.ge.s32.totalorder %s14_s25, 20   ;;  %s2226_s11 = sld [smem:[#allocation7_spill]] }
 0x195   : > { %s2227_s8 = sld [smem:[#allocation8_spill]]  ;;  %s2228_s15 = smov %s1738_s16 }
 0x196   : > { %s2229_s16 = smov %s1898_s13  ;;  %s2230_s17 = smov %s1746_s18 }
 0x197   : > { %s2231_s18 = smov %s1895_s12  ;;  %s2232_s19 = smov %s1754_s20 }
 0x198   : > { %s2234_s21 = smov %s1766_s23  ;;  %s2235_s22 = smov %s1770_s24 }
 0x199   : > { %s2233_s20 = smov %s2225_s29  ;;  %13 = sbr.rel (!%p11_p7) target bundleno = 8 (0x8), region = 235 }
 0x19a   : > { %s2236_s23 = smov %s2226_s11 }
 0x19b   : > { %s2237_s24 = smov %s2227_s8 }

// kernel: quantized_resnet18_forward.46
= control target key start
LH: loop header
LB: loop body
LE: loop exit
PB: predicated region body
PF: predicated region fallthrough
CT: control target
= control target key end

     0   :  { %vm21_vm0 = vcmask 1041409   ;;  %vm23_vm1 = vcmask 1043459   ;;  %vm25_vm2 = vcmask 1045509   ;;  %vm27_vm3 = vcmask 1047559   ;;  %s55_s0 = inlined_call_operand.vmem [shape: bf16[2,1,512], index: 0, kind: input, shape index: {}]   ;;  %s56_s1 = inlined_call_operand.vmem [shape: f32[2,512], index: 1, kind: output, shape index: {}]  }
   0x1   :  { %v36_v0 = vld [vmem:[%s55_s0] sm:$0xff]  }
   0x2   :  { %v37_v1 = vunpack.c.l.bf16 %v36_v0  ;;  %v38_v2 = vunpack.c.h.bf16 %v36_v0 }
   0x4   :  { %v20_v3 = vrot.slane %v38_v2, 7 }
   0x6   :  { %v22_v4 = vsel %vm21_vm0, %v20_v3, %v37_v1 }
   0x7   :  { %v24_v5 = vsel %vm23_vm1, %v20_v3, %v22_v4 }
   0x8   :  { %v26_v6 = vsel %vm25_vm2, %v20_v3, %v24_v5 }
   0x9   :  { %v28_v7 = vsel %vm27_vm3, %v20_v3, %v26_v6 }
   0xa   :  { %30 = vst [vmem:[%s56_s1] sm:$0xff] %v28_v7 }

// kernel: quantized_resnet18_forward.47
= control target key start
LH: loop header
LB: loop body
LE: loop exit
PB: predicated region body
PF: predicated region fallthrough
CT: control target
= control target key end

     0   :  { %s1513_s12 = smov 0   ;;  %s1515_s13 = smov 0   ;;  %s1803_s0 = inlined_call_operand.vmem [shape: bf16[16,512], index: 0, kind: input, shape index: {}]   ;;  %s1804_s1 = inlined_call_operand.vmem [shape: bf16[512,1024], index: 1, kind: input, shape index: {}]   ;;  %s1805_s2 = inlined_call_operand.vmem [shape: f32[1,1024], index: 2, kind: input, shape index: {}]   ;;  %s1806_s3 = inlined_call_operand.vmem [shape: f32[16,1024], index: 3, kind: output, shape index: {}]  }
   0x1   :  { %s1517_s14 = smov 0   ;;  %s1519_s15 = smov 0  }
   0x2   :  { %s1521_s16 = smov 0  }
   0x3 LB: > { %s28_s17 = sadd.s32 1, %s1487_s15  ;;  %s1224_s18 = sadd.s32 4294967295, %s1491_s16   ;;  %s1491_s16 = sphi %s1521_s16, %s13_s16   ;;  %s1487_s15 = sphi %s1519_s15, %s1811_s15   ;;  %s1483_s14 = sphi %s1517_s14, %s1810_s14   ;;  %s1479_s13 = sphi %s1515_s13, %s1809_s13   ;;  %s1475_s12 = sphi %s1513_s12, %s1808_s12  }
   0x4   : > { %p30_p0 = scmp.ge.s32.totalorder %s28_s17, 4  ;;  %p76_p1 = scmp.ne.s32.totalorder %s1479_s13, %s1475_s12 }
   0x5   : > { %p77_p2 = scmp.eq.s32.totalorder %s1491_s16, 0  ;;  %p134_p4 = scmp.eq.s32.totalorder %s1224_s18, 3 }
   0x6   : > { %s1813_s17 = smov (%p30_p0, %s28_s17), 0  ;;  %s69_s20 = sadd.s32 1, %s1479_s13 }
   0x7   : > { %p78_p3 = por %p77_p2, %p76_p1  ;;  %s65_s19 = ssub.s32 %s1487_s15, %s1813_s17 }
   0x8   : > { %p67_p5 = scmp.eq.s32.totalorder %s65_s19, 0  ;;  %p1548_p6 = por %p134_p4, %p76_p1 }
   0x9   : > { %p1228_p7 = scmp.ge.s32.totalorder %s1491_s16, 4 }
   0xa   : > { %s1553_s22 = scalar_select %p67_p5, %s1479_s13, %s69_s20  }
   0xb   : > { %171 = sbr.rel (%p1228_p7) target bundleno = 84 (0x54), region = 20 }
  0x10   : > { %174 = sbr.rel (!%p78_p3) target bundleno = 84 (0x54), region = 24  ;;  %s176_s23 = sand.u32 (%p78_p3), 1, %s1479_s13  }
  0x11   : > { %s1309_s24 = sshll.u32 (%p78_p3), %s1487_s15, 3  ;;  %s1229_s25 = sshll.u32 (%p78_p3), %s176_s23, 9 }
  0x12   : > { %s1561_s28 = scalar_lea.vmem (%p78_p3), %s1804_s1, %s1309_s24  ;;  %s1566_s29 = scalar_lea.vmem (%p78_p3), [#allocation3], %s1229_s25 }
  0x13   : > { %v339_v0 = vld [vmem:[%s1561_s28] sm:$0xff] (%p78_p3) }
  0x14   : > { %v341_v1 = vld [vmem:[%s1561_s28 + $0x20] sm:$0xff] (%p78_p3)  ;;  %340 = vst [vmem:[%s1566_s29] sm:$0xff] (%p78_p3), %v339_v0 }
  0x15   : > { %v343_v2 = vld [vmem:[%s1561_s28 + $0x40] sm:$0xff]  ;;  %342 = vst [vmem:[%s1566_s29 + $0x8] sm:$0xff] %v341_v1 }
  0x16   : > { %344 = vst [vmem:[%s1566_s29 + $0x10] sm:$0xff] %v343_v2  ;;  %v345_v3 = vld [vmem:[%s1561_s28 + $0x60] sm:$0xff] }
  0x17   : > { %v347_v4 = vld [vmem:[%s1561_s28 + $0x80] sm:$0xff]  ;;  %346 = vst [vmem:[%s1566_s29 + $0x18] sm:$0xff] %v345_v3 }
  0x18   : > { %v349_v5 = vld [vmem:[%s1561_s28 + $0xa0] sm:$0xff]  ;;  %348 = vst [vmem:[%s1566_s29 + $0x20] sm:$0xff] %v347_v4 }
  0x19   : > { %350 = vst [vmem:[%s1566_s29 + $0x28] sm:$0xff] %v349_v5  ;;  %v351_v6 = vld [vmem:[%s1561_s28 + $0xc0] sm:$0xff] }
  0x1a   : > { %v353_v7 = vld [vmem:[%s1561_s28 + $0xe0] sm:$0xff]  ;;  %352 = vst [vmem:[%s1566_s29 + $0x30] sm:$0xff] %v351_v6 }
  0x1b   : > { %v355_v8 = vld [vmem:[%s1561_s28 + $0x100] sm:$0xff]  ;;  %354 = vst [vmem:[%s1566_s29 + $0x38] sm:$0xff] %v353_v7 }
  0x1c   : > { %356 = vst [vmem:[%s1566_s29 + $0x40] sm:$0xff] %v355_v8  ;;  %v357_v9 = vld [vmem:[%s1561_s28 + $0x120] sm:$0xff] }
  0x1d   : > { %v359_v10 = vld [vmem:[%s1561_s28 + $0x140] sm:$0xff]  ;;  %358 = vst [vmem:[%s1566_s29 + $0x48] sm:$0xff] %v357_v9 }
  0x1e   : > { %v361_v11 = vld [vmem:[%s1561_s28 + $0x160] sm:$0xff]  ;;  %360 = vst [vmem:[%s1566_s29 + $0x50] sm:$0xff] %v359_v10 }
  0x1f   : > { %362 = vst [vmem:[%s1566_s29 + $0x58] sm:$0xff] %v361_v11  ;;  %v363_v12 = vld [vmem:[%s1561_s28 + $0x180] sm:$0xff] }
  0x20   : > { %v365_v13 = vld [vmem:[%s1561_s28 + $0x1a0] sm:$0xff]  ;;  %364 = vst [vmem:[%s1566_s29 + $0x60] sm:$0xff] %v363_v12 }
  0x21   : > { %v367_v14 = vld [vmem:[%s1561_s28 + $0x1c0] sm:$0xff]  ;;  %366 = vst [vmem:[%s1566_s29 + $0x68] sm:$0xff] %v365_v13 }
  0x22   : > { %368 = vst [vmem:[%s1566_s29 + $0x70] sm:$0xff] %v367_v14  ;;  %v369_v15 = vld [vmem:[%s1561_s28 + $0x1e0] sm:$0xff] }
  0x23   : > { %v371_v16 = vld [vmem:[%s1561_s28 + $0x200] sm:$0xff]  ;;  %370 = vst [vmem:[%s1566_s29 + $0x78] sm:$0xff] %v369_v15 }
  0x24   : > { %v373_v17 = vld [vmem:[%s1561_s28 + $0x220] sm:$0xff]  ;;  %372 = vst [vmem:[%s1566_s29 + $0x80] sm:$0xff] %v371_v16 }
  0x25   : > { %374 = vst [vmem:[%s1566_s29 + $0x88] sm:$0xff] %v373_v17  ;;  %v375_v18 = vld [vmem:[%s1561_s28 + $0x240] sm:$0xff] }
  0x26   : > { %v377_v19 = vld [vmem:[%s1561_s28 + $0x260] sm:$0xff]  ;;  %376 = vst [vmem:[%s1566_s29 + $0x90] sm:$0xff] %v375_v18 }
  0x27   : > { %v379_v20 = vld [vmem:[%s1561_s28 + $0x280] sm:$0xff]  ;;  %378 = vst [vmem:[%s1566_s29 + $0x98] sm:$0xff] %v377_v19 }
  0x28   : > { %380 = vst [vmem:[%s1566_s29 + $0xa0] sm:$0xff] %v379_v20  ;;  %v381_v21 = vld [vmem:[%s1561_s28 + $0x2a0] sm:$0xff] }
  0x29   : > { %v383_v22 = vld [vmem:[%s1561_s28 + $0x2c0] sm:$0xff]  ;;  %382 = vst [vmem:[%s1566_s29 + $0xa8] sm:$0xff] %v381_v21 }
  0x2a   : > { %v385_v23 = vld [vmem:[%s1561_s28 + $0x2e0] sm:$0xff]  ;;  %384 = vst [vmem:[%s1566_s29 + $0xb0] sm:$0xff] %v383_v22 }
  0x2b   : > { %386 = vst [vmem:[%s1566_s29 + $0xb8] sm:$0xff] %v385_v23  ;;  %v387_v24 = vld [vmem:[%s1561_s28 + $0x300] sm:$0xff] }
  0x2c   : > { %v389_v25 = vld [vmem:[%s1561_s28 + $0x320] sm:$0xff]  ;;  %388 = vst [vmem:[%s1566_s29 + $0xc0] sm:$0xff] %v387_v24 }
  0x2d   : > { %v391_v26 = vld [vmem:[%s1561_s28 + $0x340] sm:$0xff]  ;;  %390 = vst [vmem:[%s1566_s29 + $0xc8] sm:$0xff] %v389_v25 }
  0x2e   : > { %392 = vst [vmem:[%s1566_s29 + $0xd0] sm:$0xff] %v391_v26  ;;  %v393_v27 = vld [vmem:[%s1561_s28 + $0x360] sm:$0xff] }
  0x2f   : > { %v395_v28 = vld [vmem:[%s1561_s28 + $0x380] sm:$0xff]  ;;  %394 = vst [vmem:[%s1566_s29 + $0xd8] sm:$0xff] %v393_v27 }
  0x30   : > { %v397_v29 = vld [vmem:[%s1561_s28 + $0x3a0] sm:$0xff]  ;;  %396 = vst [vmem:[%s1566_s29 + $0xe0] sm:$0xff] %v395_v28 }
  0x31   : > { %398 = vst [vmem:[%s1566_s29 + $0xe8] sm:$0xff] %v397_v29  ;;  %v399_v30 = vld [vmem:[%s1561_s28 + $0x3c0] sm:$0xff] }
  0x32   : > { %v401_v31 = vld [vmem:[%s1561_s28 + $0x3e0] sm:$0xff]  ;;  %400 = vst [vmem:[%s1566_s29 + $0xf0] sm:$0xff] %v399_v30 }
  0x33   : > { %v403_v32 = vld [vmem:[%s1561_s28 + $0x400] sm:$0xff]  ;;  %402 = vst [vmem:[%s1566_s29 + $0xf8] sm:$0xff] %v401_v31 }
  0x34   : > { %404 = vst [vmem:[%s1566_s29 + $0x100] sm:$0xff] %v403_v32  ;;  %v405_v33 = vld [vmem:[%s1561_s28 + $0x420] sm:$0xff] }
  0x35   : > { %v407_v34 = vld [vmem:[%s1561_s28 + $0x440] sm:$0xff]  ;;  %406 = vst [vmem:[%s1566_s29 + $0x108] sm:$0xff] %v405_v33 }
  0x36   : > { %v409_v35 = vld [vmem:[%s1561_s28 + $0x460] sm:$0xff]  ;;  %408 = vst [vmem:[%s1566_s29 + $0x110] sm:$0xff] %v407_v34 }
  0x37   : > { %410 = vst [vmem:[%s1566_s29 + $0x118] sm:$0xff] %v409_v35  ;;  %v411_v36 = vld [vmem:[%s1561_s28 + $0x480] sm:$0xff] }
  0x38   : > { %v413_v37 = vld [vmem:[%s1561_s28 + $0x4a0] sm:$0xff]  ;;  %412 = vst [vmem:[%s1566_s29 + $0x120] sm:$0xff] %v411_v36 }
  0x39   : > { %v415_v38 = vld [vmem:[%s1561_s28 + $0x4c0] sm:$0xff]  ;;  %414 = vst [vmem:[%s1566_s29 + $0x128] sm:$0xff] %v413_v37 }
  0x3a   : > { %416 = vst [vmem:[%s1566_s29 + $0x130] sm:$0xff] %v415_v38  ;;  %v417_v39 = vld [vmem:[%s1561_s28 + $0x4e0] sm:$0xff] }
  0x3b   : > { %v419_v40 = vld [vmem:[%s1561_s28 + $0x500] sm:$0xff]  ;;  %418 = vst [vmem:[%s1566_s29 + $0x138] sm:$0xff] %v417_v39 }
  0x3c   : > { %v421_v41 = vld [vmem:[%s1561_s28 + $0x520] sm:$0xff]  ;;  %420 = vst [vmem:[%s1566_s29 + $0x140] sm:$0xff] %v419_v40 }
  0x3d   : > { %422 = vst [vmem:[%s1566_s29 + $0x148] sm:$0xff] %v421_v41  ;;  %v423_v42 = vld [vmem:[%s1561_s28 + $0x540] sm:$0xff] }
  0x3e   : > { %v425_v43 = vld [vmem:[%s1561_s28 + $0x560] sm:$0xff]  ;;  %424 = vst [vmem:[%s1566_s29 + $0x150] sm:$0xff] %v423_v42 }
  0x3f   : > { %v427_v44 = vld [vmem:[%s1561_s28 + $0x580] sm:$0xff]  ;;  %426 = vst [vmem:[%s1566_s29 + $0x158] sm:$0xff] %v425_v43 }
  0x40   : > { %428 = vst [vmem:[%s1566_s29 + $0x160] sm:$0xff] %v427_v44  ;;  %v429_v45 = vld [vmem:[%s1561_s28 + $0x5a0] sm:$0xff] }
  0x41   : > { %v431_v46 = vld [vmem:[%s1561_s28 + $0x5c0] sm:$0xff]  ;;  %430 = vst [vmem:[%s1566_s29 + $0x168] sm:$0xff] %v429_v45 }
  0x42   : > { %v433_v47 = vld [vmem:[%s1561_s28 + $0x5e0] sm:$0xff]  ;;  %432 = vst [vmem:[%s1566_s29 + $0x170] sm:$0xff] %v431_v46 }
  0x43   : > { %434 = vst [vmem:[%s1566_s29 + $0x178] sm:$0xff] %v433_v47  ;;  %v435_v48 = vld [vmem:[%s1561_s28 + $0x600] sm:$0xff] }
  0x44   : > { %v437_v49 = vld [vmem:[%s1561_s28 + $0x620] sm:$0xff]  ;;  %436 = vst [vmem:[%s1566_s29 + $0x180] sm:$0xff] %v435_v48 }
  0x45   : > { %v439_v50 = vld [vmem:[%s1561_s28 + $0x640] sm:$0xff]  ;;  %438 = vst [vmem:[%s1566_s29 + $0x188] sm:$0xff] %v437_v49 }
  0x46   : > { %440 = vst [vmem:[%s1566_s29 + $0x190] sm:$0xff] %v439_v50  ;;  %v441_v51 = vld [vmem:[%s1561_s28 + $0x660] sm:$0xff] }
  0x47   : > { %v443_v52 = vld [vmem:[%s1561_s28 + $0x680] sm:$0xff]  ;;  %442 = vst [vmem:[%s1566_s29 + $0x198] sm:$0xff] %v441_v51 }
  0x48   : > { %v445_v53 = vld [vmem:[%s1561_s28 + $0x6a0] sm:$0xff]  ;;  %444 = vst [vmem:[%s1566_s29 + $0x1a0] sm:$0xff] %v443_v52 }
  0x49   : > { %446 = vst [vmem:[%s1566_s29 + $0x1a8] sm:$0xff] %v445_v53  ;;  %v447_v54 = vld [vmem:[%s1561_s28 + $0x6c0] sm:$0xff] }
  0x4a   : > { %v449_v55 = vld [vmem:[%s1561_s28 + $0x6e0] sm:$0xff]  ;;  %448 = vst [vmem:[%s1566_s29 + $0x1b0] sm:$0xff] %v447_v54 }
  0x4b   : > { %v451_v56 = vld [vmem:[%s1561_s28 + $0x700] sm:$0xff]  ;;  %450 = vst [vmem:[%s1566_s29 + $0x1b8] sm:$0xff] %v449_v55 }
  0x4c   : > { %452 = vst [vmem:[%s1566_s29 + $0x1c0] sm:$0xff] %v451_v56  ;;  %v453_v57 = vld [vmem:[%s1561_s28 + $0x720] sm:$0xff] }
  0x4d   : > { %v455_v58 = vld [vmem:[%s1561_s28 + $0x740] sm:$0xff]  ;;  %454 = vst [vmem:[%s1566_s29 + $0x1c8] sm:$0xff] %v453_v57 }
  0x4e   : > { %v457_v59 = vld [vmem:[%s1561_s28 + $0x760] sm:$0xff]  ;;  %456 = vst [vmem:[%s1566_s29 + $0x1d0] sm:$0xff] %v455_v58 }
  0x4f   : > { %458 = vst [vmem:[%s1566_s29 + $0x1d8] sm:$0xff] %v457_v59  ;;  %v459_v60 = vld [vmem:[%s1561_s28 + $0x780] sm:$0xff] }
  0x50   : > { %v461_v61 = vld [vmem:[%s1561_s28 + $0x7a0] sm:$0xff]  ;;  %460 = vst [vmem:[%s1566_s29 + $0x1e0] sm:$0xff] %v459_v60 }
  0x51   : > { %v463_v62 = vld [vmem:[%s1561_s28 + $0x7c0] sm:$0xff]  ;;  %462 = vst [vmem:[%s1566_s29 + $0x1e8] sm:$0xff] %v461_v61 }
  0x52   : > { %464 = vst [vmem:[%s1566_s29 + $0x1f0] sm:$0xff] %v463_v62  ;;  %v465_v63 = vld [vmem:[%s1561_s28 + $0x7e0] sm:$0xff] }
  0x53   : > { %466 = vst [vmem:[%s1566_s29 + $0x1f8] sm:$0xff] %v465_v63 }
  0x54 PF: > { %p1232_p8 = scmp.ge.s32.totalorder %s1491_s16, 1  ;;  %p479_p9 = scmp.lt.s32.totalorder %s1491_s16, 5 }
  0x56   : > { %p480_p10 = pnand %p1232_p8, %p479_p9 }
  0x57   : > { %s486_s30 = sand.u32 (!%p480_p10), 1, %s1475_s12   ;;  %s1235_s20 = sshll.u32 (!%p480_p10), %s1483_s14, 1 }
  0x58   : > { %483 = sbr.rel (%p480_p10) target bundleno = 372 (0x174), region = 66  ;;  %s1233_s4 = sshll.u32 (!%p480_p10), %s486_s30, 9 }
  0x59   : > { %s1704_s9 = scalar_lea.vmem (!%p480_p10), [#allocation3], %s1233_s4  ;;  %p537_p11 = scmp.lt.s32.totalorder (!%p480_p10), %s1235_s20, 7 }
  0x5a   : > { %s1234_s26 = sshll.u32 (!%p480_p10), %s486_s30, 5 }
  0x5b   : > { %s521_s27 = scalar_lea.vmem (!%p480_p10), [#allocation4], %s1234_s26 }
  0x5d   : > { %v1449_v0 = vld [vmem:[%s1803_s0 + $0x4] ss:$16 sps:$4 sm:$0xff]   ;;  %v1452_v1 = vld [vmem:[%s1803_s0 + $0xc] ss:$16 sps:$4 sm:$0xff]   ;;  %v1355_v4 = vld [vmem:[%s1704_s9 + $0x70] ss:$8 sps:$4 sm:$0xff]  }
  0x5e   : > { %v1351_v2 = vld [vmem:[%s1704_s9 + $0x74] ss:$8 sps:$4 sm:$0xff]   ;;  %995 = vmatprep.mubr.bf16.mxu0 %v1449_v0  ;;  %1038 = vmatprep.mubr.bf16.mxu1 %v1452_v1  ;;  %v1356_v5 = vld [vmem:[%s1704_s9 + $0x170] ss:$8 sps:$4 sm:$0xff]   ;;  %v1357_v6 = vld [vmem:[%s1704_s9 + $0x64] ss:$8 sps:$4 sm:$0xff]  }
  0x5f   : > { %v1353_v3 = vld [vmem:[%s1704_s9 + $0x174] ss:$8 sps:$4 sm:$0xff]   ;;  %963 = vmatprep.subr.bf16.mxu0 %v1351_v2  ;;  %v1359_v7 = vld [vmem:[%s1704_s9 + $0x164] ss:$8 sps:$4 sm:$0xff]   ;;  %v1361_v8 = vld [vmem:[%s1704_s9 + $0x60] ss:$8 sps:$4 sm:$0xff]  }
  0x60   : > { %1006 = vmatprep.subr.bf16.mxu1 %v1353_v3  ;;  %964 = vmatpush1.bf16.msra.mxu0 %v1355_v4  ;;  %v1362_v9 = vld [vmem:[%s1704_s9 + $0x160] ss:$8 sps:$4 sm:$0xff]   ;;  %v1363_v10 = vld [vmem:[%s1704_s9 + $0x54] ss:$8 sps:$4 sm:$0xff]   ;;  %v1367_v12 = vld [vmem:[%s1704_s9 + $0x50] ss:$8 sps:$4 sm:$0xff]   ;;  %v1066_v4 = vlaneseq }
  0x61   : > { %1007 = vmatpush1.bf16.msra.mxu1 %v1356_v5  ;;  %965 = vmatprep.subr.bf16.mxu0 %v1357_v6  ;;  %v1365_v11 = vld [vmem:[%s1704_s9 + $0x154] ss:$8 sps:$4 sm:$0xff]   ;;  %v1368_v13 = vld [vmem:[%s1704_s9 + $0x150] ss:$8 sps:$4 sm:$0xff]   ;;  %v1369_v14 = vld [vmem:[%s1704_s9 + $0x44] ss:$8 sps:$4 sm:$0xff]  }
  0x62   : > { %1008 = vmatprep.subr.bf16.mxu1 %v1359_v7  ;;  %v1371_v15 = vld [vmem:[%s1704_s9 + $0x144] ss:$8 sps:$4 sm:$0xff]   ;;  %v1373_v16 = vld [vmem:[%s1704_s9 + $0x40] ss:$8 sps:$4 sm:$0xff]   ;;  %v1375_v18 = vld [vmem:[%s1704_s9 + $0x34] ss:$8 sps:$4 sm:$0xff]  }
  0x63   : > { %v1374_v17 = vld [vmem:[%s1704_s9 + $0x140] ss:$8 sps:$4 sm:$0xff]   ;;  %v1377_v19 = vld [vmem:[%s1704_s9 + $0x134] ss:$8 sps:$4 sm:$0xff]   ;;  %v1379_v20 = vld [vmem:[%s1704_s9 + $0x30] ss:$8 sps:$4 sm:$0xff]  }
  0x64   : > { %966 = vmatpush1.bf16.msra.mxu0 %v1361_v8  ;;  %v1380_v21 = vld [vmem:[%s1704_s9 + $0x130] ss:$8 sps:$4 sm:$0xff]   ;;  %v1381_v22 = vld [vmem:[%s1704_s9 + $0x24] ss:$8 sps:$4 sm:$0xff]   ;;  %v1385_v24 = vld [vmem:[%s1704_s9 + $0x20] ss:$8 sps:$4 sm:$0xff]  }
  0x65   : > { %1009 = vmatpush1.bf16.msra.mxu1 %v1362_v9  ;;  %967 = vmatprep.subr.bf16.mxu0 %v1363_v10  ;;  %v1383_v23 = vld [vmem:[%s1704_s9 + $0x124] ss:$8 sps:$4 sm:$0xff]   ;;  %v1386_v25 = vld [vmem:[%s1704_s9 + $0x120] ss:$8 sps:$4 sm:$0xff]   ;;  %v1387_v26 = vld [vmem:[%s1704_s9 + $0x14] ss:$8 sps:$4 sm:$0xff]  }
  0x66   : > { %1010 = vmatprep.subr.bf16.mxu1 %v1365_v11  ;;  %v1389_v27 = vld [vmem:[%s1704_s9 + $0x114] ss:$8 sps:$4 sm:$0xff]   ;;  %v1391_v28 = vld [vmem:[%s1704_s9 + $0x10] ss:$8 sps:$4 sm:$0xff]   ;;  %v1393_v30 = vld [vmem:[%s1704_s9 + $0x4] ss:$8 sps:$4 sm:$0xff]  }
  0x67   : > { %v1392_v29 = vld [vmem:[%s1704_s9 + $0x110] ss:$8 sps:$4 sm:$0xff]   ;;  %v1395_v31 = vld [vmem:[%s1704_s9 + $0x104] ss:$8 sps:$4 sm:$0xff]   ;;  %v1397_v32 = vld [vmem:[%s1704_s9] ss:$8 sps:$4 sm:$0xff]  }
  0x68   : > { %968 = vmatpush1.bf16.msra.mxu0 %v1367_v12  ;;  %v1398_v33 = vld [vmem:[%s1704_s9 + $0x100] ss:$8 sps:$4 sm:$0xff]   ;;  %v1399_v34 = vld [vmem:[%s1704_s9 + $0xf4] ss:$8 sps:$4 sm:$0xff]   ;;  %v1403_v36 = vld [vmem:[%s1704_s9 + $0xf0] ss:$8 sps:$4 sm:$0xff]  }
  0x69   : > { %1011 = vmatpush1.bf16.msra.mxu1 %v1368_v13  ;;  %969 = vmatprep.subr.bf16.mxu0 %v1369_v14  ;;  %v1401_v35 = vld [vmem:[%s1704_s9 + $0x1f4] ss:$8 sps:$4 sm:$0xff]   ;;  %v1404_v37 = vld [vmem:[%s1704_s9 + $0x1f0] ss:$8 sps:$4 sm:$0xff]   ;;  %v1405_v38 = vld [vmem:[%s1704_s9 + $0xe4] ss:$8 sps:$4 sm:$0xff]  }
  0x6a   : > { %1012 = vmatprep.subr.bf16.mxu1 %v1371_v15  ;;  %v1407_v39 = vld [vmem:[%s1704_s9 + $0x1e4] ss:$8 sps:$4 sm:$0xff]   ;;  %v1409_v40 = vld [vmem:[%s1704_s9 + $0xe0] ss:$8 sps:$4 sm:$0xff]   ;;  %v1411_v42 = vld [vmem:[%s1704_s9 + $0xd4] ss:$8 sps:$4 sm:$0xff]  }
  0x6b   : > { %v1410_v41 = vld [vmem:[%s1704_s9 + $0x1e0] ss:$8 sps:$4 sm:$0xff]   ;;  %v1413_v43 = vld [vmem:[%s1704_s9 + $0x1d4] ss:$8 sps:$4 sm:$0xff]   ;;  %v1415_v44 = vld [vmem:[%s1704_s9 + $0xd0] ss:$8 sps:$4 sm:$0xff]  }
  0x6c   : > { %970 = vmatpush1.bf16.msra.mxu0 %v1373_v16  ;;  %v1416_v45 = vld [vmem:[%s1704_s9 + $0x1d0] ss:$8 sps:$4 sm:$0xff]   ;;  %v1417_v46 = vld [vmem:[%s1704_s9 + $0xc4] ss:$8 sps:$4 sm:$0xff]   ;;  %v1421_v48 = vld [vmem:[%s1704_s9 + $0xc0] ss:$8 sps:$4 sm:$0xff]  }
  0x6d   : > { %1013 = vmatpush1.bf16.msra.mxu1 %v1374_v17  ;;  %971 = vmatprep.subr.bf16.mxu0 %v1375_v18  ;;  %v1419_v47 = vld [vmem:[%s1704_s9 + $0x1c4] ss:$8 sps:$4 sm:$0xff]   ;;  %v1422_v49 = vld [vmem:[%s1704_s9 + $0x1c0] ss:$8 sps:$4 sm:$0xff]   ;;  %v1423_v50 = vld [vmem:[%s1704_s9 + $0xb4] ss:$8 sps:$4 sm:$0xff]  }
  0x6e   : > { %1014 = vmatprep.subr.bf16.mxu1 %v1377_v19  ;;  %v1425_v51 = vld [vmem:[%s1704_s9 + $0x1b4] ss:$8 sps:$4 sm:$0xff]   ;;  %v1427_v52 = vld [vmem:[%s1704_s9 + $0xb0] ss:$8 sps:$4 sm:$0xff]   ;;  %v1429_v54 = vld [vmem:[%s1704_s9 + $0xa4] ss:$8 sps:$4 sm:$0xff]  }
  0x6f   : > { %v1428_v53 = vld [vmem:[%s1704_s9 + $0x1b0] ss:$8 sps:$4 sm:$0xff]   ;;  %v1431_v55 = vld [vmem:[%s1704_s9 + $0x1a4] ss:$8 sps:$4 sm:$0xff]   ;;  %v1433_v56 = vld [vmem:[%s1704_s9 + $0xa0] ss:$8 sps:$4 sm:$0xff]  }
  0x70   : > { %972 = vmatpush1.bf16.msra.mxu0 %v1379_v20  ;;  %v1434_v57 = vld [vmem:[%s1704_s9 + $0x1a0] ss:$8 sps:$4 sm:$0xff]   ;;  %v1435_v58 = vld [vmem:[%s1704_s9 + $0x94] ss:$8 sps:$4 sm:$0xff]   ;;  %v1439_v60 = vld [vmem:[%s1704_s9 + $0x90] ss:$8 sps:$4 sm:$0xff]  }
  0x71   : > { %1015 = vmatpush1.bf16.msra.mxu1 %v1380_v21  ;;  %973 = vmatprep.subr.bf16.mxu0 %v1381_v22  ;;  %v1437_v59 = vld [vmem:[%s1704_s9 + $0x194] ss:$8 sps:$4 sm:$0xff]   ;;  %v1440_v61 = vld [vmem:[%s1704_s9 + $0x190] ss:$8 sps:$4 sm:$0xff]   ;;  %v1441_v62 = vld [vmem:[%s1704_s9 + $0x84] ss:$8 sps:$4 sm:$0xff]  }
  0x72   : > { %1016 = vmatprep.subr.bf16.mxu1 %v1383_v23  ;;  %v1443_v63 = vld [vmem:[%s1704_s9 + $0x184] ss:$8 sps:$4 sm:$0xff]   ;;  %v1445_v0 = vld [vmem:[%s1704_s9 + $0x80] ss:$8 sps:$4 sm:$0xff]   ;;  %s1815_s20 = smov (!%p537_p11, %s1235_s20), 7  ;;  %v1067_v5 = vshrl.u32 %v1066_v4, 7 }
  0x73   : > { %v1446_v1 = vld [vmem:[%s1704_s9 + $0x180] ss:$8 sps:$4 sm:$0xff]   ;;  %s539_s25 = scalar_lea.vmem %s1805_s2, %s1815_s20  ;;  %s1310_s12 = sshll.u32 (%p1548_p6), %s1483_s14, 4 }
  0x74   : > { %974 = vmatpush1.bf16.msra.mxu0 %v1385_v24  ;;  %v1447_v2 = vld [vmem:[%s1803_s0] ss:$16 sps:$4 sm:$0xff]   ;;  %v1450_v3 = vld [vmem:[%s1803_s0 + $0x8] ss:$16 sps:$4 sm:$0xff]   ;;  %v1068_v6 = vsub.s32 0, %v1067_v5  ;;  %v1072_v8 = vsub.s32 1, %v1067_v5  ;;  %s1096_s30 = scalar_lea.vmem (%p1548_p6), %s1806_s3, %s1310_s12 }
  0x75   : > { %1017 = vmatpush1.bf16.msra.mxu1 %v1386_v25  ;;  %975 = vmatprep.subr.bf16.mxu0 %v1387_v26  ;;  %v1064_v7 = vld [vmem:[%s539_s25] sm:$0x3] }
  0x76   : > { %1018 = vmatprep.subr.bf16.mxu1 %v1389_v27  ;;  %v1069_v9 = vrot.slane %v1064_v7, %v1068_v6  ;;  %v1073_v13 = vrot.slane %v1064_v7, %v1072_v8 }
  0x78   : > { %976 = vmatpush1.bf16.msra.mxu0 %v1391_v28 }
  0x79   : > { %1019 = vmatpush1.bf16.msra.mxu1 %v1392_v29  ;;  %977 = vmatprep.subr.bf16.mxu0 %v1393_v30 }
  0x7a   : > { %1020 = vmatprep.subr.bf16.mxu1 %v1395_v31 }
  0x7c   : > { %978 = vmatpush1.bf16.msra.mxu0 %v1397_v32 }
  0x7d   : > { %1021 = vmatpush1.bf16.msra.mxu1 %v1398_v33  ;;  %979 = vmatprep.subr.bf16.mxu0 %v1399_v34 }
  0x7e   : > { %1022 = vmatprep.subr.bf16.mxu1 %v1401_v35 }
  0x80   : > { %980 = vmatpush2.bf16.msra.mxu0 %v1403_v36 }
  0x81   : > { %1023 = vmatpush2.bf16.msra.mxu1 %v1404_v37  ;;  %981 = vmatprep.subr.bf16.mxu0 %v1405_v38 }
  0x82   : > { %1024 = vmatprep.subr.bf16.mxu1 %v1407_v39 }
  0x84   : > { %982 = vmatpush2.bf16.msra.mxu0 %v1409_v40 }
  0x85   : > { %1025 = vmatpush2.bf16.msra.mxu1 %v1410_v41  ;;  %983 = vmatprep.subr.bf16.mxu0 %v1411_v42 }
  0x86   : > { %1026 = vmatprep.subr.bf16.mxu1 %v1413_v43 }
  0x88   : > { %984 = vmatpush2.bf16.msra.mxu0 %v1415_v44 }
  0x89   : > { %1027 = vmatpush2.bf16.msra.mxu1 %v1416_v45  ;;  %985 = vmatprep.subr.bf16.mxu0 %v1417_v46 }
  0x8a   : > { %1028 = vmatprep.subr.bf16.mxu1 %v1419_v47 }
  0x8c   : > { %986 = vmatpush2.bf16.msra.mxu0 %v1421_v48 }
  0x8d   : > { %1029 = vmatpush2.bf16.msra.mxu1 %v1422_v49  ;;  %987 = vmatprep.subr.bf16.mxu0 %v1423_v50 }
  0x8e   : > { %1030 = vmatprep.subr.bf16.mxu1 %v1425_v51 }
  0x90   : > { %988 = vmatpush2.bf16.msra.mxu0 %v1427_v52 }
  0x91   : > { %1031 = vmatpush2.bf16.msra.mxu1 %v1428_v53  ;;  %989 = vmatprep.subr.bf16.mxu0 %v1429_v54 }
  0x92   : > { %1032 = vmatprep.subr.bf16.mxu1 %v1431_v55 }
  0x94   : > { %990 = vmatpush2.bf16.msra.mxu0 %v1433_v56 }
  0x95   : > { %1033 = vmatpush2.bf16.msra.mxu1 %v1434_v57  ;;  %991 = vmatprep.subr.bf16.mxu0 %v1435_v58 }
  0x96   : > { %1034 = vmatprep.subr.bf16.mxu1 %v1437_v59 }
  0x98   : > { %992 = vmatpush2.bf16.msra.mxu0 %v1439_v60 }
  0x99   : > { %1035 = vmatpush2.bf16.msra.mxu1 %v1440_v61  ;;  %993 = vmatprep.subr.bf16.mxu0 %v1441_v62 }
  0x9a   : > { %1036 = vmatprep.subr.bf16.mxu1 %v1443_v63 }
  0x9c   : > { %994 = vmatpush2.bf16.msra.mxu0 %v1445_v0 }
  0x9d   : > { %1037 = vmatpush2.bf16.msra.mxu1 %v1446_v1 }
  0x9f   : > { %996 = vmatmul.mubr.bf16.vlgmr.msra.gmra.mxu0 %v1447_v2 }
  0xa0   : > { %1039 = vmatmul.mubr.bf16.vlgmr.msra.gmra.mxu1 %v1450_v3 }
 0x15f   : > { %v997_v10 = vpop.f32.mrf.mxu0 }
 0x160   : > { %v1040_v11 = vpop.f32.mrf.mxu1 }
 0x161   : > { %v1041_v12 = vadd.f32 %v1040_v11, %v997_v10  ;;  %v999_v14 = vpop.f32.mrf.mxu0 }
 0x162   : > { %v1042_v15 = vpop.f32.mrf.mxu1 }
 0x163   : > { %v1076_v16 = vadd.f32 %v1069_v9, %v1041_v12  ;;  %v1043_v17 = vadd.f32 %v1042_v15, %v999_v14  ;;  %v1001_v18 = vpop.f32.mrf.mxu0 }
 0x164   : > { %v1044_v19 = vpop.f32.mrf.mxu1 }
 0x165   : > { %1080 = vst [vmem:[%s521_s27] sm:$0xff] %v1076_v16  ;;  %v1077_v20 = vadd.f32 %v1073_v13, %v1043_v17  ;;  %v1045_v21 = vadd.f32 %v1044_v19, %v1001_v18  ;;  %v1003_v22 = vpop.f32.mrf.mxu0 }
 0x166   : > { %v1046_v23 = vpop.f32.mrf.mxu1 }
 0x167   : > { %1081 = vst [vmem:[%s521_s27 + $0x8] sm:$0xff] %v1077_v20  ;;  %v1078_v24 = vadd.f32 %v1069_v9, %v1045_v21  ;;  %v1047_v25 = vadd.f32 %v1046_v23, %v1003_v22  ;;  %1090 = sbr.rel (!%p1548_p6) target bundleno = 372 (0x174), region = 82 }
 0x169   : > { %1082 = vst [vmem:[%s521_s27 + $0x10] sm:$0xff] %v1078_v24  ;;  %v1079_v26 = vadd.f32 %v1073_v13, %v1047_v25 }
 0x16b   : > { %1083 = vst [vmem:[%s521_s27 + $0x18] sm:$0xff] %v1079_v26 }
 0x16c   : > { %v1109_v27 = vld [vmem:[%s521_s27] sm:$0xff] }
 0x16d   : > { %1110 = vst [vmem:[%s1096_s30] sm:$0xff] %v1109_v27 }
 0x16e   : > { %v1111_v28 = vld [vmem:[%s521_s27 + $0x8] sm:$0xff] }
 0x16f   : > { %1112 = vst [vmem:[%s1096_s30 + $0x8] sm:$0xff] %v1111_v28 }
 0x170   : > { %v1113_v29 = vld [vmem:[%s521_s27 + $0x10] sm:$0xff] }
 0x171   : > { %1114 = vst [vmem:[%s1096_s30 + $0x40] sm:$0xff] %v1113_v29 }
 0x172   : > { %v1115_v30 = vld [vmem:[%s521_s27 + $0x18] sm:$0xff] }
 0x173   : > { %1116 = vst [vmem:[%s1096_s30 + $0x48] sm:$0xff] %v1115_v30 }
 0x174 PF: > { %s13_s16 = sadd.s32 1, %s1491_s16   ;;  %s1808_s12 = smov %s1479_s13 }
 0x175   : > { %p10_p12 = scmp.ge.s32.totalorder %s13_s16, 6   ;;  %s1809_s13 = smov %s1553_s22 }
 0x176   : > { %s1810_s14 = smov %s1487_s15  ;;  %s1811_s15 = smov %s1813_s17 }
 0x177   :  { %12 = sbr.rel (!%p10_p12) target bundleno = 3 (0x3), region = 142 }

</bundles_post_ra>
